<compile_context>
chip_gen: v5e
topology: v5e:2x2
jax: 0.10.0
libtpu: 0.0.40
codegen_flags: <defaults>
</compile_context>

<pallas_src>
import functools

import jax
import jax.numpy as jnp
from jax import lax
from jax.experimental import pallas as pl
from jax.experimental.pallas import tpu as pltpu


def _round_up(x, m):
    return ((x + m - 1) // m) * m


def lstm_dropout_kernel(x_ref, wih1_ref, b1_ref, whh1_ref,
                        w2c_ref, b2_ref, wo_ref, bo_ref,
                        out_ref, zx1_ref, *, T, Bp, Hp1, Hp2):
    """Fused 2-layer LSTM + Linear forward (eval mode).

    x_ref:    (T*Bp, Din)        time-major flattened input (batch padded)
    wih1_ref: (Din, 4*Hp1)       gate-padded, pre-transposed W_ih1
    b1_ref:   (1, 4*Hp1)         b_ih1 + b_hh1 (gate-padded)
    whh1_ref: (Hp1, 4*Hp1)
    w2c_ref:  (Hp1+Hp2, 4*Hp2)   concat([W_ih2; W_hh2]) for one fused per-step dot
    b2_ref:   (1, 4*Hp2)         b_ih2 + b_hh2 (gate-padded)
    wo_ref:   (Hp2, Ep)          pre-transposed Linear weight (padded)
    bo_ref:   (1, Ep)
    out_ref:  (Bp, Ep)
    zx1_ref:  (T*Bp, 4*Hp1)      VMEM scratch: hoisted LSTM1 input projection
    """
    # ---- Hoisted LSTM1 input projection: one large MXU-efficient matmul ----
    zx1_ref[...] = (
        jnp.dot(x_ref[...], wih1_ref[...], preferred_element_type=jnp.float32)
        + b1_ref[...])

    # Loop-invariant weights: load once, keep in vregs across the recurrence.
    whh1 = whh1_ref[...]
    w2c = w2c_ref[...]
    b2 = b2_ref[...]

    def gates(z, H):
        # PyTorch gate order i, f, g, o.  H is a multiple of 128, so every
        # slice is 128-lane (vreg) aligned -> no masked / cross-lane relayout.
        i = jax.nn.sigmoid(z[:, 0 * H:1 * H])
        f = jax.nn.sigmoid(z[:, 1 * H:2 * H])
        g = jnp.tanh(z[:, 2 * H:3 * H])
        o = jax.nn.sigmoid(z[:, 3 * H:4 * H])
        return i, f, g, o

    def step(t, carry):
        h1, c1, h2, c2 = carry

        # LSTM1: only the recurrent dot remains on the serial critical path.
        row0 = pl.multiple_of(t * Bp, Bp)
        zx1_t = zx1_ref[pl.ds(row0, Bp), :]
        z1 = zx1_t + jnp.dot(h1, whh1, preferred_element_type=jnp.float32)
        i1, f1, g1, o1 = gates(z1, Hp1)
        c1 = f1 * c1 + i1 * g1
        h1 = o1 * jnp.tanh(c1)

        # dropout1: identity (eval mode).
        # LSTM2: single fused dot on lane-aligned concat([h1, h2]).
        xh2 = jnp.concatenate([h1, h2], axis=-1)
        z2 = jnp.dot(xh2, w2c, preferred_element_type=jnp.float32) + b2
        i2, f2, g2, o2 = gates(z2, Hp2)
        c2 = f2 * c2 + i2 * g2
        h2 = o2 * jnp.tanh(c2)
        return h1, c1, h2, c2

    zero1 = jnp.zeros((Bp, Hp1), jnp.float32)
    zero2 = jnp.zeros((Bp, Hp2), jnp.float32)
    # State in loop carry (vregs); unrolled so the scheduler sees across steps.
    _, _, h2, _ = lax.fori_loop(0, T, step, (zero1, zero1, zero2, zero2),
                                unroll=True)

    # dropout2: identity (eval mode), then the output Linear on the last h2.
    # out_ref last dim is a multiple of 128 -> lane-dense unmasked store.
    out_ref[...] = (jnp.dot(h2, wo_ref[...], preferred_element_type=jnp.float32)
                    + bo_ref[...])


def init_params(key, input_size, lstm_size_1, lstm_size_2, embedding_size):
    """Deterministic parameter init (PyTorch-style U(-1/sqrt(H), 1/sqrt(H)))."""
    ks = jax.random.split(key, 11)

    def u(k, shape, bound):
        return jax.random.uniform(k, shape, jnp.float32, -bound, bound)

    b1s = 1.0 / jnp.sqrt(lstm_size_1)
    b2s = 1.0 / jnp.sqrt(lstm_size_2)
    bos = 1.0 / jnp.sqrt(lstm_size_2)

    return dict(
        w_ih1=u(ks[0], (4 * lstm_size_1, input_size), b1s),
        w_hh1=u(ks[1], (4 * lstm_size_1, lstm_size_1), b1s),
        b_ih1=u(ks[2], (4 * lstm_size_1,), b1s),
        b_hh1=u(ks[3], (4 * lstm_size_1,), b1s),
        w_ih2=u(ks[4], (4 * lstm_size_2, lstm_size_1), b2s),
        w_hh2=u(ks[5], (4 * lstm_size_2, lstm_size_2), b2s),
        b_ih2=u(ks[6], (4 * lstm_size_2,), b2s),
        b_hh2=u(ks[7], (4 * lstm_size_2,), b2s),
        w_out=u(ks[8], (embedding_size, lstm_size_2), bos),
        b_out=u(ks[9], (embedding_size,), bos),
    )


def classifier_lstm_dropout_forward(x, params,
                                    lstm_size_1, lstm_size_2, embedding_size):
    """x: (B, input_size, T) — same convention as the PyTorch module, which
    permutes (0,2,1) to get batch_first (B, T, input_size)."""
    B, Din, T = x.shape
    H1, H2, E = lstm_size_1, lstm_size_2, embedding_size
    Bp = _round_up(max(B, 8), 8)
    Hp1 = _round_up(H1, 128)
    Hp2 = _round_up(H2, 128)
    Ep = _round_up(E, 128)
    f32 = jnp.float32

    def pad_gate_cols(w_t, H, Hp):
        # (In, 4*H) -> (In, 4*Hp), zero-padding each gate block independently.
        In = w_t.shape[0]
        w4 = jnp.pad(w_t.reshape(In, 4, H), ((0, 0), (0, 0), (0, Hp - H)))
        return w4.reshape(In, 4 * Hp)

    def pad_gate_bias(b, H, Hp):
        return jnp.pad(b.reshape(4, H), ((0, 0), (0, Hp - H))).reshape(1, 4 * Hp)

    # ---- layout prep (plain JAX glue, runs once outside the kernel) ----
    x_tbd = jnp.transpose(x, (2, 0, 1)).astype(f32)          # (T, B, Din)
    x_tbd = jnp.pad(x_tbd, ((0, 0), (0, Bp - B), (0, 0)))    # pad batch sublanes
    x2d = x_tbd.reshape(T * Bp, Din)

    wih1 = pad_gate_cols(params["w_ih1"].T.astype(f32), H1, Hp1)          # (Din, 4Hp1)
    whh1 = pad_gate_cols(
        jnp.pad(params["w_hh1"].T.astype(f32), ((0, Hp1 - H1), (0, 0))),
        H1, Hp1)                                                          # (Hp1, 4Hp1)
    b1 = pad_gate_bias((params["b_ih1"] + params["b_hh1"]).astype(f32), H1, Hp1)

    wih2 = pad_gate_cols(
        jnp.pad(params["w_ih2"].T.astype(f32), ((0, Hp1 - H1), (0, 0))),
        H2, Hp2)                                                          # (Hp1, 4Hp2)
    whh2 = pad_gate_cols(
        jnp.pad(params["w_hh2"].T.astype(f32), ((0, Hp2 - H2), (0, 0))),
        H2, Hp2)                                                          # (Hp2, 4Hp2)
    w2c = jnp.concatenate([wih2, whh2], axis=0)                           # (Hp1+Hp2, 4Hp2)
    b2 = pad_gate_bias((params["b_ih2"] + params["b_hh2"]).astype(f32), H2, Hp2)

    wo = jnp.pad(params["w_out"].T.astype(f32), ((0, Hp2 - H2), (0, Ep - E)))
    bo = jnp.pad(params["b_out"].astype(f32).reshape(1, E), ((0, 0), (0, Ep - E)))

    vmem = pl.BlockSpec(memory_space=pltpu.MemorySpace.VMEM)
    kernel = functools.partial(lstm_dropout_kernel, T=T, Bp=Bp, Hp1=Hp1, Hp2=Hp2)

    out_p = pl.pallas_call(
        kernel,
        out_shape=jax.ShapeDtypeStruct((Bp, Ep), f32),
        in_specs=[vmem] * 8,
        out_specs=vmem,
        scratch_shapes=[pltpu.VMEM((T * Bp, 4 * Hp1), f32)],  # hoisted x-projection
    )(x2d, wih1, b1, whh1, w2c, b2, wo, bo)
    return out_p[:B, :E]


def reference_forward(x, params, H1, H2, E):
    """Pure-JAX reference mirroring the PyTorch forward (eval mode)."""
    xb = jnp.transpose(x, (0, 2, 1)).astype(jnp.float32)  # (B, T, Din)
    B, T, _ = xb.shape

    def run_lstm(seq, w_ih, w_hh, b_ih, b_hh, H):
        def cell(carry, xt):
            h, c = carry
            z = xt @ w_ih.T + b_ih + h @ w_hh.T + b_hh
            i = jax.nn.sigmoid(z[:, 0:H])
            f = jax.nn.sigmoid(z[:, H:2 * H])
            g = jnp.tanh(z[:, 2 * H:3 * H])
            o = jax.nn.sigmoid(z[:, 3 * H:4 * H])
            c = f * c + i * g
            h = o * jnp.tanh(c)
            return (h, c), h
        init = (jnp.zeros((B, H), jnp.float32), jnp.zeros((B, H), jnp.float32))
        _, hs = lax.scan(cell, init, jnp.transpose(seq, (1, 0, 2)))
        return jnp.transpose(hs, (1, 0, 2))

    h1 = run_lstm(xb, params["w_ih1"], params["w_hh1"],
                  params["b_ih1"], params["b_hh1"], H1)
    h2 = run_lstm(h1, params["w_ih2"], params["w_hh2"],
                  params["b_ih2"], params["b_hh2"], H2)
    last = h2[:, -1, :]
    return last @ params["w_out"].T + params["b_out"]


if __name__ == "__main__":
    # Small shapes consistent with the module's forward:
    #   x: (batch, input_size, seq) -> permuted to (batch, seq, input_size)
    B, INPUT_SIZE, SEQ = 2, 16, 8
    H1, H2, EMB = 32, 64, 16

    key = jax.random.PRNGKey(0)
    kx, kp = jax.random.split(key)
    x = jax.random.normal(kx, (B, INPUT_SIZE, SEQ), dtype=jnp.float32)
    params = init_params(kp, INPUT_SIZE, H1, H2, EMB)

    out = classifier_lstm_dropout_forward(x, params, H1, H2, EMB)
    out = jax.block_until_ready(out)

    ref = jax.block_until_ready(reference_forward(x, params, H1, H2, EMB))
    assert out.shape == (B, EMB)
    assert jnp.allclose(out, ref, atol=1e-4, rtol=1e-4), "mismatch vs JAX reference"

    print("KERNEL_OK")
</pallas_src>

<mosaic_0001>
module attributes {stable_mosaic.version = 11 : i64} {
  func.func @lstm_dropout_kernel(%arg0: memref<64x16xf32, #tpu.memory_space<vmem>>, %arg1: memref<16x512xf32, #tpu.memory_space<vmem>>, %arg2: memref<1x512xf32, #tpu.memory_space<vmem>>, %arg3: memref<128x512xf32, #tpu.memory_space<vmem>>, %arg4: memref<256x512xf32, #tpu.memory_space<vmem>>, %arg5: memref<1x512xf32, #tpu.memory_space<vmem>>, %arg6: memref<128x128xf32, #tpu.memory_space<vmem>>, %arg7: memref<1x128xf32, #tpu.memory_space<vmem>>, %arg8: memref<8x128xf32, #tpu.memory_space<vmem>>, %arg9: memref<64x512xf32, #tpu.memory_space<vmem>>) attributes {dimension_semantics = [], scalar_prefetch = 0 : i64, scratch_operands = 1 : i64, tpu.core_type = #tpu.core_type<tc>} {
    %c0 = arith.constant 0 : index
    %c0_0 = arith.constant 0 : index
    %0 = vector.load %arg0[%c0, %c0_0] : memref<64x16xf32, #tpu.memory_space<vmem>>, vector<64x16xf32>
    %c0_1 = arith.constant 0 : index
    %c0_2 = arith.constant 0 : index
    %1 = vector.load %arg1[%c0_1, %c0_2] : memref<16x512xf32, #tpu.memory_space<vmem>>, vector<16x512xf32>
    %cst = arith.constant dense<0.000000e+00> : vector<64x512xf32>
    %2 = tpu.matmul %0, %1, %cst {dimension_numbers = #tpu.dot_dimension_numbers<[1], [0], [0], [1], [0, 0, 1, 1], [], []>} : vector<64x16xf32>, vector<16x512xf32>, vector<64x512xf32> -> vector<64x512xf32>
    %c0_3 = arith.constant 0 : index
    %c0_4 = arith.constant 0 : index
    %3 = vector.load %arg2[%c0_3, %c0_4] : memref<1x512xf32, #tpu.memory_space<vmem>>, vector<1x512xf32>
    %4 = vector.broadcast %3 : vector<1x512xf32> to vector<64x512xf32>
    %5 = arith.addf %2, %4 : vector<64x512xf32>
    %c0_5 = arith.constant 0 : index
    %c0_6 = arith.constant 0 : index
    %6 = vector.load %arg9[%c0_5, %c0_6] : memref<64x512xf32, #tpu.memory_space<vmem>>, vector<64x512xf32>
    tpu.vector_store %arg9[%c0_5, %c0_6], %5 {strides = array<i32>} : memref<64x512xf32, #tpu.memory_space<vmem>>, vector<64x512xf32>,
    %c0_7 = arith.constant 0 : index
    %c0_8 = arith.constant 0 : index
    %7 = vector.load %arg3[%c0_7, %c0_8] : memref<128x512xf32, #tpu.memory_space<vmem>>, vector<128x512xf32>
    %c0_9 = arith.constant 0 : index
    %c0_10 = arith.constant 0 : index
    %8 = vector.load %arg4[%c0_9, %c0_10] : memref<256x512xf32, #tpu.memory_space<vmem>>, vector<256x512xf32>
    %c0_11 = arith.constant 0 : index
    %c0_12 = arith.constant 0 : index
    %9 = vector.load %arg5[%c0_11, %c0_12] : memref<1x512xf32, #tpu.memory_space<vmem>>, vector<1x512xf32>
    %cst_13 = arith.constant 0.000000e+00 : f32
    %10 = vector.broadcast %cst_13 : f32 to vector<8x128xf32>
    %cst_14 = arith.constant 0.000000e+00 : f32
    %11 = vector.broadcast %cst_14 : f32 to vector<8x128xf32>
    %c0_i32 = arith.constant 0 : i32
    %c8_i32 = arith.constant 8 : i32
    %12 = arith.muli %c0_i32, %c8_i32 : i32
    %13 = tpu.assume_multiple %12, 8 : i32
    %14 = arith.index_cast %13 : i32 to index
    %c0_15 = arith.constant 0 : index
    %15 = vector.load %arg9[%14, %c0_15] : memref<64x512xf32, #tpu.memory_space<vmem>>, vector<8x512xf32>
    %cst_16 = arith.constant dense<0.000000e+00> : vector<8x512xf32>
    %16 = tpu.matmul %10, %7, %cst_16 {dimension_numbers = #tpu.dot_dimension_numbers<[1], [0], [0], [1], [0, 0, 1, 1], [], []>} : vector<8x128xf32>, vector<128x512xf32>, vector<8x512xf32> -> vector<8x512xf32>
    %17 = arith.addf %15, %16 : vector<8x512xf32>
    %18 = vector.extract_strided_slice %17 {offsets = [0, 0], sizes = [8, 128], strides = [1, 1]} : vector<8x512xf32> to vector<8x128xf32>
    %19 = arith.negf %18 : vector<8x128xf32>
    %20 = math.exp %19 : vector<8x128xf32>
    %cst_17 = arith.constant 1.000000e+00 : f32
    %21 = vector.broadcast %cst_17 : f32 to vector<8x128xf32>
    %22 = arith.addf %21, %20 : vector<8x128xf32>
    %23 = arith.divf %21, %22 : vector<8x128xf32>
    %24 = vector.extract_strided_slice %17 {offsets = [0, 128], sizes = [8, 128], strides = [1, 1]} : vector<8x512xf32> to vector<8x128xf32>
    %25 = arith.negf %24 : vector<8x128xf32>
    %26 = math.exp %25 : vector<8x128xf32>
    %cst_18 = arith.constant 1.000000e+00 : f32
    %27 = vector.broadcast %cst_18 : f32 to vector<8x128xf32>
    %28 = arith.addf %27, %26 : vector<8x128xf32>
    %29 = arith.divf %27, %28 : vector<8x128xf32>
    %30 = vector.extract_strided_slice %17 {offsets = [0, 256], sizes = [8, 128], strides = [1, 1]} : vector<8x512xf32> to vector<8x128xf32>
    %31 = math.tanh %30 : vector<8x128xf32>
    %32 = vector.extract_strided_slice %17 {offsets = [0, 384], sizes = [8, 128], strides = [1, 1]} : vector<8x512xf32> to vector<8x128xf32>
    %33 = arith.negf %32 : vector<8x128xf32>
    %34 = math.exp %33 : vector<8x128xf32>
    %cst_19 = arith.constant 1.000000e+00 : f32
    %35 = vector.broadcast %cst_19 : f32 to vector<8x128xf32>
    %36 = arith.addf %35, %34 : vector<8x128xf32>
    %37 = arith.divf %35, %36 : vector<8x128xf32>
    %38 = arith.mulf %29, %10 : vector<8x128xf32>
    %39 = arith.mulf %23, %31 : vector<8x128xf32>
    %40 = arith.addf %38, %39 : vector<8x128xf32>
    %41 = math.tanh %40 : vector<8x128xf32>
    %42 = arith.mulf %37, %41 : vector<8x128xf32>
    %43 = tpu.concatenate %42, %11 in 1 : vector<8x128xf32>, vector<8x128xf32> -> vector<8x256xf32>
    %cst_20 = arith.constant dense<0.000000e+00> : vector<8x512xf32>
    %44 = tpu.matmul %43, %8, %cst_20 {dimension_numbers = #tpu.dot_dimension_numbers<[1], [0], [0], [1], [0, 0, 1, 1], [], []>} : vector<8x256xf32>, vector<256x512xf32>, vector<8x512xf32> -> vector<8x512xf32>
    %45 = vector.broadcast %9 : vector<1x512xf32> to vector<8x512xf32>
    %46 = arith.addf %44, %45 : vector<8x512xf32>
    %47 = vector.extract_strided_slice %46 {offsets = [0, 0], sizes = [8, 128], strides = [1, 1]} : vector<8x512xf32> to vector<8x128xf32>
    %48 = arith.negf %47 : vector<8x128xf32>
    %49 = math.exp %48 : vector<8x128xf32>
    %cst_21 = arith.constant 1.000000e+00 : f32
    %50 = vector.broadcast %cst_21 : f32 to vector<8x128xf32>
    %51 = arith.addf %50, %49 : vector<8x128xf32>
    %52 = arith.divf %50, %51 : vector<8x128xf32>
    %53 = vector.extract_strided_slice %46 {offsets = [0, 128], sizes = [8, 128], strides = [1, 1]} : vector<8x512xf32> to vector<8x128xf32>
    %54 = arith.negf %53 : vector<8x128xf32>
    %55 = math.exp %54 : vector<8x128xf32>
    %cst_22 = arith.constant 1.000000e+00 : f32
    %56 = vector.broadcast %cst_22 : f32 to vector<8x128xf32>
    %57 = arith.addf %56, %55 : vector<8x128xf32>
    %58 = arith.divf %56, %57 : vector<8x128xf32>
    %59 = vector.extract_strided_slice %46 {offsets = [0, 256], sizes = [8, 128], strides = [1, 1]} : vector<8x512xf32> to vector<8x128xf32>
    %60 = math.tanh %59 : vector<8x128xf32>
    %61 = vector.extract_strided_slice %46 {offsets = [0, 384], sizes = [8, 128], strides = [1, 1]} : vector<8x512xf32> to vector<8x128xf32>
    %62 = arith.negf %61 : vector<8x128xf32>
    %63 = math.exp %62 : vector<8x128xf32>
    %cst_23 = arith.constant 1.000000e+00 : f32
    %64 = vector.broadcast %cst_23 : f32 to vector<8x128xf32>
    %65 = arith.addf %64, %63 : vector<8x128xf32>
    %66 = arith.divf %64, %65 : vector<8x128xf32>
    %67 = arith.mulf %58, %11 : vector<8x128xf32>
    %68 = arith.mulf %52, %60 : vector<8x128xf32>
    %69 = arith.addf %67, %68 : vector<8x128xf32>
    %70 = math.tanh %69 : vector<8x128xf32>
    %71 = arith.mulf %66, %70 : vector<8x128xf32>
    %c1_i32 = arith.constant 1 : i32
    %c8_i32_24 = arith.constant 8 : i32
    %72 = arith.muli %c1_i32, %c8_i32_24 : i32
    %73 = tpu.assume_multiple %72, 8 : i32
    %74 = arith.index_cast %73 : i32 to index
    %c0_25 = arith.constant 0 : index
    %75 = vector.load %arg9[%74, %c0_25] : memref<64x512xf32, #tpu.memory_space<vmem>>, vector<8x512xf32>
    %cst_26 = arith.constant dense<0.000000e+00> : vector<8x512xf32>
    %76 = tpu.matmul %42, %7, %cst_26 {dimension_numbers = #tpu.dot_dimension_numbers<[1], [0], [0], [1], [0, 0, 1, 1], [], []>} : vector<8x128xf32>, vector<128x512xf32>, vector<8x512xf32> -> vector<8x512xf32>
    %77 = arith.addf %75, %76 : vector<8x512xf32>
    %78 = vector.extract_strided_slice %77 {offsets = [0, 0], sizes = [8, 128], strides = [1, 1]} : vector<8x512xf32> to vector<8x128xf32>
    %79 = arith.negf %78 : vector<8x128xf32>
    %80 = math.exp %79 : vector<8x128xf32>
    %cst_27 = arith.constant 1.000000e+00 : f32
    %81 = vector.broadcast %cst_27 : f32 to vector<8x128xf32>
    %82 = arith.addf %81, %80 : vector<8x128xf32>
    %83 = arith.divf %81, %82 : vector<8x128xf32>
    %84 = vector.extract_strided_slice %77 {offsets = [0, 128], sizes = [8, 128], strides = [1, 1]} : vector<8x512xf32> to vector<8x128xf32>
    %85 = arith.negf %84 : vector<8x128xf32>
    %86 = math.exp %85 : vector<8x128xf32>
    %cst_28 = arith.constant 1.000000e+00 : f32
    %87 = vector.broadcast %cst_28 : f32 to vector<8x128xf32>
    %88 = arith.addf %87, %86 : vector<8x128xf32>
    %89 = arith.divf %87, %88 : vector<8x128xf32>
    %90 = vector.extract_strided_slice %77 {offsets = [0, 256], sizes = [8, 128], strides = [1, 1]} : vector<8x512xf32> to vector<8x128xf32>
    %91 = math.tanh %90 : vector<8x128xf32>
    %92 = vector.extract_strided_slice %77 {offsets = [0, 384], sizes = [8, 128], strides = [1, 1]} : vector<8x512xf32> to vector<8x128xf32>
    %93 = arith.negf %92 : vector<8x128xf32>
    %94 = math.exp %93 : vector<8x128xf32>
    %cst_29 = arith.constant 1.000000e+00 : f32
    %95 = vector.broadcast %cst_29 : f32 to vector<8x128xf32>
    %96 = arith.addf %95, %94 : vector<8x128xf32>
    %97 = arith.divf %95, %96 : vector<8x128xf32>
    %98 = arith.mulf %89, %40 : vector<8x128xf32>
    %99 = arith.mulf %83, %91 : vector<8x128xf32>
    %100 = arith.addf %98, %99 : vector<8x128xf32>
    %101 = math.tanh %100 : vector<8x128xf32>
    %102 = arith.mulf %97, %101 : vector<8x128xf32>
    %103 = tpu.concatenate %102, %71 in 1 : vector<8x128xf32>, vector<8x128xf32> -> vector<8x256xf32>
    %cst_30 = arith.constant dense<0.000000e+00> : vector<8x512xf32>
    %104 = tpu.matmul %103, %8, %cst_30 {dimension_numbers = #tpu.dot_dimension_numbers<[1], [0], [0], [1], [0, 0, 1, 1], [], []>} : vector<8x256xf32>, vector<256x512xf32>, vector<8x512xf32> -> vector<8x512xf32>
    %105 = vector.broadcast %9 : vector<1x512xf32> to vector<8x512xf32>
    %106 = arith.addf %104, %105 : vector<8x512xf32>
    %107 = vector.extract_strided_slice %106 {offsets = [0, 0], sizes = [8, 128], strides = [1, 1]} : vector<8x512xf32> to vector<8x128xf32>
    %108 = arith.negf %107 : vector<8x128xf32>
    %109 = math.exp %108 : vector<8x128xf32>
    %cst_31 = arith.constant 1.000000e+00 : f32
    %110 = vector.broadcast %cst_31 : f32 to vector<8x128xf32>
    %111 = arith.addf %110, %109 : vector<8x128xf32>
    %112 = arith.divf %110, %111 : vector<8x128xf32>
    %113 = vector.extract_strided_slice %106 {offsets = [0, 128], sizes = [8, 128], strides = [1, 1]} : vector<8x512xf32> to vector<8x128xf32>
    %114 = arith.negf %113 : vector<8x128xf32>
    %115 = math.exp %114 : vector<8x128xf32>
    %cst_32 = arith.constant 1.000000e+00 : f32
    %116 = vector.broadcast %cst_32 : f32 to vector<8x128xf32>
    %117 = arith.addf %116, %115 : vector<8x128xf32>
    %118 = arith.divf %116, %117 : vector<8x128xf32>
    %119 = vector.extract_strided_slice %106 {offsets = [0, 256], sizes = [8, 128], strides = [1, 1]} : vector<8x512xf32> to vector<8x128xf32>
    %120 = math.tanh %119 : vector<8x128xf32>
    %121 = vector.extract_strided_slice %106 {offsets = [0, 384], sizes = [8, 128], strides = [1, 1]} : vector<8x512xf32> to vector<8x128xf32>
    %122 = arith.negf %121 : vector<8x128xf32>
    %123 = math.exp %122 : vector<8x128xf32>
    %cst_33 = arith.constant 1.000000e+00 : f32
    %124 = vector.broadcast %cst_33 : f32 to vector<8x128xf32>
    %125 = arith.addf %124, %123 : vector<8x128xf32>
    %126 = arith.divf %124, %125 : vector<8x128xf32>
    %127 = arith.mulf %118, %69 : vector<8x128xf32>
    %128 = arith.mulf %112, %120 : vector<8x128xf32>
    %129 = arith.addf %127, %128 : vector<8x128xf32>
    %130 = math.tanh %129 : vector<8x128xf32>
    %131 = arith.mulf %126, %130 : vector<8x128xf32>
    %c2_i32 = arith.constant 2 : i32
    %c8_i32_34 = arith.constant 8 : i32
    %132 = arith.muli %c2_i32, %c8_i32_34 : i32
    %133 = tpu.assume_multiple %132, 8 : i32
    %134 = arith.index_cast %133 : i32 to index
    %c0_35 = arith.constant 0 : index
    %135 = vector.load %arg9[%134, %c0_35] : memref<64x512xf32, #tpu.memory_space<vmem>>, vector<8x512xf32>
    %cst_36 = arith.constant dense<0.000000e+00> : vector<8x512xf32>
    %136 = tpu.matmul %102, %7, %cst_36 {dimension_numbers = #tpu.dot_dimension_numbers<[1], [0], [0], [1], [0, 0, 1, 1], [], []>} : vector<8x128xf32>, vector<128x512xf32>, vector<8x512xf32> -> vector<8x512xf32>
    %137 = arith.addf %135, %136 : vector<8x512xf32>
    %138 = vector.extract_strided_slice %137 {offsets = [0, 0], sizes = [8, 128], strides = [1, 1]} : vector<8x512xf32> to vector<8x128xf32>
    %139 = arith.negf %138 : vector<8x128xf32>
    %140 = math.exp %139 : vector<8x128xf32>
    %cst_37 = arith.constant 1.000000e+00 : f32
    %141 = vector.broadcast %cst_37 : f32 to vector<8x128xf32>
    %142 = arith.addf %141, %140 : vector<8x128xf32>
    %143 = arith.divf %141, %142 : vector<8x128xf32>
    %144 = vector.extract_strided_slice %137 {offsets = [0, 128], sizes = [8, 128], strides = [1, 1]} : vector<8x512xf32> to vector<8x128xf32>
    %145 = arith.negf %144 : vector<8x128xf32>
    %146 = math.exp %145 : vector<8x128xf32>
    %cst_38 = arith.constant 1.000000e+00 : f32
    %147 = vector.broadcast %cst_38 : f32 to vector<8x128xf32>
    %148 = arith.addf %147, %146 : vector<8x128xf32>
    %149 = arith.divf %147, %148 : vector<8x128xf32>
    %150 = vector.extract_strided_slice %137 {offsets = [0, 256], sizes = [8, 128], strides = [1, 1]} : vector<8x512xf32> to vector<8x128xf32>
    %151 = math.tanh %150 : vector<8x128xf32>
    %152 = vector.extract_strided_slice %137 {offsets = [0, 384], sizes = [8, 128], strides = [1, 1]} : vector<8x512xf32> to vector<8x128xf32>
    %153 = arith.negf %152 : vector<8x128xf32>
    %154 = math.exp %153 : vector<8x128xf32>
    %cst_39 = arith.constant 1.000000e+00 : f32
    %155 = vector.broadcast %cst_39 : f32 to vector<8x128xf32>
    %156 = arith.addf %155, %154 : vector<8x128xf32>
    %157 = arith.divf %155, %156 : vector<8x128xf32>
    %158 = arith.mulf %149, %100 : vector<8x128xf32>
    %159 = arith.mulf %143, %151 : vector<8x128xf32>
    %160 = arith.addf %158, %159 : vector<8x128xf32>
    %161 = math.tanh %160 : vector<8x128xf32>
    %162 = arith.mulf %157, %161 : vector<8x128xf32>
    %163 = tpu.concatenate %162, %131 in 1 : vector<8x128xf32>, vector<8x128xf32> -> vector<8x256xf32>
    %cst_40 = arith.constant dense<0.000000e+00> : vector<8x512xf32>
    %164 = tpu.matmul %163, %8, %cst_40 {dimension_numbers = #tpu.dot_dimension_numbers<[1], [0], [0], [1], [0, 0, 1, 1], [], []>} : vector<8x256xf32>, vector<256x512xf32>, vector<8x512xf32> -> vector<8x512xf32>
    %165 = vector.broadcast %9 : vector<1x512xf32> to vector<8x512xf32>
    %166 = arith.addf %164, %165 : vector<8x512xf32>
    %167 = vector.extract_strided_slice %166 {offsets = [0, 0], sizes = [8, 128], strides = [1, 1]} : vector<8x512xf32> to vector<8x128xf32>
    %168 = arith.negf %167 : vector<8x128xf32>
    %169 = math.exp %168 : vector<8x128xf32>
    %cst_41 = arith.constant 1.000000e+00 : f32
    %170 = vector.broadcast %cst_41 : f32 to vector<8x128xf32>
    %171 = arith.addf %170, %169 : vector<8x128xf32>
    %172 = arith.divf %170, %171 : vector<8x128xf32>
    %173 = vector.extract_strided_slice %166 {offsets = [0, 128], sizes = [8, 128], strides = [1, 1]} : vector<8x512xf32> to vector<8x128xf32>
    %174 = arith.negf %173 : vector<8x128xf32>
    %175 = math.exp %174 : vector<8x128xf32>
    %cst_42 = arith.constant 1.000000e+00 : f32
    %176 = vector.broadcast %cst_42 : f32 to vector<8x128xf32>
    %177 = arith.addf %176, %175 : vector<8x128xf32>
    %178 = arith.divf %176, %177 : vector<8x128xf32>
    %179 = vector.extract_strided_slice %166 {offsets = [0, 256], sizes = [8, 128], strides = [1, 1]} : vector<8x512xf32> to vector<8x128xf32>
    %180 = math.tanh %179 : vector<8x128xf32>
    %181 = vector.extract_strided_slice %166 {offsets = [0, 384], sizes = [8, 128], strides = [1, 1]} : vector<8x512xf32> to vector<8x128xf32>
    %182 = arith.negf %181 : vector<8x128xf32>
    %183 = math.exp %182 : vector<8x128xf32>
    %cst_43 = arith.constant 1.000000e+00 : f32
    %184 = vector.broadcast %cst_43 : f32 to vector<8x128xf32>
    %185 = arith.addf %184, %183 : vector<8x128xf32>
    %186 = arith.divf %184, %185 : vector<8x128xf32>
    %187 = arith.mulf %178, %129 : vector<8x128xf32>
    %188 = arith.mulf %172, %180 : vector<8x128xf32>
    %189 = arith.addf %187, %188 : vector<8x128xf32>
    %190 = math.tanh %189 : vector<8x128xf32>
    %191 = arith.mulf %186, %190 : vector<8x128xf32>
    %c3_i32 = arith.constant 3 : i32
    %c8_i32_44 = arith.constant 8 : i32
    %192 = arith.muli %c3_i32, %c8_i32_44 : i32
    %193 = tpu.assume_multiple %192, 8 : i32
    %194 = arith.index_cast %193 : i32 to index
    %c0_45 = arith.constant 0 : index
    %195 = vector.load %arg9[%194, %c0_45] : memref<64x512xf32, #tpu.memory_space<vmem>>, vector<8x512xf32>
    %cst_46 = arith.constant dense<0.000000e+00> : vector<8x512xf32>
    %196 = tpu.matmul %162, %7, %cst_46 {dimension_numbers = #tpu.dot_dimension_numbers<[1], [0], [0], [1], [0, 0, 1, 1], [], []>} : vector<8x128xf32>, vector<128x512xf32>, vector<8x512xf32> -> vector<8x512xf32>
    %197 = arith.addf %195, %196 : vector<8x512xf32>
    %198 = vector.extract_strided_slice %197 {offsets = [0, 0], sizes = [8, 128], strides = [1, 1]} : vector<8x512xf32> to vector<8x128xf32>
    %199 = arith.negf %198 : vector<8x128xf32>
    %200 = math.exp %199 : vector<8x128xf32>
    %cst_47 = arith.constant 1.000000e+00 : f32
    %201 = vector.broadcast %cst_47 : f32 to vector<8x128xf32>
    %202 = arith.addf %201, %200 : vector<8x128xf32>
    %203 = arith.divf %201, %202 : vector<8x128xf32>
    %204 = vector.extract_strided_slice %197 {offsets = [0, 128], sizes = [8, 128], strides = [1, 1]} : vector<8x512xf32> to vector<8x128xf32>
    %205 = arith.negf %204 : vector<8x128xf32>
    %206 = math.exp %205 : vector<8x128xf32>
    %cst_48 = arith.constant 1.000000e+00 : f32
    %207 = vector.broadcast %cst_48 : f32 to vector<8x128xf32>
    %208 = arith.addf %207, %206 : vector<8x128xf32>
    %209 = arith.divf %207, %208 : vector<8x128xf32>
    %210 = vector.extract_strided_slice %197 {offsets = [0, 256], sizes = [8, 128], strides = [1, 1]} : vector<8x512xf32> to vector<8x128xf32>
    %211 = math.tanh %210 : vector<8x128xf32>
    %212 = vector.extract_strided_slice %197 {offsets = [0, 384], sizes = [8, 128], strides = [1, 1]} : vector<8x512xf32> to vector<8x128xf32>
    %213 = arith.negf %212 : vector<8x128xf32>
    %214 = math.exp %213 : vector<8x128xf32>
    %cst_49 = arith.constant 1.000000e+00 : f32
    %215 = vector.broadcast %cst_49 : f32 to vector<8x128xf32>
    %216 = arith.addf %215, %214 : vector<8x128xf32>
    %217 = arith.divf %215, %216 : vector<8x128xf32>
    %218 = arith.mulf %209, %160 : vector<8x128xf32>
    %219 = arith.mulf %203, %211 : vector<8x128xf32>
    %220 = arith.addf %218, %219 : vector<8x128xf32>
    %221 = math.tanh %220 : vector<8x128xf32>
    %222 = arith.mulf %217, %221 : vector<8x128xf32>
    %223 = tpu.concatenate %222, %191 in 1 : vector<8x128xf32>, vector<8x128xf32> -> vector<8x256xf32>
    %cst_50 = arith.constant dense<0.000000e+00> : vector<8x512xf32>
    %224 = tpu.matmul %223, %8, %cst_50 {dimension_numbers = #tpu.dot_dimension_numbers<[1], [0], [0], [1], [0, 0, 1, 1], [], []>} : vector<8x256xf32>, vector<256x512xf32>, vector<8x512xf32> -> vector<8x512xf32>
    %225 = vector.broadcast %9 : vector<1x512xf32> to vector<8x512xf32>
    %226 = arith.addf %224, %225 : vector<8x512xf32>
    %227 = vector.extract_strided_slice %226 {offsets = [0, 0], sizes = [8, 128], strides = [1, 1]} : vector<8x512xf32> to vector<8x128xf32>
    %228 = arith.negf %227 : vector<8x128xf32>
    %229 = math.exp %228 : vector<8x128xf32>
    %cst_51 = arith.constant 1.000000e+00 : f32
    %230 = vector.broadcast %cst_51 : f32 to vector<8x128xf32>
    %231 = arith.addf %230, %229 : vector<8x128xf32>
    %232 = arith.divf %230, %231 : vector<8x128xf32>
    %233 = vector.extract_strided_slice %226 {offsets = [0, 128], sizes = [8, 128], strides = [1, 1]} : vector<8x512xf32> to vector<8x128xf32>
    %234 = arith.negf %233 : vector<8x128xf32>
    %235 = math.exp %234 : vector<8x128xf32>
    %cst_52 = arith.constant 1.000000e+00 : f32
    %236 = vector.broadcast %cst_52 : f32 to vector<8x128xf32>
    %237 = arith.addf %236, %235 : vector<8x128xf32>
    %238 = arith.divf %236, %237 : vector<8x128xf32>
    %239 = vector.extract_strided_slice %226 {offsets = [0, 256], sizes = [8, 128], strides = [1, 1]} : vector<8x512xf32> to vector<8x128xf32>
    %240 = math.tanh %239 : vector<8x128xf32>
    %241 = vector.extract_strided_slice %226 {offsets = [0, 384], sizes = [8, 128], strides = [1, 1]} : vector<8x512xf32> to vector<8x128xf32>
    %242 = arith.negf %241 : vector<8x128xf32>
    %243 = math.exp %242 : vector<8x128xf32>
    %cst_53 = arith.constant 1.000000e+00 : f32
    %244 = vector.broadcast %cst_53 : f32 to vector<8x128xf32>
    %245 = arith.addf %244, %243 : vector<8x128xf32>
    %246 = arith.divf %244, %245 : vector<8x128xf32>
    %247 = arith.mulf %238, %189 : vector<8x128xf32>
    %248 = arith.mulf %232, %240 : vector<8x128xf32>
    %249 = arith.addf %247, %248 : vector<8x128xf32>
    %250 = math.tanh %249 : vector<8x128xf32>
    %251 = arith.mulf %246, %250 : vector<8x128xf32>
    %c4_i32 = arith.constant 4 : i32
    %c8_i32_54 = arith.constant 8 : i32
    %252 = arith.muli %c4_i32, %c8_i32_54 : i32
    %253 = tpu.assume_multiple %252, 8 : i32
    %254 = arith.index_cast %253 : i32 to index
    %c0_55 = arith.constant 0 : index
    %255 = vector.load %arg9[%254, %c0_55] : memref<64x512xf32, #tpu.memory_space<vmem>>, vector<8x512xf32>
    %cst_56 = arith.constant dense<0.000000e+00> : vector<8x512xf32>
    %256 = tpu.matmul %222, %7, %cst_56 {dimension_numbers = #tpu.dot_dimension_numbers<[1], [0], [0], [1], [0, 0, 1, 1], [], []>} : vector<8x128xf32>, vector<128x512xf32>, vector<8x512xf32> -> vector<8x512xf32>
    %257 = arith.addf %255, %256 : vector<8x512xf32>
    %258 = vector.extract_strided_slice %257 {offsets = [0, 0], sizes = [8, 128], strides = [1, 1]} : vector<8x512xf32> to vector<8x128xf32>
    %259 = arith.negf %258 : vector<8x128xf32>
    %260 = math.exp %259 : vector<8x128xf32>
    %cst_57 = arith.constant 1.000000e+00 : f32
    %261 = vector.broadcast %cst_57 : f32 to vector<8x128xf32>
    %262 = arith.addf %261, %260 : vector<8x128xf32>
    %263 = arith.divf %261, %262 : vector<8x128xf32>
    %264 = vector.extract_strided_slice %257 {offsets = [0, 128], sizes = [8, 128], strides = [1, 1]} : vector<8x512xf32> to vector<8x128xf32>
    %265 = arith.negf %264 : vector<8x128xf32>
    %266 = math.exp %265 : vector<8x128xf32>
    %cst_58 = arith.constant 1.000000e+00 : f32
    %267 = vector.broadcast %cst_58 : f32 to vector<8x128xf32>
    %268 = arith.addf %267, %266 : vector<8x128xf32>
    %269 = arith.divf %267, %268 : vector<8x128xf32>
    %270 = vector.extract_strided_slice %257 {offsets = [0, 256], sizes = [8, 128], strides = [1, 1]} : vector<8x512xf32> to vector<8x128xf32>
    %271 = math.tanh %270 : vector<8x128xf32>
    %272 = vector.extract_strided_slice %257 {offsets = [0, 384], sizes = [8, 128], strides = [1, 1]} : vector<8x512xf32> to vector<8x128xf32>
    %273 = arith.negf %272 : vector<8x128xf32>
    %274 = math.exp %273 : vector<8x128xf32>
    %cst_59 = arith.constant 1.000000e+00 : f32
    %275 = vector.broadcast %cst_59 : f32 to vector<8x128xf32>
    %276 = arith.addf %275, %274 : vector<8x128xf32>
    %277 = arith.divf %275, %276 : vector<8x128xf32>
    %278 = arith.mulf %269, %220 : vector<8x128xf32>
    %279 = arith.mulf %263, %271 : vector<8x128xf32>
    %280 = arith.addf %278, %279 : vector<8x128xf32>
    %281 = math.tanh %280 : vector<8x128xf32>
    %282 = arith.mulf %277, %281 : vector<8x128xf32>
    %283 = tpu.concatenate %282, %251 in 1 : vector<8x128xf32>, vector<8x128xf32> -> vector<8x256xf32>
    %cst_60 = arith.constant dense<0.000000e+00> : vector<8x512xf32>
    %284 = tpu.matmul %283, %8, %cst_60 {dimension_numbers = #tpu.dot_dimension_numbers<[1], [0], [0], [1], [0, 0, 1, 1], [], []>} : vector<8x256xf32>, vector<256x512xf32>, vector<8x512xf32> -> vector<8x512xf32>
    %285 = vector.broadcast %9 : vector<1x512xf32> to vector<8x512xf32>
    %286 = arith.addf %284, %285 : vector<8x512xf32>
    %287 = vector.extract_strided_slice %286 {offsets = [0, 0], sizes = [8, 128], strides = [1, 1]} : vector<8x512xf32> to vector<8x128xf32>
    %288 = arith.negf %287 : vector<8x128xf32>
    %289 = math.exp %288 : vector<8x128xf32>
    %cst_61 = arith.constant 1.000000e+00 : f32
    %290 = vector.broadcast %cst_61 : f32 to vector<8x128xf32>
    %291 = arith.addf %290, %289 : vector<8x128xf32>
    %292 = arith.divf %290, %291 : vector<8x128xf32>
    %293 = vector.extract_strided_slice %286 {offsets = [0, 128], sizes = [8, 128], strides = [1, 1]} : vector<8x512xf32> to vector<8x128xf32>
    %294 = arith.negf %293 : vector<8x128xf32>
    %295 = math.exp %294 : vector<8x128xf32>
    %cst_62 = arith.constant 1.000000e+00 : f32
    %296 = vector.broadcast %cst_62 : f32 to vector<8x128xf32>
    %297 = arith.addf %296, %295 : vector<8x128xf32>
    %298 = arith.divf %296, %297 : vector<8x128xf32>
    %299 = vector.extract_strided_slice %286 {offsets = [0, 256], sizes = [8, 128], strides = [1, 1]} : vector<8x512xf32> to vector<8x128xf32>
    %300 = math.tanh %299 : vector<8x128xf32>
    %301 = vector.extract_strided_slice %286 {offsets = [0, 384], sizes = [8, 128], strides = [1, 1]} : vector<8x512xf32> to vector<8x128xf32>
    %302 = arith.negf %301 : vector<8x128xf32>
    %303 = math.exp %302 : vector<8x128xf32>
    %cst_63 = arith.constant 1.000000e+00 : f32
    %304 = vector.broadcast %cst_63 : f32 to vector<8x128xf32>
    %305 = arith.addf %304, %303 : vector<8x128xf32>
    %306 = arith.divf %304, %305 : vector<8x128xf32>
    %307 = arith.mulf %298, %249 : vector<8x128xf32>
    %308 = arith.mulf %292, %300 : vector<8x128xf32>
    %309 = arith.addf %307, %308 : vector<8x128xf32>
    %310 = math.tanh %309 : vector<8x128xf32>
    %311 = arith.mulf %306, %310 : vector<8x128xf32>
    %c5_i32 = arith.constant 5 : i32
    %c8_i32_64 = arith.constant 8 : i32
    %312 = arith.muli %c5_i32, %c8_i32_64 : i32
    %313 = tpu.assume_multiple %312, 8 : i32
    %314 = arith.index_cast %313 : i32 to index
    %c0_65 = arith.constant 0 : index
    %315 = vector.load %arg9[%314, %c0_65] : memref<64x512xf32, #tpu.memory_space<vmem>>, vector<8x512xf32>
    %cst_66 = arith.constant dense<0.000000e+00> : vector<8x512xf32>
    %316 = tpu.matmul %282, %7, %cst_66 {dimension_numbers = #tpu.dot_dimension_numbers<[1], [0], [0], [1], [0, 0, 1, 1], [], []>} : vector<8x128xf32>, vector<128x512xf32>, vector<8x512xf32> -> vector<8x512xf32>
    %317 = arith.addf %315, %316 : vector<8x512xf32>
    %318 = vector.extract_strided_slice %317 {offsets = [0, 0], sizes = [8, 128], strides = [1, 1]} : vector<8x512xf32> to vector<8x128xf32>
    %319 = arith.negf %318 : vector<8x128xf32>
    %320 = math.exp %319 : vector<8x128xf32>
    %cst_67 = arith.constant 1.000000e+00 : f32
    %321 = vector.broadcast %cst_67 : f32 to vector<8x128xf32>
    %322 = arith.addf %321, %320 : vector<8x128xf32>
    %323 = arith.divf %321, %322 : vector<8x128xf32>
    %324 = vector.extract_strided_slice %317 {offsets = [0, 128], sizes = [8, 128], strides = [1, 1]} : vector<8x512xf32> to vector<8x128xf32>
    %325 = arith.negf %324 : vector<8x128xf32>
    %326 = math.exp %325 : vector<8x128xf32>
    %cst_68 = arith.constant 1.000000e+00 : f32
    %327 = vector.broadcast %cst_68 : f32 to vector<8x128xf32>
    %328 = arith.addf %327, %326 : vector<8x128xf32>
    %329 = arith.divf %327, %328 : vector<8x128xf32>
    %330 = vector.extract_strided_slice %317 {offsets = [0, 256], sizes = [8, 128], strides = [1, 1]} : vector<8x512xf32> to vector<8x128xf32>
    %331 = math.tanh %330 : vector<8x128xf32>
    %332 = vector.extract_strided_slice %317 {offsets = [0, 384], sizes = [8, 128], strides = [1, 1]} : vector<8x512xf32> to vector<8x128xf32>
    %333 = arith.negf %332 : vector<8x128xf32>
    %334 = math.exp %333 : vector<8x128xf32>
    %cst_69 = arith.constant 1.000000e+00 : f32
    %335 = vector.broadcast %cst_69 : f32 to vector<8x128xf32>
    %336 = arith.addf %335, %334 : vector<8x128xf32>
    %337 = arith.divf %335, %336 : vector<8x128xf32>
    %338 = arith.mulf %329, %280 : vector<8x128xf32>
    %339 = arith.mulf %323, %331 : vector<8x128xf32>
    %340 = arith.addf %338, %339 : vector<8x128xf32>
    %341 = math.tanh %340 : vector<8x128xf32>
    %342 = arith.mulf %337, %341 : vector<8x128xf32>
    %343 = tpu.concatenate %342, %311 in 1 : vector<8x128xf32>, vector<8x128xf32> -> vector<8x256xf32>
    %cst_70 = arith.constant dense<0.000000e+00> : vector<8x512xf32>
    %344 = tpu.matmul %343, %8, %cst_70 {dimension_numbers = #tpu.dot_dimension_numbers<[1], [0], [0], [1], [0, 0, 1, 1], [], []>} : vector<8x256xf32>, vector<256x512xf32>, vector<8x512xf32> -> vector<8x512xf32>
    %345 = vector.broadcast %9 : vector<1x512xf32> to vector<8x512xf32>
    %346 = arith.addf %344, %345 : vector<8x512xf32>
    %347 = vector.extract_strided_slice %346 {offsets = [0, 0], sizes = [8, 128], strides = [1, 1]} : vector<8x512xf32> to vector<8x128xf32>
    %348 = arith.negf %347 : vector<8x128xf32>
    %349 = math.exp %348 : vector<8x128xf32>
    %cst_71 = arith.constant 1.000000e+00 : f32
    %350 = vector.broadcast %cst_71 : f32 to vector<8x128xf32>
    %351 = arith.addf %350, %349 : vector<8x128xf32>
    %352 = arith.divf %350, %351 : vector<8x128xf32>
    %353 = vector.extract_strided_slice %346 {offsets = [0, 128], sizes = [8, 128], strides = [1, 1]} : vector<8x512xf32> to vector<8x128xf32>
    %354 = arith.negf %353 : vector<8x128xf32>
    %355 = math.exp %354 : vector<8x128xf32>
    %cst_72 = arith.constant 1.000000e+00 : f32
    %356 = vector.broadcast %cst_72 : f32 to vector<8x128xf32>
    %357 = arith.addf %356, %355 : vector<8x128xf32>
    %358 = arith.divf %356, %357 : vector<8x128xf32>
    %359 = vector.extract_strided_slice %346 {offsets = [0, 256], sizes = [8, 128], strides = [1, 1]} : vector<8x512xf32> to vector<8x128xf32>
    %360 = math.tanh %359 : vector<8x128xf32>
    %361 = vector.extract_strided_slice %346 {offsets = [0, 384], sizes = [8, 128], strides = [1, 1]} : vector<8x512xf32> to vector<8x128xf32>
    %362 = arith.negf %361 : vector<8x128xf32>
    %363 = math.exp %362 : vector<8x128xf32>
    %cst_73 = arith.constant 1.000000e+00 : f32
    %364 = vector.broadcast %cst_73 : f32 to vector<8x128xf32>
    %365 = arith.addf %364, %363 : vector<8x128xf32>
    %366 = arith.divf %364, %365 : vector<8x128xf32>
    %367 = arith.mulf %358, %309 : vector<8x128xf32>
    %368 = arith.mulf %352, %360 : vector<8x128xf32>
    %369 = arith.addf %367, %368 : vector<8x128xf32>
    %370 = math.tanh %369 : vector<8x128xf32>
    %371 = arith.mulf %366, %370 : vector<8x128xf32>
    %c6_i32 = arith.constant 6 : i32
    %c8_i32_74 = arith.constant 8 : i32
    %372 = arith.muli %c6_i32, %c8_i32_74 : i32
    %373 = tpu.assume_multiple %372, 8 : i32
    %374 = arith.index_cast %373 : i32 to index
    %c0_75 = arith.constant 0 : index
    %375 = vector.load %arg9[%374, %c0_75] : memref<64x512xf32, #tpu.memory_space<vmem>>, vector<8x512xf32>
    %cst_76 = arith.constant dense<0.000000e+00> : vector<8x512xf32>
    %376 = tpu.matmul %342, %7, %cst_76 {dimension_numbers = #tpu.dot_dimension_numbers<[1], [0], [0], [1], [0, 0, 1, 1], [], []>} : vector<8x128xf32>, vector<128x512xf32>, vector<8x512xf32> -> vector<8x512xf32>
    %377 = arith.addf %375, %376 : vector<8x512xf32>
    %378 = vector.extract_strided_slice %377 {offsets = [0, 0], sizes = [8, 128], strides = [1, 1]} : vector<8x512xf32> to vector<8x128xf32>
    %379 = arith.negf %378 : vector<8x128xf32>
    %380 = math.exp %379 : vector<8x128xf32>
    %cst_77 = arith.constant 1.000000e+00 : f32
    %381 = vector.broadcast %cst_77 : f32 to vector<8x128xf32>
    %382 = arith.addf %381, %380 : vector<8x128xf32>
    %383 = arith.divf %381, %382 : vector<8x128xf32>
    %384 = vector.extract_strided_slice %377 {offsets = [0, 128], sizes = [8, 128], strides = [1, 1]} : vector<8x512xf32> to vector<8x128xf32>
    %385 = arith.negf %384 : vector<8x128xf32>
    %386 = math.exp %385 : vector<8x128xf32>
    %cst_78 = arith.constant 1.000000e+00 : f32
    %387 = vector.broadcast %cst_78 : f32 to vector<8x128xf32>
    %388 = arith.addf %387, %386 : vector<8x128xf32>
    %389 = arith.divf %387, %388 : vector<8x128xf32>
    %390 = vector.extract_strided_slice %377 {offsets = [0, 256], sizes = [8, 128], strides = [1, 1]} : vector<8x512xf32> to vector<8x128xf32>
    %391 = math.tanh %390 : vector<8x128xf32>
    %392 = vector.extract_strided_slice %377 {offsets = [0, 384], sizes = [8, 128], strides = [1, 1]} : vector<8x512xf32> to vector<8x128xf32>
    %393 = arith.negf %392 : vector<8x128xf32>
    %394 = math.exp %393 : vector<8x128xf32>
    %cst_79 = arith.constant 1.000000e+00 : f32
    %395 = vector.broadcast %cst_79 : f32 to vector<8x128xf32>
    %396 = arith.addf %395, %394 : vector<8x128xf32>
    %397 = arith.divf %395, %396 : vector<8x128xf32>
    %398 = arith.mulf %389, %340 : vector<8x128xf32>
    %399 = arith.mulf %383, %391 : vector<8x128xf32>
    %400 = arith.addf %398, %399 : vector<8x128xf32>
    %401 = math.tanh %400 : vector<8x128xf32>
    %402 = arith.mulf %397, %401 : vector<8x128xf32>
    %403 = tpu.concatenate %402, %371 in 1 : vector<8x128xf32>, vector<8x128xf32> -> vector<8x256xf32>
    %cst_80 = arith.constant dense<0.000000e+00> : vector<8x512xf32>
    %404 = tpu.matmul %403, %8, %cst_80 {dimension_numbers = #tpu.dot_dimension_numbers<[1], [0], [0], [1], [0, 0, 1, 1], [], []>} : vector<8x256xf32>, vector<256x512xf32>, vector<8x512xf32> -> vector<8x512xf32>
    %405 = vector.broadcast %9 : vector<1x512xf32> to vector<8x512xf32>
    %406 = arith.addf %404, %405 : vector<8x512xf32>
    %407 = vector.extract_strided_slice %406 {offsets = [0, 0], sizes = [8, 128], strides = [1, 1]} : vector<8x512xf32> to vector<8x128xf32>
    %408 = arith.negf %407 : vector<8x128xf32>
    %409 = math.exp %408 : vector<8x128xf32>
    %cst_81 = arith.constant 1.000000e+00 : f32
    %410 = vector.broadcast %cst_81 : f32 to vector<8x128xf32>
    %411 = arith.addf %410, %409 : vector<8x128xf32>
    %412 = arith.divf %410, %411 : vector<8x128xf32>
    %413 = vector.extract_strided_slice %406 {offsets = [0, 128], sizes = [8, 128], strides = [1, 1]} : vector<8x512xf32> to vector<8x128xf32>
    %414 = arith.negf %413 : vector<8x128xf32>
    %415 = math.exp %414 : vector<8x128xf32>
    %cst_82 = arith.constant 1.000000e+00 : f32
    %416 = vector.broadcast %cst_82 : f32 to vector<8x128xf32>
    %417 = arith.addf %416, %415 : vector<8x128xf32>
    %418 = arith.divf %416, %417 : vector<8x128xf32>
    %419 = vector.extract_strided_slice %406 {offsets = [0, 256], sizes = [8, 128], strides = [1, 1]} : vector<8x512xf32> to vector<8x128xf32>
    %420 = math.tanh %419 : vector<8x128xf32>
    %421 = vector.extract_strided_slice %406 {offsets = [0, 384], sizes = [8, 128], strides = [1, 1]} : vector<8x512xf32> to vector<8x128xf32>
    %422 = arith.negf %421 : vector<8x128xf32>
    %423 = math.exp %422 : vector<8x128xf32>
    %cst_83 = arith.constant 1.000000e+00 : f32
    %424 = vector.broadcast %cst_83 : f32 to vector<8x128xf32>
    %425 = arith.addf %424, %423 : vector<8x128xf32>
    %426 = arith.divf %424, %425 : vector<8x128xf32>
    %427 = arith.mulf %418, %369 : vector<8x128xf32>
    %428 = arith.mulf %412, %420 : vector<8x128xf32>
    %429 = arith.addf %427, %428 : vector<8x128xf32>
    %430 = math.tanh %429 : vector<8x128xf32>
    %431 = arith.mulf %426, %430 : vector<8x128xf32>
    %c7_i32 = arith.constant 7 : i32
    %c8_i32_84 = arith.constant 8 : i32
    %432 = arith.muli %c7_i32, %c8_i32_84 : i32
    %433 = tpu.assume_multiple %432, 8 : i32
    %434 = arith.index_cast %433 : i32 to index
    %c0_85 = arith.constant 0 : index
    %435 = vector.load %arg9[%434, %c0_85] : memref<64x512xf32, #tpu.memory_space<vmem>>, vector<8x512xf32>
    %cst_86 = arith.constant dense<0.000000e+00> : vector<8x512xf32>
    %436 = tpu.matmul %402, %7, %cst_86 {dimension_numbers = #tpu.dot_dimension_numbers<[1], [0], [0], [1], [0, 0, 1, 1], [], []>} : vector<8x128xf32>, vector<128x512xf32>, vector<8x512xf32> -> vector<8x512xf32>
    %437 = arith.addf %435, %436 : vector<8x512xf32>
    %438 = vector.extract_strided_slice %437 {offsets = [0, 0], sizes = [8, 128], strides = [1, 1]} : vector<8x512xf32> to vector<8x128xf32>
    %439 = arith.negf %438 : vector<8x128xf32>
    %440 = math.exp %439 : vector<8x128xf32>
    %cst_87 = arith.constant 1.000000e+00 : f32
    %441 = vector.broadcast %cst_87 : f32 to vector<8x128xf32>
    %442 = arith.addf %441, %440 : vector<8x128xf32>
    %443 = arith.divf %441, %442 : vector<8x128xf32>
    %444 = vector.extract_strided_slice %437 {offsets = [0, 128], sizes = [8, 128], strides = [1, 1]} : vector<8x512xf32> to vector<8x128xf32>
    %445 = arith.negf %444 : vector<8x128xf32>
    %446 = math.exp %445 : vector<8x128xf32>
    %cst_88 = arith.constant 1.000000e+00 : f32
    %447 = vector.broadcast %cst_88 : f32 to vector<8x128xf32>
    %448 = arith.addf %447, %446 : vector<8x128xf32>
    %449 = arith.divf %447, %448 : vector<8x128xf32>
    %450 = vector.extract_strided_slice %437 {offsets = [0, 256], sizes = [8, 128], strides = [1, 1]} : vector<8x512xf32> to vector<8x128xf32>
    %451 = math.tanh %450 : vector<8x128xf32>
    %452 = vector.extract_strided_slice %437 {offsets = [0, 384], sizes = [8, 128], strides = [1, 1]} : vector<8x512xf32> to vector<8x128xf32>
    %453 = arith.negf %452 : vector<8x128xf32>
    %454 = math.exp %453 : vector<8x128xf32>
    %cst_89 = arith.constant 1.000000e+00 : f32
    %455 = vector.broadcast %cst_89 : f32 to vector<8x128xf32>
    %456 = arith.addf %455, %454 : vector<8x128xf32>
    %457 = arith.divf %455, %456 : vector<8x128xf32>
    %458 = arith.mulf %449, %400 : vector<8x128xf32>
    %459 = arith.mulf %443, %451 : vector<8x128xf32>
    %460 = arith.addf %458, %459 : vector<8x128xf32>
    %461 = math.tanh %460 : vector<8x128xf32>
    %462 = arith.mulf %457, %461 : vector<8x128xf32>
    %463 = tpu.concatenate %462, %431 in 1 : vector<8x128xf32>, vector<8x128xf32> -> vector<8x256xf32>
    %cst_90 = arith.constant dense<0.000000e+00> : vector<8x512xf32>
    %464 = tpu.matmul %463, %8, %cst_90 {dimension_numbers = #tpu.dot_dimension_numbers<[1], [0], [0], [1], [0, 0, 1, 1], [], []>} : vector<8x256xf32>, vector<256x512xf32>, vector<8x512xf32> -> vector<8x512xf32>
    %465 = vector.broadcast %9 : vector<1x512xf32> to vector<8x512xf32>
    %466 = arith.addf %464, %465 : vector<8x512xf32>
    %467 = vector.extract_strided_slice %466 {offsets = [0, 0], sizes = [8, 128], strides = [1, 1]} : vector<8x512xf32> to vector<8x128xf32>
    %468 = arith.negf %467 : vector<8x128xf32>
    %469 = math.exp %468 : vector<8x128xf32>
    %cst_91 = arith.constant 1.000000e+00 : f32
    %470 = vector.broadcast %cst_91 : f32 to vector<8x128xf32>
    %471 = arith.addf %470, %469 : vector<8x128xf32>
    %472 = arith.divf %470, %471 : vector<8x128xf32>
    %473 = vector.extract_strided_slice %466 {offsets = [0, 128], sizes = [8, 128], strides = [1, 1]} : vector<8x512xf32> to vector<8x128xf32>
    %474 = arith.negf %473 : vector<8x128xf32>
    %475 = math.exp %474 : vector<8x128xf32>
    %cst_92 = arith.constant 1.000000e+00 : f32
    %476 = vector.broadcast %cst_92 : f32 to vector<8x128xf32>
    %477 = arith.addf %476, %475 : vector<8x128xf32>
    %478 = arith.divf %476, %477 : vector<8x128xf32>
    %479 = vector.extract_strided_slice %466 {offsets = [0, 256], sizes = [8, 128], strides = [1, 1]} : vector<8x512xf32> to vector<8x128xf32>
    %480 = math.tanh %479 : vector<8x128xf32>
    %481 = vector.extract_strided_slice %466 {offsets = [0, 384], sizes = [8, 128], strides = [1, 1]} : vector<8x512xf32> to vector<8x128xf32>
    %482 = arith.negf %481 : vector<8x128xf32>
    %483 = math.exp %482 : vector<8x128xf32>
    %cst_93 = arith.constant 1.000000e+00 : f32
    %484 = vector.broadcast %cst_93 : f32 to vector<8x128xf32>
    %485 = arith.addf %484, %483 : vector<8x128xf32>
    %486 = arith.divf %484, %485 : vector<8x128xf32>
    %487 = arith.mulf %478, %429 : vector<8x128xf32>
    %488 = arith.mulf %472, %480 : vector<8x128xf32>
    %489 = arith.addf %487, %488 : vector<8x128xf32>
    %490 = math.tanh %489 : vector<8x128xf32>
    %491 = arith.mulf %486, %490 : vector<8x128xf32>
    %c8_i32_94 = arith.constant 8 : i32
    %c0_95 = arith.constant 0 : index
    %c0_96 = arith.constant 0 : index
    %492 = vector.load %arg6[%c0_95, %c0_96] : memref<128x128xf32, #tpu.memory_space<vmem>>, vector<128x128xf32>
    %cst_97 = arith.constant dense<0.000000e+00> : vector<8x128xf32>
    %493 = tpu.matmul %491, %492, %cst_97 {dimension_numbers = #tpu.dot_dimension_numbers<[1], [0], [0], [1], [0, 0, 1, 1], [], []>} : vector<8x128xf32>, vector<128x128xf32>, vector<8x128xf32> -> vector<8x128xf32>
    %c0_98 = arith.constant 0 : index
    %c0_99 = arith.constant 0 : index
    %494 = vector.load %arg7[%c0_98, %c0_99] : memref<1x128xf32, #tpu.memory_space<vmem>>, vector<1x128xf32>
    %495 = vector.broadcast %494 : vector<1x128xf32> to vector<8x128xf32>
    %496 = arith.addf %493, %495 : vector<8x128xf32>
    %c0_100 = arith.constant 0 : index
    %c0_101 = arith.constant 0 : index
    %497 = vector.load %arg8[%c0_100, %c0_101] : memref<8x128xf32, #tpu.memory_space<vmem>>, vector<8x128xf32>
    tpu.vector_store %arg8[%c0_100, %c0_101], %496 {strides = array<i32>} : memref<8x128xf32, #tpu.memory_space<vmem>>, vector<8x128xf32>,
    return
  }
}

</mosaic_0001>

<bundles_post_ra>
// kernel: tpu_custom_call.1
= control target key start
LH: loop header
LB: loop body
LE: loop exit
PB: predicated region body
PF: predicated region fallthrough
CT: control target
= control target key end

     0   :  { %13 = vsyncpa [#allocation4], 0  ;;  %s8423_s0 = inlined_call_operand.vmem [shape: f32[64,16], index: 0, kind: input, shape index: {}]   ;;  %s8424_s1 = inlined_call_operand.vmem [shape: f32[16,512], index: 1, kind: input, shape index: {}]   ;;  %s8425_s2 = inlined_call_operand.vmem [shape: f32[1,512], index: 2, kind: input, shape index: {}]   ;;  %s8426_s3 = inlined_call_operand.hbm [shape: f32[128,512], index: 3, kind: input, shape index: {}]   ;;  %s8427_s4 = inlined_call_operand.hbm [shape: f32[256,512], index: 4, kind: input, shape index: {}]   ;;  %s8428_s5 = inlined_call_operand.vmem [shape: f32[1,512], index: 5, kind: input, shape index: {}]   ;;  %s8429_s6 = inlined_call_operand.hbm [shape: f32[128,128], index: 6, kind: input, shape index: {}]   ;;  %s8430_s7 = inlined_call_operand.vmem [shape: f32[1,128], index: 7, kind: input, shape index: {}]   ;;  %s8431_s8 = inlined_call_operand.hbm [shape: f32[8,128], index: 8, kind: output, shape index: {}]  }
   0x1   :  { %14 = vsyncpa [#allocation7], 0 }
   0x2   :  { %15 = vsyncpa [#allocation5], 0  ;;  %s39_s29 = sshll.u32 %s8427_s4, 4  ;;  %s4669_s30 = smov [#allocation6]   ;;  %s40_s29 = int_to_ptr.hbm [resolvable:$true] %s39_s29 }
   0x3   :  { %s41_s9 = sshll.u32 %s4669_s30, 4  ;;  %s26_s12 = sshll.u32 %s8426_s3, 4  ;;  %s42_s9 = int_to_ptr.vmem [resolvable:$true] %s41_s9  ;;  %s27_s12 = int_to_ptr.hbm [resolvable:$true] %s26_s12 }
   0x4   :  { %s4670_s13 = smov 512   ;;  %s4671_s14 = smov 32  }
   0x5   :  { %47 = dma.hbm_to_vmem [thread:$0]  %s40_s29, 16384, %s42_s9, [#allocation7], %s4670_s13, %s4670_s13, %s4671_s14  }
   0x6   :  { %s4672_s15 = smov [#allocation3]   ;;  %s54_s19 = sshll.u32 %s8429_s6, 4  ;;  %s55_s19 = int_to_ptr.hbm [resolvable:$true] %s54_s19 }
   0x7   :  { %s28_s16 = sshll.u32 %s4672_s15, 4  ;;  %s4673_s4 = smov [#allocation8]   ;;  %s29_s16 = int_to_ptr.vmem [resolvable:$true] %s28_s16 }
   0x8   :  { %34 = dma.hbm_to_vmem [thread:$0]  %s27_s12, 8192, %s29_s16, [#allocation4], %s4670_s13, %s4670_s13, %s4671_s14  }
   0x9   :  { %s56_s20 = sshll.u32 %s4673_s4, 4  ;;  %s4674_s21 = smov 128   ;;  %s57_s20 = int_to_ptr.vmem [resolvable:$true] %s56_s20 }
   0xa   :  { %s4675_s22 = smov 8  }
   0xb   :  { %62 = dma.hbm_to_vmem [thread:$0]  %s55_s19, 2048, %s57_s20, [#allocation7], %s4674_s21, %s4674_s21, %s4675_s22  }
   0xc   :  { %4663 = dma.done.wait [#allocation4], 8192  }
   0xd   :  { %4664 = vsyncadd [#allocation4], 4294959104 }
   0xe   :  { %4665 = dma.done.wait [#allocation7], 18432  }
   0xf   :  { %4666 = vsyncadd [#allocation7], 4294948864  ;;  %v89_v0 = vld [vmem:[%s8424_s1 + $0x20] sm:$0xff]  ;;  %vm103_vm0 = vcmask 130048   ;;  %v4744_v3 = vld [vmem:[%s8423_s0 + $0x28] sm:$0xff]  ;;  %s4677_s30 = smov [#allocation9]  }
  0x10   :  { %v85_v1 = vld [vmem:[%s8424_s1] sm:$0xff]  ;;  %142 = vmatpush.msra.mxu0 %v89_v0  ;;  %3688 = vmatpush.msra.mxu1 %v89_v0  ;;  %v4749_v4 = vld [vmem:[%s8423_s0 + $0x30] sm:$0xff]  ;;  %v4754_v5 = vld [vmem:[%s8423_s0 + $0x38] sm:$0xff]  ;;  %s3588_s9 = sshll.u32 %s4677_s30, 4  ;;  %s3590_s12 = sshll.u32 %s8431_s8, 4  ;;  %s3589_s9 = int_to_ptr.vmem [resolvable:$true] %s3588_s9  ;;  %s3591_s12 = int_to_ptr.hbm [resolvable:$true] %s3590_s12 }
  0x11   :  { %3689 = vmatpush.msra.mxu2 %v89_v0  ;;  %3690 = vmatpush.msra.mxu3 %v89_v0  ;;  %v77_v2 = vld [vmem:[%s8423_s0] sm:$0xff]  ;;  %v90_v6 = vld [vmem:[%s8424_s1 + $0x28] sm:$0xff]  ;;  %v91_v7 = vld [vmem:[%s8424_s1 + $0x30] sm:$0xff] }
  0x12   :  { %143 = vmatpush.msra.mxu0 %v85_v1  ;;  %3691 = vmatpush.msra.mxu1 %v85_v1  ;;  %v92_v8 = vld [vmem:[%s8424_s1 + $0x38] sm:$0xff]  ;;  %v384_v9 = vld [vmem:[#allocation3 + $0x1e0] sm:$0xff]  ;;  %v86_v10 = vld [vmem:[%s8424_s1 + $0x8] sm:$0xff] }
  0x13   :  { %3692 = vmatpush.msra.mxu2 %v85_v1  ;;  %3693 = vmatpush.msra.mxu3 %v85_v1  ;;  %v87_v11 = vld [vmem:[%s8424_s1 + $0x10] sm:$0xff]  ;;  %v88_v12 = vld [vmem:[%s8424_s1 + $0x18] sm:$0xff]  ;;  %v4781_v13 = vld [vmem:[#allocation3 + $0x1e8] sm:$0xff] }
  0x14   :  { %3608 = vmatmul.msk.f32.vlgmr.msra.gmra.mxu0 %vm103_vm0, %v77_v2  ;;  %3613 = vmatmul.msk.f32.vlgmr.msra.gmra.mxu1 %vm103_vm0, %v4744_v3  ;;  %v380_v14 = vld [vmem:[#allocation3 + $0x1c0] sm:$0xff]  ;;  %v4783_v15 = vld [vmem:[#allocation3 + $0x1f8] sm:$0xff]  ;;  %v4785_v16 = vld [vmem:[#allocation3 + $0x1c8] sm:$0xff] }
  0x15   :  { %3614 = vmatmul.msk.f32.vlgmr.msra.gmra.mxu2 %vm103_vm0, %v4749_v4  ;;  %3615 = vmatmul.msk.f32.vlgmr.msra.gmra.mxu3 %vm103_vm0, %v4754_v5  ;;  %v386_v17 = vld [vmem:[#allocation3 + $0x1f0] sm:$0xff]  ;;  %v78_v18 = vld [vmem:[%s8423_s0 + $0x8] sm:$0xff]  ;;  %v376_v19 = vld [vmem:[#allocation3 + $0x1a0] sm:$0xff] }
  0x16   :  { %183 = vmatpush.msrb.mxu1 %v90_v6  ;;  %224 = vmatpush.msrb.mxu2 %v91_v7  ;;  %v4793_v20 = vld [vmem:[#allocation3 + $0x1a8] sm:$0xff]  ;;  %v4797_v21 = vld [vmem:[#allocation3 + $0x1d8] sm:$0xff]  ;;  %v382_v22 = vld [vmem:[#allocation3 + $0x1d0] sm:$0xff] }
  0x17   :  { %265 = vmatpush.msrb.mxu3 %v92_v8  ;;  %524 = vmatpush.msrb.mxu0 %v384_v9  ;;  %v372_v23 = vld [vmem:[#allocation3 + $0x180] sm:$0xff]  ;;  %v4801_v24 = vld [vmem:[#allocation3 + $0x188] sm:$0xff]  ;;  %v4804_v25 = vld [vmem:[#allocation3 + $0x1b8] sm:$0xff] }
  0x18   :  { %184 = vmatpush.msrb.mxu1 %v86_v10  ;;  %225 = vmatpush.msrb.mxu2 %v87_v11  ;;  %v378_v26 = vld [vmem:[#allocation3 + $0x1b0] sm:$0xff]  ;;  %v368_v27 = vld [vmem:[#allocation3 + $0x160] sm:$0xff]  ;;  %v4807_v28 = vld [vmem:[#allocation3 + $0x168] sm:$0xff] }
  0x19   :  { %266 = vmatpush.msrb.mxu3 %v88_v12  ;;  %525 = vmatpush.msrb.mxu0 %v380_v14  ;;  %v4810_v29 = vld [vmem:[#allocation3 + $0x198] sm:$0xff]  ;;  %v374_v30 = vld [vmem:[#allocation3 + $0x190] sm:$0xff]  ;;  %v364_v32 = vld [vmem:[#allocation3 + $0x140] sm:$0xff]  ;;  %v8432_v14 = vmov 0.0  }
  0x1a   :  { %544 = vmatpush.msra.mxu1 %v4781_v13  ;;  %564 = vmatpush.msra.mxu2 %v386_v17  ;;  %v79_v31 = vld [vmem:[%s8423_s0 + $0x10] sm:$0xff]  ;;  %v4818_v33 = vld [vmem:[#allocation3 + $0x148] sm:$0xff]  ;;  %v4822_v34 = vld [vmem:[#allocation3 + $0x178] sm:$0xff] }
  0x1b   :  { %584 = vmatpush.msra.mxu3 %v4783_v15  ;;  %526 = vmatpush.msrb.mxu0 %v376_v19  ;;  %v370_v35 = vld [vmem:[#allocation3 + $0x170] sm:$0xff]  ;;  %v360_v36 = vld [vmem:[#allocation3 + $0x120] sm:$0xff]  ;;  %v4826_v37 = vld [vmem:[#allocation3 + $0x128] sm:$0xff] }
  0x1c   :  { %545 = vmatpush.msra.mxu1 %v4785_v16  ;;  %3609 = vmatmul.msk.f32.gmra.mxu0 %vm103_vm0, %v78_v18  ;;  %v4829_v38 = vld [vmem:[#allocation3 + $0x158] sm:$0xff]  ;;  %v366_v39 = vld [vmem:[#allocation3 + $0x150] sm:$0xff]  ;;  %v356_v40 = vld [vmem:[#allocation3 + $0x100] sm:$0xff] }
  0x1d   :  { %3616 = vmatmul.msk.f32.vlgmr.msrb.gmra.mxu1 %vm103_vm0, %v77_v2  ;;  %3624 = vmatmul.msk.f32.vlgmr.msrb.gmra.mxu2 %vm103_vm0, %v77_v2  ;;  %v4832_v41 = vld [vmem:[#allocation3 + $0x108] sm:$0xff]  ;;  %v4835_v42 = vld [vmem:[#allocation3 + $0x138] sm:$0xff]  ;;  %v362_v43 = vld [vmem:[#allocation3 + $0x130] sm:$0xff] }
  0x1e   :  { %3632 = vmatmul.msk.f32.vlgmr.msrb.gmra.mxu3 %vm103_vm0, %v77_v2  ;;  %546 = vmatpush.msra.mxu1 %v4793_v20  ;;  %v80_v44 = vld [vmem:[%s8423_s0 + $0x18] sm:$0xff]  ;;  %v352_v45 = vld [vmem:[#allocation3 + $0xe0] sm:$0xff]  ;;  %v4843_v46 = vld [vmem:[#allocation3 + $0xe8] sm:$0xff] }
  0x1f   :  { %585 = vmatpush.msra.mxu3 %v4797_v21  ;;  %565 = vmatpush.msra.mxu2 %v382_v22  ;;  %v4847_v47 = vld [vmem:[#allocation3 + $0x118] sm:$0xff]  ;;  %v358_v48 = vld [vmem:[#allocation3 + $0x110] sm:$0xff]  ;;  %v348_v49 = vld [vmem:[#allocation3 + $0xc0] sm:$0xff] }
  0x20   :  { %527 = vmatpush.msrb.mxu0 %v372_v23  ;;  %547 = vmatpush.msra.mxu1 %v4801_v24  ;;  %v4851_v50 = vld [vmem:[#allocation3 + $0xc8] sm:$0xff]  ;;  %v4854_v51 = vld [vmem:[#allocation3 + $0xf8] sm:$0xff]  ;;  %v354_v52 = vld [vmem:[#allocation3 + $0xf0] sm:$0xff] }
  0x21   :  { %586 = vmatpush.msra.mxu3 %v4804_v25  ;;  %566 = vmatpush.msra.mxu2 %v378_v26  ;;  %v344_v53 = vld [vmem:[#allocation3 + $0xa0] sm:$0xff]  ;;  %v4857_v54 = vld [vmem:[#allocation3 + $0xa8] sm:$0xff]  ;;  %v4860_v55 = vld [vmem:[#allocation3 + $0xd8] sm:$0xff] }
  0x22   :  { %528 = vmatpush.msrb.mxu0 %v368_v27  ;;  %548 = vmatpush.msra.mxu1 %v4807_v28  ;;  %v350_v56 = vld [vmem:[#allocation3 + $0xd0] sm:$0xff]  ;;  %v340_v57 = vld [vmem:[#allocation3 + $0x80] sm:$0xff]  ;;  %v4869_v60 = vld [vmem:[#allocation3 + $0x88] sm:$0xff] }
  0x23   :  { %587 = vmatpush.msra.mxu3 %v4810_v29  ;;  %567 = vmatpush.msra.mxu2 %v374_v30  ;;  %v81_v58 = vld [vmem:[%s8423_s0 + $0x20] sm:$0xff]  ;;  %v4871_v61 = vld [vmem:[#allocation3 + $0xb8] sm:$0xff]  ;;  %v346_v63 = vld [vmem:[#allocation3 + $0xb0] sm:$0xff] }
  0x24   :  { %3610 = vmatmul.msk.f32.gmra.mxu0 %vm103_vm0, %v79_v31  ;;  %549 = vmatpush.msra.mxu1 %v4818_v33  ;;  %v336_v59 = vld [vmem:[#allocation3 + $0x60] sm:$0xff]  ;;  %v4876_v0 = vld [vmem:[#allocation3 + $0x68] sm:$0xff]  ;;  %v4878_v1 = vld [vmem:[#allocation3 + $0x98] sm:$0xff] }
  0x25   :  { %3617 = vmatmul.msk.f32.gmra.mxu1 %vm103_vm0, %v78_v18  ;;  %3625 = vmatmul.msk.f32.gmra.mxu2 %vm103_vm0, %v78_v18  ;;  %v332_v62 = vld [vmem:[#allocation3 + $0x40] sm:$0xff]  ;;  %v342_v6 = vld [vmem:[#allocation3 + $0x90] sm:$0xff]  ;;  %v4882_v7 = vld [vmem:[#allocation3 + $0x48] sm:$0xff] }
  0x26   :  { %3633 = vmatmul.msk.f32.gmra.mxu3 %vm103_vm0, %v78_v18  ;;  %529 = vmatpush.msrb.mxu0 %v364_v32  ;;  %v328_v2 = vld [vmem:[#allocation3 + $0x20] sm:$0xff]  ;;  %v4884_v8 = vld [vmem:[#allocation3 + $0x78] sm:$0xff]  ;;  %v4890_v10 = vld [vmem:[#allocation3 + $0x28] sm:$0xff] }
  0x27   :  { %588 = vmatpush.msra.mxu3 %v4822_v34  ;;  %568 = vmatpush.msra.mxu2 %v370_v35  ;;  %v324_v9 = vld [vmem:[#allocation3] sm:$0xff]  ;;  %v338_v11 = vld [vmem:[#allocation3 + $0x70] sm:$0xff]  ;;  %v4893_v12 = vld [vmem:[#allocation3 + $0x58] sm:$0xff] }
  0x28   :  { %530 = vmatpush.msrb.mxu0 %v360_v36  ;;  %550 = vmatpush.msra.mxu1 %v4826_v37  ;;  %v4897_v17 = vld [vmem:[#allocation3 + $0x8] sm:$0xff]  ;;  %v334_v18 = vld [vmem:[#allocation3 + $0x50] sm:$0xff]  ;;  %v4901_v19 = vld [vmem:[#allocation3 + $0x38] sm:$0xff] }
  0x29   :  { %589 = vmatpush.msra.mxu3 %v4829_v38  ;;  %569 = vmatpush.msra.mxu2 %v366_v39  ;;  %v330_v22 = vld [vmem:[#allocation3 + $0x30] sm:$0xff]  ;;  %v4905_v23 = vld [vmem:[#allocation3 + $0x18] sm:$0xff]  ;;  %v4935_v27 = vld [vmem:[#allocation6 + $0x3e8] sm:$0xff] }
  0x2a   :  { %531 = vmatpush.msrb.mxu0 %v356_v40  ;;  %551 = vmatpush.msra.mxu1 %v4832_v41  ;;  %v4908_v26 = vld [vmem:[#allocation3 + $0x10] sm:$0xff]  ;;  %v4941_v30 = vld [vmem:[#allocation6 + $0x3c8] sm:$0xff]  ;;  %v4949_v32 = vld [vmem:[#allocation6 + $0x380] sm:$0xff] }
  0x2b   :  { %590 = vmatpush.msra.mxu3 %v4835_v42  ;;  %570 = vmatpush.msra.mxu2 %v362_v43  ;;  %8931 = vst [vmem:[#allocation13_spill] sm:$0xff] %v4908_v26  ;;  %v4951_v35 = vld [vmem:[#allocation6 + $0x388] sm:$0xff]  ;;  %v4961_v40 = vld [vmem:[#allocation6 + $0x360] sm:$0xff] }
  0x2c   :  { %3611 = vmatmul.msk.f32.gmra.mxu0 %vm103_vm0, %v80_v44  ;;  %552 = vmatpush.msra.mxu1 %v4843_v46  ;;  %v4963_v43 = vld [vmem:[#allocation6 + $0x368] sm:$0xff] }
  0x2d   :  { %3618 = vmatmul.msk.f32.gmra.mxu1 %vm103_vm0, %v79_v31  ;;  %3626 = vmatmul.msk.f32.gmra.mxu2 %vm103_vm0, %v79_v31 }
  0x2e   :  { %3634 = vmatmul.msk.f32.gmra.mxu3 %vm103_vm0, %v79_v31  ;;  %532 = vmatpush.msrb.mxu0 %v352_v45  ;;  %v4943_v31 = vld [vmem:[#allocation6 + $0x3a0] sm:$0xff]  ;;  %v4969_v45 = vld [vmem:[#allocation6 + $0x348] sm:$0xff] }
  0x2f   :  { %591 = vmatpush.msra.mxu3 %v4847_v47  ;;  %571 = vmatpush.msra.mxu2 %v358_v48  ;;  %v4971_v48 = vld [vmem:[#allocation6 + $0x320] sm:$0xff] }
  0x30   :  { %533 = vmatpush.msrb.mxu0 %v348_v49  ;;  %553 = vmatpush.msra.mxu1 %v4851_v50  ;;  %v4975_v49 = vld [vmem:[#allocation6 + $0x328] sm:$0xff] }
  0x31   :  { %592 = vmatpush.msra.mxu3 %v4854_v51  ;;  %572 = vmatpush.msra.mxu2 %v354_v52  ;;  %v4977_v52 = vld [vmem:[#allocation6 + $0x300] sm:$0xff] }
  0x32   :  { %534 = vmatpush.msrb.mxu0 %v344_v53  ;;  %554 = vmatpush.msra.mxu1 %v4857_v54  ;;  %v4979_v53 = vld [vmem:[#allocation6 + $0x308] sm:$0xff] }
  0x33   :  { %593 = vmatpush.msra.mxu3 %v4860_v55  ;;  %573 = vmatpush.msra.mxu2 %v350_v56 }
  0x34   :  { %535 = vmatpush.msrb.mxu0 %v340_v57  ;;  %555 = vmatpush.msra.mxu1 %v4869_v60 }
  0x35   :  { %3619 = vmatmul.msk.f32.gmra.mxu1 %vm103_vm0, %v80_v44  ;;  %3612 = vmatmul.msk.f32.gmra.mxu0 %vm103_vm0, %v81_v58 }
  0x36   :  { %3627 = vmatmul.msk.f32.gmra.mxu2 %vm103_vm0, %v80_v44  ;;  %3635 = vmatmul.msk.f32.gmra.mxu3 %vm103_vm0, %v80_v44  ;;  %v4967_v44 = vld [vmem:[#allocation6 + $0x340] sm:$0xff] }
  0x37   :  { %536 = vmatpush.msrb.mxu0 %v336_v59  ;;  %594 = vmatpush.msra.mxu3 %v4871_v61  ;;  %v4991_v59 = vld [vmem:[#allocation6 + $0x2e0] sm:$0xff] }
  0x38   :  { %574 = vmatpush.msra.mxu2 %v346_v63  ;;  %556 = vmatpush.msra.mxu1 %v4876_v0  ;;  %8935 = vst [vmem:[#allocation17_spill] sm:$0xff] %v4991_v59 }
  0x39   :  { %537 = vmatpush.msrb.mxu0 %v332_v62  ;;  %595 = vmatpush.msra.mxu3 %v4878_v1  ;;  %v4993_v62 = vld [vmem:[#allocation6 + $0x2e8] sm:$0xff] }
  0x3a   :  { %575 = vmatpush.msra.mxu2 %v342_v6  ;;  %557 = vmatpush.msra.mxu1 %v4882_v7  ;;  %8936 = vst [vmem:[#allocation18_spill] sm:$0xff] %v4993_v62  ;;  %v5001_v6 = vld [vmem:[#allocation6 + $0x2c8] sm:$0xff] }
  0x3b   :  { %538 = vmatpush.msrb.mxu0 %v328_v2  ;;  %596 = vmatpush.msra.mxu3 %v4884_v8  ;;  %v4999_v2 = vld [vmem:[#allocation6 + $0x2c0] sm:$0xff]  ;;  %8939 = vst [vmem:[#allocation21_spill] sm:$0xff] %v5001_v6 }
  0x3c   :  { %558 = vmatpush.msra.mxu1 %v4890_v10  ;;  %576 = vmatpush.msra.mxu2 %v338_v11  ;;  %8938 = vst [vmem:[#allocation20_spill] sm:$0xff] %v4999_v2  ;;  %v5007_v11 = vld [vmem:[#allocation6 + $0x2a8] sm:$0xff] }
  0x3d   :  { %539 = vmatpush.msrb.mxu0 %v324_v9  ;;  %3620 = vmatmul.msk.f32.gmra.mxu1 %vm103_vm0, %v81_v58  ;;  %v5005_v9 = vld [vmem:[#allocation6 + $0x2a0] sm:$0xff]  ;;  %8941 = vst [vmem:[#allocation23_spill] sm:$0xff] %v5007_v11 }
  0x3e   :  { %3628 = vmatmul.msk.f32.gmra.mxu2 %vm103_vm0, %v81_v58  ;;  %540 = vmatmul.f32.vlgmr.msrb.gmra.mxu0 %v8432_v14  ;;  %8940 = vst [vmem:[#allocation22_spill] sm:$0xff] %v5005_v9 }
  0x3f   :  { %3636 = vmatmul.msk.f32.gmra.mxu3 %vm103_vm0, %v81_v58  ;;  %559 = vmatpush.msra.mxu1 %v4897_v17 }
  0x40   :  { %597 = vmatpush.msra.mxu3 %v4893_v12  ;;  %577 = vmatpush.msra.mxu2 %v334_v18  ;;  %v5011_v18 = vld [vmem:[#allocation6 + $0x280] sm:$0xff] }
  0x41   :  { %8942 = vst [vmem:[#allocation24_spill] sm:$0xff] %v5011_v18 }
  0x42   :  { %598 = vmatpush.msra.mxu3 %v4901_v19  ;;  %578 = vmatpush.msra.mxu2 %v330_v22  ;;  %v5013_v22 = vld [vmem:[#allocation6 + $0x288] sm:$0xff] }
  0x43   :  { %8943 = vst [vmem:[#allocation25_spill] sm:$0xff] %v5013_v22 }
  0x44   :  { %599 = vmatpush.msra.mxu3 %v4905_v23  ;;  %579 = vmatpush.msra.mxu2 %v4908_v26  ;;  %v5029_v26 = vld [vmem:[#allocation6 + $0x240] sm:$0xff] }
  0x45   :  { %3621 = vmatmul.msk.f32.gmra.mxu1 %vm103_vm0, %v4744_v3  ;;  %8947 = vst [vmem:[#allocation29_spill] sm:$0xff] %v5029_v26 }
  0x46   :  { %3629 = vmatmul.msk.f32.gmra.mxu2 %vm103_vm0, %v4744_v3  ;;  %740 = vmatpush.msrb.mxu3 %v4935_v27 }
  0x47   :  { %3637 = vmatmul.msk.f32.gmra.mxu3 %vm103_vm0, %v4744_v3  ;;  %v4933_v3 = vld [vmem:[#allocation6 + $0x3e0] sm:$0xff] }
  0x48   :  { %700 = vmatpush.msrb.mxu1 %v4933_v3  ;;  %741 = vmatpush.msrb.mxu3 %v4941_v30 }
  0x4d   :  { %3622 = vmatmul.msk.f32.gmra.mxu1 %vm103_vm0, %v4749_v4 }
  0x4e   :  { %3630 = vmatmul.msk.f32.gmra.mxu2 %vm103_vm0, %v4749_v4 }
  0x4f   :  { %3638 = vmatmul.msk.f32.gmra.mxu3 %vm103_vm0, %v4749_v4  ;;  %v4939_v4 = vld [vmem:[#allocation6 + $0x3c0] sm:$0xff] }
  0x50   :  { %701 = vmatpush.msrb.mxu1 %v4939_v4 }
  0x52   :  { %702 = vmatpush.msrb.mxu1 %v4943_v31 }
  0x54   :  { %703 = vmatpush.msrb.mxu1 %v4949_v32 }
  0x55   :  { %3623 = vmatmul.msk.f32.gmra.mxu1 %vm103_vm0, %v4754_v5 }
  0x56   :  { %3631 = vmatmul.msk.f32.gmra.mxu2 %vm103_vm0, %v4754_v5  ;;  %704 = vmatpush.msrb.mxu1 %v4961_v40 }
  0x57   :  { %3639 = vmatmul.msk.f32.gmra.mxu3 %vm103_vm0, %v4754_v5  ;;  %v4945_v5 = vld [vmem:[#allocation6 + $0x3a8] sm:$0xff] }
  0x58   :  { %742 = vmatpush.msrb.mxu3 %v4945_v5  ;;  %705 = vmatpush.msrb.mxu1 %v4967_v44 }
  0x5a   :  { %743 = vmatpush.msrb.mxu3 %v4951_v35  ;;  %706 = vmatpush.msrb.mxu1 %v4971_v48 }
  0x5c   :  { %744 = vmatpush.msrb.mxu3 %v4963_v43  ;;  %707 = vmatpush.msrb.mxu1 %v4977_v52 }
  0x5d   :  { %560 = vmatmul.f32.vlgmr.msra.gmra.mxu1 %v8432_v14 }
  0x5e   :  { %580 = vmatmul.f32.vlgmr.msra.gmra.mxu2 %v8432_v14  ;;  %745 = vmatpush.msrb.mxu3 %v4969_v45 }
  0x5f   :  { %600 = vmatmul.f32.vlgmr.msra.gmra.mxu3 %v8432_v14  ;;  %708 = vmatpush.msrb.mxu1 %v4991_v59 }
  0x60   :  { %746 = vmatpush.msrb.mxu3 %v4975_v49 }
  0x61   :  { %709 = vmatpush.msrb.mxu1 %v4999_v2 }
  0x62   :  { %747 = vmatpush.msrb.mxu3 %v4979_v53 }
  0x63   :  { %710 = vmatpush.msrb.mxu1 %v5005_v9 }
  0x64   :  { %748 = vmatpush.msrb.mxu3 %v4993_v62  ;;  %v5167_v62 = vld [vmem:[#allocation6 + $0x2f0] sm:$0xff] }
  0x65   :  { %711 = vmatpush.msrb.mxu1 %v5011_v18  ;;  %8997 = vst [vmem:[#allocation79_spill] sm:$0xff] %v5167_v62 }
  0x66   :  { %749 = vmatpush.msrb.mxu3 %v5001_v6 }
  0x68   :  { %750 = vmatpush.msrb.mxu3 %v5007_v11  ;;  %v5031_v11 = vld [vmem:[#allocation6 + $0x248] sm:$0xff] }
  0x69   :  { %8948 = vst [vmem:[#allocation30_spill] sm:$0xff] %v5031_v11 }
  0x6a   :  { %751 = vmatpush.msrb.mxu3 %v5013_v22  ;;  %v5037_v22 = vld [vmem:[#allocation6 + $0x220] sm:$0xff] }
  0x6b   :  { %8950 = vst [vmem:[#allocation32_spill] sm:$0xff] %v5037_v22 }
  0x91   :  { %v4957_v36 = vpop.f32.mrf.mxu0  ;;  %v4959_v39 = vpop.f32.mrf.mxu1 }
  0x92   :  { %8932 = vst [vmem:[#allocation14_spill] sm:$0xff] %v4959_v39  ;;  %v5023_v39 = vld [vmem:[#allocation6 + $0x260] sm:$0xff] }
  0x93   :  { %8945 = vst [vmem:[#allocation27_spill] sm:$0xff] %v5023_v39  ;;  %712 = vmatpush.msrb.mxu1 %v5023_v39  ;;  %v5043_v39 = vld [vmem:[#allocation6 + $0x200] sm:$0xff] }
  0x94   :  { %8952 = vst [vmem:[#allocation34_spill] sm:$0xff] %v5043_v39 }
  0x95   :  { %713 = vmatpush.msrb.mxu1 %v5029_v26  ;;  %v5057_v26 = vld [vmem:[#allocation6 + $0x3f0] sm:$0xff] }
  0x96   :  { %8958 = vst [vmem:[#allocation40_spill] sm:$0xff] %v5057_v26 }
  0x97   :  { %714 = vmatpush.msrb.mxu1 %v5037_v22 }
  0x98   :  { %v4983_v56 = vpop.f32.mrf.mxu2  ;;  %v4985_v57 = vpop.f32.mrf.mxu3 }
  0x99   :  { %8933 = vst [vmem:[#allocation15_spill] sm:$0xff] %v4983_v56  ;;  %v4995_v63 = vpop.f32.mrf.mxu0  ;;  %715 = vmatpush.msrb.mxu1 %v5043_v39 }
  0x9a   :  { %8934 = vst [vmem:[#allocation16_spill] sm:$0xff] %v4985_v57  ;;  %v4989_v58 = vpop.f32.mrf.mxu1 }
  0x9b   :  { %8937 = vst [vmem:[#allocation19_spill] sm:$0xff] %v4995_v63  ;;  %v5025_v63 = vld [vmem:[#allocation6 + $0x268] sm:$0xff]  ;;  %780 = vmatpush.msra.mxu1 %v5057_v26  ;;  %v5087_v26 = vld [vmem:[#allocation6 + $0x3b8] sm:$0xff] }
  0x9c   :  { %8946 = vst [vmem:[#allocation28_spill] sm:$0xff] %v5025_v63  ;;  %752 = vmatpush.msrb.mxu3 %v5025_v63  ;;  %v5045_v63 = vld [vmem:[#allocation6 + $0x208] sm:$0xff] }
  0x9d   :  { %8953 = vst [vmem:[#allocation35_spill] sm:$0xff] %v5045_v63 }
  0x9e   :  { %753 = vmatpush.msrb.mxu3 %v5031_v11  ;;  %v5055_v11 = vld [vmem:[#allocation6 + $0x1e8] sm:$0xff]  ;;  %8968 = vst [vmem:[#allocation50_spill] sm:$0xff] %v5087_v26 }
  0x9f   :  { %8957 = vst [vmem:[#allocation39_spill] sm:$0xff] %v5055_v11  ;;  %720 = vmatpush.msrb.mxu2 %v5055_v11  ;;  %v5079_v11 = vld [vmem:[#allocation6 + $0x1a0] sm:$0xff] }
  0xa0   :  { %v5015_v14 = vpop.f32.mrf.mxu2  ;;  %8965 = vst [vmem:[#allocation47_spill] sm:$0xff] %v5079_v11 }
  0xa1   :  { %v5017_v57 = vpop.f32.mrf.mxu3  ;;  %v5033_v9 = vpop.f32.mrf.mxu0 }
  0xa2   :  { %v5021_v56 = vpop.f32.mrf.mxu1  ;;  %8949 = vst [vmem:[#allocation31_spill] sm:$0xff] %v5033_v9  ;;  %v5053_v9 = vld [vmem:[#allocation6 + $0x1e0] sm:$0xff] }
  0xa3   :  { %8944 = vst [vmem:[#allocation26_spill] sm:$0xff] %v5021_v56  ;;  %v5039_v56 = vld [vmem:[#allocation6 + $0x228] sm:$0xff]  ;;  %680 = vmatpush.msra.mxu0 %v5053_v9 }
  0xa4   :  { %8951 = vst [vmem:[#allocation33_spill] sm:$0xff] %v5039_v56  ;;  %754 = vmatpush.msrb.mxu3 %v5039_v56  ;;  %v5063_v56 = vld [vmem:[#allocation6 + $0x3f8] sm:$0xff] }
  0xa5   :  { %8956 = vst [vmem:[#allocation38_spill] sm:$0xff] %v5053_v9  ;;  %v5081_v9 = vld [vmem:[#allocation6 + $0x1a8] sm:$0xff] }
  0xa6   :  { %755 = vmatpush.msrb.mxu3 %v5045_v63  ;;  %8960 = vst [vmem:[#allocation42_spill] sm:$0xff] %v5063_v56  ;;  %v5071_v63 = vld [vmem:[#allocation6 + $0x3d0] sm:$0xff] }
  0xa7   :  { %8963 = vst [vmem:[#allocation45_spill] sm:$0xff] %v5071_v63  ;;  %781 = vmatpush.msra.mxu1 %v5071_v63  ;;  %v5097_v63 = vld [vmem:[#allocation6 + $0x390] sm:$0xff] }
  0xa8   :  { %v5047_v18 = vpop.f32.mrf.mxu2  ;;  %820 = vmatpush.msra.mxu3 %v5063_v56  ;;  %8966 = vst [vmem:[#allocation48_spill] sm:$0xff] %v5081_v9  ;;  %v5083_v56 = vld [vmem:[#allocation6 + $0x3b0] sm:$0xff] }
  0xa9   :  { %8954 = vst [vmem:[#allocation36_spill] sm:$0xff] %v5047_v18  ;;  %v5049_v6 = vpop.f32.mrf.mxu3  ;;  %v5067_v18 = vld [vmem:[#allocation6 + $0x1c0] sm:$0xff]  ;;  %782 = vmatpush.msra.mxu1 %v5083_v56 }
  0xaa   :  { %8955 = vst [vmem:[#allocation37_spill] sm:$0xff] %v5049_v6  ;;  %v5059_v22 = vpop.f32.mrf.mxu1  ;;  %v5069_v6 = vld [vmem:[#allocation6 + $0x1c8] sm:$0xff]  ;;  %681 = vmatpush.msra.mxu0 %v5067_v18 }
  0xab   :  { %8959 = vst [vmem:[#allocation41_spill] sm:$0xff] %v5059_v22  ;;  %721 = vmatpush.msrb.mxu2 %v5069_v6  ;;  %v5075_v22 = vld [vmem:[#allocation6 + $0x3d8] sm:$0xff]  ;;  %783 = vmatpush.msra.mxu1 %v5097_v63 }
  0xac   :  { %8961 = vst [vmem:[#allocation43_spill] sm:$0xff] %v5067_v18  ;;  %821 = vmatpush.msra.mxu3 %v5075_v22  ;;  %682 = vmatpush.msra.mxu0 %v5079_v11  ;;  %v5089_v18 = vpop.f32.mrf.mxu0  ;;  %v5101_v11 = vld [vmem:[#allocation6 + $0x398] sm:$0xff] }
  0xad   :  { %8962 = vst [vmem:[#allocation44_spill] sm:$0xff] %v5069_v6  ;;  %722 = vmatpush.msrb.mxu2 %v5081_v9  ;;  %v5093_v6 = vld [vmem:[#allocation6 + $0x180] sm:$0xff] }
  0xae   :  { %8964 = vst [vmem:[#allocation46_spill] sm:$0xff] %v5075_v22  ;;  %822 = vmatpush.msra.mxu3 %v5087_v26  ;;  %v5095_v22 = vld [vmem:[#allocation6 + $0x188] sm:$0xff]  ;;  %683 = vmatpush.msra.mxu0 %v5093_v6 }
  0xaf   :  { %8967 = vst [vmem:[#allocation49_spill] sm:$0xff] %v5083_v56  ;;  %723 = vmatpush.msrb.mxu2 %v5095_v22  ;;  %v5111_v26 = vld [vmem:[#allocation6 + $0x168] sm:$0xff]  ;;  %v5113_v56 = vld [vmem:[#allocation6 + $0x370] sm:$0xff] }
  0xb0   :  { %8969 = vst [vmem:[#allocation51_spill] sm:$0xff] %v5089_v18  ;;  %v5103_v9 = vpop.f32.mrf.mxu2  ;;  %823 = vmatpush.msra.mxu3 %v5101_v11  ;;  %v5109_v18 = vld [vmem:[#allocation6 + $0x160] sm:$0xff]  ;;  %784 = vmatpush.msra.mxu1 %v5113_v56 }
  0xb1   :  { %8970 = vst [vmem:[#allocation52_spill] sm:$0xff] %v5093_v6  ;;  %v5105_v39 = vpop.f32.mrf.mxu3  ;;  %684 = vmatpush.msra.mxu0 %v5109_v18  ;;  %724 = vmatpush.msrb.mxu2 %v5111_v26  ;;  %v5127_v6 = vld [vmem:[#allocation6 + $0x350] sm:$0xff] }
  0xb2   :  { %8971 = vst [vmem:[#allocation53_spill] sm:$0xff] %v5095_v22  ;;  %v5115_v2 = vpop.f32.mrf.mxu1  ;;  %v5119_v22 = vld [vmem:[#allocation6 + $0x378] sm:$0xff]  ;;  %785 = vmatpush.msra.mxu1 %v5127_v6 }
  0xb3   :  { %8972 = vst [vmem:[#allocation54_spill] sm:$0xff] %v5097_v63  ;;  %824 = vmatpush.msra.mxu3 %v5119_v22  ;;  %v5151_v63 = vld [vmem:[#allocation6 + $0x318] sm:$0xff] }
  0xb4   :  { %8973 = vst [vmem:[#allocation55_spill] sm:$0xff] %v5101_v11  ;;  %v5143_v11 = vld [vmem:[#allocation6 + $0x100] sm:$0xff] }
  0xb5   :  { %8974 = vst [vmem:[#allocation56_spill] sm:$0xff] %v5103_v9  ;;  %v5123_v9 = vld [vmem:[#allocation6 + $0x140] sm:$0xff] }
  0xb6   :  { %8975 = vst [vmem:[#allocation57_spill] sm:$0xff] %v5105_v39  ;;  %v5125_v39 = vld [vmem:[#allocation6 + $0x148] sm:$0xff]  ;;  %685 = vmatpush.msra.mxu0 %v5123_v9 }
  0xb7   :  { %8976 = vst [vmem:[#allocation58_spill] sm:$0xff] %v5109_v18  ;;  %725 = vmatpush.msrb.mxu2 %v5125_v39  ;;  %v5133_v18 = vld [vmem:[#allocation6 + $0x120] sm:$0xff] }
  0xb8   :  { %8977 = vst [vmem:[#allocation59_spill] sm:$0xff] %v5111_v26  ;;  %v5135_v26 = vld [vmem:[#allocation6 + $0x128] sm:$0xff]  ;;  %686 = vmatpush.msra.mxu0 %v5133_v18 }
  0xb9   :  { %8978 = vst [vmem:[#allocation60_spill] sm:$0xff] %v5113_v56  ;;  %v5141_v56 = vld [vmem:[#allocation6 + $0x338] sm:$0xff]  ;;  %726 = vmatpush.msrb.mxu2 %v5135_v26 }
  0xba   :  { %8979 = vst [vmem:[#allocation61_spill] sm:$0xff] %v5115_v2  ;;  %v5131_v2 = vld [vmem:[#allocation6 + $0x358] sm:$0xff]  ;;  %687 = vmatpush.msra.mxu0 %v5143_v11 }
  0xbb   :  { %8980 = vst [vmem:[#allocation62_spill] sm:$0xff] %v5119_v22  ;;  %825 = vmatpush.msra.mxu3 %v5131_v2  ;;  %v5139_v22 = vld [vmem:[#allocation6 + $0x330] sm:$0xff] }
  0xbc   :  { %8981 = vst [vmem:[#allocation63_spill] sm:$0xff] %v5123_v9  ;;  %v5149_v9 = vld [vmem:[#allocation6 + $0x310] sm:$0xff]  ;;  %786 = vmatpush.msra.mxu1 %v5139_v22 }
  0xbd   :  { %8982 = vst [vmem:[#allocation64_spill] sm:$0xff] %v5125_v39  ;;  %v5147_v39 = vld [vmem:[#allocation6 + $0x108] sm:$0xff]  ;;  %826 = vmatpush.msra.mxu3 %v5141_v56 }
  0xbe   :  { %8983 = vst [vmem:[#allocation65_spill] sm:$0xff] %v5127_v6  ;;  %727 = vmatpush.msrb.mxu2 %v5147_v39  ;;  %v5159_v6 = vpop.f32.mrf.mxu2  ;;  %787 = vmatpush.msra.mxu1 %v5149_v9 }
  0xbf   :  { %8984 = vst [vmem:[#allocation66_spill] sm:$0xff] %v5131_v2  ;;  %v5157_v2 = vpop.f32.mrf.mxu0  ;;  %827 = vmatpush.msra.mxu3 %v5151_v63 }
  0xc0   :  { %8985 = vst [vmem:[#allocation67_spill] sm:$0xff] %v5133_v18  ;;  %v5165_v18 = vld [vmem:[#allocation6 + $0xe8] sm:$0xff]  ;;  %788 = vmatpush.msra.mxu1 %v5167_v62  ;;  %v5226_v62 = vld [vmem:[#allocation6 + $0x270] sm:$0xff] }
  0xc1   :  { %8986 = vst [vmem:[#allocation68_spill] sm:$0xff] %v5135_v26  ;;  %v5163_v26 = vld [vmem:[#allocation6 + $0xe0] sm:$0xff]  ;;  %728 = vmatpush.msrb.mxu2 %v5165_v18 }
  0xc2   :  { %8987 = vst [vmem:[#allocation69_spill] sm:$0xff] %v5139_v22  ;;  %v5169_v22 = vpop.f32.mrf.mxu3  ;;  %688 = vmatpush.msra.mxu0 %v5163_v26 }
  0xc3   :  { %8988 = vst [vmem:[#allocation70_spill] sm:$0xff] %v5141_v56  ;;  %v5171_v56 = vpop.f32.mrf.mxu1 }
  0xc4   :  { %8989 = vst [vmem:[#allocation71_spill] sm:$0xff] %v5143_v11  ;;  %v5183_v11 = vld [vmem:[#allocation6 + $0x2d0] sm:$0xff] }
  0xc5   :  { %8990 = vst [vmem:[#allocation72_spill] sm:$0xff] %v5147_v39  ;;  %v5181_v39 = vld [vmem:[#allocation6 + $0xc8] sm:$0xff]  ;;  %789 = vmatpush.msra.mxu1 %v5183_v11 }
  0xc6   :  { %8991 = vst [vmem:[#allocation73_spill] sm:$0xff] %v5149_v9  ;;  %729 = vmatpush.msrb.mxu2 %v5181_v39 }
  0xc7   :  { %8992 = vst [vmem:[#allocation74_spill] sm:$0xff] %v5151_v63 }
  0xc8   :  { %8993 = vst [vmem:[#allocation75_spill] sm:$0xff] %v5157_v2  ;;  %v5175_v2 = vld [vmem:[#allocation6 + $0x2f8] sm:$0xff] }
  0xc9   :  { %8994 = vst [vmem:[#allocation76_spill] sm:$0xff] %v5159_v6  ;;  %828 = vmatpush.msra.mxu3 %v5175_v2  ;;  %v5179_v6 = vld [vmem:[#allocation6 + $0xc0] sm:$0xff] }
  0xca   :  { %8995 = vst [vmem:[#allocation77_spill] sm:$0xff] %v5163_v26  ;;  %689 = vmatpush.msra.mxu0 %v5179_v6  ;;  %v5195_v26 = vld [vmem:[#allocation6 + $0x2b0] sm:$0xff]  ;;  %v5228_v63 = vpop.f32.mrf.mxu3 }
  0xcb   :  { %8996 = vst [vmem:[#allocation78_spill] sm:$0xff] %v5165_v18  ;;  %v5193_v18 = vld [vmem:[#allocation6 + $0xa8] sm:$0xff]  ;;  %790 = vmatpush.msra.mxu1 %v5195_v26  ;;  %v5230_v9 = vpop.f32.mrf.mxu1 }
  0xcc   :  { %8998 = vst [vmem:[#allocation80_spill] sm:$0xff] %v5169_v22  ;;  %v5191_v22 = vld [vmem:[#allocation6 + $0xa0] sm:$0xff]  ;;  %730 = vmatpush.msrb.mxu2 %v5193_v18 }
  0xcd   :  { %8999 = vst [vmem:[#allocation81_spill] sm:$0xff] %v5171_v56  ;;  %v5187_v56 = vld [vmem:[#allocation6 + $0x2d8] sm:$0xff]  ;;  %690 = vmatpush.msra.mxu0 %v5191_v22 }
  0xce   :  { %9000 = vst [vmem:[#allocation82_spill] sm:$0xff] %v5175_v2  ;;  %829 = vmatpush.msra.mxu3 %v5187_v56  ;;  %v5199_v2 = vld [vmem:[#allocation6 + $0x2b8] sm:$0xff] }
  0xcf   :  { %9001 = vst [vmem:[#allocation83_spill] sm:$0xff] %v5179_v6  ;;  %v5205_v6 = vld [vmem:[#allocation6 + $0x88] sm:$0xff] }
  0xd0   :  { %9002 = vst [vmem:[#allocation84_spill] sm:$0xff] %v5181_v39  ;;  %830 = vmatpush.msra.mxu3 %v5199_v2  ;;  %v5203_v39 = vld [vmem:[#allocation6 + $0x80] sm:$0xff]  ;;  %731 = vmatpush.msrb.mxu2 %v5205_v6 }
  0xd1   :  { %9003 = vst [vmem:[#allocation85_spill] sm:$0xff] %v5183_v11  ;;  %v5212_v11 = vld [vmem:[%s8425_s2] sm:$0xf]  ;;  %691 = vmatpush.msra.mxu0 %v5203_v39 }
  0xd2   :  { %9004 = vst [vmem:[#allocation86_spill] sm:$0xff] %v5187_v56  ;;  %v5207_v56 = vld [vmem:[#allocation6 + $0x290] sm:$0xff] }
  0xd3   :  { %9005 = vst [vmem:[#allocation87_spill] sm:$0xff] %v5191_v22  ;;  %v5218_v22 = vpop.f32.mrf.mxu2  ;;  %791 = vmatpush.msra.mxu1 %v5207_v56 }
  0xd4   :  { %9006 = vst [vmem:[#allocation88_spill] sm:$0xff] %v5193_v18  ;;  %v5216_v18 = vld [vmem:[#allocation6 + $0x298] sm:$0xff] }
  0xd5   :  { %9007 = vst [vmem:[#allocation89_spill] sm:$0xff] %v5195_v26  ;;  %831 = vmatpush.msra.mxu3 %v5216_v18  ;;  %v5224_v26 = vld [vmem:[#allocation6 + $0x68] sm:$0xff]  ;;  %792 = vmatpush.msra.mxu1 %v5226_v62 }
  0xd6   :  { %9008 = vst [vmem:[#allocation90_spill] sm:$0xff] %v5199_v2  ;;  %v5222_v2 = vld [vmem:[#allocation6 + $0x60] sm:$0xff]  ;;  %732 = vmatpush.msrb.mxu2 %v5224_v26 }
  0xd7   :  { %9009 = vst [vmem:[#allocation91_spill] sm:$0xff] %v5203_v39  ;;  %692 = vmatpush.msra.mxu0 %v5222_v2  ;;  %v5241_v39 = vld [vmem:[#allocation6 + $0x40] sm:$0xff] }
  0xd8   :  { %9010 = vst [vmem:[#allocation92_spill] sm:$0xff] %v5205_v6  ;;  %v5234_v6 = vld [vmem:[#allocation6 + $0x278] sm:$0xff] }
  0xd9   :  { %9011 = vst [vmem:[#allocation93_spill] sm:$0xff] %v5207_v56  ;;  %832 = vmatpush.msra.mxu3 %v5234_v6  ;;  %693 = vmatpush.msra.mxu0 %v5241_v39  ;;  %v5259_v56 = vld [vmem:[#allocation6 + $0x230] sm:$0xff] }
  0xda   :  { %9012 = vst [vmem:[#allocation94_spill] sm:$0xff] %v5216_v18  ;;  %v5243_v18 = vld [vmem:[#allocation6 + $0x48] sm:$0xff] }
  0xdb   :  { %9013 = vst [vmem:[#allocation95_spill] sm:$0xff] %v5218_v22  ;;  %v5237_v22 = vperm.slane %v5212_v11, 0  ;;  %733 = vmatpush.msrb.mxu2 %v5243_v18 }
  0xdc   :  { %9014 = vst [vmem:[#allocation96_spill] sm:$0xff] %v5222_v2 }
  0xdd   :  { %9015 = vst [vmem:[#allocation97_spill] sm:$0xff] %v5224_v26  ;;  %v5249_v26 = vld [vmem:[#allocation6 + $0x258] sm:$0xff]  ;;  %v146_v2 = vadd.f32 %v4957_v36, %v5237_v22  ;;  %v5267_v36 = vld [vmem:[#allocation6] sm:$0xff] }
  0xde   :  { %9016 = vst [vmem:[#allocation98_spill] sm:$0xff] %v5226_v62  ;;  %833 = vmatpush.msra.mxu3 %v5249_v26  ;;  %v5257_v62 = vld [vmem:[#allocation6 + $0x28] sm:$0xff] }
  0xdf   :  { %9017 = vst [vmem:[#allocation99_spill] sm:$0xff] %v5228_v63  ;;  %v5245_v63 = vld [vmem:[#allocation6 + $0x250] sm:$0xff]  ;;  %734 = vmatpush.msrb.mxu2 %v5257_v62 }
  0xe0   :  { %9018 = vst [vmem:[#allocation100_spill] sm:$0xff] %v5230_v9  ;;  %v541_v9 = vpop.f32.mrf.mxu0  ;;  %793 = vmatpush.msra.mxu1 %v5245_v63 }
  0xe1   :  { %9019 = vst [vmem:[#allocation101_spill] sm:$0xff] %v5234_v6  ;;  %v5255_v6 = vld [vmem:[#allocation6 + $0x20] sm:$0xff] }
  0xe2   :  { %9020 = vst [vmem:[#allocation102_spill] sm:$0xff] %v5237_v22  ;;  %694 = vmatpush.msra.mxu0 %v5255_v6  ;;  %794 = vmatpush.msra.mxu1 %v5259_v56  ;;  %v5269_v22 = vld [vmem:[#allocation6 + $0x8] sm:$0xff] }
  0xe3   :  { %9021 = vst [vmem:[#allocation103_spill] sm:$0xff] %v5241_v39  ;;  %v604_v39 = vadd.f32 %v541_v9, %v146_v2  ;;  %735 = vmatpush.msrb.mxu2 %v5269_v22  ;;  %v5281_v2 = vpop.f32.mrf.mxu2  ;;  %v5285_v9 = vpop.f32.mrf.mxu3 }
  0xe4   :  { %9022 = vst [vmem:[#allocation104_spill] sm:$0xff] %v5243_v18  ;;  %v5263_v18 = vld [vmem:[#allocation6 + $0x238] sm:$0xff]  ;;  %695 = vmatpush.msra.mxu0 %v5267_v36 }
  0xe5   :  { %9023 = vst [vmem:[#allocation105_spill] sm:$0xff] %v5245_v63  ;;  %834 = vmatpush.msra.mxu3 %v5263_v18  ;;  %v5279_v63 = vld [vmem:[#allocation6 + $0x1f8] sm:$0xff]  ;;  %v3640_v59 = vmul.f32 -1.442695, %v604_v39  ;;  %v5307_v39 = vld [vmem:[#allocation6 + $0x190] sm:$0xff] }
  0xe6   :  { %9024 = vst [vmem:[#allocation106_spill] sm:$0xff] %v5249_v26  ;;  %v5271_v26 = vld [vmem:[#allocation6 + $0x210] sm:$0xff]  ;;  %800 = vmatpush.msra.mxu2 %v5279_v63 }
  0xe7   :  { %9025 = vst [vmem:[#allocation107_spill] sm:$0xff] %v5255_v6  ;;  %v5275_v6 = vld [vmem:[#allocation6 + $0x218] sm:$0xff]  ;;  %795 = vmatpush.msra.mxu1 %v5271_v26  ;;  %3704 = vpow2.f32 %v3640_v59  ;;  %v5327_v59 = vld [vmem:[#allocation6 + $0x150] sm:$0xff] }
  0xe8   :  { %9026 = vst [vmem:[#allocation108_spill] sm:$0xff] %v5257_v62  ;;  %v5277_v62 = vld [vmem:[#allocation6 + $0x1f0] sm:$0xff]  ;;  %835 = vmatpush.msra.mxu3 %v5275_v6 }
  0xe9   :  { %9027 = vst [vmem:[#allocation109_spill] sm:$0xff] %v5259_v56  ;;  %v9034_v56 = vmov 0.0   ;;  %760 = vmatpush.msrb.mxu0 %v5277_v62 }
  0xea   :  { %9028 = vst [vmem:[#allocation110_spill] sm:$0xff] %v5263_v18  ;;  %v5287_v18 = vpop.f32.mrf.mxu1  ;;  %716 = vmatmul.f32.vlgmr.msrb.gmra.mxu1 %v9034_v56  ;;  %756 = vmatmul.f32.vlgmr.msrb.gmra.mxu3 %v9034_v56 }
  0xeb   :  { %9029 = vst [vmem:[#allocation111_spill] sm:$0xff] %v5267_v36  ;;  %v5293_v36 = vld [vmem:[#allocation6 + $0x1d8] sm:$0xff]  ;;  %930 = vmatpush.msrb.mxu1 %v4781_v13  ;;  %970 = vmatpush.msrb.mxu3 %v4783_v15  ;;  %v5315_v13 = vld [vmem:[#allocation6 + $0x170] sm:$0xff] }
  0xec   :  { %9030 = vst [vmem:[#allocation112_spill] sm:$0xff] %v5269_v22  ;;  %v5291_v22 = vld [vmem:[#allocation6 + $0x1d0] sm:$0xff]  ;;  %801 = vmatpush.msra.mxu2 %v5293_v36  ;;  %v5317_v15 = vld [vmem:[#allocation6 + $0x178] sm:$0xff] }
  0xed   :  { %9031 = vst [vmem:[#allocation113_spill] sm:$0xff] %v5281_v2  ;;  %v5299_v2 = vld [vmem:[#allocation6 + $0x1b0] sm:$0xff]  ;;  %761 = vmatpush.msrb.mxu0 %v5291_v22  ;;  %931 = vmatpush.msrb.mxu1 %v4785_v16  ;;  %v5321_v16 = vpop.f32.mrf.mxu3 }
  0xee   :  { %9032 = vst [vmem:[#allocation114_spill] sm:$0xff] %v5285_v9  ;;  %971 = vmatpush.msrb.mxu3 %v4797_v21  ;;  %v5309_v9 = vld [vmem:[#allocation6 + $0x198] sm:$0xff] }
  0xef   :  { %9033 = vst [vmem:[#allocation115_spill] sm:$0xff] %v5287_v18  ;;  %v5301_v18 = vld [vmem:[#allocation6 + $0x1b8] sm:$0xff]  ;;  %762 = vmatpush.msrb.mxu0 %v5299_v2  ;;  %932 = vmatpush.msrb.mxu1 %v4793_v20 }
  0xf0   :  { %802 = vmatpush.msra.mxu2 %v5301_v18  ;;  %972 = vmatpush.msrb.mxu3 %v4804_v25  ;;  %9035 = vst [vmem:[#allocation116_spill] sm:$0xff] %v5321_v16  ;;  %v5329_v20 = vld [vmem:[#allocation6 + $0x158] sm:$0xff]  ;;  %v5333_v25 = vpop.f32.mrf.mxu2  ;;  %v5337_v16 = vld [vmem:[#allocation6 + $0x130] sm:$0xff] }
  0xf1   :  { %763 = vmatpush.msrb.mxu0 %v5307_v39  ;;  %933 = vmatpush.msrb.mxu1 %v4801_v24  ;;  %9037 = vst [vmem:[#allocation118_spill] sm:$0xff] %v5327_v59  ;;  %v3705_v24 = vpop.eup %3704 }
  0xf2   :  { %803 = vmatpush.msra.mxu2 %v5309_v9  ;;  %v5323_v21 = vpop.f32.mrf.mxu1  ;;  %973 = vmatpush.msrb.mxu3 %v4810_v29  ;;  %9038 = vst [vmem:[#allocation119_spill] sm:$0xff] %v5329_v20  ;;  %v5342_v29 = vperm.slane %v5212_v11, 1 }
  0xf3   :  { %9036 = vst [vmem:[#allocation117_spill] sm:$0xff] %v5323_v21  ;;  %764 = vmatpush.msrb.mxu0 %v5315_v13  ;;  %934 = vmatpush.msrb.mxu1 %v4807_v28  ;;  %v5339_v21 = vld [vmem:[#allocation6 + $0x138] sm:$0xff] }
  0xf4   :  { %804 = vmatpush.msra.mxu2 %v5317_v15  ;;  %9039 = vst [vmem:[#allocation120_spill] sm:$0xff] %v5333_v25  ;;  %974 = vmatpush.msrb.mxu3 %v4822_v34  ;;  %v5348_v25 = vld [vmem:[#allocation6 + $0x110] sm:$0xff]  ;;  %v5350_v28 = vld [vmem:[#allocation6 + $0x118] sm:$0xff]  ;;  %v5354_v34 = vadd.f32 1.0, %v3705_v24 }
  0xf5   :  { %9040 = vst [vmem:[#allocation121_spill] sm:$0xff] %v5339_v21  ;;  %765 = vmatpush.msrb.mxu0 %v5327_v59  ;;  %935 = vmatpush.msrb.mxu1 %v4818_v33  ;;  %v5358_v59 = vld [vmem:[#allocation6 + $0xf0] sm:$0xff]  ;;  %v187_v33 = vadd.f32 %v4989_v58, %v5342_v29 }
  0xf6   :  { %9041 = vst [vmem:[#allocation122_spill] sm:$0xff] %v5342_v29  ;;  %805 = vmatpush.msra.mxu2 %v5329_v20  ;;  %975 = vmatpush.msrb.mxu3 %v4829_v38  ;;  %v5360_v20 = vld [vmem:[#allocation6 + $0xf8] sm:$0xff]  ;;  %v5366_v38 = vpop.f32.mrf.mxu3  ;;  %3706 = vrcp.f32 %v5354_v34  ;;  %v5379_v58 = vld [vmem:[#allocation6 + $0xb0] sm:$0xff]  ;;  %vm617_vm2 = vweird.f32 %v5354_v34 }
  0xf7   :  { %766 = vmatpush.msrb.mxu0 %v5337_v16  ;;  %936 = vmatpush.msrb.mxu1 %v4826_v37  ;;  %9042 = vst [vmem:[#allocation123_spill] sm:$0xff] %v5366_v38  ;;  %v5370_v37 = vld [vmem:[#allocation6 + $0xd0] sm:$0xff] }
  0xf8   :  { %806 = vmatpush.msra.mxu2 %v5339_v21  ;;  %976 = vmatpush.msrb.mxu3 %v4835_v42  ;;  %v5372_v42 = vld [vmem:[#allocation6 + $0xd8] sm:$0xff] }
  0xf9   :  { %767 = vmatpush.msrb.mxu0 %v5348_v25  ;;  %937 = vmatpush.msrb.mxu1 %v4832_v41  ;;  %v5381_v41 = vld [vmem:[#allocation6 + $0xb8] sm:$0xff] }
  0xfa   :  { %807 = vmatpush.msra.mxu2 %v5350_v28  ;;  %v561_v21 = vpop.f32.mrf.mxu1  ;;  %977 = vmatpush.msrb.mxu3 %v4847_v47  ;;  %v5384_v47 = vperm.slane %v5212_v11, 3 }
  0xfb   :  { %v605_v24 = vadd.f32 %v561_v21, %v187_v33  ;;  %768 = vmatpush.msrb.mxu0 %v5358_v59  ;;  %938 = vmatpush.msrb.mxu1 %v4843_v46  ;;  %v5388_v21 = vpop.f32.mrf.mxu2  ;;  %v5392_v46 = vld [vmem:[#allocation6 + $0x90] sm:$0xff] }
  0xfc   :  { %808 = vmatpush.msra.mxu2 %v5360_v20  ;;  %978 = vmatpush.msrb.mxu3 %v4854_v51  ;;  %9043 = vst [vmem:[#allocation124_spill] sm:$0xff] %v5384_v47  ;;  %v5394_v51 = vld [vmem:[#allocation6 + $0x98] sm:$0xff]  ;;  %v269_v33 = vadd.f32 %v5017_v57, %v5384_v47  ;;  %v5421_v47 = vperm.slane %v5212_v11, 2  ;;  %v5435_v11 = vld [vmem:[#allocation6 + $0x10] sm:$0xff] }
  0xfd   :  { %v3641_v38 = vmul.f32 -1.442695, %v605_v24  ;;  %769 = vmatpush.msrb.mxu0 %v5370_v37  ;;  %9044 = vst [vmem:[#allocation125_spill] sm:$0xff] %v5388_v21  ;;  %939 = vmatpush.msrb.mxu1 %v4851_v50  ;;  %v5404_v50 = vld [vmem:[#allocation6 + $0x70] sm:$0xff]  ;;  %v5416_v57 = vld [vmem:[#allocation6 + $0x58] sm:$0xff] }
  0xfe   :  { %809 = vmatpush.msra.mxu2 %v5372_v42  ;;  %979 = vmatpush.msrb.mxu3 %v4860_v55  ;;  %v5406_v55 = vld [vmem:[#allocation6 + $0x78] sm:$0xff]  ;;  %v601_v24 = vpop.f32.mrf.mxu3 }
  0xff   :  { %3708 = vpow2.f32 %v3641_v38  ;;  %770 = vmatpush.msrb.mxu0 %v5379_v58  ;;  %940 = vmatpush.msrb.mxu1 %v4857_v54  ;;  %v5408_v38 = vpop.eup %3706  ;;  %v607_v54 = vadd.f32 %v601_v24, %v269_v33  ;;  %v5429_v33 = vld [vmem:[#allocation6 + $0x38] sm:$0xff] }
 0x100   :  { %810 = vmatpush.msra.mxu2 %v5381_v41  ;;  %980 = vmatpush.msrb.mxu3 %v4871_v61  ;;  %v5414_v61 = vld [vmem:[#allocation6 + $0x50] sm:$0xff]  ;;  %vm618_vm1 = vweird.f32 %v5408_v38 }
 0x101   :  { %771 = vmatpush.msrb.mxu0 %v5392_v46  ;;  %941 = vmatpush.msrb.mxu1 %v4869_v60  ;;  %v613_v60 = vmul.f32 %v5408_v38, %v5354_v34  ;;  %vm5466_vm4 = vmor %vm617_vm2, %vm618_vm1 }
 0x102   :  { %811 = vmatpush.msra.mxu2 %v5394_v51  ;;  %981 = vmatpush.msrb.mxu3 %v4878_v1  ;;  %v3642_v1 = vmul.f32 -1.442695, %v607_v54  ;;  %v5437_v54 = vld [vmem:[#allocation6 + $0x18] sm:$0xff] }
 0x103   :  { %796 = vmatmul.f32.vlgmr.msra.gmra.mxu1 %v9034_v56  ;;  %836 = vmatmul.f32.vlgmr.msra.gmra.mxu3 %v9034_v56  ;;  %v5427_v56 = vld [vmem:[#allocation6 + $0x30] sm:$0xff] }
 0x104   :  { %772 = vmatpush.msrb.mxu0 %v5404_v50  ;;  %812 = vmatpush.msra.mxu2 %v5406_v55  ;;  %3710 = vpow2.f32 %v3642_v1 }
 0x105   :  { %v3709_v21 = vpop.eup %3708  ;;  %942 = vmatpush.msrb.mxu1 %v4876_v0  ;;  %982 = vmatpush.msrb.mxu3 %v4884_v8  ;;  %v581_v0 = vpop.f32.mrf.mxu2  ;;  %v228_v8 = vadd.f32 %v5015_v14, %v5421_v47 }
 0x106   :  { %v630_v24 = vadd.f32 1.0, %v3709_v21  ;;  %773 = vmatpush.msrb.mxu0 %v5414_v61  ;;  %813 = vmatpush.msra.mxu2 %v5416_v57  ;;  %v614_v21 = vsub.f32 1.0, %v613_v60 }
 0x107   :  { %943 = vmatpush.msrb.mxu1 %v4882_v7  ;;  %983 = vmatpush.msrb.mxu3 %v4893_v12  ;;  %v606_v7 = vadd.f32 %v581_v0, %v228_v8 }
 0x108   :  { %3712 = vrcp.f32 %v630_v24  ;;  %774 = vmatpush.msrb.mxu0 %v5427_v56  ;;  %814 = vmatpush.msra.mxu2 %v5429_v33  ;;  %v615_v14 = vmul.f32 %v5408_v38, %v614_v21  ;;  %vm636_vm5 = vweird.f32 %v630_v24 }
 0x109   :  { %944 = vmatpush.msrb.mxu1 %v4890_v10  ;;  %984 = vmatpush.msrb.mxu3 %v4901_v19  ;;  %3714 = vtanh.f32 %v606_v7 }
 0x10a   :  { %775 = vmatpush.msrb.mxu0 %v5435_v11  ;;  %815 = vmatpush.msra.mxu2 %v5437_v54  ;;  %v3711_v12 = vpop.eup %3710 }
 0x10b   :  { %945 = vmatpush.msrb.mxu1 %v4897_v17  ;;  %985 = vmatpush.msrb.mxu3 %v4905_v23  ;;  %v5452_v10 = vadd.f32 1.0, %v3711_v12  ;;  %v616_v23 = vadd.f32 %v5408_v38, %v615_v14  ;;  %v9047_v14 = vld [vmem:[#allocation17_spill] sm:$0xff] }
 0x10d   :  { %1077 = vmatpush.msra.mxu1 %v4933_v3  ;;  %1117 = vmatpush.msra.mxu3 %v4935_v27  ;;  %3716 = vrcp.f32 %v5452_v10  ;;  %v642_v3 = vand.u32 2147483648, %v630_v24  ;;  %v623_v27 = vand.u32 2147483648, %v5354_v34  ;;  %vm656_vm10 = vweird.f32 %v5452_v10 }
 0x10e   :  { %v3713_v60 = vpop.eup %3712 }
 0x10f   :  { %1078 = vmatpush.msra.mxu1 %v4939_v4  ;;  %1118 = vmatpush.msra.mxu3 %v4941_v30  ;;  %v632_v19 = vmul.f32 %v3713_v60, %v630_v24  ;;  %v621_v30 = vand.u32 2147483647, %v5354_v34  ;;  %vm637_vm3 = vweird.f32 %v3713_v60  ;;  %v3715_v1 = vpop.eup %3714  ;;  %v643_v8 = vor.u32 1.1754944e-38, %v642_v3  ;;  %v9052_v3 = vld [vmem:[#allocation23_spill] sm:$0xff] }
 0x110   :  { %v624_v34 = vor.u32 1.1754944e-38, %v623_v27  ;;  %vm638_vm6 = vmor %vm636_vm5, %vm637_vm3 }
 0x111   :  { %1079 = vmatpush.msra.mxu1 %v4943_v31  ;;  %1119 = vmatpush.msra.mxu3 %v4945_v5  ;;  %v633_v17 = vsub.f32 1.0, %v632_v19  ;;  %v640_v31 = vand.u32 2147483647, %v630_v24  ;;  %vm622_vm7 = vcmp.eq.f32.partialorder %v621_v30, 8.507059e+37  ;;  %v660_v19 = vand.u32 2147483647, %v5452_v10 }
 0x112   :  { %v9054_v30 = vld [vmem:[#allocation25_spill] sm:$0xff] }
 0x113   :  { %1080 = vmatpush.msra.mxu1 %v4949_v32  ;;  %1120 = vmatpush.msra.mxu3 %v4951_v35  ;;  %v634_v4 = vmul.f32 %v3713_v60, %v633_v17  ;;  %v620_v32 = vsel %vm5466_vm4, %v5408_v38, %v616_v23  ;;  %v3717_v0 = vpop.eup %3716  ;;  %vm641_vm8 = vcmp.eq.f32.partialorder %v640_v31, 8.507059e+37  ;;  %v9051_v23 = vld [vmem:[#allocation22_spill] sm:$0xff]  ;;  %vm661_vm12 = vcmp.eq.f32.partialorder %v660_v19, 8.507059e+37  ;;  %v5542_v19 = vld [vmem:[#allocation3 + $0x140] sm:$0xff] }
 0x114   :  { %vm657_vm9 = vweird.f32 %v3717_v0 }
 0x115   :  { %1081 = vmatpush.msra.mxu1 %v4961_v40  ;;  %1121 = vmatpush.msra.mxu3 %v4963_v43  ;;  %v635_v35 = vadd.f32 %v3713_v60, %v634_v4  ;;  %v652_v40 = vmul.f32 %v3717_v0, %v5452_v10  ;;  %v625_v43 = vsel %vm622_vm7, %v624_v34, %v620_v32  ;;  %vm658_vm11 = vmor %vm656_vm10, %vm657_vm9  ;;  %v9053_v4 = vld [vmem:[#allocation24_spill] sm:$0xff]  ;;  %v9057_v34 = vld [vmem:[#allocation29_spill] sm:$0xff] }
 0x116   :  { %v667_v7 = vmul.f32 %v3715_v1, %v625_v43  ;;  %v9056_v32 = vld [vmem:[#allocation28_spill] sm:$0xff] }
 0x117   :  { %1082 = vmatpush.msra.mxu1 %v4967_v44  ;;  %1122 = vmatpush.msra.mxu3 %v4969_v45  ;;  %v639_v21 = vsel %vm638_vm6, %v3713_v60, %v635_v35  ;;  %v653_v12 = vsub.f32 1.0, %v652_v40  ;;  %v9048_v60 = vld [vmem:[#allocation18_spill] sm:$0xff]  ;;  %v5502_v35 = vld [vmem:[#allocation3 + $0x1e0] sm:$0xff] }
 0x118   :  { %v644_v24 = vsel %vm641_vm8, %v643_v8, %v639_v21  ;;  %v5510_v8 = vld [vmem:[#allocation3 + $0x1c0] sm:$0xff]  ;;  %v5514_v21 = vld [vmem:[#allocation3 + $0x1d0] sm:$0xff] }
 0x119   :  { %1083 = vmatpush.msra.mxu1 %v4971_v48  ;;  %1123 = vmatpush.msra.mxu3 %v4975_v49  ;;  %v666_v38 = vmul.f32 0.0, %v644_v24  ;;  %v654_v45 = vmul.f32 %v3717_v0, %v653_v12  ;;  %v662_v49 = vand.u32 2147483648, %v5452_v10  ;;  %v9055_v10 = vld [vmem:[#allocation27_spill] sm:$0xff]  ;;  %v9058_v40 = vld [vmem:[#allocation30_spill] sm:$0xff]  ;;  %v5518_v43 = vld [vmem:[#allocation3 + $0x1a0] sm:$0xff] }
 0x11a   :  { %v9059_v24 = vld [vmem:[#allocation32_spill] sm:$0xff] }
 0x11b   :  { %1084 = vmatpush.msra.mxu1 %v4977_v52  ;;  %1124 = vmatpush.msra.mxu3 %v4979_v53  ;;  %v5482_v44 = vadd.f32 %v667_v7, %v666_v38  ;;  %v655_v48 = vadd.f32 %v3717_v0, %v654_v45  ;;  %v9049_v52 = vld [vmem:[#allocation20_spill] sm:$0xff]  ;;  %v9050_v53 = vld [vmem:[#allocation21_spill] sm:$0xff]  ;;  %v663_v27 = vor.u32 1.1754944e-38, %v662_v49  ;;  %v5522_v38 = vld [vmem:[#allocation3 + $0x1b0] sm:$0xff] }
 0x11c   :  { %v9060_v7 = vld [vmem:[#allocation33_spill] sm:$0xff]  ;;  %v5526_v12 = vld [vmem:[#allocation3 + $0x180] sm:$0xff]  ;;  %v9061_v45 = vld [vmem:[#allocation34_spill] sm:$0xff] }
 0x11d   :  { %1085 = vmatpush.msra.mxu1 %v9047_v14  ;;  %1125 = vmatpush.msra.mxu3 %v9048_v60  ;;  %3718 = vtanh.f32 %v5482_v44  ;;  %v659_v17 = vsel %vm658_vm11, %v3717_v0, %v655_v48  ;;  %v5506_v0 = vld [vmem:[#allocation3 + $0x1f0] sm:$0xff]  ;;  %v5535_v60 = vld [vmem:[#allocation3 + $0x160] sm:$0xff]  ;;  %v9062_v49 = vld [vmem:[#allocation35_spill] sm:$0xff] }
 0x11e   :  { %v664_v5 = vsel %vm661_vm12, %v663_v27, %v659_v17  ;;  %v5530_v14 = vld [vmem:[#allocation3 + $0x190] sm:$0xff] }
 0x11f   :  { %1086 = vmatpush.msra.mxu1 %v9049_v52  ;;  %1126 = vmatpush.msra.mxu3 %v9050_v53  ;;  %v5538_v48 = vld [vmem:[#allocation3 + $0x170] sm:$0xff]  ;;  %v9063_v52 = vld [vmem:[#allocation40_spill] sm:$0xff] }
 0x120   :  { %v5546_v53 = vld [vmem:[#allocation3 + $0x150] sm:$0xff] }
 0x121   :  { %1087 = vmatpush.msra.mxu1 %v9051_v23  ;;  %1127 = vmatpush.msra.mxu3 %v9052_v3  ;;  %v9064_v17 = vld [vmem:[#allocation42_spill] sm:$0xff]  ;;  %v5550_v23 = vld [vmem:[#allocation3 + $0x120] sm:$0xff]  ;;  %v9065_v3 = vld [vmem:[#allocation45_spill] sm:$0xff] }
 0x122   :  { %v5554_v27 = vld [vmem:[#allocation3 + $0x130] sm:$0xff] }
 0x123   :  { %1088 = vmatpush.msra.mxu1 %v9053_v4  ;;  %1128 = vmatpush.msra.mxu3 %v9054_v30  ;;  %v3719_v31 = vpop.eup %3718  ;;  %v9066_v4 = vld [vmem:[#allocation46_spill] sm:$0xff]  ;;  %v5558_v30 = vld [vmem:[#allocation3 + $0x100] sm:$0xff] }
 0x124   :  { %v5496_v1 = vmul.f32 %v3719_v31, %v664_v5  ;;  %v9067_v31 = vld [vmem:[#allocation49_spill] sm:$0xff]  ;;  %v5562_v5 = vld [vmem:[#allocation3 + $0x110] sm:$0xff] }
 0x125   :  { %1089 = vmatpush.msra.mxu1 %v9055_v10  ;;  %1129 = vmatpush.msra.mxu3 %v9056_v32  ;;  %v9068_v10 = vld [vmem:[#allocation50_spill] sm:$0xff]  ;;  %v5566_v32 = vld [vmem:[#allocation3 + $0xe0] sm:$0xff] }
 0x126   :  { %696 = vmatmul.f32.vlgmr.msra.gmra.mxu0 %v5496_v1  ;;  %736 = vmatmul.f32.vlgmr.msrb.gmra.mxu2 %v5496_v1 }
 0x127   :  { %910 = vmatpush.msra.mxu0 %v5502_v35  ;;  %946 = vmatmul.f32.vlgmr.msrb.gmra.mxu1 %v5496_v1 }
 0x128   :  { %950 = vmatpush.msrb.mxu2 %v5506_v0  ;;  %986 = vmatmul.f32.vlgmr.msrb.gmra.mxu3 %v5496_v1 }
 0x129   :  { %911 = vmatpush.msra.mxu0 %v5510_v8  ;;  %1090 = vmatpush.msra.mxu1 %v9057_v34  ;;  %v9069_v34 = vld [vmem:[#allocation54_spill] sm:$0xff] }
 0x12a   :  { %951 = vmatpush.msrb.mxu2 %v5514_v21  ;;  %1130 = vmatpush.msra.mxu3 %v9058_v40  ;;  %v5570_v40 = vld [vmem:[#allocation3 + $0xf0] sm:$0xff] }
 0x12b   :  { %912 = vmatpush.msra.mxu0 %v5518_v43  ;;  %1091 = vmatpush.msra.mxu1 %v9059_v24  ;;  %v9070_v24 = vld [vmem:[#allocation55_spill] sm:$0xff] }
 0x12c   :  { %952 = vmatpush.msrb.mxu2 %v5522_v38  ;;  %1131 = vmatpush.msra.mxu3 %v9060_v7  ;;  %v5574_v7 = vld [vmem:[#allocation3 + $0xc0] sm:$0xff] }
 0x12d   :  { %913 = vmatpush.msra.mxu0 %v5526_v12  ;;  %1092 = vmatpush.msra.mxu1 %v9061_v45  ;;  %v9071_v45 = vld [vmem:[#allocation60_spill] sm:$0xff] }
 0x12e   :  { %953 = vmatpush.msrb.mxu2 %v5530_v14  ;;  %776 = vmatmul.f32.vlgmr.msrb.gmra.mxu0 %v5496_v1 }
 0x12f   :  { %816 = vmatmul.f32.vlgmr.msra.gmra.mxu2 %v5496_v1  ;;  %914 = vmatpush.msra.mxu0 %v5535_v60 }
 0x130   :  { %954 = vmatpush.msrb.mxu2 %v5538_v48  ;;  %1132 = vmatpush.msra.mxu3 %v9062_v49  ;;  %v5578_v49 = vld [vmem:[#allocation3 + $0xd0] sm:$0xff] }
 0x131   :  { %915 = vmatpush.msra.mxu0 %v5542_v19  ;;  %1157 = vmatpush.msrb.mxu1 %v9063_v52  ;;  %9072 = vst [vmem:[#allocation17_spill] sm:$0xff] %v5578_v49  ;;  %v9073_v52 = vld [vmem:[#allocation62_spill] sm:$0xff] }
 0x132   :  { %955 = vmatpush.msrb.mxu2 %v5546_v53  ;;  %1197 = vmatpush.msrb.mxu3 %v9064_v17  ;;  %v5582_v17 = vld [vmem:[#allocation3 + $0xa0] sm:$0xff] }
 0x133   :  { %916 = vmatpush.msra.mxu0 %v5550_v23  ;;  %1158 = vmatpush.msrb.mxu1 %v9065_v3  ;;  %9074 = vst [vmem:[#allocation18_spill] sm:$0xff] %v5582_v17  ;;  %v9075_v3 = vld [vmem:[#allocation65_spill] sm:$0xff] }
 0x134   :  { %956 = vmatpush.msrb.mxu2 %v5554_v27  ;;  %1198 = vmatpush.msrb.mxu3 %v9066_v4  ;;  %v5586_v4 = vld [vmem:[#allocation3 + $0xb0] sm:$0xff] }
 0x135   :  { %917 = vmatpush.msra.mxu0 %v5558_v30  ;;  %1159 = vmatpush.msrb.mxu1 %v9067_v31  ;;  %9076 = vst [vmem:[#allocation20_spill] sm:$0xff] %v5586_v4  ;;  %v9077_v31 = vld [vmem:[#allocation66_spill] sm:$0xff] }
 0x136   :  { %957 = vmatpush.msrb.mxu2 %v5562_v5  ;;  %1199 = vmatpush.msrb.mxu3 %v9068_v10  ;;  %v5590_v10 = vld [vmem:[#allocation3 + $0x80] sm:$0xff] }
 0x137   :  { %918 = vmatpush.msra.mxu0 %v5566_v32  ;;  %1160 = vmatpush.msrb.mxu1 %v9069_v34  ;;  %9078 = vst [vmem:[#allocation21_spill] sm:$0xff] %v5590_v10  ;;  %v9079_v34 = vld [vmem:[#allocation69_spill] sm:$0xff] }
 0x138   :  { %958 = vmatpush.msrb.mxu2 %v5570_v40  ;;  %1200 = vmatpush.msrb.mxu3 %v9070_v24  ;;  %v5594_v24 = vld [vmem:[#allocation3 + $0x90] sm:$0xff] }
 0x139   :  { %919 = vmatpush.msra.mxu0 %v5574_v7  ;;  %1161 = vmatpush.msrb.mxu1 %v9071_v45  ;;  %9080 = vst [vmem:[#allocation22_spill] sm:$0xff] %v5594_v24  ;;  %v9081_v45 = vld [vmem:[#allocation70_spill] sm:$0xff] }
 0x13a   :  { %959 = vmatpush.msrb.mxu2 %v5578_v49  ;;  %1201 = vmatpush.msrb.mxu3 %v9073_v52  ;;  %v5598_v52 = vld [vmem:[#allocation3 + $0x60] sm:$0xff] }
 0x13b   :  { %920 = vmatpush.msra.mxu0 %v5582_v17  ;;  %1162 = vmatpush.msrb.mxu1 %v9075_v3  ;;  %9082 = vst [vmem:[#allocation23_spill] sm:$0xff] %v5598_v52  ;;  %v9083_v3 = vld [vmem:[#allocation73_spill] sm:$0xff]  ;;  %v9102_v17 = vld [vmem:[#allocation44_spill] sm:$0xff] }
 0x13c   :  { %960 = vmatpush.msrb.mxu2 %v5586_v4  ;;  %1202 = vmatpush.msrb.mxu3 %v9077_v31  ;;  %v5602_v4 = vld [vmem:[#allocation3 + $0x70] sm:$0xff]  ;;  %v9106_v49 = vld [vmem:[#allocation48_spill] sm:$0xff] }
 0x13d   :  { %921 = vmatpush.msra.mxu0 %v5590_v10  ;;  %1163 = vmatpush.msrb.mxu1 %v9079_v34  ;;  %9084 = vst [vmem:[#allocation24_spill] sm:$0xff] %v5602_v4  ;;  %v9085_v31 = vld [vmem:[#allocation74_spill] sm:$0xff]  ;;  %v5606_v10 = vld [vmem:[#allocation3 + $0x40] sm:$0xff]  ;;  %v9087_v34 = vld [vmem:[#allocation79_spill] sm:$0xff] }
 0x13e   :  { %961 = vmatpush.msrb.mxu2 %v5594_v24  ;;  %1203 = vmatpush.msrb.mxu3 %v9081_v45  ;;  %9086 = vst [vmem:[#allocation25_spill] sm:$0xff] %v5606_v10  ;;  %v5610_v24 = vld [vmem:[#allocation3 + $0x50] sm:$0xff] }
 0x13f   :  { %922 = vmatpush.msra.mxu0 %v5598_v52  ;;  %1164 = vmatpush.msrb.mxu1 %v9083_v3  ;;  %9088 = vst [vmem:[#allocation27_spill] sm:$0xff] %v5610_v24  ;;  %v9089_v45 = vld [vmem:[#allocation82_spill] sm:$0xff]  ;;  %v5614_v52 = vld [vmem:[#allocation3 + $0x20] sm:$0xff]  ;;  %v9091_v3 = vld [vmem:[#allocation85_spill] sm:$0xff] }
 0x140   :  { %962 = vmatpush.msrb.mxu2 %v5602_v4  ;;  %1204 = vmatpush.msrb.mxu3 %v9085_v31  ;;  %9090 = vst [vmem:[#allocation28_spill] sm:$0xff] %v5614_v52  ;;  %v5618_v4 = vld [vmem:[#allocation3 + $0x30] sm:$0xff] }
 0x141   :  { %923 = vmatpush.msra.mxu0 %v5606_v10  ;;  %1165 = vmatpush.msrb.mxu1 %v9087_v34  ;;  %9092 = vst [vmem:[#allocation29_spill] sm:$0xff] %v5618_v4  ;;  %v9093_v31 = vld [vmem:[#allocation86_spill] sm:$0xff]  ;;  %v5622_v10 = vld [vmem:[#allocation3] sm:$0xff]  ;;  %v9095_v34 = vld [vmem:[#allocation89_spill] sm:$0xff] }
 0x142   :  { %963 = vmatpush.msrb.mxu2 %v5610_v24  ;;  %1205 = vmatpush.msrb.mxu3 %v9089_v45  ;;  %9094 = vst [vmem:[#allocation30_spill] sm:$0xff] %v5622_v10  ;;  %v9096_v24 = vld [vmem:[#allocation13_spill] sm:$0xff]  ;;  %v9097_v45 = vld [vmem:[#allocation38_spill] sm:$0xff] }
 0x143   :  { %924 = vmatpush.msra.mxu0 %v5614_v52  ;;  %1166 = vmatpush.msrb.mxu1 %v9091_v3  ;;  %v9098_v3 = vld [vmem:[#allocation39_spill] sm:$0xff]  ;;  %v9099_v52 = vld [vmem:[#allocation90_spill] sm:$0xff] }
 0x144   :  { %964 = vmatpush.msrb.mxu2 %v5618_v4  ;;  %1206 = vmatpush.msrb.mxu3 %v9093_v31  ;;  %v9100_v4 = vld [vmem:[#allocation43_spill] sm:$0xff]  ;;  %v9101_v31 = vld [vmem:[#allocation93_spill] sm:$0xff] }
 0x145   :  { %925 = vmatpush.msra.mxu0 %v5622_v10  ;;  %1167 = vmatpush.msrb.mxu1 %v9095_v34  ;;  %v9103_v10 = vld [vmem:[#allocation94_spill] sm:$0xff]  ;;  %v9104_v34 = vld [vmem:[#allocation47_spill] sm:$0xff] }
 0x146   :  { %965 = vmatpush.msrb.mxu2 %v9096_v24  ;;  %926 = vmatmul.f32.vlgmr.msra.gmra.mxu0 %v5496_v1  ;;  %v9105_v24 = vld [vmem:[#allocation98_spill] sm:$0xff] }
 0x147   :  { %966 = vmatmul.f32.vlgmr.msrb.gmra.mxu2 %v5496_v1  ;;  %1057 = vmatpush.msrb.mxu0 %v9097_v45  ;;  %v9107_v1 = vld [vmem:[#allocation101_spill] sm:$0xff]  ;;  %v9108_v45 = vld [vmem:[#allocation52_spill] sm:$0xff] }
 0x148   :  { %1097 = vmatpush.msra.mxu2 %v9098_v3  ;;  %1207 = vmatpush.msrb.mxu3 %v9099_v52  ;;  %v9109_v3 = vld [vmem:[#allocation105_spill] sm:$0xff] }
 0x149   :  { %1058 = vmatpush.msrb.mxu0 %v9100_v4  ;;  %1168 = vmatpush.msrb.mxu1 %v9101_v31  ;;  %v9110_v52 = vld [vmem:[#allocation53_spill] sm:$0xff]  ;;  %v9111_v4 = vld [vmem:[#allocation106_spill] sm:$0xff] }
 0x14a   :  { %1098 = vmatpush.msra.mxu2 %v9102_v17  ;;  %1208 = vmatpush.msrb.mxu3 %v9103_v10  ;;  %v9112_v31 = vld [vmem:[#allocation58_spill] sm:$0xff]  ;;  %v9113_v17 = vld [vmem:[#allocation109_spill] sm:$0xff]  ;;  %v9114_v10 = vld [vmem:[#allocation59_spill] sm:$0xff] }
 0x14b   :  { %1059 = vmatpush.msrb.mxu0 %v9104_v34  ;;  %1169 = vmatpush.msrb.mxu1 %v9105_v24  ;;  %v9115_v34 = vld [vmem:[#allocation110_spill] sm:$0xff]  ;;  %v9116_v24 = vld [vmem:[#allocation63_spill] sm:$0xff] }
 0x14c   :  { %1099 = vmatpush.msra.mxu2 %v9106_v49  ;;  %1209 = vmatpush.msrb.mxu3 %v9107_v1  ;;  %v9117_v49 = vld [vmem:[#allocation64_spill] sm:$0xff]  ;;  %v9118_v1 = vld [vmem:[#allocation67_spill] sm:$0xff] }
 0x14d   :  { %1060 = vmatpush.msrb.mxu0 %v9108_v45  ;;  %1170 = vmatpush.msrb.mxu1 %v9109_v3  ;;  %v9119_v45 = vld [vmem:[#allocation68_spill] sm:$0xff]  ;;  %v9120_v3 = vld [vmem:[#allocation71_spill] sm:$0xff] }
 0x14e   :  { %1100 = vmatpush.msra.mxu2 %v9110_v52  ;;  %1210 = vmatpush.msrb.mxu3 %v9111_v4  ;;  %v9121_v52 = vld [vmem:[#allocation72_spill] sm:$0xff]  ;;  %v9122_v4 = vld [vmem:[#allocation77_spill] sm:$0xff] }
 0x14f   :  { %1061 = vmatpush.msrb.mxu0 %v9112_v31  ;;  %1171 = vmatpush.msrb.mxu1 %v9113_v17  ;;  %v9123_v31 = vld [vmem:[#allocation78_spill] sm:$0xff]  ;;  %v9124_v17 = vld [vmem:[#allocation83_spill] sm:$0xff] }
 0x150   :  { %1101 = vmatpush.msra.mxu2 %v9114_v10  ;;  %1211 = vmatpush.msrb.mxu3 %v9115_v34  ;;  %v9125_v10 = vld [vmem:[#allocation84_spill] sm:$0xff] }
 0x151   :  { %1062 = vmatpush.msrb.mxu0 %v9116_v24  ;;  %1172 = vmatpush.msrb.mxu1 %v5271_v26  ;;  %v9126_v26 = vld [vmem:[#allocation87_spill] sm:$0xff]  ;;  %v9127_v34 = vld [vmem:[#allocation88_spill] sm:$0xff] }
 0x152   :  { %1102 = vmatpush.msra.mxu2 %v9117_v49  ;;  %1212 = vmatpush.msrb.mxu3 %v5275_v6  ;;  %v9128_v6 = vld [vmem:[#allocation91_spill] sm:$0xff]  ;;  %v9129_v24 = vld [vmem:[#allocation92_spill] sm:$0xff] }
 0x153   :  { %1063 = vmatpush.msrb.mxu0 %v9118_v1  ;;  %v9130_v49 = vld [vmem:[#allocation96_spill] sm:$0xff]  ;;  %v9131_v1 = vld [vmem:[#allocation97_spill] sm:$0xff] }
 0x154   :  { %1103 = vmatpush.msra.mxu2 %v9119_v45  ;;  %v9132_v45 = vld [vmem:[#allocation103_spill] sm:$0xff] }
 0x155   :  { %1064 = vmatpush.msrb.mxu0 %v9120_v3  ;;  %v9133_v3 = vld [vmem:[#allocation104_spill] sm:$0xff] }
 0x156   :  { %1104 = vmatpush.msra.mxu2 %v9121_v52  ;;  %v9134_v52 = vld [vmem:[#allocation107_spill] sm:$0xff] }
 0x157   :  { %1065 = vmatpush.msrb.mxu0 %v9122_v4  ;;  %v9135_v4 = vld [vmem:[#allocation108_spill] sm:$0xff] }
 0x158   :  { %1105 = vmatpush.msra.mxu2 %v9123_v31  ;;  %v9136_v31 = vld [vmem:[#allocation111_spill] sm:$0xff] }
 0x159   :  { %1066 = vmatpush.msrb.mxu0 %v9124_v17  ;;  %v9137_v17 = vld [vmem:[#allocation112_spill] sm:$0xff] }
 0x15a   :  { %1106 = vmatpush.msra.mxu2 %v9125_v10  ;;  %v9138_v10 = vld [vmem:[#allocation118_spill] sm:$0xff] }
 0x15b   :  { %1067 = vmatpush.msrb.mxu0 %v9126_v26 }
 0x15c   :  { %1107 = vmatpush.msra.mxu2 %v9127_v34  ;;  %v9145_v34 = vld [vmem:[#allocation124_spill] sm:$0xff] }
 0x15d   :  { %1068 = vmatpush.msrb.mxu0 %v9128_v6  ;;  %v9146_v6 = vld [vmem:[#allocation37_spill] sm:$0xff] }
 0x15e   :  { %1108 = vmatpush.msra.mxu2 %v9129_v24  ;;  %v272_v24 = vadd.f32 %v9146_v6, %v9145_v34 }
 0x15f   :  { %1069 = vmatpush.msrb.mxu0 %v9130_v49 }
 0x160   :  { %1109 = vmatpush.msra.mxu2 %v9131_v1 }
 0x161   :  { %1070 = vmatpush.msrb.mxu0 %v9132_v45 }
 0x162   :  { %1110 = vmatpush.msra.mxu2 %v9133_v3 }
 0x163   :  { %1071 = vmatpush.msrb.mxu0 %v9134_v52 }
 0x164   :  { %1111 = vmatpush.msra.mxu2 %v9135_v4 }
 0x165   :  { %1072 = vmatpush.msrb.mxu0 %v9136_v31 }
 0x166   :  { %1112 = vmatpush.msra.mxu2 %v9137_v17 }
 0x167   :  { %1137 = vmatpush.msra.mxu0 %v5277_v62  ;;  %v9139_v62 = vld [vmem:[#allocation119_spill] sm:$0xff] }
 0x168   :  { %1177 = vmatpush.msrb.mxu2 %v5279_v63  ;;  %v9140_v63 = vld [vmem:[#allocation121_spill] sm:$0xff] }
 0x169   :  { %1138 = vmatpush.msra.mxu0 %v5291_v22  ;;  %v516_v22 = vld [vmem:[%s8428_s5] sm:$0xf] }
 0x16a   :  { %1178 = vmatpush.msrb.mxu2 %v5293_v36  ;;  %v5720_v1 = vperm.slane %v516_v22, 2 }
 0x16b   :  { %1139 = vmatpush.msra.mxu0 %v5299_v2  ;;  %v5707_v2 = vperm.slane %v516_v22, 0 }
 0x16c   :  { %1179 = vmatpush.msrb.mxu2 %v5301_v18  ;;  %v717_v18 = vpop.f32.mrf.mxu1  ;;  %9147 = vst [vmem:[#allocation35_spill] sm:$0xff] %v5720_v1 }
 0x16d   :  { %1140 = vmatpush.msra.mxu0 %v5307_v39  ;;  %9141 = vst [vmem:[#allocation32_spill] sm:$0xff] %v5707_v2 }
 0x16e   :  { %1180 = vmatpush.msrb.mxu2 %v5309_v9  ;;  %v757_v9 = vpop.f32.mrf.mxu3 }
 0x16f   :  { %1141 = vmatpush.msra.mxu0 %v5315_v13 }
 0x170   :  { %1181 = vmatpush.msrb.mxu2 %v5317_v15 }
 0x171   :  { %1142 = vmatpush.msra.mxu0 %v9138_v10 }
 0x172   :  { %1182 = vmatpush.msrb.mxu2 %v9139_v62 }
 0x173   :  { %1143 = vmatpush.msra.mxu0 %v5337_v16  ;;  %v5710_v16 = vperm.slane %v516_v22, 1 }
 0x174   :  { %1183 = vmatpush.msrb.mxu2 %v9140_v63 }
 0x175   :  { %1144 = vmatpush.msra.mxu0 %v5348_v25  ;;  %9142 = vst [vmem:[#allocation33_spill] sm:$0xff] %v5710_v16 }
 0x176   :  { %1184 = vmatpush.msrb.mxu2 %v5350_v28 }
 0x177   :  { %1145 = vmatpush.msra.mxu0 %v5358_v59 }
 0x178   :  { %1185 = vmatpush.msrb.mxu2 %v5360_v20 }
 0x179   :  { %1146 = vmatpush.msra.mxu0 %v5370_v37  ;;  %v9143_v37 = vld [vmem:[#allocation26_spill] sm:$0xff] }
 0x17a   :  { %1186 = vmatpush.msrb.mxu2 %v5372_v42  ;;  %v190_v42 = vadd.f32 %v9143_v37, %v5342_v29 }
 0x17b   :  { %1147 = vmatpush.msra.mxu0 %v5379_v58 }
 0x17c   :  { %1187 = vmatpush.msrb.mxu2 %v5381_v41 }
 0x17d   :  { %1148 = vmatpush.msra.mxu0 %v5392_v46 }
 0x17e   :  { %1188 = vmatpush.msrb.mxu2 %v5394_v51 }
 0x17f   :  { %1149 = vmatpush.msra.mxu0 %v5404_v50 }
 0x180   :  { %1189 = vmatpush.msrb.mxu2 %v5406_v55  ;;  %v797_v36 = vpop.f32.mrf.mxu1  ;;  %v5715_v55 = vperm.slane %v516_v22, 3 }
 0x181   :  { %1150 = vmatpush.msra.mxu0 %v5414_v61 }
 0x182   :  { %1190 = vmatpush.msrb.mxu2 %v5416_v57  ;;  %9144 = vst [vmem:[#allocation34_spill] sm:$0xff] %v5715_v55 }
 0x183   :  { %1151 = vmatpush.msra.mxu0 %v5427_v56 }
 0x184   :  { %1191 = vmatpush.msrb.mxu2 %v5429_v33 }
 0x185   :  { %1152 = vmatpush.msra.mxu0 %v5435_v11 }
 0x186   :  { %1192 = vmatpush.msrb.mxu2 %v5437_v54  ;;  %v837_v58 = vpop.f32.mrf.mxu3 }
 0x1a3   :  { %v697_v39 = vpop.f32.mrf.mxu0 }
 0x1a4   :  { %v698_v13 = vadd.f32 %v697_v39, %v5707_v2  ;;  %v947_v25 = vpop.f32.mrf.mxu1 }
 0x1a5   :  { %v991_v46 = vadd.f32 %v947_v25, %v190_v42 }
 0x1a6   :  { %v718_v15 = vadd.f32 %v717_v18, %v698_v13 }
 0x1a7   :  { %v3647_v57 = vmul.f32 -1.442695, %v991_v46 }
 0x1a8   :  { %v3643_v59 = vmul.f32 -1.442695, %v718_v15 }
 0x1a9   :  { %v737_v20 = vpop.f32.mrf.mxu2 }
 0x1aa   :  { %3720 = vpow2.f32 %v3643_v59  ;;  %v738_v28 = vadd.f32 %v737_v20, %v5710_v16  ;;  %v9148_v59 = vld [vmem:[#allocation102_spill] sm:$0xff]  ;;  %v9149_v20 = vld [vmem:[#allocation19_spill] sm:$0xff] }
 0x1ab   :  { %v987_v54 = vpop.f32.mrf.mxu3  ;;  %v777_v45 = vpop.f32.mrf.mxu0  ;;  %v149_v25 = vadd.f32 %v9149_v20, %v9148_v59 }
 0x1ac   :  { %v758_v41 = vadd.f32 %v757_v9, %v738_v28  ;;  %v993_v4 = vadd.f32 %v987_v54, %v272_v24  ;;  %v778_v10 = vadd.f32 %v777_v45, %v5720_v1 }
 0x1ae   :  { %v3644_v51 = vmul.f32 -1.442695, %v758_v41  ;;  %v3648_v63 = vmul.f32 -1.442695, %v993_v4  ;;  %v798_v13 = vadd.f32 %v797_v36, %v778_v10 }
 0x1b0   :  { %v3721_v50 = vpop.eup %3720  ;;  %3722 = vpow2.f32 %v3644_v51 }
 0x1b1   :  { %v843_v61 = vadd.f32 1.0, %v3721_v50 }
 0x1b2   :  { %v817_v56 = vpop.f32.mrf.mxu2 }
 0x1b3   :  { %3724 = vrcp.f32 %v843_v61  ;;  %v818_v33 = vadd.f32 %v817_v56, %v5715_v55  ;;  %v855_v28 = vand.u32 2147483648, %v843_v61  ;;  %vm849_vm14 = vweird.f32 %v843_v61 }
 0x1b4   :  { %3726 = vpow2.f32 %v3647_v57 }
 0x1b5   :  { %v838_v26 = vadd.f32 %v837_v58, %v818_v33  ;;  %v853_v58 = vand.u32 2147483647, %v843_v61 }
 0x1b6   :  { %v3723_v11 = vpop.eup %3722 }
 0x1b7   :  { %v862_v49 = vadd.f32 1.0, %v3723_v11  ;;  %v3645_v3 = vmul.f32 -1.442695, %v838_v26  ;;  %v856_v11 = vor.u32 1.1754944e-38, %v855_v28  ;;  %vm854_vm2 = vcmp.eq.f32.partialorder %v853_v58, 8.507059e+37 }
 0x1b9   :  { %v3725_v52 = vpop.eup %3724  ;;  %3728 = vrcp.f32 %v862_v49  ;;  %v874_v41 = vand.u32 2147483648, %v862_v49  ;;  %v872_v36 = vand.u32 2147483647, %v862_v49  ;;  %vm868_vm1 = vweird.f32 %v862_v49 }
 0x1ba   :  { %v845_v31 = vmul.f32 %v3725_v52, %v843_v61  ;;  %v3727_v17 = vpop.eup %3726  ;;  %3730 = vpow2.f32 %v3645_v3  ;;  %vm850_vm13 = vweird.f32 %v3725_v52 }
 0x1bb   :  { %v5723_v18 = vadd.f32 1.0, %v3727_v17  ;;  %3732 = vpow2.f32 %v3648_v63  ;;  %vm5728_vm15 = vmor %vm849_vm14, %vm850_vm13  ;;  %v875_v6 = vor.u32 1.1754944e-38, %v874_v41  ;;  %vm873_vm4 = vcmp.eq.f32.partialorder %v872_v36, 8.507059e+37 }
 0x1bc   :  { %v846_v62 = vsub.f32 1.0, %v845_v31 }
 0x1bd   :  { %3734 = vrcp.f32 %v5723_v18  ;;  %vm1022_vm10 = vweird.f32 %v5723_v18 }
 0x1be   :  { %v847_v9 = vmul.f32 %v3725_v52, %v846_v62  ;;  %3736 = vtanh.f32 %v798_v13 }
 0x1bf   :  { %v3729_v39 = vpop.eup %3728 }
 0x1c0   :  { %v864_v15 = vmul.f32 %v3729_v39, %v862_v49  ;;  %v848_v22 = vadd.f32 %v3725_v52, %v847_v9  ;;  %v3731_v37 = vpop.eup %3730  ;;  %vm869_vm0 = vweird.f32 %v3729_v39 }
 0x1c1   :  { %v882_v51 = vadd.f32 1.0, %v3731_v37  ;;  %v3733_v26 = vpop.eup %3732  ;;  %vm870_vm3 = vmor %vm868_vm1, %vm869_vm0 }
 0x1c2   :  { %v865_v42 = vsub.f32 1.0, %v864_v15  ;;  %v852_v56 = vsel %vm5728_vm15, %v3725_v52, %v848_v22  ;;  %v5736_v62 = vadd.f32 1.0, %v3733_v26 }
 0x1c3   :  { %v927_v50 = vpop.f32.mrf.mxu0  ;;  %3738 = vrcp.f32 %v882_v51  ;;  %v857_v24 = vsel %vm854_vm2, %v856_v11, %v852_v56  ;;  %v5734_v45 = vpop.eup %3734  ;;  %v894_v22 = vand.u32 2147483648, %v882_v51  ;;  %v892_v28 = vand.u32 2147483647, %v882_v51 }
 0x1c4   :  { %v866_v57 = vmul.f32 %v3729_v39, %v865_v42  ;;  %v990_v33 = vadd.f32 %v927_v50, %v149_v25  ;;  %v3737_v4 = vpop.eup %3736  ;;  %v1018_v49 = vmul.f32 %v5734_v45, %v5723_v18  ;;  %vm888_vm6 = vweird.f32 %v882_v51 }
 0x1c5   :  { %v899_v17 = vmul.f32 %v3737_v4, %v857_v24  ;;  %v895_v42 = vor.u32 1.1754944e-38, %v894_v22  ;;  %vm893_vm8 = vcmp.eq.f32.partialorder %v892_v28, 8.507059e+37  ;;  %vm1023_vm9 = vweird.f32 %v5734_v45  ;;  %v5761_v4 = vld [vmem:[#allocation3 + $0x1f8] sm:$0xff] }
 0x1c6   :  { %v867_v61 = vadd.f32 %v3729_v39, %v866_v57  ;;  %v3646_v54 = vmul.f32 -1.442695, %v990_v33  ;;  %v1019_v20 = vsub.f32 1.0, %v1018_v49  ;;  %v9152_v57 = vld [vmem:[#allocation36_spill] sm:$0xff]  ;;  %vm5766_vm11 = vmor %vm1022_vm10, %vm1023_vm9  ;;  %v5771_v49 = vld [vmem:[#allocation3 + $0x1c8] sm:$0xff]  ;;  %vm1042_vm2 = vweird.f32 %v5736_v62 }
 0x1c7   :  { %v231_v56 = vadd.f32 %v9152_v57, %v5421_v47  ;;  %v5784_v28 = vld [vmem:[#allocation3 + $0x1b8] sm:$0xff] }
 0x1c8   :  { %v871_v3 = vsel %vm870_vm3, %v3729_v39, %v867_v61  ;;  %3740 = vpow2.f32 %v3646_v54  ;;  %v1020_v41 = vmul.f32 %v5734_v45, %v1019_v20 }
 0x1c9   :  { %v876_v31 = vsel %vm873_vm4, %v875_v6, %v871_v3  ;;  %v3739_v10 = vpop.eup %3738  ;;  %v1028_v6 = vand.u32 2147483648, %v5723_v18  ;;  %v5758_v3 = vld [vmem:[#allocation3 + $0x1e8] sm:$0xff] }
 0x1ca   :  { %v898_v52 = vmul.f32 0.0, %v876_v31  ;;  %v884_v9 = vmul.f32 %v3739_v10, %v882_v51  ;;  %vm889_vm5 = vweird.f32 %v3739_v10  ;;  %v967_v46 = vpop.f32.mrf.mxu2  ;;  %v1021_v26 = vadd.f32 %v5734_v45, %v1020_v41  ;;  %v5788_v41 = vld [vmem:[#allocation3 + $0x188] sm:$0xff] }
 0x1cb   :  { %vm890_vm7 = vmor %vm888_vm6, %vm889_vm5  ;;  %v992_v54 = vadd.f32 %v967_v46, %v231_v56  ;;  %v1029_v22 = vor.u32 1.1754944e-38, %v1028_v6  ;;  %v5795_v56 = vld [vmem:[#allocation3 + $0x168] sm:$0xff] }
 0x1cc   :  { %v5740_v63 = vadd.f32 %v899_v17, %v898_v52  ;;  %v885_v15 = vsub.f32 1.0, %v884_v9  ;;  %v1026_v52 = vand.u32 2147483647, %v5723_v18  ;;  %v5774_v9 = vld [vmem:[#allocation3 + $0x1d8] sm:$0xff]  ;;  %v1025_v18 = vsel %vm5766_vm11, %v5734_v45, %v1021_v26  ;;  %v5802_v26 = vld [vmem:[#allocation3 + $0x148] sm:$0xff] }
 0x1cd   :  { %v5791_v45 = vld [vmem:[#allocation3 + $0x198] sm:$0xff]  ;;  %v5822_v17 = vld [vmem:[#allocation3 + $0x108] sm:$0xff] }
 0x1ce   :  { %v3741_v13 = vpop.eup %3740  ;;  %3742 = vtanh.f32 %v5740_v63  ;;  %v886_v25 = vmul.f32 %v3739_v10, %v885_v15  ;;  %vm1027_vm14 = vcmp.eq.f32.partialorder %v1026_v52, 8.507059e+37  ;;  %v1046_v52 = vand.u32 2147483647, %v5736_v62 }
 0x1cf   :  { %3744 = vrcp.f32 %v5736_v62  ;;  %v5744_v39 = vadd.f32 1.0, %v3741_v13 }
 0x1d0   :  { %v887_v37 = vadd.f32 %v3739_v10, %v886_v25  ;;  %v5781_v25 = vld [vmem:[#allocation3 + $0x1a8] sm:$0xff]  ;;  %vm1047_vm4 = vcmp.eq.f32.partialorder %v1046_v52, 8.507059e+37  ;;  %v5944_v52 = vld [vmem:[#allocation6 + $0x320] sm:$0xff] }
 0x1d1   :  { %3746 = vrcp.f32 %v5744_v39  ;;  %v1007_v15 = vand.u32 2147483647, %v5744_v39  ;;  %vm1003_vm13 = vweird.f32 %v5744_v39  ;;  %9168 = vst [vmem:[#allocation62_spill] sm:$0xff] %v5944_v52 }
 0x1d2   :  { %v891_v36 = vsel %vm890_vm7, %v3739_v10, %v887_v37  ;;  %v1009_v10 = vand.u32 2147483648, %v5744_v39  ;;  %3748 = vtanh.f32 %v992_v54 }
 0x1d3   :  { %v896_v33 = vsel %vm893_vm8, %v895_v42, %v891_v36  ;;  %vm1008_vm0 = vcmp.eq.f32.partialorder %v1007_v15, 8.507059e+37  ;;  %v5829_v15 = vld [vmem:[#allocation3 + $0xe8] sm:$0xff] }
 0x1d4   :  { %v3743_v58 = vpop.eup %3742  ;;  %v1010_v42 = vor.u32 1.1754944e-38, %v1009_v10  ;;  %v5825_v10 = vld [vmem:[#allocation3 + $0x118] sm:$0xff] }
 0x1d5   :  { %v5748_v50 = vpop.eup %3744  ;;  %v902_v11 = vmul.f32 %v3743_v58, %v896_v33  ;;  %v1030_v58 = vsel %vm1027_vm14, %v1029_v22, %v1025_v18  ;;  %v5798_v33 = vld [vmem:[#allocation3 + $0x178] sm:$0xff]  ;;  %v5835_v22 = vld [vmem:[#allocation3 + $0xc8] sm:$0xff] }
 0x1d6   :  { %v1038_v24 = vmul.f32 %v5748_v50, %v5736_v62  ;;  %v1052_v54 = vmul.f32 %v1030_v58, %v5482_v44  ;;  %vm1043_vm1 = vweird.f32 %v5748_v50  ;;  %v5815_v44 = vld [vmem:[#allocation3 + $0x138] sm:$0xff]  ;;  %v5843_v58 = vld [vmem:[#allocation3 + $0xa8] sm:$0xff] }
 0x1d7   :  { %v3747_v61 = vpop.eup %3746  ;;  %1093 = vmatmul.f32.vlgmr.msra.gmra.mxu1 %v902_v11  ;;  %1133 = vmatmul.f32.vlgmr.msra.gmra.mxu3 %v902_v11  ;;  %vm1044_vm3 = vmor %vm1042_vm2, %vm1043_vm1  ;;  %v5832_v18 = vld [vmem:[#allocation3 + $0xf8] sm:$0xff] }
 0x1d8   :  { %v999_v51 = vmul.f32 %v3747_v61, %v5744_v39  ;;  %1307 = vmatpush.msra.mxu1 %v5758_v3  ;;  %1347 = vmatpush.msra.mxu3 %v5761_v4  ;;  %vm1004_vm12 = vweird.f32 %v3747_v61  ;;  %v1039_v20 = vsub.f32 1.0, %v1038_v24  ;;  %v3749_v36 = vpop.eup %3748  ;;  %v5812_v24 = vld [vmem:[#allocation3 + $0x128] sm:$0xff] }
 0x1d9   :  { %vm1005_vm15 = vmor %vm1003_vm13, %vm1004_vm12 }
 0x1da   :  { %v1000_v31 = vsub.f32 1.0, %v999_v51  ;;  %1308 = vmatpush.msra.mxu1 %v5771_v49  ;;  %1348 = vmatpush.msra.mxu3 %v5774_v9  ;;  %v1040_v57 = vmul.f32 %v5748_v50, %v1039_v20  ;;  %v5838_v20 = vld [vmem:[#allocation3 + $0xd8] sm:$0xff] }
 0x1dc   :  { %v1001_v13 = vmul.f32 %v3747_v61, %v1000_v31  ;;  %1309 = vmatpush.msra.mxu1 %v5781_v25  ;;  %1349 = vmatpush.msra.mxu3 %v5784_v28  ;;  %v1041_v6 = vadd.f32 %v5748_v50, %v1040_v57  ;;  %v1048_v31 = vand.u32 2147483648, %v5736_v62  ;;  %v5852_v57 = vld [vmem:[#allocation3 + $0x98] sm:$0xff] }
 0x1de   :  { %v1002_v37 = vadd.f32 %v3747_v61, %v1001_v13  ;;  %1310 = vmatpush.msra.mxu1 %v5788_v41  ;;  %1350 = vmatpush.msra.mxu3 %v5791_v45  ;;  %v1045_v13 = vsel %vm1044_vm3, %v5748_v50, %v1041_v6  ;;  %v1049_v62 = vor.u32 1.1754944e-38, %v1048_v31  ;;  %v5870_v6 = vld [vmem:[#allocation3 + $0x58] sm:$0xff]  ;;  %v5940_v31 = vld [vmem:[#allocation6 + $0x348] sm:$0xff] }
 0x1df   :  { %1173 = vmatmul.f32.vlgmr.msrb.gmra.mxu1 %v902_v11  ;;  %1213 = vmatmul.f32.vlgmr.msrb.gmra.mxu3 %v902_v11  ;;  %v5805_v11 = vld [vmem:[#allocation3 + $0x158] sm:$0xff]  ;;  %9166 = vst [vmem:[#allocation60_spill] sm:$0xff] %v5940_v31 }
 0x1e0   :  { %v1006_v46 = vsel %vm1005_vm15, %v3747_v61, %v1002_v37  ;;  %1311 = vmatpush.msra.mxu1 %v5795_v56  ;;  %1351 = vmatpush.msra.mxu3 %v5798_v33  ;;  %v1050_v50 = vsel %vm1047_vm4, %v1049_v62, %v1045_v13  ;;  %v9169_v13 = vld [vmem:[#allocation22_spill] sm:$0xff]  ;;  %v5948_v62 = vld [vmem:[#allocation6 + $0x328] sm:$0xff] }
 0x1e1   :  { %v1011_v39 = vsel %vm1008_vm0, %v1010_v42, %v1006_v46  ;;  %v5846_v46 = vld [vmem:[#allocation3 + $0xb8] sm:$0xff]  ;;  %9170 = vst [vmem:[#allocation65_spill] sm:$0xff] %v5948_v62 }
 0x1e2   :  { %v1053_v51 = vmul.f32 %v3749_v36, %v1011_v39  ;;  %1312 = vmatpush.msra.mxu1 %v5802_v26  ;;  %1352 = vmatpush.msra.mxu3 %v5805_v11  ;;  %v5849_v36 = vld [vmem:[#allocation3 + $0x88] sm:$0xff] }
 0x1e3   :  { %v5859_v39 = vld [vmem:[#allocation3 + $0x68] sm:$0xff] }
 0x1e4   :  { %v5808_v61 = vadd.f32 %v1053_v51, %v1052_v54  ;;  %1313 = vmatpush.msra.mxu1 %v5812_v24  ;;  %1353 = vmatpush.msra.mxu3 %v5815_v44  ;;  %v5862_v54 = vld [vmem:[#allocation3 + $0x78] sm:$0xff]  ;;  %v5867_v51 = vld [vmem:[#allocation3 + $0x48] sm:$0xff] }
 0x1e6   :  { %3750 = vtanh.f32 %v5808_v61  ;;  %1314 = vmatpush.msra.mxu1 %v5822_v17  ;;  %1354 = vmatpush.msra.mxu3 %v5825_v10 }
 0x1e8   :  { %1315 = vmatpush.msra.mxu1 %v5829_v15  ;;  %1355 = vmatpush.msra.mxu3 %v5832_v18 }
 0x1ea   :  { %1316 = vmatpush.msra.mxu1 %v5835_v22  ;;  %1356 = vmatpush.msra.mxu3 %v5838_v20 }
 0x1ec   :  { %v3751_v37 = vpop.eup %3750  ;;  %1317 = vmatpush.msra.mxu1 %v5843_v58  ;;  %1357 = vmatpush.msra.mxu3 %v5846_v46 }
 0x1ed   :  { %v5841_v42 = vmul.f32 %v3751_v37, %v1050_v50  ;;  %v9171_v37 = vld [vmem:[#allocation23_spill] sm:$0xff]  ;;  %v5952_v50 = vld [vmem:[#allocation6 + $0x300] sm:$0xff] }
 0x1ee   :  { %1318 = vmatpush.msra.mxu1 %v5849_v36  ;;  %1358 = vmatpush.msra.mxu3 %v5852_v57  ;;  %9172 = vst [vmem:[#allocation66_spill] sm:$0xff] %v5952_v50 }
 0x1ef   :  { %1073 = vmatmul.f32.vlgmr.msrb.gmra.mxu0 %v5841_v42  ;;  %1113 = vmatmul.f32.vlgmr.msra.gmra.mxu2 %v5841_v42 }
 0x1f0   :  { %1287 = vmatpush.msrb.mxu0 %v5502_v35  ;;  %1327 = vmatpush.msra.mxu2 %v5506_v0  ;;  %v5875_v35 = vld [vmem:[#allocation3 + $0x28] sm:$0xff]  ;;  %v5878_v0 = vld [vmem:[#allocation3 + $0x38] sm:$0xff] }
 0x1f1   :  { %1319 = vmatpush.msra.mxu1 %v5859_v39  ;;  %1359 = vmatpush.msra.mxu3 %v5862_v54 }
 0x1f2   :  { %1288 = vmatpush.msrb.mxu0 %v5510_v8  ;;  %1328 = vmatpush.msra.mxu2 %v5514_v21  ;;  %v5883_v8 = vld [vmem:[#allocation3 + $0x8] sm:$0xff]  ;;  %v5886_v21 = vld [vmem:[#allocation3 + $0x18] sm:$0xff] }
 0x1f3   :  { %1320 = vmatpush.msra.mxu1 %v5867_v51  ;;  %1360 = vmatpush.msra.mxu3 %v5870_v6 }
 0x1f4   :  { %1289 = vmatpush.msrb.mxu0 %v5518_v43  ;;  %1329 = vmatpush.msra.mxu2 %v5522_v38  ;;  %v5896_v43 = vld [vmem:[#allocation6 + $0x3e0] sm:$0xff]  ;;  %v5900_v38 = vld [vmem:[#allocation6 + $0x3e8] sm:$0xff] }
 0x1f5   :  { %1321 = vmatpush.msra.mxu1 %v5875_v35  ;;  %1361 = vmatpush.msra.mxu3 %v5878_v0 }
 0x1f6   :  { %1290 = vmatpush.msrb.mxu0 %v5526_v12  ;;  %1330 = vmatpush.msra.mxu2 %v5530_v14  ;;  %v5904_v12 = vld [vmem:[#allocation6 + $0x3c0] sm:$0xff]  ;;  %v5908_v14 = vld [vmem:[#allocation6 + $0x3c8] sm:$0xff] }
 0x1f7   :  { %1322 = vmatpush.msra.mxu1 %v5883_v8  ;;  %1362 = vmatpush.msra.mxu3 %v5886_v21  ;;  %9155 = vst [vmem:[#allocation40_spill] sm:$0xff] %v5908_v14 }
 0x1f8   :  { %1153 = vmatmul.f32.vlgmr.msra.gmra.mxu0 %v5841_v42  ;;  %1193 = vmatmul.f32.vlgmr.msrb.gmra.mxu2 %v5841_v42 }
 0x1f9   :  { %1291 = vmatpush.msrb.mxu0 %v5535_v60  ;;  %1323 = vmatmul.f32.vlgmr.msra.gmra.mxu1 %v5841_v42  ;;  %v5912_v60 = vld [vmem:[#allocation6 + $0x3a0] sm:$0xff] }
 0x1fa   :  { %1331 = vmatpush.msra.mxu2 %v5538_v48  ;;  %1363 = vmatmul.f32.vlgmr.msra.gmra.mxu3 %v5841_v42  ;;  %9156 = vst [vmem:[#allocation42_spill] sm:$0xff] %v5912_v60  ;;  %v5916_v48 = vld [vmem:[#allocation6 + $0x3a8] sm:$0xff] }
 0x1fb   :  { %1292 = vmatpush.msrb.mxu0 %v5542_v19  ;;  %1454 = vmatpush.msrb.mxu1 %v5896_v43  ;;  %9157 = vst [vmem:[#allocation45_spill] sm:$0xff] %v5916_v48  ;;  %v5920_v19 = vld [vmem:[#allocation6 + $0x380] sm:$0xff] }
 0x1fc   :  { %1332 = vmatpush.msra.mxu2 %v5546_v53  ;;  %1494 = vmatpush.msrb.mxu3 %v5900_v38  ;;  %9158 = vst [vmem:[#allocation46_spill] sm:$0xff] %v5920_v19  ;;  %v5924_v53 = vld [vmem:[#allocation6 + $0x388] sm:$0xff] }
 0x1fd   :  { %1293 = vmatpush.msrb.mxu0 %v5550_v23  ;;  %1455 = vmatpush.msrb.mxu1 %v5904_v12  ;;  %9159 = vst [vmem:[#allocation49_spill] sm:$0xff] %v5924_v53  ;;  %v5928_v23 = vld [vmem:[#allocation6 + $0x360] sm:$0xff] }
 0x1fe   :  { %1333 = vmatpush.msra.mxu2 %v5554_v27  ;;  %1495 = vmatpush.msrb.mxu3 %v5908_v14  ;;  %9160 = vst [vmem:[#allocation50_spill] sm:$0xff] %v5928_v23  ;;  %v9161_v27 = vld [vmem:[#allocation17_spill] sm:$0xff] }
 0x1ff   :  { %1294 = vmatpush.msrb.mxu0 %v5558_v30  ;;  %1456 = vmatpush.msrb.mxu1 %v5912_v60  ;;  %v5932_v30 = vld [vmem:[#allocation6 + $0x368] sm:$0xff] }
 0x200   :  { %1334 = vmatpush.msra.mxu2 %v5562_v5  ;;  %1496 = vmatpush.msrb.mxu3 %v5916_v48  ;;  %9162 = vst [vmem:[#allocation54_spill] sm:$0xff] %v5932_v30  ;;  %v9163_v5 = vld [vmem:[#allocation18_spill] sm:$0xff] }
 0x201   :  { %1295 = vmatpush.msrb.mxu0 %v5566_v32  ;;  %1457 = vmatpush.msrb.mxu1 %v5920_v19  ;;  %v5936_v32 = vld [vmem:[#allocation6 + $0x340] sm:$0xff] }
 0x202   :  { %1335 = vmatpush.msra.mxu2 %v5570_v40  ;;  %1497 = vmatpush.msrb.mxu3 %v5924_v53  ;;  %9164 = vst [vmem:[#allocation55_spill] sm:$0xff] %v5936_v32  ;;  %v9165_v40 = vld [vmem:[#allocation20_spill] sm:$0xff] }
 0x203   :  { %1296 = vmatpush.msrb.mxu0 %v5574_v7  ;;  %1458 = vmatpush.msrb.mxu1 %v5928_v23  ;;  %v9167_v7 = vld [vmem:[#allocation21_spill] sm:$0xff] }
 0x204   :  { %1336 = vmatpush.msra.mxu2 %v9161_v27  ;;  %1498 = vmatpush.msrb.mxu3 %v5932_v30  ;;  %v9173_v27 = vld [vmem:[#allocation24_spill] sm:$0xff]  ;;  %v9293_v30 = vld [vmem:[#allocation41_spill] sm:$0xff] }
 0x205   :  { %1297 = vmatpush.msrb.mxu0 %v9163_v5  ;;  %1459 = vmatpush.msrb.mxu1 %v5936_v32  ;;  %v5956_v5 = vld [vmem:[#allocation6 + $0x308] sm:$0xff] }
 0x206   :  { %1337 = vmatpush.msra.mxu2 %v9165_v40  ;;  %1499 = vmatpush.msrb.mxu3 %v5940_v31  ;;  %9174 = vst [vmem:[#allocation69_spill] sm:$0xff] %v5956_v5  ;;  %v9175_v40 = vld [vmem:[#allocation25_spill] sm:$0xff] }
 0x207   :  { %1298 = vmatpush.msrb.mxu0 %v9167_v7  ;;  %1460 = vmatpush.msrb.mxu1 %v5944_v52  ;;  %v5960_v7 = vld [vmem:[#allocation6 + $0x2e0] sm:$0xff] }
 0x208   :  { %1338 = vmatpush.msra.mxu2 %v9169_v13  ;;  %1500 = vmatpush.msrb.mxu3 %v5948_v62  ;;  %9176 = vst [vmem:[#allocation70_spill] sm:$0xff] %v5960_v7  ;;  %v9177_v13 = vld [vmem:[#allocation27_spill] sm:$0xff]  ;;  %v5964_v62 = vld [vmem:[#allocation6 + $0x2e8] sm:$0xff] }
 0x209   :  { %1299 = vmatpush.msrb.mxu0 %v9171_v37  ;;  %1461 = vmatpush.msrb.mxu1 %v5952_v50  ;;  %9178 = vst [vmem:[#allocation73_spill] sm:$0xff] %v5964_v62  ;;  %v9179_v37 = vld [vmem:[#allocation28_spill] sm:$0xff] }
 0x20a   :  { %1339 = vmatpush.msra.mxu2 %v9173_v27  ;;  %1501 = vmatpush.msrb.mxu3 %v5956_v5  ;;  %v5968_v50 = vld [vmem:[#allocation6 + $0x2c0] sm:$0xff]  ;;  %v9181_v27 = vld [vmem:[#allocation29_spill] sm:$0xff] }
 0x20b   :  { %1300 = vmatpush.msrb.mxu0 %v9175_v40  ;;  %1462 = vmatpush.msrb.mxu1 %v5960_v7  ;;  %9180 = vst [vmem:[#allocation74_spill] sm:$0xff] %v5968_v50  ;;  %v5972_v5 = vld [vmem:[#allocation6 + $0x2c8] sm:$0xff]  ;;  %v9183_v40 = vld [vmem:[#allocation30_spill] sm:$0xff]  ;;  %v5976_v7 = vld [vmem:[#allocation6 + $0x2a0] sm:$0xff] }
 0x20c   :  { %1340 = vmatpush.msra.mxu2 %v9177_v13  ;;  %1502 = vmatpush.msrb.mxu3 %v5964_v62  ;;  %9182 = vst [vmem:[#allocation79_spill] sm:$0xff] %v5972_v5  ;;  %v5979_v13 = vld [vmem:[#allocation3 + $0x10] sm:$0xff] }
 0x20d   :  { %1301 = vmatpush.msrb.mxu0 %v9179_v37  ;;  %1463 = vmatpush.msrb.mxu1 %v5968_v50  ;;  %9184 = vst [vmem:[#allocation82_spill] sm:$0xff] %v5976_v7  ;;  %v5984_v37 = vld [vmem:[#allocation6 + $0x2a8] sm:$0xff] }
 0x20e   :  { %1341 = vmatpush.msra.mxu2 %v9181_v27  ;;  %1503 = vmatpush.msrb.mxu3 %v5972_v5  ;;  %9185 = vst [vmem:[#allocation85_spill] sm:$0xff] %v5979_v13  ;;  %v5987_v27 = vld [vmem:[#allocation6 + $0x280] sm:$0xff] }
 0x20f   :  { %1302 = vmatpush.msrb.mxu0 %v9183_v40  ;;  %1464 = vmatpush.msrb.mxu1 %v5976_v7  ;;  %9186 = vst [vmem:[#allocation86_spill] sm:$0xff] %v5984_v37  ;;  %v5990_v40 = vld [vmem:[#allocation6 + $0x1e0] sm:$0xff]  ;;  %v5993_v7 = vld [vmem:[#allocation6 + $0x288] sm:$0xff] }
 0x210   :  { %1342 = vmatpush.msra.mxu2 %v5979_v13  ;;  %1303 = vmatmul.f32.vlgmr.msrb.gmra.mxu0 %v5841_v42  ;;  %9187 = vst [vmem:[#allocation89_spill] sm:$0xff] %v5987_v27  ;;  %v5996_v13 = vld [vmem:[#allocation6 + $0x1e8] sm:$0xff] }
 0x211   :  { %1343 = vmatmul.f32.vlgmr.msra.gmra.mxu2 %v5841_v42  ;;  %1504 = vmatpush.msrb.mxu3 %v5984_v37  ;;  %9188 = vst [vmem:[#allocation13_spill] sm:$0xff] %v5990_v40  ;;  %v5999_v42 = vld [vmem:[#allocation6 + $0x260] sm:$0xff] }
 0x212   :  { %1465 = vmatpush.msrb.mxu1 %v5987_v27  ;;  %1434 = vmatpush.msra.mxu0 %v5990_v40  ;;  %9189 = vst [vmem:[#allocation38_spill] sm:$0xff] %v5993_v7  ;;  %v6002_v37 = vld [vmem:[#allocation6 + $0x1c0] sm:$0xff]  ;;  %v6005_v27 = vld [vmem:[#allocation6 + $0x268] sm:$0xff] }
 0x213   :  { %1505 = vmatpush.msrb.mxu3 %v5993_v7  ;;  %9190 = vst [vmem:[#allocation39_spill] sm:$0xff] %v5996_v13  ;;  %1474 = vmatpush.msrb.mxu2 %v5996_v13  ;;  %v6008_v40 = vld [vmem:[#allocation6 + $0x1c8] sm:$0xff]  ;;  %v6011_v7 = vld [vmem:[#allocation6 + $0x240] sm:$0xff] }
 0x214   :  { %9191 = vst [vmem:[#allocation90_spill] sm:$0xff] %v5999_v42  ;;  %1466 = vmatpush.msrb.mxu1 %v5999_v42  ;;  %1435 = vmatpush.msra.mxu0 %v6002_v37  ;;  %v6014_v13 = vld [vmem:[#allocation6 + $0x1a0] sm:$0xff]  ;;  %v6017_v42 = vld [vmem:[#allocation6 + $0x248] sm:$0xff] }
 0x215   :  { %9192 = vst [vmem:[#allocation43_spill] sm:$0xff] %v6002_v37  ;;  %1506 = vmatpush.msrb.mxu3 %v6005_v27  ;;  %1475 = vmatpush.msrb.mxu2 %v6008_v40  ;;  %v6020_v37 = vld [vmem:[#allocation6 + $0x1a8] sm:$0xff] }
 0x216   :  { %9193 = vst [vmem:[#allocation93_spill] sm:$0xff] %v6005_v27  ;;  %1467 = vmatpush.msrb.mxu1 %v6011_v7  ;;  %1436 = vmatpush.msra.mxu0 %v6014_v13  ;;  %v6023_v27 = vld [vmem:[#allocation6 + $0x220] sm:$0xff] }
 0x217   :  { %9194 = vst [vmem:[#allocation44_spill] sm:$0xff] %v6008_v40  ;;  %1507 = vmatpush.msrb.mxu3 %v6017_v42  ;;  %1476 = vmatpush.msrb.mxu2 %v6020_v37  ;;  %v6026_v40 = vld [vmem:[#allocation6 + $0x180] sm:$0xff] }
 0x218   :  { %9195 = vst [vmem:[#allocation94_spill] sm:$0xff] %v6011_v7  ;;  %1468 = vmatpush.msrb.mxu1 %v6023_v27  ;;  %1437 = vmatpush.msra.mxu0 %v6026_v40  ;;  %v6029_v7 = vld [vmem:[#allocation6 + $0x228] sm:$0xff] }
 0x219   :  { %9196 = vst [vmem:[#allocation47_spill] sm:$0xff] %v6014_v13  ;;  %1508 = vmatpush.msrb.mxu3 %v6029_v7  ;;  %v6032_v13 = vld [vmem:[#allocation6 + $0x188] sm:$0xff] }
 0x21a   :  { %9197 = vst [vmem:[#allocation98_spill] sm:$0xff] %v6017_v42  ;;  %1477 = vmatpush.msrb.mxu2 %v6032_v13  ;;  %v6035_v42 = vld [vmem:[#allocation6 + $0x200] sm:$0xff] }
 0x21b   :  { %9198 = vst [vmem:[#allocation48_spill] sm:$0xff] %v6020_v37  ;;  %1469 = vmatpush.msrb.mxu1 %v6035_v42  ;;  %v6038_v37 = vld [vmem:[#allocation6 + $0x160] sm:$0xff] }
 0x21c   :  { %9199 = vst [vmem:[#allocation101_spill] sm:$0xff] %v6023_v27  ;;  %1438 = vmatpush.msra.mxu0 %v6038_v37  ;;  %v6041_v27 = vld [vmem:[#allocation6 + $0x208] sm:$0xff] }
 0x21d   :  { %9200 = vst [vmem:[#allocation52_spill] sm:$0xff] %v6026_v40  ;;  %1509 = vmatpush.msrb.mxu3 %v6041_v27  ;;  %v6044_v40 = vld [vmem:[#allocation6 + $0x168] sm:$0xff] }
 0x21e   :  { %9201 = vst [vmem:[#allocation105_spill] sm:$0xff] %v6029_v7  ;;  %1478 = vmatpush.msrb.mxu2 %v6044_v40  ;;  %v6047_v7 = vld [vmem:[#allocation6 + $0x3f0] sm:$0xff] }
 0x21f   :  { %9202 = vst [vmem:[#allocation53_spill] sm:$0xff] %v6032_v13  ;;  %1534 = vmatpush.msra.mxu1 %v6047_v7  ;;  %v6050_v13 = vld [vmem:[#allocation6 + $0x3f8] sm:$0xff] }
 0x220   :  { %9203 = vst [vmem:[#allocation106_spill] sm:$0xff] %v6035_v42  ;;  %1574 = vmatpush.msra.mxu3 %v6050_v13  ;;  %v6053_v42 = vld [vmem:[#allocation6 + $0x140] sm:$0xff] }
 0x221   :  { %9204 = vst [vmem:[#allocation58_spill] sm:$0xff] %v6038_v37  ;;  %1439 = vmatpush.msra.mxu0 %v6053_v42  ;;  %v6056_v37 = vld [vmem:[#allocation6 + $0x148] sm:$0xff] }
 0x222   :  { %9205 = vst [vmem:[#allocation109_spill] sm:$0xff] %v6041_v27  ;;  %1479 = vmatpush.msrb.mxu2 %v6056_v37  ;;  %v6059_v27 = vld [vmem:[#allocation6 + $0x3d0] sm:$0xff] }
 0x223   :  { %9206 = vst [vmem:[#allocation59_spill] sm:$0xff] %v6044_v40  ;;  %1535 = vmatpush.msra.mxu1 %v6059_v27  ;;  %v6062_v40 = vld [vmem:[#allocation6 + $0x3d8] sm:$0xff] }
 0x224   :  { %9207 = vst [vmem:[#allocation110_spill] sm:$0xff] %v6047_v7  ;;  %1575 = vmatpush.msra.mxu3 %v6062_v40  ;;  %v6065_v7 = vld [vmem:[#allocation6 + $0x120] sm:$0xff] }
 0x225   :  { %9208 = vst [vmem:[#allocation63_spill] sm:$0xff] %v6050_v13  ;;  %1440 = vmatpush.msra.mxu0 %v6065_v7  ;;  %v6068_v13 = vld [vmem:[#allocation6 + $0x128] sm:$0xff] }
 0x226   :  { %9209 = vst [vmem:[#allocation64_spill] sm:$0xff] %v6053_v42  ;;  %1480 = vmatpush.msrb.mxu2 %v6068_v13  ;;  %v6071_v42 = vld [vmem:[#allocation6 + $0x3b0] sm:$0xff] }
 0x227   :  { %9210 = vst [vmem:[#allocation67_spill] sm:$0xff] %v6056_v37  ;;  %1536 = vmatpush.msra.mxu1 %v6071_v42  ;;  %v6074_v37 = vld [vmem:[#allocation6 + $0x3b8] sm:$0xff] }
 0x228   :  { %9211 = vst [vmem:[#allocation68_spill] sm:$0xff] %v6059_v27  ;;  %1576 = vmatpush.msra.mxu3 %v6074_v37  ;;  %v6077_v27 = vld [vmem:[#allocation6 + $0x100] sm:$0xff] }
 0x229   :  { %9212 = vst [vmem:[#allocation71_spill] sm:$0xff] %v6062_v40  ;;  %1441 = vmatpush.msra.mxu0 %v6077_v27  ;;  %v6080_v40 = vld [vmem:[#allocation6 + $0x108] sm:$0xff] }
 0x22a   :  { %9213 = vst [vmem:[#allocation72_spill] sm:$0xff] %v6065_v7  ;;  %1481 = vmatpush.msrb.mxu2 %v6080_v40  ;;  %v6083_v7 = vld [vmem:[#allocation6 + $0x390] sm:$0xff] }
 0x22b   :  { %9214 = vst [vmem:[#allocation77_spill] sm:$0xff] %v6068_v13  ;;  %1537 = vmatpush.msra.mxu1 %v6083_v7  ;;  %v6086_v13 = vld [vmem:[#allocation6 + $0x398] sm:$0xff] }
 0x22c   :  { %9215 = vst [vmem:[#allocation78_spill] sm:$0xff] %v6071_v42  ;;  %1577 = vmatpush.msra.mxu3 %v6086_v13  ;;  %v6089_v42 = vld [vmem:[#allocation6 + $0xe0] sm:$0xff] }
 0x22d   :  { %9216 = vst [vmem:[#allocation83_spill] sm:$0xff] %v6074_v37  ;;  %1442 = vmatpush.msra.mxu0 %v6089_v42  ;;  %v6092_v37 = vld [vmem:[#allocation6 + $0xe8] sm:$0xff] }
 0x22e   :  { %9217 = vst [vmem:[#allocation84_spill] sm:$0xff] %v6077_v27  ;;  %1482 = vmatpush.msrb.mxu2 %v6092_v37  ;;  %v6095_v27 = vld [vmem:[#allocation6 + $0x370] sm:$0xff] }
 0x22f   :  { %9218 = vst [vmem:[#allocation87_spill] sm:$0xff] %v6080_v40  ;;  %1538 = vmatpush.msra.mxu1 %v6095_v27  ;;  %v6098_v40 = vld [vmem:[#allocation6 + $0x378] sm:$0xff] }
 0x230   :  { %9219 = vst [vmem:[#allocation88_spill] sm:$0xff] %v6083_v7  ;;  %1578 = vmatpush.msra.mxu3 %v6098_v40  ;;  %v6101_v7 = vld [vmem:[#allocation6 + $0xc0] sm:$0xff] }
 0x231   :  { %9220 = vst [vmem:[#allocation91_spill] sm:$0xff] %v6086_v13  ;;  %1443 = vmatpush.msra.mxu0 %v6101_v7  ;;  %v6104_v13 = vld [vmem:[#allocation6 + $0xc8] sm:$0xff] }
 0x232   :  { %9221 = vst [vmem:[#allocation92_spill] sm:$0xff] %v6089_v42  ;;  %1483 = vmatpush.msrb.mxu2 %v6104_v13  ;;  %v6107_v42 = vld [vmem:[#allocation6 + $0x350] sm:$0xff] }
 0x233   :  { %9222 = vst [vmem:[#allocation96_spill] sm:$0xff] %v6092_v37  ;;  %1539 = vmatpush.msra.mxu1 %v6107_v42  ;;  %v6110_v37 = vld [vmem:[#allocation6 + $0x358] sm:$0xff] }
 0x234   :  { %9223 = vst [vmem:[#allocation97_spill] sm:$0xff] %v6095_v27  ;;  %1579 = vmatpush.msra.mxu3 %v6110_v37  ;;  %v6113_v27 = vld [vmem:[#allocation6 + $0xa0] sm:$0xff] }
 0x235   :  { %9224 = vst [vmem:[#allocation103_spill] sm:$0xff] %v6098_v40  ;;  %1444 = vmatpush.msra.mxu0 %v6113_v27  ;;  %v6116_v40 = vld [vmem:[#allocation6 + $0xa8] sm:$0xff] }
 0x236   :  { %9225 = vst [vmem:[#allocation104_spill] sm:$0xff] %v6101_v7  ;;  %1484 = vmatpush.msrb.mxu2 %v6116_v40  ;;  %v6119_v7 = vld [vmem:[#allocation6 + $0x330] sm:$0xff] }
 0x237   :  { %9226 = vst [vmem:[#allocation107_spill] sm:$0xff] %v6104_v13  ;;  %1540 = vmatpush.msra.mxu1 %v6119_v7  ;;  %v6122_v13 = vld [vmem:[#allocation6 + $0x338] sm:$0xff] }
 0x238   :  { %9227 = vst [vmem:[#allocation108_spill] sm:$0xff] %v6107_v42  ;;  %1580 = vmatpush.msra.mxu3 %v6122_v13  ;;  %v6125_v42 = vld [vmem:[#allocation6 + $0x80] sm:$0xff] }
 0x239   :  { %9228 = vst [vmem:[#allocation111_spill] sm:$0xff] %v6110_v37  ;;  %1445 = vmatpush.msra.mxu0 %v6125_v42  ;;  %v6128_v37 = vld [vmem:[#allocation6 + $0x88] sm:$0xff] }
 0x23a   :  { %9229 = vst [vmem:[#allocation112_spill] sm:$0xff] %v6113_v27  ;;  %1485 = vmatpush.msrb.mxu2 %v6128_v37  ;;  %v6131_v27 = vld [vmem:[#allocation6 + $0x310] sm:$0xff] }
 0x23b   :  { %9230 = vst [vmem:[#allocation118_spill] sm:$0xff] %v6116_v40  ;;  %1541 = vmatpush.msra.mxu1 %v6131_v27  ;;  %v6134_v40 = vld [vmem:[#allocation6 + $0x318] sm:$0xff] }
 0x23c   :  { %9231 = vst [vmem:[#allocation119_spill] sm:$0xff] %v6119_v7  ;;  %1581 = vmatpush.msra.mxu3 %v6134_v40  ;;  %v6137_v7 = vld [vmem:[#allocation6 + $0x60] sm:$0xff] }
 0x23d   :  { %9232 = vst [vmem:[#allocation121_spill] sm:$0xff] %v6122_v13  ;;  %1446 = vmatpush.msra.mxu0 %v6137_v7  ;;  %v6140_v13 = vld [vmem:[#allocation6 + $0x68] sm:$0xff] }
 0x23e   :  { %9233 = vst [vmem:[#allocation26_spill] sm:$0xff] %v6125_v42  ;;  %1486 = vmatpush.msrb.mxu2 %v6140_v13  ;;  %v6143_v42 = vld [vmem:[#allocation6 + $0x2f0] sm:$0xff] }
 0x23f   :  { %9234 = vst [vmem:[#allocation37_spill] sm:$0xff] %v6128_v37  ;;  %1542 = vmatpush.msra.mxu1 %v6143_v42  ;;  %v6146_v37 = vld [vmem:[#allocation6 + $0x2f8] sm:$0xff] }
 0x240   :  { %9235 = vst [vmem:[#allocation19_spill] sm:$0xff] %v6131_v27  ;;  %1582 = vmatpush.msra.mxu3 %v6146_v37  ;;  %v6149_v27 = vld [vmem:[#allocation6 + $0x40] sm:$0xff] }
 0x241   :  { %9236 = vst [vmem:[#allocation36_spill] sm:$0xff] %v6134_v40  ;;  %1447 = vmatpush.msra.mxu0 %v6149_v27  ;;  %v6152_v40 = vld [vmem:[#allocation6 + $0x48] sm:$0xff] }
 0x242   :  { %9237 = vst [vmem:[#allocation17_spill] sm:$0xff] %v6137_v7  ;;  %1487 = vmatpush.msrb.mxu2 %v6152_v40  ;;  %v6155_v7 = vld [vmem:[#allocation6 + $0x2d0] sm:$0xff] }
 0x243   :  { %9238 = vst [vmem:[#allocation18_spill] sm:$0xff] %v6140_v13  ;;  %1543 = vmatpush.msra.mxu1 %v6155_v7  ;;  %v6158_v13 = vld [vmem:[#allocation6 + $0x2d8] sm:$0xff] }
 0x244   :  { %9239 = vst [vmem:[#allocation20_spill] sm:$0xff] %v6143_v42  ;;  %1583 = vmatpush.msra.mxu3 %v6158_v13  ;;  %v6161_v42 = vld [vmem:[#allocation6 + $0x20] sm:$0xff] }
 0x245   :  { %9240 = vst [vmem:[#allocation21_spill] sm:$0xff] %v6146_v37  ;;  %1448 = vmatpush.msra.mxu0 %v6161_v42  ;;  %v6164_v37 = vld [vmem:[#allocation6 + $0x28] sm:$0xff] }
 0x246   :  { %9241 = vst [vmem:[#allocation22_spill] sm:$0xff] %v6149_v27  ;;  %1488 = vmatpush.msrb.mxu2 %v6164_v37  ;;  %v6167_v27 = vld [vmem:[#allocation6 + $0x2b0] sm:$0xff] }
 0x247   :  { %9242 = vst [vmem:[#allocation23_spill] sm:$0xff] %v6152_v40  ;;  %1544 = vmatpush.msra.mxu1 %v6167_v27  ;;  %v6170_v40 = vld [vmem:[#allocation6 + $0x2b8] sm:$0xff] }
 0x248   :  { %9243 = vst [vmem:[#allocation24_spill] sm:$0xff] %v6155_v7  ;;  %1584 = vmatpush.msra.mxu3 %v6170_v40  ;;  %v6173_v7 = vld [vmem:[#allocation6] sm:$0xff] }
 0x249   :  { %9244 = vst [vmem:[#allocation25_spill] sm:$0xff] %v6158_v13  ;;  %1449 = vmatpush.msra.mxu0 %v6173_v7  ;;  %v6176_v13 = vld [vmem:[#allocation6 + $0x8] sm:$0xff] }
 0x24a   :  { %9245 = vst [vmem:[#allocation27_spill] sm:$0xff] %v6161_v42  ;;  %1489 = vmatpush.msrb.mxu2 %v6176_v13  ;;  %v6179_v42 = vld [vmem:[#allocation6 + $0x290] sm:$0xff] }
 0x24b   :  { %9246 = vst [vmem:[#allocation28_spill] sm:$0xff] %v6164_v37  ;;  %1545 = vmatpush.msra.mxu1 %v6179_v42  ;;  %v6182_v37 = vld [vmem:[#allocation6 + $0x298] sm:$0xff] }
 0x24c   :  { %9247 = vst [vmem:[#allocation29_spill] sm:$0xff] %v6167_v27  ;;  %1585 = vmatpush.msra.mxu3 %v6182_v37  ;;  %v6185_v27 = vld [vmem:[#allocation6 + $0x1f0] sm:$0xff] }
 0x24d   :  { %9248 = vst [vmem:[#allocation30_spill] sm:$0xff] %v6170_v40  ;;  %1514 = vmatpush.msrb.mxu0 %v6185_v27  ;;  %v6188_v40 = vld [vmem:[#allocation6 + $0x1f8] sm:$0xff] }
 0x24e   :  { %9249 = vst [vmem:[#allocation126_spill] sm:$0xff] %v6173_v7  ;;  %1554 = vmatpush.msra.mxu2 %v6188_v40  ;;  %v6191_v7 = vld [vmem:[#allocation6 + $0x270] sm:$0xff] }
 0x24f   :  { %9250 = vst [vmem:[#allocation127_spill] sm:$0xff] %v6176_v13  ;;  %1546 = vmatpush.msra.mxu1 %v6191_v7  ;;  %v6194_v13 = vld [vmem:[#allocation6 + $0x278] sm:$0xff] }
 0x250   :  { %9251 = vst [vmem:[#allocation128_spill] sm:$0xff] %v6179_v42  ;;  %1586 = vmatpush.msra.mxu3 %v6194_v13  ;;  %v6197_v42 = vld [vmem:[#allocation6 + $0x1d0] sm:$0xff] }
 0x251   :  { %9252 = vst [vmem:[#allocation129_spill] sm:$0xff] %v6182_v37  ;;  %1515 = vmatpush.msrb.mxu0 %v6197_v42  ;;  %v6200_v37 = vld [vmem:[#allocation6 + $0x1d8] sm:$0xff] }
 0x252   :  { %9253 = vst [vmem:[#allocation130_spill] sm:$0xff] %v6185_v27  ;;  %1555 = vmatpush.msra.mxu2 %v6200_v37  ;;  %v6203_v27 = vld [vmem:[#allocation6 + $0x250] sm:$0xff] }
 0x253   :  { %9254 = vst [vmem:[#allocation131_spill] sm:$0xff] %v6188_v40  ;;  %1547 = vmatpush.msra.mxu1 %v6203_v27  ;;  %v6206_v40 = vld [vmem:[#allocation6 + $0x258] sm:$0xff] }
 0x254   :  { %9255 = vst [vmem:[#allocation132_spill] sm:$0xff] %v6191_v7  ;;  %1587 = vmatpush.msra.mxu3 %v6206_v40  ;;  %v6209_v7 = vld [vmem:[#allocation6 + $0x1b0] sm:$0xff] }
 0x255   :  { %9256 = vst [vmem:[#allocation133_spill] sm:$0xff] %v6194_v13  ;;  %1516 = vmatpush.msrb.mxu0 %v6209_v7  ;;  %v6212_v13 = vld [vmem:[#allocation6 + $0x1b8] sm:$0xff] }
 0x256   :  { %9257 = vst [vmem:[#allocation134_spill] sm:$0xff] %v6197_v42  ;;  %1556 = vmatpush.msra.mxu2 %v6212_v13  ;;  %v6215_v42 = vld [vmem:[#allocation6 + $0x230] sm:$0xff] }
 0x257   :  { %9258 = vst [vmem:[#allocation135_spill] sm:$0xff] %v6200_v37  ;;  %1548 = vmatpush.msra.mxu1 %v6215_v42  ;;  %v6218_v37 = vld [vmem:[#allocation6 + $0x238] sm:$0xff] }
 0x258   :  { %9259 = vst [vmem:[#allocation136_spill] sm:$0xff] %v6203_v27  ;;  %1588 = vmatpush.msra.mxu3 %v6218_v37  ;;  %v6221_v27 = vld [vmem:[#allocation6 + $0x190] sm:$0xff] }
 0x259   :  { %9260 = vst [vmem:[#allocation137_spill] sm:$0xff] %v6206_v40  ;;  %1517 = vmatpush.msrb.mxu0 %v6221_v27  ;;  %v6224_v40 = vld [vmem:[#allocation6 + $0x198] sm:$0xff] }
 0x25a   :  { %9261 = vst [vmem:[#allocation138_spill] sm:$0xff] %v6209_v7  ;;  %1557 = vmatpush.msra.mxu2 %v6224_v40  ;;  %v6227_v7 = vld [vmem:[#allocation6 + $0x210] sm:$0xff]  ;;  %v1134_v50 = vpop.f32.mrf.mxu3 }
 0x25b   :  { %9262 = vst [vmem:[#allocation139_spill] sm:$0xff] %v6212_v13  ;;  %1549 = vmatpush.msra.mxu1 %v6227_v7  ;;  %v6230_v13 = vld [vmem:[#allocation6 + $0x218] sm:$0xff] }
 0x25c   :  { %9263 = vst [vmem:[#allocation140_spill] sm:$0xff] %v6215_v42  ;;  %1589 = vmatpush.msra.mxu3 %v6230_v13  ;;  %v6233_v42 = vld [vmem:[#allocation6 + $0x170] sm:$0xff] }
 0x25d   :  { %9264 = vst [vmem:[#allocation141_spill] sm:$0xff] %v6218_v37  ;;  %1518 = vmatpush.msrb.mxu0 %v6233_v42  ;;  %v6236_v37 = vld [vmem:[#allocation6 + $0x178] sm:$0xff] }
 0x25e   :  { %9265 = vst [vmem:[#allocation142_spill] sm:$0xff] %v6221_v27  ;;  %1558 = vmatpush.msra.mxu2 %v6236_v37  ;;  %v6239_v27 = vld [vmem:[#allocation6 + $0x150] sm:$0xff] }
 0x25f   :  { %9266 = vst [vmem:[#allocation143_spill] sm:$0xff] %v6224_v40  ;;  %1519 = vmatpush.msrb.mxu0 %v6239_v27  ;;  %v6242_v40 = vld [vmem:[#allocation6 + $0x158] sm:$0xff] }
 0x260   :  { %9267 = vst [vmem:[#allocation144_spill] sm:$0xff] %v6227_v7  ;;  %1559 = vmatpush.msra.mxu2 %v6242_v40  ;;  %v6245_v7 = vld [vmem:[#allocation6 + $0x130] sm:$0xff] }
 0x261   :  { %9268 = vst [vmem:[#allocation145_spill] sm:$0xff] %v6230_v13  ;;  %1520 = vmatpush.msrb.mxu0 %v6245_v7  ;;  %v6248_v13 = vld [vmem:[#allocation6 + $0x138] sm:$0xff] }
 0x262   :  { %9269 = vst [vmem:[#allocation146_spill] sm:$0xff] %v6233_v42  ;;  %1560 = vmatpush.msra.mxu2 %v6248_v13  ;;  %v6251_v42 = vld [vmem:[#allocation6 + $0x110] sm:$0xff]  ;;  %v1214_v19 = vpop.f32.mrf.mxu3 }
 0x263   :  { %9270 = vst [vmem:[#allocation147_spill] sm:$0xff] %v6236_v37  ;;  %1521 = vmatpush.msrb.mxu0 %v6251_v42  ;;  %v6254_v37 = vld [vmem:[#allocation6 + $0x118] sm:$0xff] }
 0x264   :  { %9271 = vst [vmem:[#allocation148_spill] sm:$0xff] %v6239_v27  ;;  %1561 = vmatpush.msra.mxu2 %v6254_v37  ;;  %v6257_v27 = vld [vmem:[#allocation6 + $0xf0] sm:$0xff] }
 0x265   :  { %9272 = vst [vmem:[#allocation149_spill] sm:$0xff] %v6242_v40  ;;  %1522 = vmatpush.msrb.mxu0 %v6257_v27  ;;  %v6260_v40 = vld [vmem:[#allocation6 + $0xf8] sm:$0xff] }
 0x266   :  { %9273 = vst [vmem:[#allocation150_spill] sm:$0xff] %v6245_v7  ;;  %1562 = vmatpush.msra.mxu2 %v6260_v40  ;;  %v6263_v7 = vld [vmem:[#allocation6 + $0xd0] sm:$0xff] }
 0x267   :  { %9274 = vst [vmem:[#allocation151_spill] sm:$0xff] %v6248_v13  ;;  %1523 = vmatpush.msrb.mxu0 %v6263_v7  ;;  %v6266_v13 = vld [vmem:[#allocation6 + $0xd8] sm:$0xff] }
 0x268   :  { %9275 = vst [vmem:[#allocation152_spill] sm:$0xff] %v6251_v42  ;;  %1563 = vmatpush.msra.mxu2 %v6266_v13  ;;  %v6269_v42 = vld [vmem:[#allocation6 + $0xb0] sm:$0xff] }
 0x269   :  { %9276 = vst [vmem:[#allocation153_spill] sm:$0xff] %v6254_v37  ;;  %1524 = vmatpush.msrb.mxu0 %v6269_v42  ;;  %v6272_v37 = vld [vmem:[#allocation6 + $0xb8] sm:$0xff] }
 0x26a   :  { %9277 = vst [vmem:[#allocation154_spill] sm:$0xff] %v6257_v27  ;;  %1564 = vmatpush.msra.mxu2 %v6272_v37  ;;  %v6275_v27 = vld [vmem:[#allocation6 + $0x90] sm:$0xff] }
 0x26b   :  { %9278 = vst [vmem:[#allocation155_spill] sm:$0xff] %v6260_v40  ;;  %1525 = vmatpush.msrb.mxu0 %v6275_v27  ;;  %v6278_v40 = vld [vmem:[#allocation6 + $0x98] sm:$0xff] }
 0x26c   :  { %9279 = vst [vmem:[#allocation156_spill] sm:$0xff] %v6263_v7  ;;  %1565 = vmatpush.msra.mxu2 %v6278_v40  ;;  %v6281_v7 = vld [vmem:[#allocation6 + $0x70] sm:$0xff]  ;;  %v1074_v5 = vpop.f32.mrf.mxu0 }
 0x26d   :  { %9280 = vst [vmem:[#allocation157_spill] sm:$0xff] %v6266_v13  ;;  %1526 = vmatpush.msrb.mxu0 %v6281_v7  ;;  %v6284_v13 = vld [vmem:[#allocation6 + $0x78] sm:$0xff] }
 0x26e   :  { %9281 = vst [vmem:[#allocation158_spill] sm:$0xff] %v6269_v42  ;;  %1566 = vmatpush.msra.mxu2 %v6284_v13  ;;  %v6287_v42 = vld [vmem:[#allocation6 + $0x50] sm:$0xff] }
 0x26f   :  { %9282 = vst [vmem:[#allocation159_spill] sm:$0xff] %v6272_v37  ;;  %1527 = vmatpush.msrb.mxu0 %v6287_v42  ;;  %v6290_v37 = vld [vmem:[#allocation6 + $0x58] sm:$0xff] }
 0x270   :  { %9283 = vst [vmem:[#allocation160_spill] sm:$0xff] %v6275_v27  ;;  %1567 = vmatpush.msra.mxu2 %v6290_v37  ;;  %v6293_v27 = vld [vmem:[#allocation6 + $0x30] sm:$0xff] }
 0x271   :  { %9284 = vst [vmem:[#allocation161_spill] sm:$0xff] %v6278_v40  ;;  %1528 = vmatpush.msrb.mxu0 %v6293_v27  ;;  %v6296_v40 = vld [vmem:[#allocation6 + $0x38] sm:$0xff] }
 0x272   :  { %9285 = vst [vmem:[#allocation162_spill] sm:$0xff] %v6281_v7  ;;  %1568 = vmatpush.msra.mxu2 %v6296_v40  ;;  %v6299_v7 = vld [vmem:[#allocation6 + $0x10] sm:$0xff]  ;;  %v1114_v31 = vpop.f32.mrf.mxu2 }
 0x273   :  { %9286 = vst [vmem:[#allocation163_spill] sm:$0xff] %v6284_v13  ;;  %1529 = vmatpush.msrb.mxu0 %v6299_v7  ;;  %v6302_v13 = vld [vmem:[#allocation6 + $0x18] sm:$0xff] }
 0x274   :  { %9287 = vst [vmem:[#allocation164_spill] sm:$0xff] %v6287_v42  ;;  %1569 = vmatpush.msra.mxu2 %v6302_v13  ;;  %v1094_v42 = vpop.f32.mrf.mxu1 }
 0x275   :  { %9288 = vst [vmem:[#allocation165_spill] sm:$0xff] %v6290_v37  ;;  %v1075_v37 = vadd.f32 %v1074_v5, %v5707_v2 }
 0x276   :  { %9289 = vst [vmem:[#allocation166_spill] sm:$0xff] %v6293_v27 }
 0x277   :  { %9290 = vst [vmem:[#allocation167_spill] sm:$0xff] %v6296_v40  ;;  %v1095_v52 = vadd.f32 %v1094_v42, %v1075_v37  ;;  %v1115_v40 = vadd.f32 %v1114_v31, %v5710_v16 }
 0x278   :  { %9291 = vst [vmem:[#allocation168_spill] sm:$0xff] %v6299_v7  ;;  %v193_v7 = vadd.f32 %v9293_v30, %v5342_v29  ;;  %v9294_v30 = vld [vmem:[#allocation57_spill] sm:$0xff] }
 0x279   :  { %9292 = vst [vmem:[#allocation169_spill] sm:$0xff] %v6302_v13  ;;  %v3649_v27 = vmul.f32 -1.442695, %v1095_v52  ;;  %v1135_v32 = vadd.f32 %v1134_v50, %v1115_v40  ;;  %v275_v40 = vadd.f32 %v9294_v30, %v9145_v34 }
 0x27b   :  { %3752 = vpow2.f32 %v3649_v27  ;;  %v3650_v53 = vmul.f32 -1.442695, %v1135_v32  ;;  %v1194_v5 = vpop.f32.mrf.mxu2  ;;  %v1154_v27 = vpop.f32.mrf.mxu0 }
 0x27c   :  { %v1174_v62 = vpop.f32.mrf.mxu1  ;;  %v1195_v52 = vadd.f32 %v1194_v5, %v5715_v55 }
 0x27d   :  { %3754 = vpow2.f32 %v3650_v53  ;;  %v1364_v50 = vpop.f32.mrf.mxu3  ;;  %v1155_v53 = vadd.f32 %v1154_v27, %v5720_v1 }
 0x27e   :  { %v1215_v42 = vadd.f32 %v1214_v19, %v1195_v52 }
 0x27f   :  { %v1175_v5 = vadd.f32 %v1174_v62, %v1155_v53 }
 0x280   :  { %v3651_v32 = vmul.f32 -1.442695, %v1215_v42 }
 0x281   :  { %v3753_v48 = vpop.eup %3752 }
 0x282   :  { %v1220_v60 = vadd.f32 1.0, %v3753_v48 }
 0x283   :  { %v3755_v37 = vpop.eup %3754 }
 0x284   :  { %v1324_v23 = vpop.f32.mrf.mxu1  ;;  %3756 = vrcp.f32 %v1220_v60  ;;  %v1239_v31 = vadd.f32 1.0, %v3755_v37  ;;  %v1232_v42 = vand.u32 2147483648, %v1220_v60  ;;  %vm1226_vm6 = vweird.f32 %v1220_v60 }
 0x285   :  { %v1368_v13 = vadd.f32 %v1324_v23, %v193_v7  ;;  %v1370_v23 = vadd.f32 %v1364_v50, %v275_v40  ;;  %v1230_v27 = vand.u32 2147483647, %v1220_v60  ;;  %v9295_v50 = vld [vmem:[#allocation31_spill] sm:$0xff] }
 0x286   :  { %v152_v40 = vadd.f32 %v9295_v50, %v9148_v59  ;;  %v1251_v62 = vand.u32 2147483648, %v1239_v31  ;;  %v1249_v53 = vand.u32 2147483647, %v1239_v31  ;;  %vm1245_vm9 = vweird.f32 %v1239_v31 }
 0x287   :  { %v3653_v2 = vmul.f32 -1.442695, %v1368_v13  ;;  %v3654_v16 = vmul.f32 -1.442695, %v1370_v23  ;;  %vm1231_vm10 = vcmp.eq.f32.partialorder %v1230_v27, 8.507059e+37 }
 0x288   :  { %vm1250_vm12 = vcmp.eq.f32.partialorder %v1249_v53, 8.507059e+37 }
 0x289   :  { %3758 = vpow2.f32 %v3653_v2 }
 0x28a   :  { %v3757_v29 = vpop.eup %3756  ;;  %3760 = vrcp.f32 %v1239_v31 }
 0x28b   :  { %v1222_v48 = vmul.f32 %v3757_v29, %v1220_v60  ;;  %3762 = vpow2.f32 %v3651_v32  ;;  %vm1227_vm5 = vweird.f32 %v3757_v29  ;;  %v1233_v60 = vor.u32 1.1754944e-38, %v1232_v42 }
 0x28c   :  { %3764 = vtanh.f32 %v1175_v5  ;;  %vm6317_vm7 = vmor %vm1226_vm6, %vm1227_vm5  ;;  %v1252_v5 = vor.u32 1.1754944e-38, %v1251_v62 }
 0x28d   :  { %v1223_v7 = vsub.f32 1.0, %v1222_v48  ;;  %3766 = vpow2.f32 %v3654_v16  ;;  %v1304_v23 = vpop.f32.mrf.mxu0 }
 0x28e   :  { %v1367_v16 = vadd.f32 %v1304_v23, %v152_v40 }
 0x28f   :  { %v3759_v13 = vpop.eup %3758  ;;  %v1224_v55 = vmul.f32 %v3757_v29, %v1223_v7 }
 0x290   :  { %v3761_v19 = vpop.eup %3760  ;;  %v6313_v14 = vadd.f32 1.0, %v3759_v13 }
 0x291   :  { %v3763_v52 = vpop.eup %3762  ;;  %v1241_v2 = vmul.f32 %v3761_v19, %v1239_v31  ;;  %v1225_v37 = vadd.f32 %v3757_v29, %v1224_v55  ;;  %vm1246_vm8 = vweird.f32 %v3761_v19 }
 0x292   :  { %v1259_v30 = vadd.f32 1.0, %v3763_v52  ;;  %v3765_v13 = vpop.eup %3764  ;;  %vm1247_vm11 = vmor %vm1245_vm9, %vm1246_vm8  ;;  %vm1399_vm2 = vweird.f32 %v6313_v14 }
 0x293   :  { %v1242_v34 = vsub.f32 1.0, %v1241_v2  ;;  %v1229_v48 = vsel %vm6317_vm7, %v3757_v29, %v1225_v37  ;;  %v3652_v2 = vmul.f32 -1.442695, %v1367_v16  ;;  %v3767_v50 = vpop.eup %3766 }
 0x294   :  { %3768 = vrcp.f32 %v1259_v30  ;;  %v1234_v52 = vsel %vm1231_vm10, %v1233_v60, %v1229_v48  ;;  %v6331_v32 = vadd.f32 1.0, %v3767_v50  ;;  %v1271_v53 = vand.u32 2147483648, %v1259_v30 }
 0x295   :  { %v1243_v55 = vmul.f32 %v3761_v19, %v1242_v34  ;;  %3770 = vrcp.f32 %v6313_v14  ;;  %v1276_v42 = vmul.f32 %v3765_v13, %v1234_v52  ;;  %vm1265_vm14 = vweird.f32 %v1259_v30 }
 0x296   :  { %3772 = vpow2.f32 %v3652_v2  ;;  %v9298_v2 = vld [vmem:[#allocation56_spill] sm:$0xff]  ;;  %vm1419_vm10 = vweird.f32 %v6331_v32 }
 0x297   :  { %v1244_v7 = vadd.f32 %v3761_v19, %v1243_v55  ;;  %v1269_v55 = vand.u32 2147483647, %v1259_v30  ;;  %v234_v50 = vadd.f32 %v9298_v2, %v5421_v47  ;;  %v9307_v2 = vld [vmem:[#allocation54_spill] sm:$0xff] }
 0x299   :  { %v1248_v59 = vsel %vm1247_vm11, %v3761_v19, %v1244_v7  ;;  %vm1270_vm0 = vcmp.eq.f32.partialorder %v1269_v55, 8.507059e+37 }
 0x29a   :  { %v3769_v34 = vpop.eup %3768  ;;  %v1253_v1 = vsel %vm1250_vm12, %v1252_v5, %v1248_v59  ;;  %v1344_v5 = vpop.f32.mrf.mxu2 }
 0x29b   :  { %v6324_v29 = vpop.eup %3770  ;;  %v1275_v37 = vmul.f32 %v1253_v1, %v5740_v63  ;;  %v1261_v40 = vmul.f32 %v3769_v34, %v1259_v30  ;;  %vm1266_vm13 = vweird.f32 %v3769_v34  ;;  %v1272_v63 = vor.u32 1.1754944e-38, %v1271_v53 }
 0x29c   :  { %v1395_v62 = vmul.f32 %v6324_v29, %v6313_v14  ;;  %v3773_v59 = vpop.eup %3772  ;;  %vm1267_vm15 = vmor %vm1265_vm14, %vm1266_vm13  ;;  %v1369_v30 = vadd.f32 %v1344_v5, %v234_v50  ;;  %vm1400_vm1 = vweird.f32 %v6324_v29  ;;  %v9306_v5 = vld [vmem:[#allocation50_spill] sm:$0xff]  ;;  %v6475_v50 = vld [vmem:[#allocation3 + $0xa0] sm:$0xff] }
 0x29d   :  { %v6327_v31 = vadd.f32 %v1276_v42, %v1275_v37  ;;  %v1262_v27 = vsub.f32 1.0, %v1261_v40  ;;  %v1374_v48 = vadd.f32 1.0, %v3773_v59  ;;  %vm6351_vm3 = vmor %vm1399_vm2, %vm1400_vm1 }
 0x29e   :  { %v1396_v1 = vsub.f32 1.0, %v1395_v62 }
 0x29f   :  { %3774 = vtanh.f32 %v6327_v31  ;;  %v1263_v19 = vmul.f32 %v3769_v34, %v1262_v27  ;;  %v1405_v27 = vand.u32 2147483648, %v6313_v14  ;;  %v1386_v53 = vand.u32 2147483648, %v1374_v48 }
 0x2a0   :  { %3776 = vrcp.f32 %v6331_v32  ;;  %v1397_v13 = vmul.f32 %v6324_v29, %v1396_v1  ;;  %vm1380_vm5 = vweird.f32 %v1374_v48 }
 0x2a1   :  { %v1264_v23 = vadd.f32 %v3769_v34, %v1263_v19  ;;  %3778 = vrcp.f32 %v1374_v48  ;;  %v1406_v55 = vor.u32 1.1754944e-38, %v1405_v27  ;;  %v6487_v27 = vld [vmem:[#allocation3 + $0x90] sm:$0xff] }
 0x2a2   :  { %v1398_v40 = vadd.f32 %v6324_v29, %v1397_v13  ;;  %3780 = vtanh.f32 %v1369_v30  ;;  %v6467_v13 = vld [vmem:[#allocation3 + $0xc0] sm:$0xff] }
 0x2a3   :  { %v1268_v60 = vsel %vm1267_vm15, %v3769_v34, %v1264_v23  ;;  %v9309_v30 = vld [vmem:[#allocation60_spill] sm:$0xff] }
 0x2a4   :  { %v1273_v7 = vsel %vm1270_vm0, %v1272_v63, %v1268_v60  ;;  %v6459_v60 = vld [vmem:[#allocation3 + $0xe0] sm:$0xff] }
 0x2a5   :  { %v3775_v16 = vpop.eup %3774 }
 0x2a6   :  { %v1279_v52 = vmul.f32 %v3775_v16, %v1273_v7  ;;  %v6338_v37 = vpop.eup %3776  ;;  %v6463_v16 = vld [vmem:[#allocation3 + $0xf0] sm:$0xff]  ;;  %v9305_v7 = vld [vmem:[#allocation49_spill] sm:$0xff] }
 0x2a7   :  { %v3779_v42 = vpop.eup %3778  ;;  %v1415_v62 = vmul.f32 %v6338_v37, %v6331_v32  ;;  %vm1420_vm9 = vweird.f32 %v6338_v37 }
 0x2a8   :  { %1470 = vmatmul.f32.vlgmr.msrb.gmra.mxu1 %v1279_v52  ;;  %1510 = vmatmul.f32.vlgmr.msrb.gmra.mxu3 %v1279_v52  ;;  %v1376_v34 = vmul.f32 %v3779_v42, %v1374_v48  ;;  %vm1381_vm4 = vweird.f32 %v3779_v42  ;;  %vm1421_vm11 = vmor %vm1419_vm10, %vm1420_vm9 }
 0x2a9   :  { %1684 = vmatpush.msrb.mxu1 %v5758_v3  ;;  %1724 = vmatpush.msrb.mxu3 %v5761_v4  ;;  %v1403_v3 = vand.u32 2147483647, %v6313_v14  ;;  %v1416_v23 = vsub.f32 1.0, %v1415_v62  ;;  %vm1382_vm7 = vmor %vm1380_vm5, %vm1381_vm4  ;;  %v9311_v62 = vld [vmem:[#allocation65_spill] sm:$0xff]  ;;  %v6495_v4 = vld [vmem:[#allocation3 + $0x70] sm:$0xff] }
 0x2aa   :  { %v1377_v19 = vsub.f32 1.0, %v1376_v34  ;;  %v6483_v34 = vld [vmem:[#allocation3 + $0x80] sm:$0xff] }
 0x2ab   :  { %1685 = vmatpush.msrb.mxu1 %v5771_v49  ;;  %1725 = vmatpush.msrb.mxu3 %v5774_v9  ;;  %v1384_v49 = vand.u32 2147483647, %v1374_v48  ;;  %v1402_v9 = vsel %vm6351_vm3, %v6324_v29, %v1398_v40  ;;  %vm1404_vm6 = vcmp.eq.f32.partialorder %v1403_v3, 8.507059e+37  ;;  %v3781_v29 = vpop.eup %3780  ;;  %v1417_v63 = vmul.f32 %v6338_v37, %v1416_v23  ;;  %v9310_v40 = vld [vmem:[#allocation62_spill] sm:$0xff]  ;;  %v6507_v23 = vld [vmem:[#allocation3 + $0x20] sm:$0xff] }
 0x2ac   :  { %v1378_v59 = vmul.f32 %v3779_v42, %v1377_v19  ;;  %v6491_v19 = vld [vmem:[#allocation3 + $0x60] sm:$0xff]  ;;  %v9312_v3 = vld [vmem:[#allocation66_spill] sm:$0xff] }
 0x2ad   :  { %1686 = vmatpush.msrb.mxu1 %v5781_v25  ;;  %1726 = vmatpush.msrb.mxu3 %v5784_v28  ;;  %v1387_v25 = vor.u32 1.1754944e-38, %v1386_v53  ;;  %v1407_v28 = vsel %vm1404_vm6, %v1406_v55, %v1402_v9  ;;  %vm1385_vm8 = vcmp.eq.f32.partialorder %v1384_v49, 8.507059e+37  ;;  %v9313_v53 = vld [vmem:[#allocation69_spill] sm:$0xff]  ;;  %v9314_v49 = vld [vmem:[#allocation70_spill] sm:$0xff] }
 0x2ae   :  { %v1379_v14 = vadd.f32 %v3779_v42, %v1378_v59  ;;  %v6499_v59 = vld [vmem:[#allocation3 + $0x40] sm:$0xff]  ;;  %v6503_v9 = vld [vmem:[#allocation3 + $0x50] sm:$0xff]  ;;  %v9315_v55 = vld [vmem:[#allocation73_spill] sm:$0xff] }
 0x2af   :  { %1687 = vmatpush.msrb.mxu1 %v5788_v41  ;;  %1727 = vmatpush.msrb.mxu3 %v5791_v45  ;;  %v1429_v45 = vmul.f32 %v1407_v28, %v5808_v61  ;;  %v9317_v28 = vld [vmem:[#allocation79_spill] sm:$0xff] }
 0x2b0   :  { %1550 = vmatmul.f32.vlgmr.msra.gmra.mxu1 %v1279_v52  ;;  %1590 = vmatmul.f32.vlgmr.msra.gmra.mxu3 %v1279_v52  ;;  %v1383_v1 = vsel %vm1382_vm7, %v3779_v42, %v1379_v14  ;;  %v6471_v52 = vld [vmem:[#allocation3 + $0xd0] sm:$0xff] }
 0x2b1   :  { %1688 = vmatpush.msrb.mxu1 %v5795_v56  ;;  %1728 = vmatpush.msrb.mxu3 %v5798_v33  ;;  %v1388_v41 = vsel %vm1385_vm8, %v1387_v25, %v1383_v1  ;;  %v1418_v33 = vadd.f32 %v6338_v37, %v1417_v63  ;;  %v6479_v42 = vld [vmem:[#allocation3 + $0xb0] sm:$0xff]  ;;  %v6515_v1 = vld [vmem:[#allocation3] sm:$0xff]  ;;  %v9319_v63 = vld [vmem:[#allocation85_spill] sm:$0xff] }
 0x2b2   :  { %v1430_v48 = vmul.f32 %v3781_v29, %v1388_v41  ;;  %v9316_v14 = vld [vmem:[#allocation74_spill] sm:$0xff] }
 0x2b3   :  { %1689 = vmatpush.msrb.mxu1 %v5802_v26  ;;  %1729 = vmatpush.msrb.mxu3 %v5805_v11  ;;  %v1425_v26 = vand.u32 2147483648, %v6331_v32  ;;  %v1423_v11 = vand.u32 2147483647, %v6331_v32  ;;  %v1422_v61 = vsel %vm1421_vm11, %v6338_v37, %v1418_v33  ;;  %v6455_v32 = vld [vmem:[#allocation3 + $0x110] sm:$0xff]  ;;  %v9308_v37 = vld [vmem:[#allocation55_spill] sm:$0xff] }
 0x2b4   :  { %v6370_v56 = vadd.f32 %v1430_v48, %v1429_v45  ;;  %v6511_v25 = vld [vmem:[#allocation3 + $0x30] sm:$0xff]  ;;  %v9321_v45 = vld [vmem:[#allocation89_spill] sm:$0xff] }
 0x2b5   :  { %1690 = vmatpush.msrb.mxu1 %v5812_v24  ;;  %1730 = vmatpush.msrb.mxu3 %v5815_v44  ;;  %v1426_v24 = vor.u32 1.1754944e-38, %v1425_v26  ;;  %vm1424_vm12 = vcmp.eq.f32.partialorder %v1423_v11, 8.507059e+37  ;;  %v9318_v29 = vld [vmem:[#allocation82_spill] sm:$0xff]  ;;  %v9322_v48 = vld [vmem:[#allocation13_spill] sm:$0xff]  ;;  %v9324_v26 = vld [vmem:[#allocation39_spill] sm:$0xff] }
 0x2b6   :  { %3782 = vtanh.f32 %v6370_v56  ;;  %v9320_v41 = vld [vmem:[#allocation86_spill] sm:$0xff] }
 0x2b7   :  { %1691 = vmatpush.msrb.mxu1 %v5822_v17  ;;  %1731 = vmatpush.msrb.mxu3 %v5825_v10  ;;  %v1427_v17 = vsel %vm1424_vm12, %v1426_v24, %v1422_v61  ;;  %v9323_v33 = vld [vmem:[#allocation38_spill] sm:$0xff]  ;;  %v9326_v61 = vld [vmem:[#allocation43_spill] sm:$0xff]  ;;  %v9327_v24 = vld [vmem:[#allocation93_spill] sm:$0xff] }
 0x2b8   :  { %v9325_v11 = vld [vmem:[#allocation90_spill] sm:$0xff] }
 0x2b9   :  { %1692 = vmatpush.msrb.mxu1 %v5829_v15  ;;  %1732 = vmatpush.msrb.mxu3 %v5832_v18  ;;  %v6393_v15 = vld [vmem:[#allocation3 + $0x1e0] sm:$0xff]  ;;  %v6396_v18 = vld [vmem:[#allocation3 + $0x1f0] sm:$0xff] }
 0x2bb   :  { %1693 = vmatpush.msrb.mxu1 %v5835_v22  ;;  %1733 = vmatpush.msrb.mxu3 %v5838_v20  ;;  %v6401_v22 = vld [vmem:[#allocation3 + $0x1c0] sm:$0xff]  ;;  %v6404_v20 = vld [vmem:[#allocation3 + $0x1d0] sm:$0xff] }
 0x2bc   :  { %v3783_v44 = vpop.eup %3782 }
 0x2bd   :  { %1694 = vmatpush.msrb.mxu1 %v5843_v58  ;;  %1734 = vmatpush.msrb.mxu3 %v5846_v46  ;;  %v6387_v10 = vmul.f32 %v3783_v44, %v1427_v17  ;;  %v6409_v58 = vld [vmem:[#allocation3 + $0x1a0] sm:$0xff]  ;;  %v6412_v46 = vld [vmem:[#allocation3 + $0x1b0] sm:$0xff] }
 0x2be   :  { %v9328_v44 = vld [vmem:[#allocation44_spill] sm:$0xff]  ;;  %v9329_v17 = vld [vmem:[#allocation94_spill] sm:$0xff] }
 0x2bf   :  { %1695 = vmatpush.msrb.mxu1 %v5849_v36  ;;  %1735 = vmatpush.msrb.mxu3 %v5852_v57  ;;  %v6417_v36 = vld [vmem:[#allocation3 + $0x180] sm:$0xff]  ;;  %v6420_v57 = vld [vmem:[#allocation3 + $0x190] sm:$0xff] }
 0x2c0   :  { %1450 = vmatmul.f32.vlgmr.msra.gmra.mxu0 %v6387_v10  ;;  %1490 = vmatmul.f32.vlgmr.msrb.gmra.mxu2 %v6387_v10 }
 0x2c1   :  { %1664 = vmatpush.msra.mxu0 %v6393_v15  ;;  %1704 = vmatpush.msrb.mxu2 %v6396_v18 }
 0x2c2   :  { %1696 = vmatpush.msrb.mxu1 %v5859_v39  ;;  %1736 = vmatpush.msrb.mxu3 %v5862_v54  ;;  %v6427_v39 = vld [vmem:[#allocation3 + $0x160] sm:$0xff]  ;;  %v6431_v54 = vld [vmem:[#allocation3 + $0x170] sm:$0xff] }
 0x2c3   :  { %1665 = vmatpush.msra.mxu0 %v6401_v22  ;;  %1705 = vmatpush.msrb.mxu2 %v6404_v20 }
 0x2c4   :  { %1697 = vmatpush.msrb.mxu1 %v5867_v51  ;;  %1737 = vmatpush.msrb.mxu3 %v5870_v6  ;;  %v6435_v51 = vld [vmem:[#allocation3 + $0x140] sm:$0xff]  ;;  %v6439_v6 = vld [vmem:[#allocation3 + $0x150] sm:$0xff] }
 0x2c5   :  { %1666 = vmatpush.msra.mxu0 %v6409_v58  ;;  %1706 = vmatpush.msrb.mxu2 %v6412_v46 }
 0x2c6   :  { %1698 = vmatpush.msrb.mxu1 %v5875_v35  ;;  %1738 = vmatpush.msrb.mxu3 %v5878_v0  ;;  %v6443_v35 = vld [vmem:[#allocation3 + $0x120] sm:$0xff]  ;;  %v6447_v0 = vld [vmem:[#allocation3 + $0x130] sm:$0xff] }
 0x2c7   :  { %1667 = vmatpush.msra.mxu0 %v6417_v36  ;;  %1707 = vmatpush.msrb.mxu2 %v6420_v57 }
 0x2c8   :  { %1699 = vmatpush.msrb.mxu1 %v5883_v8  ;;  %1739 = vmatpush.msrb.mxu3 %v5886_v21  ;;  %v9301_v8 = vld [vmem:[#allocation40_spill] sm:$0xff] }
 0x2c9   :  { %1530 = vmatmul.f32.vlgmr.msrb.gmra.mxu0 %v6387_v10  ;;  %1570 = vmatmul.f32.vlgmr.msra.gmra.mxu2 %v6387_v10  ;;  %v6451_v21 = vld [vmem:[#allocation3 + $0x100] sm:$0xff] }
 0x2ca   :  { %1668 = vmatpush.msra.mxu0 %v6427_v39  ;;  %1700 = vmatmul.f32.vlgmr.msrb.gmra.mxu1 %v6387_v10 }
 0x2cb   :  { %1708 = vmatpush.msrb.mxu2 %v6431_v54  ;;  %1740 = vmatmul.f32.vlgmr.msrb.gmra.mxu3 %v6387_v10 }
 0x2cc   :  { %1669 = vmatpush.msra.mxu0 %v6435_v51  ;;  %1831 = vmatpush.msra.mxu1 %v5896_v43  ;;  %v9302_v43 = vld [vmem:[#allocation42_spill] sm:$0xff] }
 0x2cd   :  { %1709 = vmatpush.msrb.mxu2 %v6439_v6  ;;  %1871 = vmatpush.msra.mxu3 %v5900_v38  ;;  %v9303_v38 = vld [vmem:[#allocation45_spill] sm:$0xff] }
 0x2ce   :  { %1670 = vmatpush.msra.mxu0 %v6443_v35  ;;  %1832 = vmatpush.msra.mxu1 %v5904_v12  ;;  %v9304_v12 = vld [vmem:[#allocation46_spill] sm:$0xff] }
 0x2cf   :  { %1710 = vmatpush.msrb.mxu2 %v6447_v0  ;;  %1872 = vmatpush.msra.mxu3 %v9301_v8  ;;  %v9331_v8 = vld [vmem:[#allocation98_spill] sm:$0xff] }
 0x2d0   :  { %1671 = vmatpush.msra.mxu0 %v6451_v21  ;;  %1833 = vmatpush.msra.mxu1 %v9302_v43  ;;  %v9332_v43 = vld [vmem:[#allocation48_spill] sm:$0xff] }
 0x2d1   :  { %1711 = vmatpush.msrb.mxu2 %v6455_v32  ;;  %1873 = vmatpush.msra.mxu3 %v9303_v38  ;;  %v9333_v38 = vld [vmem:[#allocation101_spill] sm:$0xff] }
 0x2d2   :  { %1672 = vmatpush.msra.mxu0 %v6459_v60  ;;  %1834 = vmatpush.msra.mxu1 %v9304_v12  ;;  %v9334_v12 = vld [vmem:[#allocation52_spill] sm:$0xff] }
 0x2d3   :  { %1712 = vmatpush.msrb.mxu2 %v6463_v16  ;;  %1874 = vmatpush.msra.mxu3 %v9305_v7  ;;  %v9335_v7 = vld [vmem:[#allocation105_spill] sm:$0xff] }
 0x2d4   :  { %1673 = vmatpush.msra.mxu0 %v6467_v13  ;;  %1835 = vmatpush.msra.mxu1 %v9306_v5  ;;  %v9336_v5 = vld [vmem:[#allocation53_spill] sm:$0xff] }
 0x2d5   :  { %1713 = vmatpush.msrb.mxu2 %v6471_v52  ;;  %1875 = vmatpush.msra.mxu3 %v9307_v2  ;;  %v9337_v2 = vld [vmem:[#allocation106_spill] sm:$0xff] }
 0x2d6   :  { %1674 = vmatpush.msra.mxu0 %v6475_v50  ;;  %1836 = vmatpush.msra.mxu1 %v9308_v37  ;;  %v9338_v37 = vld [vmem:[#allocation58_spill] sm:$0xff] }
 0x2d7   :  { %1714 = vmatpush.msrb.mxu2 %v6479_v42  ;;  %1876 = vmatpush.msra.mxu3 %v9309_v30  ;;  %v9339_v30 = vld [vmem:[#allocation109_spill] sm:$0xff] }
 0x2d8   :  { %1675 = vmatpush.msra.mxu0 %v6483_v34  ;;  %1837 = vmatpush.msra.mxu1 %v9310_v40  ;;  %v9340_v40 = vld [vmem:[#allocation59_spill] sm:$0xff] }
 0x2d9   :  { %1715 = vmatpush.msrb.mxu2 %v6487_v27  ;;  %1877 = vmatpush.msra.mxu3 %v9311_v62  ;;  %v9341_v62 = vld [vmem:[#allocation110_spill] sm:$0xff] }
 0x2da   :  { %1676 = vmatpush.msra.mxu0 %v6491_v19  ;;  %1838 = vmatpush.msra.mxu1 %v9312_v3  ;;  %v9342_v3 = vld [vmem:[#allocation63_spill] sm:$0xff] }
 0x2db   :  { %1716 = vmatpush.msrb.mxu2 %v6495_v4  ;;  %1878 = vmatpush.msra.mxu3 %v9313_v53  ;;  %v9343_v53 = vld [vmem:[#allocation64_spill] sm:$0xff] }
 0x2dc   :  { %1677 = vmatpush.msra.mxu0 %v6499_v59  ;;  %1839 = vmatpush.msra.mxu1 %v9314_v49  ;;  %v9344_v49 = vld [vmem:[#allocation67_spill] sm:$0xff] }
 0x2dd   :  { %1717 = vmatpush.msrb.mxu2 %v6503_v9  ;;  %1879 = vmatpush.msra.mxu3 %v9315_v55  ;;  %v9345_v55 = vld [vmem:[#allocation68_spill] sm:$0xff] }
 0x2de   :  { %1678 = vmatpush.msra.mxu0 %v6507_v23  ;;  %1840 = vmatpush.msra.mxu1 %v9316_v14  ;;  %v9346_v14 = vld [vmem:[#allocation71_spill] sm:$0xff] }
 0x2df   :  { %1718 = vmatpush.msrb.mxu2 %v6511_v25  ;;  %1880 = vmatpush.msra.mxu3 %v9317_v28  ;;  %v9347_v28 = vld [vmem:[#allocation72_spill] sm:$0xff] }
 0x2e0   :  { %1679 = vmatpush.msra.mxu0 %v6515_v1  ;;  %1841 = vmatpush.msra.mxu1 %v9318_v29  ;;  %v9348_v29 = vld [vmem:[#allocation77_spill] sm:$0xff] }
 0x2e1   :  { %1719 = vmatpush.msrb.mxu2 %v9319_v63  ;;  %1680 = vmatmul.f32.vlgmr.msra.gmra.mxu0 %v6387_v10  ;;  %v9349_v63 = vld [vmem:[#allocation78_spill] sm:$0xff] }
 0x2e2   :  { %1720 = vmatmul.f32.vlgmr.msrb.gmra.mxu2 %v6387_v10  ;;  %1881 = vmatpush.msra.mxu3 %v9320_v41  ;;  %v9330_v10 = vld [vmem:[#allocation47_spill] sm:$0xff] }
 0x2e3   :  { %1842 = vmatpush.msra.mxu1 %v9321_v45  ;;  %1811 = vmatpush.msrb.mxu0 %v9322_v48  ;;  %v9350_v41 = vld [vmem:[#allocation83_spill] sm:$0xff]  ;;  %v9351_v45 = vld [vmem:[#allocation84_spill] sm:$0xff] }
 0x2e4   :  { %1882 = vmatpush.msra.mxu3 %v9323_v33  ;;  %1851 = vmatpush.msra.mxu2 %v9324_v26  ;;  %v9352_v48 = vld [vmem:[#allocation87_spill] sm:$0xff]  ;;  %v9353_v33 = vld [vmem:[#allocation88_spill] sm:$0xff] }
 0x2e5   :  { %1843 = vmatpush.msra.mxu1 %v9325_v11  ;;  %1812 = vmatpush.msrb.mxu0 %v9326_v61  ;;  %v9354_v26 = vld [vmem:[#allocation91_spill] sm:$0xff]  ;;  %v9355_v11 = vld [vmem:[#allocation92_spill] sm:$0xff] }
 0x2e6   :  { %1883 = vmatpush.msra.mxu3 %v9327_v24  ;;  %1852 = vmatpush.msra.mxu2 %v9328_v44  ;;  %v9356_v61 = vld [vmem:[#allocation96_spill] sm:$0xff]  ;;  %v9357_v24 = vld [vmem:[#allocation97_spill] sm:$0xff]  ;;  %v9358_v44 = vld [vmem:[#allocation103_spill] sm:$0xff] }
 0x2e7   :  { %1844 = vmatpush.msra.mxu1 %v9329_v17  ;;  %1813 = vmatpush.msrb.mxu0 %v9330_v10  ;;  %v9359_v17 = vld [vmem:[#allocation104_spill] sm:$0xff]  ;;  %v9360_v10 = vld [vmem:[#allocation107_spill] sm:$0xff] }
 0x2e8   :  { %1884 = vmatpush.msra.mxu3 %v9331_v8  ;;  %1853 = vmatpush.msra.mxu2 %v9332_v43  ;;  %v9361_v8 = vld [vmem:[#allocation108_spill] sm:$0xff]  ;;  %v9362_v43 = vld [vmem:[#allocation111_spill] sm:$0xff] }
 0x2e9   :  { %1845 = vmatpush.msra.mxu1 %v9333_v38  ;;  %1814 = vmatpush.msrb.mxu0 %v9334_v12  ;;  %v9363_v38 = vld [vmem:[#allocation112_spill] sm:$0xff]  ;;  %v9364_v12 = vld [vmem:[#allocation118_spill] sm:$0xff] }
 0x2ea   :  { %1885 = vmatpush.msra.mxu3 %v9335_v7  ;;  %1854 = vmatpush.msra.mxu2 %v9336_v5  ;;  %v9365_v7 = vld [vmem:[#allocation119_spill] sm:$0xff]  ;;  %v9366_v5 = vld [vmem:[#allocation121_spill] sm:$0xff] }
 0x2eb   :  { %1846 = vmatpush.msra.mxu1 %v9337_v2  ;;  %1815 = vmatpush.msrb.mxu0 %v9338_v37  ;;  %v9367_v2 = vld [vmem:[#allocation26_spill] sm:$0xff]  ;;  %v9368_v37 = vld [vmem:[#allocation37_spill] sm:$0xff] }
 0x2ec   :  { %1886 = vmatpush.msra.mxu3 %v9339_v30  ;;  %1855 = vmatpush.msra.mxu2 %v9340_v40  ;;  %v9369_v30 = vld [vmem:[#allocation19_spill] sm:$0xff]  ;;  %v9370_v40 = vld [vmem:[#allocation36_spill] sm:$0xff] }
 0x2ed   :  { %1911 = vmatpush.msrb.mxu1 %v9341_v62  ;;  %1816 = vmatpush.msrb.mxu0 %v9343_v53  ;;  %v9371_v62 = vld [vmem:[#allocation17_spill] sm:$0xff]  ;;  %v9373_v53 = vld [vmem:[#allocation20_spill] sm:$0xff] }
 0x2ee   :  { %1951 = vmatpush.msrb.mxu3 %v9342_v3  ;;  %1856 = vmatpush.msra.mxu2 %v9344_v49  ;;  %v9372_v3 = vld [vmem:[#allocation18_spill] sm:$0xff]  ;;  %v9374_v49 = vld [vmem:[#allocation21_spill] sm:$0xff] }
 0x2ef   :  { %1912 = vmatpush.msrb.mxu1 %v9345_v55  ;;  %1817 = vmatpush.msrb.mxu0 %v9347_v28  ;;  %v9375_v55 = vld [vmem:[#allocation22_spill] sm:$0xff]  ;;  %v9377_v28 = vld [vmem:[#allocation24_spill] sm:$0xff] }
 0x2f0   :  { %1952 = vmatpush.msrb.mxu3 %v9346_v14  ;;  %1857 = vmatpush.msra.mxu2 %v9348_v29  ;;  %v9376_v14 = vld [vmem:[#allocation23_spill] sm:$0xff]  ;;  %v9378_v29 = vld [vmem:[#allocation25_spill] sm:$0xff] }
 0x2f1   :  { %1913 = vmatpush.msrb.mxu1 %v9349_v63  ;;  %1818 = vmatpush.msrb.mxu0 %v9351_v45  ;;  %v9379_v63 = vld [vmem:[#allocation27_spill] sm:$0xff]  ;;  %v9381_v45 = vld [vmem:[#allocation29_spill] sm:$0xff] }
 0x2f2   :  { %1953 = vmatpush.msrb.mxu3 %v9350_v41  ;;  %1858 = vmatpush.msra.mxu2 %v9352_v48  ;;  %v9380_v41 = vld [vmem:[#allocation28_spill] sm:$0xff]  ;;  %v9382_v48 = vld [vmem:[#allocation30_spill] sm:$0xff] }
 0x2f3   :  { %1914 = vmatpush.msrb.mxu1 %v9353_v33  ;;  %1819 = vmatpush.msrb.mxu0 %v9355_v11  ;;  %v9383_v33 = vld [vmem:[#allocation126_spill] sm:$0xff]  ;;  %v9385_v11 = vld [vmem:[#allocation128_spill] sm:$0xff] }
 0x2f4   :  { %1954 = vmatpush.msrb.mxu3 %v9354_v26  ;;  %1859 = vmatpush.msra.mxu2 %v9356_v61  ;;  %v9384_v26 = vld [vmem:[#allocation127_spill] sm:$0xff]  ;;  %v9386_v61 = vld [vmem:[#allocation129_spill] sm:$0xff] }
 0x2f5   :  { %1915 = vmatpush.msrb.mxu1 %v9357_v24  ;;  %1820 = vmatpush.msrb.mxu0 %v9359_v17  ;;  %v9387_v24 = vld [vmem:[#allocation130_spill] sm:$0xff]  ;;  %v9389_v17 = vld [vmem:[#allocation132_spill] sm:$0xff] }
 0x2f6   :  { %1955 = vmatpush.msrb.mxu3 %v9358_v44  ;;  %1860 = vmatpush.msra.mxu2 %v9360_v10  ;;  %v9388_v44 = vld [vmem:[#allocation131_spill] sm:$0xff]  ;;  %v9390_v10 = vld [vmem:[#allocation133_spill] sm:$0xff] }
 0x2f7   :  { %1916 = vmatpush.msrb.mxu1 %v9361_v8  ;;  %1821 = vmatpush.msrb.mxu0 %v9363_v38  ;;  %v9391_v8 = vld [vmem:[#allocation134_spill] sm:$0xff]  ;;  %v9393_v38 = vld [vmem:[#allocation136_spill] sm:$0xff] }
 0x2f8   :  { %1956 = vmatpush.msrb.mxu3 %v9362_v43  ;;  %1861 = vmatpush.msra.mxu2 %v9364_v12  ;;  %v9392_v43 = vld [vmem:[#allocation135_spill] sm:$0xff]  ;;  %v9394_v12 = vld [vmem:[#allocation137_spill] sm:$0xff] }
 0x2f9   :  { %1917 = vmatpush.msrb.mxu1 %v9365_v7  ;;  %1822 = vmatpush.msrb.mxu0 %v9367_v2  ;;  %v9395_v7 = vld [vmem:[#allocation138_spill] sm:$0xff]  ;;  %v9397_v2 = vld [vmem:[#allocation140_spill] sm:$0xff] }
 0x2fa   :  { %1957 = vmatpush.msrb.mxu3 %v9366_v5  ;;  %1862 = vmatpush.msra.mxu2 %v9368_v37  ;;  %v9396_v5 = vld [vmem:[#allocation139_spill] sm:$0xff]  ;;  %v9398_v37 = vld [vmem:[#allocation141_spill] sm:$0xff] }
 0x2fb   :  { %1918 = vmatpush.msrb.mxu1 %v9369_v30  ;;  %1823 = vmatpush.msrb.mxu0 %v9371_v62  ;;  %v9399_v30 = vld [vmem:[#allocation142_spill] sm:$0xff]  ;;  %v9401_v62 = vld [vmem:[#allocation144_spill] sm:$0xff] }
 0x2fc   :  { %1958 = vmatpush.msrb.mxu3 %v9370_v40  ;;  %1863 = vmatpush.msra.mxu2 %v9372_v3  ;;  %v9400_v40 = vld [vmem:[#allocation143_spill] sm:$0xff]  ;;  %v9402_v3 = vld [vmem:[#allocation145_spill] sm:$0xff] }
 0x2fd   :  { %1919 = vmatpush.msrb.mxu1 %v9373_v53  ;;  %1824 = vmatpush.msrb.mxu0 %v9375_v55  ;;  %v9403_v53 = vld [vmem:[#allocation146_spill] sm:$0xff]  ;;  %v9405_v55 = vld [vmem:[#allocation148_spill] sm:$0xff] }
 0x2fe   :  { %1959 = vmatpush.msrb.mxu3 %v9374_v49  ;;  %1864 = vmatpush.msra.mxu2 %v9376_v14  ;;  %v9404_v49 = vld [vmem:[#allocation147_spill] sm:$0xff]  ;;  %v9406_v14 = vld [vmem:[#allocation149_spill] sm:$0xff] }
 0x2ff   :  { %1920 = vmatpush.msrb.mxu1 %v9377_v28  ;;  %1825 = vmatpush.msrb.mxu0 %v9379_v63  ;;  %v9407_v28 = vld [vmem:[#allocation150_spill] sm:$0xff]  ;;  %v9409_v63 = vld [vmem:[#allocation152_spill] sm:$0xff] }
 0x300   :  { %1960 = vmatpush.msrb.mxu3 %v9378_v29  ;;  %1865 = vmatpush.msra.mxu2 %v9380_v41  ;;  %v9408_v29 = vld [vmem:[#allocation151_spill] sm:$0xff]  ;;  %v9410_v41 = vld [vmem:[#allocation153_spill] sm:$0xff] }
 0x301   :  { %1921 = vmatpush.msrb.mxu1 %v9381_v45  ;;  %1826 = vmatpush.msrb.mxu0 %v9383_v33  ;;  %v9411_v45 = vld [vmem:[#allocation154_spill] sm:$0xff]  ;;  %v9413_v33 = vld [vmem:[#allocation156_spill] sm:$0xff] }
 0x302   :  { %1961 = vmatpush.msrb.mxu3 %v9382_v48  ;;  %1866 = vmatpush.msra.mxu2 %v9384_v26  ;;  %v9412_v48 = vld [vmem:[#allocation155_spill] sm:$0xff]  ;;  %v9414_v26 = vld [vmem:[#allocation157_spill] sm:$0xff] }
 0x303   :  { %1922 = vmatpush.msrb.mxu1 %v9385_v11  ;;  %1891 = vmatpush.msra.mxu0 %v9387_v24  ;;  %v9415_v11 = vld [vmem:[#allocation158_spill] sm:$0xff]  ;;  %v9417_v24 = vld [vmem:[#allocation160_spill] sm:$0xff] }
 0x304   :  { %1962 = vmatpush.msrb.mxu3 %v9386_v61  ;;  %1931 = vmatpush.msrb.mxu2 %v9388_v44  ;;  %v9416_v61 = vld [vmem:[#allocation159_spill] sm:$0xff]  ;;  %v9418_v44 = vld [vmem:[#allocation161_spill] sm:$0xff] }
 0x305   :  { %1923 = vmatpush.msrb.mxu1 %v9389_v17  ;;  %1892 = vmatpush.msra.mxu0 %v9391_v8  ;;  %v9419_v17 = vld [vmem:[#allocation162_spill] sm:$0xff]  ;;  %v9421_v8 = vld [vmem:[#allocation164_spill] sm:$0xff] }
 0x306   :  { %1963 = vmatpush.msrb.mxu3 %v9390_v10  ;;  %1932 = vmatpush.msrb.mxu2 %v9392_v43  ;;  %v9420_v10 = vld [vmem:[#allocation163_spill] sm:$0xff]  ;;  %v9422_v43 = vld [vmem:[#allocation165_spill] sm:$0xff] }
 0x307   :  { %1924 = vmatpush.msrb.mxu1 %v9393_v38  ;;  %1893 = vmatpush.msra.mxu0 %v9395_v7  ;;  %v9423_v38 = vld [vmem:[#allocation166_spill] sm:$0xff]  ;;  %v9425_v7 = vld [vmem:[#allocation168_spill] sm:$0xff] }
 0x308   :  { %1964 = vmatpush.msrb.mxu3 %v9394_v12  ;;  %1933 = vmatpush.msrb.mxu2 %v9396_v5  ;;  %v9424_v12 = vld [vmem:[#allocation167_spill] sm:$0xff]  ;;  %v9426_v5 = vld [vmem:[#allocation169_spill] sm:$0xff] }
 0x309   :  { %1925 = vmatpush.msrb.mxu1 %v9397_v2  ;;  %1894 = vmatpush.msra.mxu0 %v9399_v30  ;;  %v9427_v30 = vld [vmem:[#allocation32_spill] sm:$0xff] }
 0x30a   :  { %1965 = vmatpush.msrb.mxu3 %v9398_v37  ;;  %1934 = vmatpush.msrb.mxu2 %v9400_v40 }
 0x30b   :  { %1926 = vmatpush.msrb.mxu1 %v9401_v62  ;;  %1895 = vmatpush.msra.mxu0 %v9403_v53 }
 0x30c   :  { %1966 = vmatpush.msrb.mxu3 %v9402_v3  ;;  %1935 = vmatpush.msrb.mxu2 %v9404_v49 }
 0x30d   :  { %1896 = vmatpush.msra.mxu0 %v9405_v55 }
 0x30e   :  { %1936 = vmatpush.msrb.mxu2 %v9406_v14  ;;  %v9428_v14 = vld [vmem:[#allocation33_spill] sm:$0xff] }
 0x30f   :  { %1897 = vmatpush.msra.mxu0 %v9407_v28 }
 0x310   :  { %1937 = vmatpush.msrb.mxu2 %v9408_v29 }
 0x311   :  { %1898 = vmatpush.msra.mxu0 %v9409_v63  ;;  %v9429_v63 = vld [vmem:[#allocation122_spill] sm:$0xff] }
 0x312   :  { %1938 = vmatpush.msrb.mxu2 %v9410_v41  ;;  %v9430_v41 = vld [vmem:[#allocation61_spill] sm:$0xff] }
 0x313   :  { %1899 = vmatpush.msra.mxu0 %v9411_v45  ;;  %v196_v45 = vadd.f32 %v9430_v41, %v9429_v63 }
 0x314   :  { %1939 = vmatpush.msrb.mxu2 %v9412_v48 }
 0x315   :  { %1900 = vmatpush.msra.mxu0 %v9413_v33 }
 0x316   :  { %1940 = vmatpush.msrb.mxu2 %v9414_v26 }
 0x317   :  { %1901 = vmatpush.msra.mxu0 %v9415_v11 }
 0x318   :  { %1941 = vmatpush.msrb.mxu2 %v9416_v61 }
 0x319   :  { %1902 = vmatpush.msra.mxu0 %v9417_v24 }
 0x31a   :  { %1942 = vmatpush.msrb.mxu2 %v9418_v44 }
 0x31b   :  { %1903 = vmatpush.msra.mxu0 %v9419_v17 }
 0x31c   :  { %1943 = vmatpush.msrb.mxu2 %v9420_v10  ;;  %v9431_v10 = vld [vmem:[#allocation34_spill] sm:$0xff] }
 0x31d   :  { %1904 = vmatpush.msra.mxu0 %v9421_v8 }
 0x31e   :  { %1944 = vmatpush.msrb.mxu2 %v9422_v43 }
 0x31f   :  { %1905 = vmatpush.msra.mxu0 %v9423_v38 }
 0x320   :  { %1945 = vmatpush.msrb.mxu2 %v9424_v12 }
 0x321   :  { %1906 = vmatpush.msra.mxu0 %v9425_v7 }
 0x322   :  { %1946 = vmatpush.msrb.mxu2 %v9426_v5 }
 0x325   :  { %v1471_v2 = vpop.f32.mrf.mxu1 }
 0x32b   :  { %v1511_v62 = vpop.f32.mrf.mxu3 }
 0x32d   :  { %v1551_v3 = vpop.f32.mrf.mxu1 }
 0x333   :  { %v1591_v26 = vpop.f32.mrf.mxu3 }
 0x33d   :  { %v1451_v37 = vpop.f32.mrf.mxu0 }
 0x33e   :  { %v1452_v40 = vadd.f32 %v1451_v37, %v9427_v30  ;;  %v9433_v37 = vld [vmem:[#allocation80_spill] sm:$0xff] }
 0x340   :  { %v1472_v53 = vadd.f32 %v1471_v2, %v1452_v40  ;;  %v9432_v2 = vld [vmem:[#allocation124_spill] sm:$0xff] }
 0x341   :  { %v278_v40 = vadd.f32 %v9433_v37, %v9432_v2 }
 0x342   :  { %v3655_v49 = vmul.f32 -1.442695, %v1472_v53 }
 0x343   :  { %v1491_v55 = vpop.f32.mrf.mxu2 }
 0x344   :  { %3784 = vpow2.f32 %v3655_v49  ;;  %v1492_v28 = vadd.f32 %v1491_v55, %v9428_v14  ;;  %v9434_v49 = vld [vmem:[#allocation35_spill] sm:$0xff] }
 0x346   :  { %v1512_v29 = vadd.f32 %v1511_v62, %v1492_v28  ;;  %v1531_v38 = vpop.f32.mrf.mxu0 }
 0x347   :  { %v1701_v48 = vpop.f32.mrf.mxu1  ;;  %v1532_v55 = vadd.f32 %v1531_v38, %v9434_v49 }
 0x348   :  { %v3656_v33 = vmul.f32 -1.442695, %v1512_v29  ;;  %v1745_v11 = vadd.f32 %v1701_v48, %v196_v45 }
 0x349   :  { %v1552_v48 = vadd.f32 %v1551_v3, %v1532_v55 }
 0x34a   :  { %v3785_v61 = vpop.eup %3784  ;;  %3786 = vpow2.f32 %v3656_v33  ;;  %v3659_v17 = vmul.f32 -1.442695, %v1745_v11 }
 0x34b   :  { %v1597_v24 = vadd.f32 1.0, %v3785_v61 }
 0x34c   :  { %v1571_v44 = vpop.f32.mrf.mxu2 }
 0x34d   :  { %3788 = vrcp.f32 %v1597_v24  ;;  %v1572_v8 = vadd.f32 %v1571_v44, %v9431_v10  ;;  %vm1603_vm14 = vweird.f32 %v1597_v24  ;;  %v1607_v38 = vand.u32 2147483647, %v1597_v24 }
 0x34e   :  { %3790 = vpow2.f32 %v3659_v17  ;;  %v1741_v5 = vpop.f32.mrf.mxu3 }
 0x34f   :  { %v1592_v12 = vadd.f32 %v1591_v26, %v1572_v8  ;;  %v1747_v29 = vadd.f32 %v1741_v5, %v278_v40  ;;  %v9435_v5 = vld [vmem:[#allocation102_spill] sm:$0xff]  ;;  %v9436_v40 = vld [vmem:[#allocation51_spill] sm:$0xff]  ;;  %vm1608_vm2 = vcmp.eq.f32.partialorder %v1607_v38, 8.507059e+37 }
 0x350   :  { %v3787_v43 = vpop.eup %3786 }
 0x351   :  { %v1616_v7 = vadd.f32 1.0, %v3787_v43  ;;  %v3657_v62 = vmul.f32 -1.442695, %v1592_v12  ;;  %v3660_v11 = vmul.f32 -1.442695, %v1747_v29  ;;  %v1609_v43 = vand.u32 2147483648, %v1597_v24 }
 0x353   :  { %v3789_v53 = vpop.eup %3788  ;;  %3792 = vrcp.f32 %v1616_v7  ;;  %v1628_v3 = vand.u32 2147483648, %v1616_v7  ;;  %vm1622_vm1 = vweird.f32 %v1616_v7 }
 0x354   :  { %v1599_v28 = vmul.f32 %v3789_v53, %v1597_v24  ;;  %3794 = vpow2.f32 %v3657_v62  ;;  %v3791_v45 = vpop.eup %3790  ;;  %vm1604_vm13 = vweird.f32 %v3789_v53  ;;  %v155_v62 = vadd.f32 %v9436_v40, %v9435_v5 }
 0x355   :  { %v6637_v8 = vadd.f32 1.0, %v3791_v45  ;;  %3796 = vtanh.f32 %v1552_v48  ;;  %vm6641_vm15 = vmor %vm1603_vm14, %vm1604_vm13  ;;  %v1610_v24 = vor.u32 1.1754944e-38, %v1609_v43 }
 0x356   :  { %v1600_v41 = vsub.f32 1.0, %v1599_v28  ;;  %3798 = vpow2.f32 %v3660_v11  ;;  %v1626_v28 = vand.u32 2147483647, %v1616_v7 }
 0x357   :  { %vm1776_vm10 = vweird.f32 %v6637_v8 }
 0x358   :  { %v1601_v33 = vmul.f32 %v3789_v53, %v1600_v41  ;;  %vm1627_vm4 = vcmp.eq.f32.partialorder %v1626_v28, 8.507059e+37 }
 0x359   :  { %v3793_v26 = vpop.eup %3792 }
 0x35a   :  { %v3795_v61 = vpop.eup %3794  ;;  %v1618_v44 = vmul.f32 %v3793_v26, %v1616_v7  ;;  %v1602_v17 = vadd.f32 %v3789_v53, %v1601_v33  ;;  %vm1623_vm0 = vweird.f32 %v3793_v26 }
 0x35b   :  { %v1636_v12 = vadd.f32 1.0, %v3795_v61  ;;  %v3797_v11 = vpop.eup %3796  ;;  %vm1624_vm3 = vmor %vm1622_vm1, %vm1623_vm0  ;;  %v1629_v61 = vor.u32 1.1754944e-38, %v1628_v3 }
 0x35c   :  { %v1619_v37 = vsub.f32 1.0, %v1618_v44  ;;  %v1606_v41 = vsel %vm6641_vm15, %v3789_v53, %v1602_v17  ;;  %v3799_v5 = vpop.eup %3798 }
 0x35d   :  { %3800 = vrcp.f32 %v1636_v12  ;;  %v1611_v44 = vsel %vm1608_vm2, %v1610_v24, %v1606_v41  ;;  %v6655_v55 = vadd.f32 1.0, %v3799_v5  ;;  %v1648_v28 = vand.u32 2147483648, %v1636_v12 }
 0x35e   :  { %v1620_v29 = vmul.f32 %v3793_v26, %v1619_v37  ;;  %3802 = vrcp.f32 %v6637_v8  ;;  %v1681_v45 = vpop.f32.mrf.mxu0  ;;  %v1653_v43 = vmul.f32 %v3797_v11, %v1611_v44  ;;  %vm1642_vm6 = vweird.f32 %v1636_v12  ;;  %v9439_v44 = vld [vmem:[#allocation76_spill] sm:$0xff] }
 0x35f   :  { %v1744_v48 = vadd.f32 %v1681_v45, %v155_v62  ;;  %v1649_v45 = vor.u32 1.1754944e-38, %v1648_v28  ;;  %vm1796_vm2 = vweird.f32 %v6655_v55 }
 0x360   :  { %v1621_v33 = vadd.f32 %v3793_v26, %v1620_v29  ;;  %v1646_v29 = vand.u32 2147483647, %v1636_v12 }
 0x361   :  { %v3658_v40 = vmul.f32 -1.442695, %v1744_v48 }
 0x362   :  { %v1625_v49 = vsel %vm1624_vm3, %v3793_v26, %v1621_v33  ;;  %vm1647_vm8 = vcmp.eq.f32.partialorder %v1646_v29, 8.507059e+37  ;;  %v6682_v29 = vld [vmem:[#allocation3 + $0x1d8] sm:$0xff] }
 0x363   :  { %v3801_v37 = vpop.eup %3800  ;;  %v1630_v2 = vsel %vm1627_vm4, %v1629_v61, %v1625_v49  ;;  %3804 = vpow2.f32 %v3658_v40  ;;  %v237_v40 = vadd.f32 %v9439_v44, %v5421_v47 }
 0x364   :  { %v6648_v53 = vpop.eup %3802  ;;  %v1652_v17 = vmul.f32 %v1630_v2, %v6327_v31  ;;  %v1638_v62 = vmul.f32 %v3801_v37, %v1636_v12  ;;  %vm1643_vm5 = vweird.f32 %v3801_v37 }
 0x365   :  { %v1772_v3 = vmul.f32 %v6648_v53, %v6637_v8  ;;  %vm1644_vm7 = vmor %vm1642_vm6, %vm1643_vm5  ;;  %v1721_v11 = vpop.f32.mrf.mxu2  ;;  %vm1777_vm9 = vweird.f32 %v6648_v53 }
 0x366   :  { %v6651_v7 = vadd.f32 %v1653_v43, %v1652_v17  ;;  %v1639_v38 = vsub.f32 1.0, %v1638_v62  ;;  %v1746_v43 = vadd.f32 %v1721_v11, %v237_v40  ;;  %v6667_v62 = vld [vmem:[#allocation3 + $0x1e8] sm:$0xff]  ;;  %vm6687_vm11 = vmor %vm1776_vm10, %vm1777_vm9 }
 0x367   :  { %v1773_v2 = vsub.f32 1.0, %v1772_v3 }
 0x368   :  { %3806 = vtanh.f32 %v6651_v7  ;;  %v1640_v26 = vmul.f32 %v3801_v37, %v1639_v38 }
 0x369   :  { %v3805_v49 = vpop.eup %3804  ;;  %3808 = vrcp.f32 %v6655_v55  ;;  %v1774_v33 = vmul.f32 %v6648_v53, %v1773_v2  ;;  %v1780_v2 = vand.u32 2147483647, %v6637_v8 }
 0x36a   :  { %v6658_v41 = vadd.f32 1.0, %v3805_v49  ;;  %v1641_v31 = vadd.f32 %v3801_v37, %v1640_v26  ;;  %v1782_v26 = vand.u32 2147483648, %v6637_v8  ;;  %v6679_v49 = vld [vmem:[#allocation3 + $0x1c8] sm:$0xff] }
 0x36b   :  { %v1775_v3 = vadd.f32 %v6648_v53, %v1774_v33  ;;  %vm1781_vm14 = vcmp.eq.f32.partialorder %v1780_v2, 8.507059e+37  ;;  %v6716_v2 = vld [vmem:[#allocation3 + $0x148] sm:$0xff] }
 0x36c   :  { %3810 = vrcp.f32 %v6658_v41  ;;  %v1645_v5 = vsel %vm1644_vm7, %v3801_v37, %v1641_v31  ;;  %v6670_v37 = vld [vmem:[#allocation3 + $0x1f8] sm:$0xff]  ;;  %v1761_v11 = vand.u32 2147483647, %v6658_v41  ;;  %v1783_v44 = vor.u32 1.1754944e-38, %v1782_v26 }
 0x36d   :  { %v1650_v48 = vsel %vm1647_vm8, %v1649_v45, %v1645_v5  ;;  %v1763_v5 = vand.u32 2147483648, %v6658_v41  ;;  %3812 = vtanh.f32 %v1746_v43  ;;  %v1779_v8 = vsel %vm6687_vm11, %v6648_v53, %v1775_v3  ;;  %v6705_v43 = vld [vmem:[#allocation3 + $0x198] sm:$0xff]  ;;  %v6709_v53 = vld [vmem:[#allocation3 + $0x168] sm:$0xff] }
 0x36e   :  { %v3807_v24 = vpop.eup %3806  ;;  %vm1757_vm13 = vweird.f32 %v6658_v41  ;;  %v1784_v45 = vsel %vm1781_vm14, %v1783_v44, %v1779_v8  ;;  %v6712_v3 = vld [vmem:[#allocation3 + $0x178] sm:$0xff]  ;;  %vm1762_vm0 = vcmp.eq.f32.partialorder %v1761_v11, 8.507059e+37  ;;  %v6723_v44 = vld [vmem:[#allocation3 + $0x128] sm:$0xff] }
 0x36f   :  { %v1656_v61 = vmul.f32 %v3807_v24, %v1650_v48  ;;  %v6665_v17 = vpop.eup %3808  ;;  %v6692_v24 = vld [vmem:[#allocation3 + $0x1a8] sm:$0xff]  ;;  %v6695_v48 = vld [vmem:[#allocation3 + $0x1b8] sm:$0xff] }
 0x370   :  { %v1792_v28 = vmul.f32 %v6665_v17, %v6655_v55  ;;  %9442 = vst [vmem:[#allocation41_spill] sm:$0xff] %v6692_v24  ;;  %vm1797_vm1 = vweird.f32 %v6665_v17 }
 0x371   :  { %1847 = vmatmul.f32.vlgmr.msra.gmra.mxu1 %v1656_v61  ;;  %1887 = vmatmul.f32.vlgmr.msra.gmra.mxu3 %v1656_v61  ;;  %vm1798_vm3 = vmor %vm1796_vm2, %vm1797_vm1 }
 0x372   :  { %v3811_v12 = vpop.eup %3810  ;;  %2061 = vmatpush.msra.mxu1 %v6667_v62  ;;  %2101 = vmatpush.msra.mxu3 %v6670_v37  ;;  %v1793_v40 = vsub.f32 1.0, %v1792_v28 }
 0x373   :  { %v1753_v38 = vmul.f32 %v3811_v12, %v6658_v41  ;;  %vm1758_vm12 = vweird.f32 %v3811_v12  ;;  %v3813_v28 = vpop.eup %3812 }
 0x374   :  { %2062 = vmatpush.msra.mxu1 %v6679_v49  ;;  %2102 = vmatpush.msra.mxu3 %v6682_v29  ;;  %vm1759_vm15 = vmor %vm1757_vm13, %vm1758_vm12 }
 0x375   :  { %v1754_v31 = vsub.f32 1.0, %v1753_v38  ;;  %v6702_v38 = vld [vmem:[#allocation3 + $0x188] sm:$0xff] }
 0x376   :  { %2063 = vmatpush.msra.mxu1 %v6692_v24  ;;  %2103 = vmatpush.msra.mxu3 %v6695_v48 }
 0x377   :  { %v1755_v33 = vmul.f32 %v3811_v12, %v1754_v31  ;;  %v1764_v31 = vor.u32 1.1754944e-38, %v1763_v5  ;;  %v1806_v5 = vmul.f32 %v1784_v45, %v6370_v56  ;;  %v6736_v56 = vld [vmem:[#allocation3 + $0x118] sm:$0xff]  ;;  %v1800_v45 = vand.u32 2147483647, %v6655_v55 }
 0x378   :  { %2064 = vmatpush.msra.mxu1 %v6702_v38  ;;  %2104 = vmatpush.msra.mxu3 %v6705_v43  ;;  %9443 = vst [vmem:[#allocation57_spill] sm:$0xff] %v6736_v56 }
 0x379   :  { %v1756_v24 = vadd.f32 %v3811_v12, %v1755_v33  ;;  %1927 = vmatmul.f32.vlgmr.msrb.gmra.mxu1 %v1656_v61  ;;  %1967 = vmatmul.f32.vlgmr.msrb.gmra.mxu3 %v1656_v61  ;;  %v1794_v33 = vmul.f32 %v6665_v17, %v1793_v40  ;;  %v6719_v61 = vld [vmem:[#allocation3 + $0x158] sm:$0xff]  ;;  %v6733_v40 = vld [vmem:[#allocation3 + $0x108] sm:$0xff]  ;;  %vm1801_vm4 = vcmp.eq.f32.partialorder %v1800_v45, 8.507059e+37 }
 0x37a   :  { %2065 = vmatpush.msra.mxu1 %v6709_v53  ;;  %2105 = vmatpush.msra.mxu3 %v6712_v3  ;;  %v6777_v45 = vld [vmem:[#allocation3 + $0x78] sm:$0xff] }
 0x37b   :  { %v1760_v26 = vsel %vm1759_vm15, %v3811_v12, %v1756_v24  ;;  %v6726_v12 = vld [vmem:[#allocation3 + $0x138] sm:$0xff]  ;;  %v1795_v11 = vadd.f32 %v6665_v17, %v1794_v33 }
 0x37c   :  { %v1765_v41 = vsel %vm1762_vm0, %v1764_v31, %v1760_v26  ;;  %2066 = vmatpush.msra.mxu1 %v6716_v2  ;;  %2106 = vmatpush.msra.mxu3 %v6719_v61  ;;  %v1802_v31 = vand.u32 2147483648, %v6655_v55  ;;  %v6743_v26 = vld [vmem:[#allocation3 + $0xe8] sm:$0xff] }
 0x37d   :  { %v1807_v8 = vmul.f32 %v3813_v28, %v1765_v41  ;;  %9444 = vst [vmem:[#allocation31_spill] sm:$0xff] %v6743_v26  ;;  %v6746_v28 = vld [vmem:[#allocation3 + $0xf8] sm:$0xff]  ;;  %v1799_v33 = vsel %vm1798_vm3, %v6665_v17, %v1795_v11  ;;  %v6750_v41 = vld [vmem:[#allocation3 + $0xc8] sm:$0xff] }
 0x37e   :  { %2067 = vmatpush.msra.mxu1 %v6723_v44  ;;  %2107 = vmatpush.msra.mxu3 %v6726_v12  ;;  %9445 = vst [vmem:[#allocation56_spill] sm:$0xff] %v6746_v28  ;;  %v1803_v55 = vor.u32 1.1754944e-38, %v1802_v31  ;;  %v6774_v31 = vld [vmem:[#allocation3 + $0x68] sm:$0xff] }
 0x37f   :  { %v6729_v24 = vadd.f32 %v1807_v8, %v1806_v5  ;;  %9446 = vst [vmem:[#allocation40_spill] sm:$0xff] %v6750_v41  ;;  %v6753_v5 = vld [vmem:[#allocation3 + $0xd8] sm:$0xff]  ;;  %v6756_v8 = vld [vmem:[#allocation3 + $0xa8] sm:$0xff] }
 0x380   :  { %2068 = vmatpush.msra.mxu1 %v6733_v40  ;;  %2108 = vmatpush.msra.mxu3 %v6736_v56  ;;  %v1804_v17 = vsel %vm1801_vm4, %v1803_v55, %v1799_v33  ;;  %v6764_v56 = vld [vmem:[#allocation3 + $0x88] sm:$0xff]  ;;  %v6785_v33 = vld [vmem:[#allocation3 + $0x58] sm:$0xff]  ;;  %v6914_v55 = vld [vmem:[#allocation6 + $0x260] sm:$0xff] }
 0x381   :  { %3814 = vtanh.f32 %v6729_v24  ;;  %9466 = vst [vmem:[#allocation89_spill] sm:$0xff] %v6914_v55 }
 0x382   :  { %2069 = vmatpush.msra.mxu1 %v6743_v26  ;;  %2109 = vmatpush.msra.mxu3 %v6746_v28  ;;  %v6759_v26 = vld [vmem:[#allocation3 + $0xb8] sm:$0xff] }
 0x384   :  { %2070 = vmatpush.msra.mxu1 %v6750_v41  ;;  %2110 = vmatpush.msra.mxu3 %v6753_v5  ;;  %v6767_v41 = vld [vmem:[#allocation3 + $0x98] sm:$0xff] }
 0x386   :  { %2071 = vmatpush.msra.mxu1 %v6756_v8  ;;  %2111 = vmatpush.msra.mxu3 %v6759_v26 }
 0x387   :  { %v3815_v28 = vpop.eup %3814 }
 0x388   :  { %v6762_v11 = vmul.f32 %v3815_v28, %v1804_v17  ;;  %2072 = vmatpush.msra.mxu1 %v6764_v56  ;;  %2112 = vmatpush.msra.mxu3 %v6767_v41  ;;  %v6782_v28 = vld [vmem:[#allocation3 + $0x48] sm:$0xff]  ;;  %v6917_v17 = vld [vmem:[#allocation6 + $0x1c0] sm:$0xff] }
 0x389   :  { %9467 = vst [vmem:[#allocation13_spill] sm:$0xff] %v6917_v17 }
 0x38a   :  { %1827 = vmatmul.f32.vlgmr.msrb.gmra.mxu0 %v6762_v11  ;;  %1867 = vmatmul.f32.vlgmr.msra.gmra.mxu2 %v6762_v11 }
 0x38b   :  { %2041 = vmatpush.msrb.mxu0 %v6393_v15  ;;  %2081 = vmatpush.msra.mxu2 %v6396_v18  ;;  %v6790_v15 = vld [vmem:[#allocation3 + $0x28] sm:$0xff]  ;;  %v6793_v18 = vld [vmem:[#allocation3 + $0x38] sm:$0xff] }
 0x38c   :  { %2073 = vmatpush.msra.mxu1 %v6774_v31  ;;  %2113 = vmatpush.msra.mxu3 %v6777_v45 }
 0x38d   :  { %2042 = vmatpush.msrb.mxu0 %v6401_v22  ;;  %2082 = vmatpush.msra.mxu2 %v6404_v20  ;;  %v6798_v22 = vld [vmem:[#allocation3 + $0x8] sm:$0xff]  ;;  %v6801_v20 = vld [vmem:[#allocation3 + $0x18] sm:$0xff] }
 0x38e   :  { %2074 = vmatpush.msra.mxu1 %v6782_v28  ;;  %2114 = vmatpush.msra.mxu3 %v6785_v33 }
 0x38f   :  { %2043 = vmatpush.msrb.mxu0 %v6409_v58  ;;  %2083 = vmatpush.msra.mxu2 %v6412_v46  ;;  %v6811_v58 = vld [vmem:[#allocation6 + $0x3e0] sm:$0xff]  ;;  %v6815_v46 = vld [vmem:[#allocation6 + $0x3e8] sm:$0xff] }
 0x390   :  { %2075 = vmatpush.msra.mxu1 %v6790_v15  ;;  %2115 = vmatpush.msra.mxu3 %v6793_v18 }
 0x391   :  { %2044 = vmatpush.msrb.mxu0 %v6417_v36  ;;  %2084 = vmatpush.msra.mxu2 %v6420_v57  ;;  %v6819_v36 = vld [vmem:[#allocation6 + $0x3c0] sm:$0xff]  ;;  %v6823_v57 = vld [vmem:[#allocation6 + $0x3c8] sm:$0xff] }
 0x392   :  { %2076 = vmatpush.msra.mxu1 %v6798_v22  ;;  %2116 = vmatpush.msra.mxu3 %v6801_v20 }
 0x393   :  { %1907 = vmatmul.f32.vlgmr.msra.gmra.mxu0 %v6762_v11  ;;  %1947 = vmatmul.f32.vlgmr.msrb.gmra.mxu2 %v6762_v11 }
 0x394   :  { %2045 = vmatpush.msrb.mxu0 %v6427_v39  ;;  %2077 = vmatmul.f32.vlgmr.msra.gmra.mxu1 %v6762_v11  ;;  %v6827_v39 = vld [vmem:[#allocation6 + $0x3a0] sm:$0xff] }
 0x395   :  { %2085 = vmatpush.msra.mxu2 %v6431_v54  ;;  %2117 = vmatmul.f32.vlgmr.msra.gmra.mxu3 %v6762_v11  ;;  %v6831_v54 = vld [vmem:[#allocation6 + $0x3a8] sm:$0xff] }
 0x396   :  { %2046 = vmatpush.msrb.mxu0 %v6435_v51  ;;  %2208 = vmatpush.msrb.mxu1 %v6811_v58  ;;  %v6835_v51 = vld [vmem:[#allocation6 + $0x380] sm:$0xff] }
 0x397   :  { %2086 = vmatpush.msra.mxu2 %v6439_v6  ;;  %2248 = vmatpush.msrb.mxu3 %v6815_v46  ;;  %v6839_v6 = vld [vmem:[#allocation6 + $0x388] sm:$0xff] }
 0x398   :  { %2047 = vmatpush.msrb.mxu0 %v6443_v35  ;;  %2209 = vmatpush.msrb.mxu1 %v6819_v36  ;;  %v6843_v35 = vld [vmem:[#allocation6 + $0x360] sm:$0xff] }
 0x399   :  { %2087 = vmatpush.msra.mxu2 %v6447_v0  ;;  %2249 = vmatpush.msrb.mxu3 %v6823_v57  ;;  %9447 = vst [vmem:[#allocation42_spill] sm:$0xff] %v6843_v35  ;;  %v6847_v0 = vld [vmem:[#allocation6 + $0x368] sm:$0xff] }
 0x39a   :  { %2048 = vmatpush.msrb.mxu0 %v6451_v21  ;;  %2210 = vmatpush.msrb.mxu1 %v6827_v39  ;;  %9448 = vst [vmem:[#allocation45_spill] sm:$0xff] %v6847_v0  ;;  %v6851_v21 = vld [vmem:[#allocation6 + $0x340] sm:$0xff] }
 0x39b   :  { %2088 = vmatpush.msra.mxu2 %v6455_v32  ;;  %2250 = vmatpush.msrb.mxu3 %v6831_v54  ;;  %9449 = vst [vmem:[#allocation46_spill] sm:$0xff] %v6851_v21  ;;  %v6855_v32 = vld [vmem:[#allocation6 + $0x348] sm:$0xff] }
 0x39c   :  { %2049 = vmatpush.msrb.mxu0 %v6459_v60  ;;  %2211 = vmatpush.msrb.mxu1 %v6835_v51  ;;  %9450 = vst [vmem:[#allocation49_spill] sm:$0xff] %v6855_v32  ;;  %v6859_v60 = vld [vmem:[#allocation6 + $0x320] sm:$0xff] }
 0x39d   :  { %2089 = vmatpush.msra.mxu2 %v6463_v16  ;;  %2251 = vmatpush.msrb.mxu3 %v6839_v6  ;;  %9451 = vst [vmem:[#allocation50_spill] sm:$0xff] %v6859_v60  ;;  %v6863_v16 = vld [vmem:[#allocation6 + $0x328] sm:$0xff] }
 0x39e   :  { %2050 = vmatpush.msrb.mxu0 %v6467_v13  ;;  %2212 = vmatpush.msrb.mxu1 %v6843_v35  ;;  %9452 = vst [vmem:[#allocation54_spill] sm:$0xff] %v6863_v16  ;;  %v6867_v13 = vld [vmem:[#allocation6 + $0x300] sm:$0xff] }
 0x39f   :  { %2090 = vmatpush.msra.mxu2 %v6471_v52  ;;  %2252 = vmatpush.msrb.mxu3 %v6847_v0  ;;  %9453 = vst [vmem:[#allocation55_spill] sm:$0xff] %v6867_v13  ;;  %v6871_v52 = vld [vmem:[#allocation6 + $0x308] sm:$0xff] }
 0x3a0   :  { %2051 = vmatpush.msrb.mxu0 %v6475_v50  ;;  %2213 = vmatpush.msrb.mxu1 %v6851_v21  ;;  %9454 = vst [vmem:[#allocation60_spill] sm:$0xff] %v6871_v52  ;;  %v6875_v50 = vld [vmem:[#allocation6 + $0x2e0] sm:$0xff] }
 0x3a1   :  { %2091 = vmatpush.msra.mxu2 %v6479_v42  ;;  %2253 = vmatpush.msrb.mxu3 %v6855_v32  ;;  %9455 = vst [vmem:[#allocation62_spill] sm:$0xff] %v6875_v50  ;;  %v6879_v42 = vld [vmem:[#allocation6 + $0x2e8] sm:$0xff] }
 0x3a2   :  { %2052 = vmatpush.msrb.mxu0 %v6483_v34  ;;  %2214 = vmatpush.msrb.mxu1 %v6859_v60  ;;  %9456 = vst [vmem:[#allocation65_spill] sm:$0xff] %v6879_v42  ;;  %v6883_v34 = vld [vmem:[#allocation6 + $0x2c0] sm:$0xff] }
 0x3a3   :  { %2092 = vmatpush.msra.mxu2 %v6487_v27  ;;  %2254 = vmatpush.msrb.mxu3 %v6863_v16  ;;  %9457 = vst [vmem:[#allocation66_spill] sm:$0xff] %v6883_v34  ;;  %v6887_v27 = vld [vmem:[#allocation6 + $0x2c8] sm:$0xff] }
 0x3a4   :  { %2053 = vmatpush.msrb.mxu0 %v6491_v19  ;;  %2215 = vmatpush.msrb.mxu1 %v6867_v13  ;;  %9458 = vst [vmem:[#allocation69_spill] sm:$0xff] %v6887_v27  ;;  %v6891_v19 = vld [vmem:[#allocation6 + $0x2a0] sm:$0xff] }
 0x3a5   :  { %2093 = vmatpush.msra.mxu2 %v6495_v4  ;;  %2255 = vmatpush.msrb.mxu3 %v6871_v52  ;;  %9459 = vst [vmem:[#allocation70_spill] sm:$0xff] %v6891_v19  ;;  %v6894_v4 = vld [vmem:[#allocation3 + $0x10] sm:$0xff] }
 0x3a6   :  { %2054 = vmatpush.msrb.mxu0 %v6499_v59  ;;  %2216 = vmatpush.msrb.mxu1 %v6875_v50  ;;  %9460 = vst [vmem:[#allocation73_spill] sm:$0xff] %v6894_v4  ;;  %v6899_v59 = vld [vmem:[#allocation6 + $0x2a8] sm:$0xff] }
 0x3a7   :  { %2094 = vmatpush.msra.mxu2 %v6503_v9  ;;  %2256 = vmatpush.msrb.mxu3 %v6879_v42  ;;  %9461 = vst [vmem:[#allocation74_spill] sm:$0xff] %v6899_v59  ;;  %v6902_v9 = vld [vmem:[#allocation6 + $0x280] sm:$0xff]  ;;  %v9568_v42 = vld [vmem:[#allocation81_spill] sm:$0xff] }
 0x3a8   :  { %2055 = vmatpush.msrb.mxu0 %v6507_v23  ;;  %2217 = vmatpush.msrb.mxu1 %v6883_v34  ;;  %9462 = vst [vmem:[#allocation79_spill] sm:$0xff] %v6902_v9  ;;  %v6905_v23 = vld [vmem:[#allocation6 + $0x1e0] sm:$0xff] }
 0x3a9   :  { %2095 = vmatpush.msra.mxu2 %v6511_v25  ;;  %2257 = vmatpush.msrb.mxu3 %v6887_v27  ;;  %9463 = vst [vmem:[#allocation82_spill] sm:$0xff] %v6905_v23  ;;  %v6908_v25 = vld [vmem:[#allocation6 + $0x288] sm:$0xff] }
 0x3aa   :  { %2056 = vmatpush.msrb.mxu0 %v6515_v1  ;;  %2218 = vmatpush.msrb.mxu1 %v6891_v19  ;;  %9464 = vst [vmem:[#allocation85_spill] sm:$0xff] %v6908_v25  ;;  %v6911_v1 = vld [vmem:[#allocation6 + $0x1e8] sm:$0xff] }
 0x3ab   :  { %2096 = vmatpush.msra.mxu2 %v6894_v4  ;;  %2057 = vmatmul.f32.vlgmr.msrb.gmra.mxu0 %v6762_v11  ;;  %9465 = vst [vmem:[#allocation86_spill] sm:$0xff] %v6911_v1 }
 0x3ac   :  { %2097 = vmatmul.f32.vlgmr.msra.gmra.mxu2 %v6762_v11  ;;  %2258 = vmatpush.msrb.mxu3 %v6899_v59  ;;  %v6920_v11 = vld [vmem:[#allocation6 + $0x268] sm:$0xff] }
 0x3ad   :  { %2219 = vmatpush.msrb.mxu1 %v6902_v9  ;;  %2188 = vmatpush.msra.mxu0 %v6905_v23  ;;  %9468 = vst [vmem:[#allocation38_spill] sm:$0xff] %v6920_v11  ;;  %v6923_v23 = vld [vmem:[#allocation6 + $0x1c8] sm:$0xff] }
 0x3ae   :  { %2259 = vmatpush.msrb.mxu3 %v6908_v25  ;;  %2228 = vmatpush.msrb.mxu2 %v6911_v1  ;;  %9469 = vst [vmem:[#allocation39_spill] sm:$0xff] %v6923_v23  ;;  %v6926_v25 = vld [vmem:[#allocation6 + $0x240] sm:$0xff] }
 0x3af   :  { %2220 = vmatpush.msrb.mxu1 %v6914_v55  ;;  %2189 = vmatpush.msra.mxu0 %v6917_v17  ;;  %9470 = vst [vmem:[#allocation90_spill] sm:$0xff] %v6926_v25  ;;  %v6929_v1 = vld [vmem:[#allocation6 + $0x1a0] sm:$0xff]  ;;  %v6932_v55 = vld [vmem:[#allocation6 + $0x248] sm:$0xff] }
 0x3b0   :  { %2260 = vmatpush.msrb.mxu3 %v6920_v11  ;;  %2229 = vmatpush.msrb.mxu2 %v6923_v23  ;;  %9471 = vst [vmem:[#allocation43_spill] sm:$0xff] %v6929_v1  ;;  %v6935_v17 = vld [vmem:[#allocation6 + $0x1a8] sm:$0xff]  ;;  %v6938_v11 = vld [vmem:[#allocation6 + $0x220] sm:$0xff] }
 0x3b1   :  { %2221 = vmatpush.msrb.mxu1 %v6926_v25  ;;  %2190 = vmatpush.msra.mxu0 %v6929_v1  ;;  %9472 = vst [vmem:[#allocation93_spill] sm:$0xff] %v6932_v55  ;;  %v6941_v23 = vld [vmem:[#allocation6 + $0x180] sm:$0xff]  ;;  %v6944_v25 = vld [vmem:[#allocation6 + $0x228] sm:$0xff] }
 0x3b2   :  { %2261 = vmatpush.msrb.mxu3 %v6932_v55  ;;  %9473 = vst [vmem:[#allocation44_spill] sm:$0xff] %v6935_v17  ;;  %2230 = vmatpush.msrb.mxu2 %v6935_v17  ;;  %v6947_v1 = vld [vmem:[#allocation6 + $0x188] sm:$0xff]  ;;  %v6950_v55 = vld [vmem:[#allocation6 + $0x200] sm:$0xff] }
 0x3b3   :  { %9474 = vst [vmem:[#allocation94_spill] sm:$0xff] %v6938_v11  ;;  %2222 = vmatpush.msrb.mxu1 %v6938_v11  ;;  %2191 = vmatpush.msra.mxu0 %v6941_v23  ;;  %v6953_v17 = vld [vmem:[#allocation6 + $0x160] sm:$0xff]  ;;  %v6956_v11 = vld [vmem:[#allocation6 + $0x208] sm:$0xff] }
 0x3b4   :  { %9475 = vst [vmem:[#allocation47_spill] sm:$0xff] %v6941_v23  ;;  %2262 = vmatpush.msrb.mxu3 %v6944_v25  ;;  %2231 = vmatpush.msrb.mxu2 %v6947_v1  ;;  %v6959_v23 = vld [vmem:[#allocation6 + $0x168] sm:$0xff] }
 0x3b5   :  { %9476 = vst [vmem:[#allocation98_spill] sm:$0xff] %v6944_v25  ;;  %2223 = vmatpush.msrb.mxu1 %v6950_v55  ;;  %2192 = vmatpush.msra.mxu0 %v6953_v17  ;;  %v6962_v25 = vld [vmem:[#allocation6 + $0x3f0] sm:$0xff] }
 0x3b6   :  { %9477 = vst [vmem:[#allocation48_spill] sm:$0xff] %v6947_v1  ;;  %2263 = vmatpush.msrb.mxu3 %v6956_v11  ;;  %2232 = vmatpush.msrb.mxu2 %v6959_v23  ;;  %v6965_v1 = vld [vmem:[#allocation6 + $0x3f8] sm:$0xff] }
 0x3b7   :  { %9478 = vst [vmem:[#allocation101_spill] sm:$0xff] %v6950_v55  ;;  %2288 = vmatpush.msra.mxu1 %v6962_v25  ;;  %v6968_v55 = vld [vmem:[#allocation6 + $0x140] sm:$0xff] }
 0x3b8   :  { %9479 = vst [vmem:[#allocation52_spill] sm:$0xff] %v6953_v17  ;;  %2328 = vmatpush.msra.mxu3 %v6965_v1  ;;  %2193 = vmatpush.msra.mxu0 %v6968_v55  ;;  %v6971_v17 = vld [vmem:[#allocation6 + $0x148] sm:$0xff] }
 0x3b9   :  { %9480 = vst [vmem:[#allocation105_spill] sm:$0xff] %v6956_v11  ;;  %2233 = vmatpush.msrb.mxu2 %v6971_v17  ;;  %v6974_v11 = vld [vmem:[#allocation6 + $0x3d0] sm:$0xff] }
 0x3ba   :  { %9481 = vst [vmem:[#allocation53_spill] sm:$0xff] %v6959_v23  ;;  %2289 = vmatpush.msra.mxu1 %v6974_v11  ;;  %v6977_v23 = vld [vmem:[#allocation6 + $0x3d8] sm:$0xff] }
 0x3bb   :  { %9482 = vst [vmem:[#allocation106_spill] sm:$0xff] %v6962_v25  ;;  %2329 = vmatpush.msra.mxu3 %v6977_v23  ;;  %v6980_v25 = vld [vmem:[#allocation6 + $0x120] sm:$0xff] }
 0x3bc   :  { %9483 = vst [vmem:[#allocation58_spill] sm:$0xff] %v6965_v1  ;;  %2194 = vmatpush.msra.mxu0 %v6980_v25  ;;  %v6983_v1 = vld [vmem:[#allocation6 + $0x128] sm:$0xff] }
 0x3bd   :  { %9484 = vst [vmem:[#allocation109_spill] sm:$0xff] %v6968_v55  ;;  %2234 = vmatpush.msrb.mxu2 %v6983_v1  ;;  %v6986_v55 = vld [vmem:[#allocation6 + $0x3b0] sm:$0xff] }
 0x3be   :  { %9485 = vst [vmem:[#allocation59_spill] sm:$0xff] %v6971_v17  ;;  %2290 = vmatpush.msra.mxu1 %v6986_v55  ;;  %v6989_v17 = vld [vmem:[#allocation6 + $0x3b8] sm:$0xff] }
 0x3bf   :  { %9486 = vst [vmem:[#allocation110_spill] sm:$0xff] %v6974_v11  ;;  %2330 = vmatpush.msra.mxu3 %v6989_v17  ;;  %v6992_v11 = vld [vmem:[#allocation6 + $0x100] sm:$0xff] }
 0x3c0   :  { %9487 = vst [vmem:[#allocation63_spill] sm:$0xff] %v6977_v23  ;;  %2195 = vmatpush.msra.mxu0 %v6992_v11  ;;  %v6995_v23 = vld [vmem:[#allocation6 + $0x108] sm:$0xff] }
 0x3c1   :  { %9488 = vst [vmem:[#allocation64_spill] sm:$0xff] %v6980_v25  ;;  %2235 = vmatpush.msrb.mxu2 %v6995_v23  ;;  %v6998_v25 = vld [vmem:[#allocation6 + $0x390] sm:$0xff] }
 0x3c2   :  { %9489 = vst [vmem:[#allocation67_spill] sm:$0xff] %v6983_v1  ;;  %2291 = vmatpush.msra.mxu1 %v6998_v25  ;;  %v7001_v1 = vld [vmem:[#allocation6 + $0x398] sm:$0xff] }
 0x3c3   :  { %9490 = vst [vmem:[#allocation68_spill] sm:$0xff] %v6986_v55  ;;  %2331 = vmatpush.msra.mxu3 %v7001_v1  ;;  %v7004_v55 = vld [vmem:[#allocation6 + $0xe0] sm:$0xff] }
 0x3c4   :  { %9491 = vst [vmem:[#allocation71_spill] sm:$0xff] %v6989_v17  ;;  %2196 = vmatpush.msra.mxu0 %v7004_v55  ;;  %v7007_v17 = vld [vmem:[#allocation6 + $0xe8] sm:$0xff] }
 0x3c5   :  { %9492 = vst [vmem:[#allocation72_spill] sm:$0xff] %v6992_v11  ;;  %2236 = vmatpush.msrb.mxu2 %v7007_v17  ;;  %v7010_v11 = vld [vmem:[#allocation6 + $0x370] sm:$0xff] }
 0x3c6   :  { %9493 = vst [vmem:[#allocation77_spill] sm:$0xff] %v6995_v23  ;;  %2292 = vmatpush.msra.mxu1 %v7010_v11  ;;  %v7013_v23 = vld [vmem:[#allocation6 + $0x378] sm:$0xff] }
 0x3c7   :  { %9494 = vst [vmem:[#allocation78_spill] sm:$0xff] %v6998_v25  ;;  %2332 = vmatpush.msra.mxu3 %v7013_v23  ;;  %v7016_v25 = vld [vmem:[#allocation6 + $0xc0] sm:$0xff] }
 0x3c8   :  { %9495 = vst [vmem:[#allocation83_spill] sm:$0xff] %v7001_v1  ;;  %2197 = vmatpush.msra.mxu0 %v7016_v25  ;;  %v7019_v1 = vld [vmem:[#allocation6 + $0xc8] sm:$0xff] }
 0x3c9   :  { %9496 = vst [vmem:[#allocation84_spill] sm:$0xff] %v7004_v55  ;;  %2237 = vmatpush.msrb.mxu2 %v7019_v1  ;;  %v7022_v55 = vld [vmem:[#allocation6 + $0x350] sm:$0xff] }
 0x3ca   :  { %9497 = vst [vmem:[#allocation87_spill] sm:$0xff] %v7007_v17  ;;  %2293 = vmatpush.msra.mxu1 %v7022_v55  ;;  %v7025_v17 = vld [vmem:[#allocation6 + $0x358] sm:$0xff] }
 0x3cb   :  { %9498 = vst [vmem:[#allocation88_spill] sm:$0xff] %v7010_v11  ;;  %2333 = vmatpush.msra.mxu3 %v7025_v17  ;;  %v7028_v11 = vld [vmem:[#allocation6 + $0xa0] sm:$0xff] }
 0x3cc   :  { %9499 = vst [vmem:[#allocation91_spill] sm:$0xff] %v7013_v23  ;;  %2198 = vmatpush.msra.mxu0 %v7028_v11  ;;  %v7031_v23 = vld [vmem:[#allocation6 + $0xa8] sm:$0xff] }
 0x3cd   :  { %9500 = vst [vmem:[#allocation92_spill] sm:$0xff] %v7016_v25  ;;  %2238 = vmatpush.msrb.mxu2 %v7031_v23  ;;  %v7034_v25 = vld [vmem:[#allocation6 + $0x330] sm:$0xff] }
 0x3ce   :  { %9501 = vst [vmem:[#allocation96_spill] sm:$0xff] %v7019_v1  ;;  %2294 = vmatpush.msra.mxu1 %v7034_v25  ;;  %v7037_v1 = vld [vmem:[#allocation6 + $0x338] sm:$0xff] }
 0x3cf   :  { %9502 = vst [vmem:[#allocation97_spill] sm:$0xff] %v7022_v55  ;;  %2334 = vmatpush.msra.mxu3 %v7037_v1  ;;  %v7040_v55 = vld [vmem:[#allocation6 + $0x80] sm:$0xff] }
 0x3d0   :  { %9503 = vst [vmem:[#allocation103_spill] sm:$0xff] %v7025_v17  ;;  %2199 = vmatpush.msra.mxu0 %v7040_v55  ;;  %v7043_v17 = vld [vmem:[#allocation6 + $0x88] sm:$0xff] }
 0x3d1   :  { %9504 = vst [vmem:[#allocation104_spill] sm:$0xff] %v7028_v11  ;;  %2239 = vmatpush.msrb.mxu2 %v7043_v17  ;;  %v7046_v11 = vld [vmem:[#allocation6 + $0x310] sm:$0xff] }
 0x3d2   :  { %9505 = vst [vmem:[#allocation107_spill] sm:$0xff] %v7031_v23  ;;  %2295 = vmatpush.msra.mxu1 %v7046_v11  ;;  %v7049_v23 = vld [vmem:[#allocation6 + $0x318] sm:$0xff] }
 0x3d3   :  { %9506 = vst [vmem:[#allocation108_spill] sm:$0xff] %v7034_v25  ;;  %2335 = vmatpush.msra.mxu3 %v7049_v23  ;;  %v7052_v25 = vld [vmem:[#allocation6 + $0x60] sm:$0xff] }
 0x3d4   :  { %9507 = vst [vmem:[#allocation111_spill] sm:$0xff] %v7037_v1  ;;  %2200 = vmatpush.msra.mxu0 %v7052_v25  ;;  %v7055_v1 = vld [vmem:[#allocation6 + $0x68] sm:$0xff] }
 0x3d5   :  { %9508 = vst [vmem:[#allocation112_spill] sm:$0xff] %v7040_v55  ;;  %2240 = vmatpush.msrb.mxu2 %v7055_v1  ;;  %v7058_v55 = vld [vmem:[#allocation6 + $0x2f0] sm:$0xff] }
 0x3d6   :  { %9509 = vst [vmem:[#allocation118_spill] sm:$0xff] %v7043_v17  ;;  %2296 = vmatpush.msra.mxu1 %v7058_v55  ;;  %v7061_v17 = vld [vmem:[#allocation6 + $0x2f8] sm:$0xff] }
 0x3d7   :  { %9510 = vst [vmem:[#allocation119_spill] sm:$0xff] %v7046_v11  ;;  %2336 = vmatpush.msra.mxu3 %v7061_v17  ;;  %v7064_v11 = vld [vmem:[#allocation6 + $0x40] sm:$0xff] }
 0x3d8   :  { %9511 = vst [vmem:[#allocation121_spill] sm:$0xff] %v7049_v23  ;;  %2201 = vmatpush.msra.mxu0 %v7064_v11  ;;  %v7067_v23 = vld [vmem:[#allocation6 + $0x48] sm:$0xff] }
 0x3d9   :  { %9512 = vst [vmem:[#allocation26_spill] sm:$0xff] %v7052_v25  ;;  %2241 = vmatpush.msrb.mxu2 %v7067_v23  ;;  %v7070_v25 = vld [vmem:[#allocation6 + $0x2d0] sm:$0xff] }
 0x3da   :  { %9513 = vst [vmem:[#allocation37_spill] sm:$0xff] %v7055_v1  ;;  %2297 = vmatpush.msra.mxu1 %v7070_v25  ;;  %v7073_v1 = vld [vmem:[#allocation6 + $0x2d8] sm:$0xff] }
 0x3db   :  { %9514 = vst [vmem:[#allocation19_spill] sm:$0xff] %v7058_v55  ;;  %2337 = vmatpush.msra.mxu3 %v7073_v1  ;;  %v7076_v55 = vld [vmem:[#allocation6 + $0x20] sm:$0xff] }
 0x3dc   :  { %9515 = vst [vmem:[#allocation36_spill] sm:$0xff] %v7061_v17  ;;  %2202 = vmatpush.msra.mxu0 %v7076_v55  ;;  %v7079_v17 = vld [vmem:[#allocation6 + $0x28] sm:$0xff] }
 0x3dd   :  { %9516 = vst [vmem:[#allocation17_spill] sm:$0xff] %v7064_v11  ;;  %2242 = vmatpush.msrb.mxu2 %v7079_v17  ;;  %v7082_v11 = vld [vmem:[#allocation6 + $0x2b0] sm:$0xff] }
 0x3de   :  { %9517 = vst [vmem:[#allocation18_spill] sm:$0xff] %v7067_v23  ;;  %2298 = vmatpush.msra.mxu1 %v7082_v11  ;;  %v7085_v23 = vld [vmem:[#allocation6 + $0x2b8] sm:$0xff] }
 0x3df   :  { %9518 = vst [vmem:[#allocation20_spill] sm:$0xff] %v7070_v25  ;;  %2338 = vmatpush.msra.mxu3 %v7085_v23  ;;  %v7088_v25 = vld [vmem:[#allocation6] sm:$0xff] }
 0x3e0   :  { %9519 = vst [vmem:[#allocation21_spill] sm:$0xff] %v7073_v1  ;;  %2203 = vmatpush.msra.mxu0 %v7088_v25  ;;  %v7091_v1 = vld [vmem:[#allocation6 + $0x8] sm:$0xff] }
 0x3e1   :  { %9520 = vst [vmem:[#allocation22_spill] sm:$0xff] %v7076_v55  ;;  %2243 = vmatpush.msrb.mxu2 %v7091_v1  ;;  %v7094_v55 = vld [vmem:[#allocation6 + $0x290] sm:$0xff] }
 0x3e2   :  { %9521 = vst [vmem:[#allocation23_spill] sm:$0xff] %v7079_v17  ;;  %2299 = vmatpush.msra.mxu1 %v7094_v55  ;;  %v7097_v17 = vld [vmem:[#allocation6 + $0x298] sm:$0xff] }
 0x3e3   :  { %9522 = vst [vmem:[#allocation24_spill] sm:$0xff] %v7082_v11  ;;  %2339 = vmatpush.msra.mxu3 %v7097_v17  ;;  %v7100_v11 = vld [vmem:[#allocation6 + $0x1f0] sm:$0xff] }
 0x3e4   :  { %9523 = vst [vmem:[#allocation25_spill] sm:$0xff] %v7085_v23  ;;  %2268 = vmatpush.msrb.mxu0 %v7100_v11  ;;  %v7103_v23 = vld [vmem:[#allocation6 + $0x1f8] sm:$0xff] }
 0x3e5   :  { %9524 = vst [vmem:[#allocation27_spill] sm:$0xff] %v7088_v25  ;;  %2308 = vmatpush.msra.mxu2 %v7103_v23  ;;  %v7106_v25 = vld [vmem:[#allocation6 + $0x270] sm:$0xff] }
 0x3e6   :  { %9525 = vst [vmem:[#allocation28_spill] sm:$0xff] %v7091_v1  ;;  %2300 = vmatpush.msra.mxu1 %v7106_v25  ;;  %v7109_v1 = vld [vmem:[#allocation6 + $0x278] sm:$0xff] }
 0x3e7   :  { %9526 = vst [vmem:[#allocation29_spill] sm:$0xff] %v7094_v55  ;;  %2340 = vmatpush.msra.mxu3 %v7109_v1  ;;  %v7112_v55 = vld [vmem:[#allocation6 + $0x1d0] sm:$0xff] }
 0x3e8   :  { %9527 = vst [vmem:[#allocation30_spill] sm:$0xff] %v7097_v17  ;;  %2269 = vmatpush.msrb.mxu0 %v7112_v55  ;;  %v7115_v17 = vld [vmem:[#allocation6 + $0x1d8] sm:$0xff] }
 0x3e9   :  { %9528 = vst [vmem:[#allocation126_spill] sm:$0xff] %v7100_v11  ;;  %2309 = vmatpush.msra.mxu2 %v7115_v17  ;;  %v7118_v11 = vld [vmem:[#allocation6 + $0x250] sm:$0xff] }
 0x3ea   :  { %9529 = vst [vmem:[#allocation127_spill] sm:$0xff] %v7103_v23  ;;  %2301 = vmatpush.msra.mxu1 %v7118_v11  ;;  %v7121_v23 = vld [vmem:[#allocation6 + $0x258] sm:$0xff] }
 0x3eb   :  { %9530 = vst [vmem:[#allocation128_spill] sm:$0xff] %v7106_v25  ;;  %2341 = vmatpush.msra.mxu3 %v7121_v23  ;;  %v7124_v25 = vld [vmem:[#allocation6 + $0x1b0] sm:$0xff] }
 0x3ec   :  { %9531 = vst [vmem:[#allocation129_spill] sm:$0xff] %v7109_v1  ;;  %2270 = vmatpush.msrb.mxu0 %v7124_v25  ;;  %v7127_v1 = vld [vmem:[#allocation6 + $0x1b8] sm:$0xff] }
 0x3ed   :  { %9532 = vst [vmem:[#allocation130_spill] sm:$0xff] %v7112_v55  ;;  %2310 = vmatpush.msra.mxu2 %v7127_v1  ;;  %v7130_v55 = vld [vmem:[#allocation6 + $0x230] sm:$0xff] }
 0x3ee   :  { %9533 = vst [vmem:[#allocation131_spill] sm:$0xff] %v7115_v17  ;;  %2302 = vmatpush.msra.mxu1 %v7130_v55  ;;  %v7133_v17 = vld [vmem:[#allocation6 + $0x238] sm:$0xff] }
 0x3ef   :  { %9534 = vst [vmem:[#allocation132_spill] sm:$0xff] %v7118_v11  ;;  %2342 = vmatpush.msra.mxu3 %v7133_v17  ;;  %v7136_v11 = vld [vmem:[#allocation6 + $0x190] sm:$0xff] }
 0x3f0   :  { %9535 = vst [vmem:[#allocation133_spill] sm:$0xff] %v7121_v23  ;;  %2271 = vmatpush.msrb.mxu0 %v7136_v11  ;;  %v7139_v23 = vld [vmem:[#allocation6 + $0x198] sm:$0xff] }
 0x3f1   :  { %9536 = vst [vmem:[#allocation134_spill] sm:$0xff] %v7124_v25  ;;  %2311 = vmatpush.msra.mxu2 %v7139_v23  ;;  %v7142_v25 = vld [vmem:[#allocation6 + $0x210] sm:$0xff] }
 0x3f2   :  { %9537 = vst [vmem:[#allocation135_spill] sm:$0xff] %v7127_v1  ;;  %2303 = vmatpush.msra.mxu1 %v7142_v25  ;;  %v7145_v1 = vld [vmem:[#allocation6 + $0x218] sm:$0xff] }
 0x3f3   :  { %9538 = vst [vmem:[#allocation136_spill] sm:$0xff] %v7130_v55  ;;  %2343 = vmatpush.msra.mxu3 %v7145_v1  ;;  %v7148_v55 = vld [vmem:[#allocation6 + $0x170] sm:$0xff] }
 0x3f4   :  { %9539 = vst [vmem:[#allocation137_spill] sm:$0xff] %v7133_v17  ;;  %2272 = vmatpush.msrb.mxu0 %v7148_v55  ;;  %v7151_v17 = vld [vmem:[#allocation6 + $0x178] sm:$0xff]  ;;  %v1888_v59 = vpop.f32.mrf.mxu3 }
 0x3f5   :  { %9540 = vst [vmem:[#allocation138_spill] sm:$0xff] %v7136_v11  ;;  %2312 = vmatpush.msra.mxu2 %v7151_v17  ;;  %v7154_v11 = vld [vmem:[#allocation6 + $0x150] sm:$0xff] }
 0x3f6   :  { %9541 = vst [vmem:[#allocation139_spill] sm:$0xff] %v7139_v23  ;;  %2273 = vmatpush.msrb.mxu0 %v7154_v11  ;;  %v7157_v23 = vld [vmem:[#allocation6 + $0x158] sm:$0xff] }
 0x3f7   :  { %9542 = vst [vmem:[#allocation140_spill] sm:$0xff] %v7142_v25  ;;  %2313 = vmatpush.msra.mxu2 %v7157_v23  ;;  %v7160_v25 = vld [vmem:[#allocation6 + $0x130] sm:$0xff] }
 0x3f8   :  { %9543 = vst [vmem:[#allocation141_spill] sm:$0xff] %v7145_v1  ;;  %2274 = vmatpush.msrb.mxu0 %v7160_v25  ;;  %v7163_v1 = vld [vmem:[#allocation6 + $0x138] sm:$0xff] }
 0x3f9   :  { %9544 = vst [vmem:[#allocation142_spill] sm:$0xff] %v7148_v55  ;;  %2314 = vmatpush.msra.mxu2 %v7163_v1  ;;  %v7166_v55 = vld [vmem:[#allocation6 + $0x110] sm:$0xff] }
 0x3fa   :  { %9545 = vst [vmem:[#allocation143_spill] sm:$0xff] %v7151_v17  ;;  %2275 = vmatpush.msrb.mxu0 %v7166_v55  ;;  %v7169_v17 = vld [vmem:[#allocation6 + $0x118] sm:$0xff] }
 0x3fb   :  { %9546 = vst [vmem:[#allocation144_spill] sm:$0xff] %v7154_v11  ;;  %2315 = vmatpush.msra.mxu2 %v7169_v17  ;;  %v7172_v11 = vld [vmem:[#allocation6 + $0xf0] sm:$0xff] }
 0x3fc   :  { %9547 = vst [vmem:[#allocation145_spill] sm:$0xff] %v7157_v23  ;;  %2276 = vmatpush.msrb.mxu0 %v7172_v11  ;;  %v7175_v23 = vld [vmem:[#allocation6 + $0xf8] sm:$0xff]  ;;  %v1968_v13 = vpop.f32.mrf.mxu3 }
 0x3fd   :  { %9548 = vst [vmem:[#allocation146_spill] sm:$0xff] %v7160_v25  ;;  %2316 = vmatpush.msra.mxu2 %v7175_v23  ;;  %v7178_v25 = vld [vmem:[#allocation6 + $0xd0] sm:$0xff] }
 0x3fe   :  { %9549 = vst [vmem:[#allocation147_spill] sm:$0xff] %v7163_v1  ;;  %2277 = vmatpush.msrb.mxu0 %v7178_v25  ;;  %v7181_v1 = vld [vmem:[#allocation6 + $0xd8] sm:$0xff] }
 0x3ff   :  { %9550 = vst [vmem:[#allocation148_spill] sm:$0xff] %v7166_v55  ;;  %2317 = vmatpush.msra.mxu2 %v7181_v1  ;;  %v7184_v55 = vld [vmem:[#allocation6 + $0xb0] sm:$0xff] }
 0x400   :  { %9551 = vst [vmem:[#allocation149_spill] sm:$0xff] %v7169_v17  ;;  %2278 = vmatpush.msrb.mxu0 %v7184_v55  ;;  %v7187_v17 = vld [vmem:[#allocation6 + $0xb8] sm:$0xff] }
 0x401   :  { %9552 = vst [vmem:[#allocation150_spill] sm:$0xff] %v7172_v11  ;;  %2318 = vmatpush.msra.mxu2 %v7187_v17  ;;  %v7190_v11 = vld [vmem:[#allocation6 + $0x90] sm:$0xff] }
 0x402   :  { %9553 = vst [vmem:[#allocation151_spill] sm:$0xff] %v7175_v23  ;;  %2279 = vmatpush.msrb.mxu0 %v7190_v11  ;;  %v7193_v23 = vld [vmem:[#allocation6 + $0x98] sm:$0xff] }
 0x403   :  { %9554 = vst [vmem:[#allocation152_spill] sm:$0xff] %v7178_v25  ;;  %2319 = vmatpush.msra.mxu2 %v7193_v23  ;;  %v7196_v25 = vld [vmem:[#allocation6 + $0x70] sm:$0xff] }
 0x404   :  { %9555 = vst [vmem:[#allocation153_spill] sm:$0xff] %v7181_v1  ;;  %2280 = vmatpush.msrb.mxu0 %v7196_v25  ;;  %v7199_v1 = vld [vmem:[#allocation6 + $0x78] sm:$0xff] }
 0x405   :  { %9556 = vst [vmem:[#allocation154_spill] sm:$0xff] %v7184_v55  ;;  %2320 = vmatpush.msra.mxu2 %v7199_v1  ;;  %v7202_v55 = vld [vmem:[#allocation6 + $0x50] sm:$0xff] }
 0x406   :  { %9557 = vst [vmem:[#allocation155_spill] sm:$0xff] %v7187_v17  ;;  %2281 = vmatpush.msrb.mxu0 %v7202_v55  ;;  %v7205_v17 = vld [vmem:[#allocation6 + $0x58] sm:$0xff] }
 0x407   :  { %9558 = vst [vmem:[#allocation156_spill] sm:$0xff] %v7190_v11  ;;  %2321 = vmatpush.msra.mxu2 %v7205_v17  ;;  %v7208_v11 = vld [vmem:[#allocation6 + $0x30] sm:$0xff]  ;;  %v1828_v9 = vpop.f32.mrf.mxu0 }
 0x408   :  { %9559 = vst [vmem:[#allocation157_spill] sm:$0xff] %v7193_v23  ;;  %2282 = vmatpush.msrb.mxu0 %v7208_v11  ;;  %v7211_v23 = vld [vmem:[#allocation6 + $0x38] sm:$0xff] }
 0x409   :  { %9560 = vst [vmem:[#allocation158_spill] sm:$0xff] %v7196_v25  ;;  %2322 = vmatpush.msra.mxu2 %v7211_v23  ;;  %v7214_v25 = vld [vmem:[#allocation6 + $0x10] sm:$0xff] }
 0x40a   :  { %9561 = vst [vmem:[#allocation159_spill] sm:$0xff] %v7199_v1  ;;  %2283 = vmatpush.msrb.mxu0 %v7214_v25  ;;  %v7217_v1 = vld [vmem:[#allocation6 + $0x18] sm:$0xff] }
 0x40b   :  { %9562 = vst [vmem:[#allocation160_spill] sm:$0xff] %v7202_v55  ;;  %2323 = vmatpush.msra.mxu2 %v7217_v1  ;;  %v1848_v55 = vpop.f32.mrf.mxu1 }
 0x40c   :  { %9563 = vst [vmem:[#allocation161_spill] sm:$0xff] %v7205_v17  ;;  %v1829_v17 = vadd.f32 %v1828_v9, %v9427_v30 }
 0x40d   :  { %9564 = vst [vmem:[#allocation162_spill] sm:$0xff] %v7208_v11  ;;  %v1868_v27 = vpop.f32.mrf.mxu2 }
 0x40e   :  { %9565 = vst [vmem:[#allocation163_spill] sm:$0xff] %v7211_v23  ;;  %v1849_v19 = vadd.f32 %v1848_v55, %v1829_v17  ;;  %v1869_v23 = vadd.f32 %v1868_v27, %v9428_v14 }
 0x40f   :  { %9566 = vst [vmem:[#allocation164_spill] sm:$0xff] %v7214_v25  ;;  %v199_v25 = vadd.f32 %v9568_v42, %v9429_v63  ;;  %v9570_v42 = vld [vmem:[#allocation99_spill] sm:$0xff] }
 0x410   :  { %9567 = vst [vmem:[#allocation165_spill] sm:$0xff] %v7217_v1  ;;  %v3661_v11 = vmul.f32 -1.442695, %v1849_v19  ;;  %v1889_v34 = vadd.f32 %v1888_v59, %v1869_v23  ;;  %v1908_v17 = vpop.f32.mrf.mxu0  ;;  %v9569_v23 = vld [vmem:[#allocation124_spill] sm:$0xff] }
 0x411   :  { %v281_v63 = vadd.f32 %v9570_v42, %v9569_v23 }
 0x412   :  { %3816 = vpow2.f32 %v3661_v11  ;;  %v3662_v52 = vmul.f32 -1.442695, %v1889_v34 }
 0x413   :  { %v1928_v4 = vpop.f32.mrf.mxu1 }
 0x414   :  { %3818 = vpow2.f32 %v3662_v52 }
 0x416   :  { %v1948_v9 = vpop.f32.mrf.mxu2 }
 0x417   :  { %v1949_v19 = vadd.f32 %v1948_v9, %v9431_v10 }
 0x418   :  { %v3817_v16 = vpop.eup %3816  ;;  %v2118_v59 = vpop.f32.mrf.mxu3 }
 0x419   :  { %v1974_v60 = vadd.f32 1.0, %v3817_v16  ;;  %v1969_v11 = vadd.f32 %v1968_v13, %v1949_v19 }
 0x41a   :  { %v3819_v55 = vpop.eup %3818 }
 0x41b   :  { %v2078_v50 = vpop.f32.mrf.mxu1  ;;  %3820 = vrcp.f32 %v1974_v60  ;;  %v1993_v27 = vadd.f32 1.0, %v3819_v55  ;;  %v3663_v34 = vmul.f32 -1.442695, %v1969_v11  ;;  %v1986_v11 = vand.u32 2147483648, %v1974_v60 }
 0x41c   :  { %v2122_v1 = vadd.f32 %v2078_v50, %v199_v25  ;;  %v9571_v50 = vld [vmem:[#allocation35_spill] sm:$0xff]  ;;  %v2124_v25 = vadd.f32 %v2118_v59, %v281_v63  ;;  %vm1980_vm6 = vweird.f32 %v1974_v60  ;;  %v9572_v63 = vld [vmem:[#allocation102_spill] sm:$0xff] }
 0x41d   :  { %v1909_v52 = vadd.f32 %v1908_v17, %v9571_v50  ;;  %v1984_v17 = vand.u32 2147483647, %v1974_v60  ;;  %v9573_v59 = vld [vmem:[#allocation75_spill] sm:$0xff]  ;;  %vm1999_vm9 = vweird.f32 %v1993_v27 }
 0x41e   :  { %v3665_v30 = vmul.f32 -1.442695, %v2122_v1  ;;  %v3666_v21 = vmul.f32 -1.442695, %v2124_v25 }
 0x41f   :  { %v1929_v9 = vadd.f32 %v1928_v4, %v1909_v52  ;;  %v2005_v4 = vand.u32 2147483648, %v1993_v27  ;;  %vm1985_vm10 = vcmp.eq.f32.partialorder %v1984_v17, 8.507059e+37 }
 0x420   :  { %3822 = vpow2.f32 %v3665_v30 }
 0x421   :  { %v3821_v14 = vpop.eup %3820  ;;  %3824 = vrcp.f32 %v1993_v27 }
 0x422   :  { %v1976_v16 = vmul.f32 %v3821_v14, %v1974_v60  ;;  %3826 = vpow2.f32 %v3663_v34  ;;  %vm1981_vm5 = vweird.f32 %v3821_v14  ;;  %v158_v34 = vadd.f32 %v9573_v59, %v9572_v63 }
 0x423   :  { %3828 = vtanh.f32 %v1929_v9  ;;  %vm7232_vm7 = vmor %vm1980_vm6, %vm1981_vm5  ;;  %v1987_v60 = vor.u32 1.1754944e-38, %v1986_v11 }
 0x424   :  { %v1977_v1 = vsub.f32 1.0, %v1976_v16  ;;  %3830 = vpow2.f32 %v3666_v21  ;;  %v2003_v16 = vand.u32 2147483647, %v1993_v27 }
 0x426   :  { %v3823_v32 = vpop.eup %3822  ;;  %v1978_v10 = vmul.f32 %v3821_v14, %v1977_v1  ;;  %vm2004_vm12 = vcmp.eq.f32.partialorder %v2003_v16, 8.507059e+37 }
 0x427   :  { %v3825_v13 = vpop.eup %3824  ;;  %v7228_v0 = vadd.f32 1.0, %v3823_v32 }
 0x428   :  { %v3827_v19 = vpop.eup %3826  ;;  %v1995_v30 = vmul.f32 %v3825_v13, %v1993_v27  ;;  %v1979_v55 = vadd.f32 %v3821_v14, %v1978_v10  ;;  %vm2000_vm8 = vweird.f32 %v3825_v13  ;;  %v2058_v25 = vpop.f32.mrf.mxu0 }
 0x429   :  { %v2013_v42 = vadd.f32 1.0, %v3827_v19  ;;  %v2121_v21 = vadd.f32 %v2058_v25, %v158_v34  ;;  %v3829_v9 = vpop.eup %3828  ;;  %vm2001_vm11 = vmor %vm1999_vm9, %vm2000_vm8  ;;  %v2006_v19 = vor.u32 1.1754944e-38, %v2005_v4  ;;  %vm2153_vm2 = vweird.f32 %v7228_v0 }
 0x42a   :  { %v1996_v23 = vsub.f32 1.0, %v1995_v30  ;;  %v1983_v32 = vsel %vm7232_vm7, %v3821_v14, %v1979_v55  ;;  %v3831_v63 = vpop.eup %3830 }
 0x42b   :  { %3832 = vrcp.f32 %v2013_v42  ;;  %v1988_v30 = vsel %vm1985_vm10, %v1987_v60, %v1983_v32  ;;  %v3664_v59 = vmul.f32 -1.442695, %v2121_v21  ;;  %v7246_v52 = vadd.f32 1.0, %v3831_v63 }
 0x42c   :  { %v1997_v10 = vmul.f32 %v3825_v13, %v1996_v23  ;;  %3834 = vrcp.f32 %v7228_v0  ;;  %v2030_v11 = vmul.f32 %v3829_v9, %v1988_v30  ;;  %v2025_v16 = vand.u32 2147483648, %v2013_v42  ;;  %v9576_v30 = vld [vmem:[#allocation95_spill] sm:$0xff] }
 0x42d   :  { %3836 = vpow2.f32 %v3664_v59  ;;  %vm2019_vm14 = vweird.f32 %v2013_v42  ;;  %v240_v59 = vadd.f32 %v9576_v30, %v5421_v47  ;;  %vm2173_vm10 = vweird.f32 %v7246_v52  ;;  %v7308_v30 = vld [vmem:[#allocation3 + $0x1e0] sm:$0xff] }
 0x42e   :  { %v1998_v1 = vadd.f32 %v3825_v13, %v1997_v10  ;;  %v2023_v10 = vand.u32 2147483647, %v2013_v42 }
 0x42f   :  { %v2098_v9 = vpop.f32.mrf.mxu2 }
 0x430   :  { %v2002_v50 = vsel %vm2001_vm11, %v3825_v13, %v1998_v1  ;;  %vm2024_vm0 = vcmp.eq.f32.partialorder %v2023_v10, 8.507059e+37 }
 0x431   :  { %v3833_v23 = vpop.eup %3832  ;;  %v2007_v35 = vsel %vm2004_vm12, %v2006_v19, %v2002_v50 }
 0x432   :  { %v7239_v14 = vpop.eup %3834  ;;  %v2029_v55 = vmul.f32 %v2007_v35, %v6651_v7  ;;  %v2015_v34 = vmul.f32 %v3833_v23, %v2013_v42  ;;  %vm2020_vm13 = vweird.f32 %v3833_v23  ;;  %v2026_v35 = vor.u32 1.1754944e-38, %v2025_v16 }
 0x433   :  { %v2149_v4 = vmul.f32 %v7239_v14, %v7228_v0  ;;  %v3837_v50 = vpop.eup %3836  ;;  %vm2021_vm15 = vmor %vm2019_vm14, %vm2020_vm13  ;;  %v2123_v42 = vadd.f32 %v2098_v9, %v240_v59  ;;  %vm2154_vm1 = vweird.f32 %v7239_v14  ;;  %v7366_v59 = vld [vmem:[#allocation3 + $0x100] sm:$0xff] }
 0x434   :  { %v7242_v27 = vadd.f32 %v2030_v11, %v2029_v55  ;;  %v2016_v17 = vsub.f32 1.0, %v2015_v34  ;;  %v2128_v32 = vadd.f32 1.0, %v3837_v50  ;;  %vm7266_vm3 = vmor %vm2153_vm2, %vm2154_vm1  ;;  %v9579_v50 = vld [vmem:[#allocation41_spill] sm:$0xff] }
 0x435   :  { %v2150_v7 = vsub.f32 1.0, %v2149_v4 }
 0x436   :  { %3838 = vtanh.f32 %v7242_v27  ;;  %v2017_v13 = vmul.f32 %v3833_v23, %v2016_v17  ;;  %v2159_v17 = vand.u32 2147483648, %v7228_v0  ;;  %v2140_v16 = vand.u32 2147483648, %v2128_v32 }
 0x437   :  { %3840 = vrcp.f32 %v7246_v52  ;;  %v2151_v1 = vmul.f32 %v7239_v14, %v2150_v7  ;;  %vm2134_vm5 = vweird.f32 %v2128_v32 }
 0x438   :  { %v2018_v25 = vadd.f32 %v3833_v23, %v2017_v13  ;;  %3842 = vrcp.f32 %v2128_v32 }
 0x439   :  { %v2152_v34 = vadd.f32 %v7239_v14, %v2151_v1  ;;  %3844 = vtanh.f32 %v2123_v42  ;;  %v9583_v1 = vld [vmem:[#allocation40_spill] sm:$0xff]  ;;  %v7394_v42 = vld [vmem:[#allocation3 + $0xb0] sm:$0xff] }
 0x43a   :  { %v2022_v60 = vsel %vm2021_vm15, %v3833_v23, %v2018_v25  ;;  %v2160_v25 = vor.u32 1.1754944e-38, %v2159_v17  ;;  %v7402_v17 = vld [vmem:[#allocation3 + $0x90] sm:$0xff] }
 0x43b   :  { %v2027_v21 = vsel %vm2024_vm0, %v2026_v35, %v2022_v60 }
 0x43c   :  { %v3839_v63 = vpop.eup %3838 }
 0x43d   :  { %v2033_v19 = vmul.f32 %v3839_v63, %v2027_v21  ;;  %v7253_v55 = vpop.eup %3840  ;;  %v9580_v21 = vld [vmem:[#allocation57_spill] sm:$0xff] }
 0x43e   :  { %v3843_v11 = vpop.eup %3842  ;;  %v2169_v4 = vmul.f32 %v7253_v55, %v7246_v52  ;;  %vm2174_vm9 = vweird.f32 %v7253_v55 }
 0x43f   :  { %2224 = vmatmul.f32.vlgmr.msrb.gmra.mxu1 %v2033_v19  ;;  %2264 = vmatmul.f32.vlgmr.msrb.gmra.mxu3 %v2033_v19  ;;  %v2130_v23 = vmul.f32 %v3843_v11, %v2128_v32  ;;  %vm2135_vm4 = vweird.f32 %v3843_v11  ;;  %vm2175_vm11 = vmor %vm2173_vm10, %vm2174_vm9 }
 0x440   :  { %2438 = vmatpush.msrb.mxu1 %v6667_v62  ;;  %2478 = vmatpush.msrb.mxu3 %v6670_v37  ;;  %v2157_v62 = vand.u32 2147483647, %v7228_v0  ;;  %v2170_v7 = vsub.f32 1.0, %v2169_v4  ;;  %vm2136_vm7 = vmor %vm2134_vm5, %vm2135_vm4  ;;  %v9589_v4 = vld [vmem:[#allocation54_spill] sm:$0xff] }
 0x441   :  { %v2131_v13 = vsub.f32 1.0, %v2130_v23  ;;  %v7398_v23 = vld [vmem:[#allocation3 + $0x80] sm:$0xff]  ;;  %v7410_v37 = vld [vmem:[#allocation3 + $0x70] sm:$0xff] }
 0x442   :  { %2439 = vmatpush.msrb.mxu1 %v6679_v49  ;;  %2479 = vmatpush.msrb.mxu3 %v6682_v29  ;;  %v2138_v49 = vand.u32 2147483647, %v2128_v32  ;;  %v2156_v29 = vsel %vm7266_vm3, %v7239_v14, %v2152_v34  ;;  %vm2158_vm6 = vcmp.eq.f32.partialorder %v2157_v62, 8.507059e+37  ;;  %v3845_v14 = vpop.eup %3844  ;;  %v2171_v63 = vmul.f32 %v7253_v55, %v2170_v7  ;;  %v9588_v34 = vld [vmem:[#allocation50_spill] sm:$0xff]  ;;  %v9590_v62 = vld [vmem:[#allocation55_spill] sm:$0xff] }
 0x443   :  { %v2132_v10 = vmul.f32 %v3843_v11, %v2131_v13  ;;  %v2161_v35 = vsel %vm2158_vm6, %v2160_v25, %v2156_v29  ;;  %v7406_v13 = vld [vmem:[#allocation3 + $0x60] sm:$0xff]  ;;  %v9593_v29 = vld [vmem:[#allocation65_spill] sm:$0xff]  ;;  %v9594_v7 = vld [vmem:[#allocation66_spill] sm:$0xff] }
 0x444   :  { %2440 = vmatpush.msrb.mxu1 %v9579_v50  ;;  %2480 = vmatpush.msrb.mxu3 %v6695_v48  ;;  %v2141_v48 = vor.u32 1.1754944e-38, %v2140_v16  ;;  %vm2139_vm8 = vcmp.eq.f32.partialorder %v2138_v49, 8.507059e+37  ;;  %v9591_v16 = vld [vmem:[#allocation60_spill] sm:$0xff]  ;;  %v7418_v49 = vld [vmem:[#allocation3 + $0x50] sm:$0xff] }
 0x445   :  { %v2133_v0 = vadd.f32 %v3843_v11, %v2132_v10  ;;  %v7414_v50 = vld [vmem:[#allocation3 + $0x40] sm:$0xff]  ;;  %v9592_v10 = vld [vmem:[#allocation62_spill] sm:$0xff] }
 0x446   :  { %2441 = vmatpush.msrb.mxu1 %v6702_v38  ;;  %2481 = vmatpush.msrb.mxu3 %v6705_v43  ;;  %v2183_v43 = vmul.f32 %v2161_v35, %v6729_v24  ;;  %v7422_v25 = vld [vmem:[#allocation3 + $0x20] sm:$0xff] }
 0x447   :  { %2304 = vmatmul.f32.vlgmr.msra.gmra.mxu1 %v2033_v19  ;;  %2344 = vmatmul.f32.vlgmr.msra.gmra.mxu3 %v2033_v19  ;;  %v2137_v60 = vsel %vm2136_vm7, %v3843_v11, %v2133_v0  ;;  %v7390_v11 = vld [vmem:[#allocation3 + $0xa0] sm:$0xff]  ;;  %v7426_v0 = vld [vmem:[#allocation3 + $0x30] sm:$0xff] }
 0x448   :  { %2442 = vmatpush.msrb.mxu1 %v6709_v53  ;;  %2482 = vmatpush.msrb.mxu3 %v6712_v3  ;;  %v2142_v38 = vsel %vm2139_vm8, %v2141_v48, %v2137_v60  ;;  %v2172_v3 = vadd.f32 %v7253_v55, %v2171_v63  ;;  %v9595_v48 = vld [vmem:[#allocation69_spill] sm:$0xff]  ;;  %v7430_v35 = vld [vmem:[#allocation3] sm:$0xff]  ;;  %v9596_v60 = vld [vmem:[#allocation70_spill] sm:$0xff] }
 0x449   :  { %v2184_v32 = vmul.f32 %v3845_v14, %v2142_v38  ;;  %v9597_v14 = vld [vmem:[#allocation73_spill] sm:$0xff]  ;;  %v9598_v63 = vld [vmem:[#allocation74_spill] sm:$0xff]  ;;  %v9599_v38 = vld [vmem:[#allocation79_spill] sm:$0xff] }
 0x44a   :  { %2443 = vmatpush.msrb.mxu1 %v6716_v2  ;;  %2483 = vmatpush.msrb.mxu3 %v6719_v61  ;;  %v2179_v2 = vand.u32 2147483648, %v7246_v52  ;;  %v2177_v61 = vand.u32 2147483647, %v7246_v52  ;;  %v2176_v24 = vsel %vm2175_vm11, %v7253_v55, %v2172_v3  ;;  %v7386_v55 = vld [vmem:[#allocation3 + $0xd0] sm:$0xff] }
 0x44b   :  { %v7285_v53 = vadd.f32 %v2184_v32, %v2183_v43  ;;  %v9600_v43 = vld [vmem:[#allocation82_spill] sm:$0xff]  ;;  %v9601_v32 = vld [vmem:[#allocation85_spill] sm:$0xff] }
 0x44c   :  { %2444 = vmatpush.msrb.mxu1 %v6723_v44  ;;  %2484 = vmatpush.msrb.mxu3 %v6726_v12  ;;  %v9581_v44 = vld [vmem:[#allocation31_spill] sm:$0xff]  ;;  %v9582_v12 = vld [vmem:[#allocation56_spill] sm:$0xff]  ;;  %vm2178_vm12 = vcmp.eq.f32.partialorder %v2177_v61, 8.507059e+37  ;;  %v9602_v3 = vld [vmem:[#allocation86_spill] sm:$0xff] }
 0x44d   :  { %3846 = vtanh.f32 %v7285_v53  ;;  %v9605_v61 = vld [vmem:[#allocation38_spill] sm:$0xff] }
 0x44e   :  { %2445 = vmatpush.msrb.mxu1 %v6733_v40  ;;  %2485 = vmatpush.msrb.mxu3 %v9580_v21  ;;  %v2180_v40 = vor.u32 1.1754944e-38, %v2179_v2  ;;  %v9603_v21 = vld [vmem:[#allocation89_spill] sm:$0xff] }
 0x44f   :  { %v9604_v2 = vld [vmem:[#allocation13_spill] sm:$0xff] }
 0x450   :  { %2446 = vmatpush.msrb.mxu1 %v9581_v44  ;;  %2486 = vmatpush.msrb.mxu3 %v9582_v12  ;;  %v2181_v19 = vsel %vm2178_vm12, %v2180_v40, %v2176_v24  ;;  %v9606_v44 = vld [vmem:[#allocation39_spill] sm:$0xff]  ;;  %v9607_v12 = vld [vmem:[#allocation90_spill] sm:$0xff]  ;;  %v9610_v40 = vld [vmem:[#allocation44_spill] sm:$0xff] }
 0x451   :  { %v9608_v24 = vld [vmem:[#allocation43_spill] sm:$0xff] }
 0x452   :  { %2447 = vmatpush.msrb.mxu1 %v9583_v1  ;;  %2487 = vmatpush.msrb.mxu3 %v6753_v5  ;;  %v7311_v5 = vld [vmem:[#allocation3 + $0x1f0] sm:$0xff]  ;;  %v9609_v1 = vld [vmem:[#allocation93_spill] sm:$0xff] }
 0x453   :  { %v3847_v9 = vpop.eup %3846 }
 0x454   :  { %2448 = vmatpush.msrb.mxu1 %v6756_v8  ;;  %2488 = vmatpush.msrb.mxu3 %v6759_v26  ;;  %v7302_v52 = vmul.f32 %v3847_v9, %v2181_v19  ;;  %v7316_v26 = vld [vmem:[#allocation3 + $0x1c0] sm:$0xff]  ;;  %v7327_v8 = vld [vmem:[#allocation3 + $0x1b0] sm:$0xff]  ;;  %v9612_v19 = vld [vmem:[#allocation47_spill] sm:$0xff] }
 0x455   :  { %v9611_v9 = vld [vmem:[#allocation94_spill] sm:$0xff] }
 0x456   :  { %2449 = vmatpush.msrb.mxu1 %v6764_v56  ;;  %2489 = vmatpush.msrb.mxu3 %v6767_v41  ;;  %v7319_v56 = vld [vmem:[#allocation3 + $0x1d0] sm:$0xff]  ;;  %v7324_v41 = vld [vmem:[#allocation3 + $0x1a0] sm:$0xff] }
 0x457   :  { %2204 = vmatmul.f32.vlgmr.msra.gmra.mxu0 %v7302_v52  ;;  %2244 = vmatmul.f32.vlgmr.msrb.gmra.mxu2 %v7302_v52 }
 0x458   :  { %2418 = vmatpush.msra.mxu0 %v7308_v30  ;;  %2458 = vmatpush.msrb.mxu2 %v7311_v5 }
 0x459   :  { %2450 = vmatpush.msrb.mxu1 %v6774_v31  ;;  %2490 = vmatpush.msrb.mxu3 %v6777_v45  ;;  %v7332_v31 = vld [vmem:[#allocation3 + $0x180] sm:$0xff]  ;;  %v7335_v45 = vld [vmem:[#allocation3 + $0x190] sm:$0xff] }
 0x45a   :  { %2419 = vmatpush.msra.mxu0 %v7316_v26  ;;  %2459 = vmatpush.msrb.mxu2 %v7319_v56 }
 0x45b   :  { %2451 = vmatpush.msrb.mxu1 %v6782_v28  ;;  %2491 = vmatpush.msrb.mxu3 %v6785_v33  ;;  %v7342_v28 = vld [vmem:[#allocation3 + $0x160] sm:$0xff]  ;;  %v7346_v33 = vld [vmem:[#allocation3 + $0x170] sm:$0xff] }
 0x45c   :  { %2420 = vmatpush.msra.mxu0 %v7324_v41  ;;  %2460 = vmatpush.msrb.mxu2 %v7327_v8 }
 0x45d   :  { %2452 = vmatpush.msrb.mxu1 %v6790_v15  ;;  %2492 = vmatpush.msrb.mxu3 %v6793_v18  ;;  %v7350_v15 = vld [vmem:[#allocation3 + $0x140] sm:$0xff]  ;;  %v7354_v18 = vld [vmem:[#allocation3 + $0x150] sm:$0xff] }
 0x45e   :  { %2421 = vmatpush.msra.mxu0 %v7332_v31  ;;  %2461 = vmatpush.msrb.mxu2 %v7335_v45 }
 0x45f   :  { %2453 = vmatpush.msrb.mxu1 %v6798_v22  ;;  %2493 = vmatpush.msrb.mxu3 %v6801_v20  ;;  %v7358_v22 = vld [vmem:[#allocation3 + $0x120] sm:$0xff]  ;;  %v7362_v20 = vld [vmem:[#allocation3 + $0x130] sm:$0xff] }
 0x460   :  { %2284 = vmatmul.f32.vlgmr.msrb.gmra.mxu0 %v7302_v52  ;;  %2324 = vmatmul.f32.vlgmr.msra.gmra.mxu2 %v7302_v52 }
 0x461   :  { %2422 = vmatpush.msra.mxu0 %v7342_v28  ;;  %2454 = vmatmul.f32.vlgmr.msrb.gmra.mxu1 %v7302_v52 }
 0x462   :  { %2462 = vmatpush.msrb.mxu2 %v7346_v33  ;;  %2494 = vmatmul.f32.vlgmr.msrb.gmra.mxu3 %v7302_v52 }
 0x463   :  { %2423 = vmatpush.msra.mxu0 %v7350_v15  ;;  %2585 = vmatpush.msra.mxu1 %v6811_v58  ;;  %v7370_v58 = vld [vmem:[#allocation3 + $0x110] sm:$0xff] }
 0x464   :  { %2463 = vmatpush.msrb.mxu2 %v7354_v18  ;;  %2625 = vmatpush.msra.mxu3 %v6815_v46  ;;  %v7374_v46 = vld [vmem:[#allocation3 + $0xe0] sm:$0xff] }
 0x465   :  { %2424 = vmatpush.msra.mxu0 %v7358_v22  ;;  %2586 = vmatpush.msra.mxu1 %v6819_v36  ;;  %v7378_v36 = vld [vmem:[#allocation3 + $0xf0] sm:$0xff] }
 0x466   :  { %2464 = vmatpush.msrb.mxu2 %v7362_v20  ;;  %2626 = vmatpush.msra.mxu3 %v6823_v57  ;;  %v7382_v57 = vld [vmem:[#allocation3 + $0xc0] sm:$0xff] }
 0x467   :  { %2425 = vmatpush.msra.mxu0 %v7366_v59  ;;  %2587 = vmatpush.msra.mxu1 %v6827_v39  ;;  %v9584_v39 = vld [vmem:[#allocation42_spill] sm:$0xff] }
 0x468   :  { %2465 = vmatpush.msrb.mxu2 %v7370_v58  ;;  %2627 = vmatpush.msra.mxu3 %v6831_v54  ;;  %v9585_v54 = vld [vmem:[#allocation45_spill] sm:$0xff] }
 0x469   :  { %2426 = vmatpush.msra.mxu0 %v7374_v46  ;;  %2588 = vmatpush.msra.mxu1 %v6835_v51  ;;  %v9586_v51 = vld [vmem:[#allocation46_spill] sm:$0xff] }
 0x46a   :  { %2466 = vmatpush.msrb.mxu2 %v7378_v36  ;;  %2628 = vmatpush.msra.mxu3 %v6839_v6  ;;  %v9587_v6 = vld [vmem:[#allocation49_spill] sm:$0xff] }
 0x46b   :  { %2427 = vmatpush.msra.mxu0 %v7382_v57  ;;  %2589 = vmatpush.msra.mxu1 %v9584_v39  ;;  %v9614_v39 = vld [vmem:[#allocation48_spill] sm:$0xff] }
 0x46c   :  { %2467 = vmatpush.msrb.mxu2 %v7386_v55  ;;  %2629 = vmatpush.msra.mxu3 %v9585_v54  ;;  %v9615_v54 = vld [vmem:[#allocation101_spill] sm:$0xff] }
 0x46d   :  { %2428 = vmatpush.msra.mxu0 %v7390_v11  ;;  %2590 = vmatpush.msra.mxu1 %v9586_v51  ;;  %v9616_v51 = vld [vmem:[#allocation52_spill] sm:$0xff] }
 0x46e   :  { %2468 = vmatpush.msrb.mxu2 %v7394_v42  ;;  %2630 = vmatpush.msra.mxu3 %v9587_v6  ;;  %v9617_v6 = vld [vmem:[#allocation105_spill] sm:$0xff] }
 0x46f   :  { %2429 = vmatpush.msra.mxu0 %v7398_v23  ;;  %2591 = vmatpush.msra.mxu1 %v9588_v34  ;;  %v9618_v34 = vld [vmem:[#allocation53_spill] sm:$0xff] }
 0x470   :  { %2469 = vmatpush.msrb.mxu2 %v7402_v17  ;;  %2631 = vmatpush.msra.mxu3 %v9589_v4  ;;  %v9619_v4 = vld [vmem:[#allocation106_spill] sm:$0xff] }
 0x471   :  { %2430 = vmatpush.msra.mxu0 %v7406_v13  ;;  %2592 = vmatpush.msra.mxu1 %v9590_v62  ;;  %v9620_v62 = vld [vmem:[#allocation58_spill] sm:$0xff] }
 0x472   :  { %2470 = vmatpush.msrb.mxu2 %v7410_v37  ;;  %2632 = vmatpush.msra.mxu3 %v9591_v16  ;;  %v9621_v16 = vld [vmem:[#allocation109_spill] sm:$0xff] }
 0x473   :  { %2431 = vmatpush.msra.mxu0 %v7414_v50  ;;  %2593 = vmatpush.msra.mxu1 %v9592_v10  ;;  %v9622_v10 = vld [vmem:[#allocation59_spill] sm:$0xff] }
 0x474   :  { %2471 = vmatpush.msrb.mxu2 %v7418_v49  ;;  %2633 = vmatpush.msra.mxu3 %v9593_v29  ;;  %v9623_v29 = vld [vmem:[#allocation110_spill] sm:$0xff] }
 0x475   :  { %2432 = vmatpush.msra.mxu0 %v7422_v25  ;;  %2594 = vmatpush.msra.mxu1 %v9594_v7  ;;  %v9624_v7 = vld [vmem:[#allocation63_spill] sm:$0xff] }
 0x476   :  { %2472 = vmatpush.msrb.mxu2 %v7426_v0  ;;  %2634 = vmatpush.msra.mxu3 %v9595_v48  ;;  %v9625_v48 = vld [vmem:[#allocation64_spill] sm:$0xff] }
 0x477   :  { %2433 = vmatpush.msra.mxu0 %v7430_v35  ;;  %2595 = vmatpush.msra.mxu1 %v9596_v60  ;;  %v9626_v60 = vld [vmem:[#allocation67_spill] sm:$0xff] }
 0x478   :  { %2473 = vmatpush.msrb.mxu2 %v9597_v14  ;;  %2434 = vmatmul.f32.vlgmr.msra.gmra.mxu0 %v7302_v52  ;;  %v9627_v14 = vld [vmem:[#allocation68_spill] sm:$0xff] }
 0x479   :  { %2474 = vmatmul.f32.vlgmr.msrb.gmra.mxu2 %v7302_v52  ;;  %2635 = vmatpush.msra.mxu3 %v9598_v63  ;;  %v9613_v52 = vld [vmem:[#allocation98_spill] sm:$0xff]  ;;  %v9628_v63 = vld [vmem:[#allocation71_spill] sm:$0xff] }
 0x47a   :  { %2596 = vmatpush.msra.mxu1 %v9599_v38  ;;  %2565 = vmatpush.msrb.mxu0 %v9600_v43  ;;  %v9629_v38 = vld [vmem:[#allocation72_spill] sm:$0xff]  ;;  %v9630_v43 = vld [vmem:[#allocation77_spill] sm:$0xff] }
 0x47b   :  { %2636 = vmatpush.msra.mxu3 %v9601_v32  ;;  %2605 = vmatpush.msra.mxu2 %v9602_v3  ;;  %v9631_v32 = vld [vmem:[#allocation78_spill] sm:$0xff]  ;;  %v9632_v3 = vld [vmem:[#allocation83_spill] sm:$0xff] }
 0x47c   :  { %2597 = vmatpush.msra.mxu1 %v9603_v21  ;;  %2566 = vmatpush.msrb.mxu0 %v9604_v2  ;;  %v9633_v21 = vld [vmem:[#allocation84_spill] sm:$0xff]  ;;  %v9634_v2 = vld [vmem:[#allocation87_spill] sm:$0xff] }
 0x47d   :  { %2637 = vmatpush.msra.mxu3 %v9605_v61  ;;  %2606 = vmatpush.msra.mxu2 %v9606_v44  ;;  %v9635_v61 = vld [vmem:[#allocation88_spill] sm:$0xff]  ;;  %v9636_v44 = vld [vmem:[#allocation91_spill] sm:$0xff] }
 0x47e   :  { %2598 = vmatpush.msra.mxu1 %v9607_v12  ;;  %2567 = vmatpush.msrb.mxu0 %v9608_v24  ;;  %v9637_v12 = vld [vmem:[#allocation92_spill] sm:$0xff] }
 0x47f   :  { %2638 = vmatpush.msra.mxu3 %v9609_v1  ;;  %2607 = vmatpush.msra.mxu2 %v9610_v40  ;;  %v9638_v24 = vld [vmem:[#allocation96_spill] sm:$0xff]  ;;  %v9639_v1 = vld [vmem:[#allocation97_spill] sm:$0xff]  ;;  %v9640_v40 = vld [vmem:[#allocation103_spill] sm:$0xff] }
 0x480   :  { %2599 = vmatpush.msra.mxu1 %v9611_v9  ;;  %2568 = vmatpush.msrb.mxu0 %v9612_v19  ;;  %v9641_v9 = vld [vmem:[#allocation104_spill] sm:$0xff]  ;;  %v9642_v19 = vld [vmem:[#allocation107_spill] sm:$0xff] }
 0x481   :  { %2639 = vmatpush.msra.mxu3 %v9613_v52  ;;  %2608 = vmatpush.msra.mxu2 %v9614_v39  ;;  %v9643_v52 = vld [vmem:[#allocation108_spill] sm:$0xff]  ;;  %v9644_v39 = vld [vmem:[#allocation111_spill] sm:$0xff] }
 0x482   :  { %2600 = vmatpush.msra.mxu1 %v9615_v54  ;;  %2569 = vmatpush.msrb.mxu0 %v9616_v51  ;;  %v9645_v54 = vld [vmem:[#allocation112_spill] sm:$0xff]  ;;  %v9646_v51 = vld [vmem:[#allocation118_spill] sm:$0xff] }
 0x483   :  { %2640 = vmatpush.msra.mxu3 %v9617_v6  ;;  %2609 = vmatpush.msra.mxu2 %v9618_v34  ;;  %v9647_v6 = vld [vmem:[#allocation119_spill] sm:$0xff]  ;;  %v9648_v34 = vld [vmem:[#allocation121_spill] sm:$0xff] }
 0x484   :  { %2665 = vmatpush.msrb.mxu1 %v9619_v4  ;;  %2570 = vmatpush.msrb.mxu0 %v9621_v16  ;;  %v9649_v4 = vld [vmem:[#allocation26_spill] sm:$0xff]  ;;  %v9651_v16 = vld [vmem:[#allocation19_spill] sm:$0xff] }
 0x485   :  { %2705 = vmatpush.msrb.mxu3 %v9620_v62  ;;  %2610 = vmatpush.msra.mxu2 %v9622_v10  ;;  %v9650_v62 = vld [vmem:[#allocation37_spill] sm:$0xff]  ;;  %v9652_v10 = vld [vmem:[#allocation36_spill] sm:$0xff] }
 0x486   :  { %2666 = vmatpush.msrb.mxu1 %v9623_v29  ;;  %2571 = vmatpush.msrb.mxu0 %v9625_v48  ;;  %v9653_v29 = vld [vmem:[#allocation17_spill] sm:$0xff]  ;;  %v9655_v48 = vld [vmem:[#allocation20_spill] sm:$0xff] }
 0x487   :  { %2706 = vmatpush.msrb.mxu3 %v9624_v7  ;;  %2611 = vmatpush.msra.mxu2 %v9626_v60  ;;  %v9654_v7 = vld [vmem:[#allocation18_spill] sm:$0xff]  ;;  %v9656_v60 = vld [vmem:[#allocation21_spill] sm:$0xff] }
 0x488   :  { %2667 = vmatpush.msrb.mxu1 %v9627_v14  ;;  %2572 = vmatpush.msrb.mxu0 %v9629_v38  ;;  %v9657_v14 = vld [vmem:[#allocation22_spill] sm:$0xff]  ;;  %v9659_v38 = vld [vmem:[#allocation24_spill] sm:$0xff] }
 0x489   :  { %2707 = vmatpush.msrb.mxu3 %v9628_v63  ;;  %2612 = vmatpush.msra.mxu2 %v9630_v43  ;;  %v9658_v63 = vld [vmem:[#allocation23_spill] sm:$0xff]  ;;  %v9660_v43 = vld [vmem:[#allocation25_spill] sm:$0xff] }
 0x48a   :  { %2668 = vmatpush.msrb.mxu1 %v9631_v32  ;;  %2573 = vmatpush.msrb.mxu0 %v9633_v21  ;;  %v9661_v32 = vld [vmem:[#allocation27_spill] sm:$0xff]  ;;  %v9663_v21 = vld [vmem:[#allocation29_spill] sm:$0xff] }
 0x48b   :  { %2708 = vmatpush.msrb.mxu3 %v9632_v3  ;;  %2613 = vmatpush.msra.mxu2 %v9634_v2  ;;  %v9662_v3 = vld [vmem:[#allocation28_spill] sm:$0xff]  ;;  %v9664_v2 = vld [vmem:[#allocation30_spill] sm:$0xff] }
 0x48c   :  { %2669 = vmatpush.msrb.mxu1 %v9635_v61  ;;  %2574 = vmatpush.msrb.mxu0 %v9637_v12  ;;  %v9665_v61 = vld [vmem:[#allocation126_spill] sm:$0xff]  ;;  %v9667_v12 = vld [vmem:[#allocation128_spill] sm:$0xff] }
 0x48d   :  { %2709 = vmatpush.msrb.mxu3 %v9636_v44  ;;  %2614 = vmatpush.msra.mxu2 %v9638_v24  ;;  %v9666_v44 = vld [vmem:[#allocation127_spill] sm:$0xff]  ;;  %v9668_v24 = vld [vmem:[#allocation129_spill] sm:$0xff] }
 0x48e   :  { %2670 = vmatpush.msrb.mxu1 %v9639_v1  ;;  %2575 = vmatpush.msrb.mxu0 %v9641_v9  ;;  %v9669_v1 = vld [vmem:[#allocation130_spill] sm:$0xff]  ;;  %v9671_v9 = vld [vmem:[#allocation132_spill] sm:$0xff] }
 0x48f   :  { %2710 = vmatpush.msrb.mxu3 %v9640_v40  ;;  %2615 = vmatpush.msra.mxu2 %v9642_v19  ;;  %v9670_v40 = vld [vmem:[#allocation131_spill] sm:$0xff]  ;;  %v9672_v19 = vld [vmem:[#allocation133_spill] sm:$0xff] }
 0x490   :  { %2671 = vmatpush.msrb.mxu1 %v9643_v52  ;;  %2576 = vmatpush.msrb.mxu0 %v9645_v54  ;;  %v9673_v52 = vld [vmem:[#allocation134_spill] sm:$0xff]  ;;  %v9675_v54 = vld [vmem:[#allocation136_spill] sm:$0xff] }
 0x491   :  { %2711 = vmatpush.msrb.mxu3 %v9644_v39  ;;  %2616 = vmatpush.msra.mxu2 %v9646_v51  ;;  %v9674_v39 = vld [vmem:[#allocation135_spill] sm:$0xff]  ;;  %v9676_v51 = vld [vmem:[#allocation137_spill] sm:$0xff] }
 0x492   :  { %2672 = vmatpush.msrb.mxu1 %v9647_v6  ;;  %2577 = vmatpush.msrb.mxu0 %v9649_v4  ;;  %v9677_v6 = vld [vmem:[#allocation138_spill] sm:$0xff]  ;;  %v9679_v4 = vld [vmem:[#allocation140_spill] sm:$0xff] }
 0x493   :  { %2712 = vmatpush.msrb.mxu3 %v9648_v34  ;;  %2617 = vmatpush.msra.mxu2 %v9650_v62  ;;  %v9678_v34 = vld [vmem:[#allocation139_spill] sm:$0xff]  ;;  %v9680_v62 = vld [vmem:[#allocation141_spill] sm:$0xff] }
 0x494   :  { %2673 = vmatpush.msrb.mxu1 %v9651_v16  ;;  %2578 = vmatpush.msrb.mxu0 %v9653_v29  ;;  %v9681_v16 = vld [vmem:[#allocation142_spill] sm:$0xff]  ;;  %v9683_v29 = vld [vmem:[#allocation144_spill] sm:$0xff] }
 0x495   :  { %2713 = vmatpush.msrb.mxu3 %v9652_v10  ;;  %2618 = vmatpush.msra.mxu2 %v9654_v7  ;;  %v9682_v10 = vld [vmem:[#allocation143_spill] sm:$0xff]  ;;  %v9684_v7 = vld [vmem:[#allocation145_spill] sm:$0xff] }
 0x496   :  { %2674 = vmatpush.msrb.mxu1 %v9655_v48  ;;  %2579 = vmatpush.msrb.mxu0 %v9657_v14  ;;  %v9685_v48 = vld [vmem:[#allocation146_spill] sm:$0xff]  ;;  %v9687_v14 = vld [vmem:[#allocation148_spill] sm:$0xff] }
 0x497   :  { %2714 = vmatpush.msrb.mxu3 %v9656_v60  ;;  %2619 = vmatpush.msra.mxu2 %v9658_v63  ;;  %v9686_v60 = vld [vmem:[#allocation147_spill] sm:$0xff]  ;;  %v9688_v63 = vld [vmem:[#allocation149_spill] sm:$0xff] }
 0x498   :  { %2675 = vmatpush.msrb.mxu1 %v9659_v38  ;;  %2580 = vmatpush.msrb.mxu0 %v9661_v32  ;;  %v9689_v38 = vld [vmem:[#allocation150_spill] sm:$0xff]  ;;  %v9691_v32 = vld [vmem:[#allocation152_spill] sm:$0xff] }
 0x499   :  { %2715 = vmatpush.msrb.mxu3 %v9660_v43  ;;  %2620 = vmatpush.msra.mxu2 %v9662_v3  ;;  %v9690_v43 = vld [vmem:[#allocation151_spill] sm:$0xff]  ;;  %v9692_v3 = vld [vmem:[#allocation153_spill] sm:$0xff] }
 0x49a   :  { %2676 = vmatpush.msrb.mxu1 %v9663_v21  ;;  %2645 = vmatpush.msra.mxu0 %v9665_v61  ;;  %v9693_v21 = vld [vmem:[#allocation154_spill] sm:$0xff]  ;;  %v9695_v61 = vld [vmem:[#allocation156_spill] sm:$0xff] }
 0x49b   :  { %2716 = vmatpush.msrb.mxu3 %v9664_v2  ;;  %2685 = vmatpush.msrb.mxu2 %v9666_v44  ;;  %v9694_v2 = vld [vmem:[#allocation155_spill] sm:$0xff]  ;;  %v9696_v44 = vld [vmem:[#allocation157_spill] sm:$0xff] }
 0x49c   :  { %2677 = vmatpush.msrb.mxu1 %v9667_v12  ;;  %2646 = vmatpush.msra.mxu0 %v9669_v1  ;;  %v9697_v12 = vld [vmem:[#allocation158_spill] sm:$0xff]  ;;  %v9699_v1 = vld [vmem:[#allocation160_spill] sm:$0xff] }
 0x49d   :  { %2717 = vmatpush.msrb.mxu3 %v9668_v24  ;;  %2686 = vmatpush.msrb.mxu2 %v9670_v40  ;;  %v9698_v24 = vld [vmem:[#allocation159_spill] sm:$0xff]  ;;  %v9700_v40 = vld [vmem:[#allocation161_spill] sm:$0xff] }
 0x49e   :  { %2678 = vmatpush.msrb.mxu1 %v9671_v9  ;;  %2647 = vmatpush.msra.mxu0 %v9673_v52  ;;  %v9701_v9 = vld [vmem:[#allocation162_spill] sm:$0xff]  ;;  %v9703_v52 = vld [vmem:[#allocation164_spill] sm:$0xff] }
 0x49f   :  { %2718 = vmatpush.msrb.mxu3 %v9672_v19  ;;  %2687 = vmatpush.msrb.mxu2 %v9674_v39  ;;  %v9702_v19 = vld [vmem:[#allocation163_spill] sm:$0xff]  ;;  %v9704_v39 = vld [vmem:[#allocation165_spill] sm:$0xff] }
 0x4a0   :  { %2679 = vmatpush.msrb.mxu1 %v9675_v54  ;;  %2648 = vmatpush.msra.mxu0 %v9677_v6  ;;  %v9705_v6 = vld [vmem:[#allocation32_spill] sm:$0xff] }
 0x4a1   :  { %2719 = vmatpush.msrb.mxu3 %v9676_v51  ;;  %2688 = vmatpush.msrb.mxu2 %v9678_v34 }
 0x4a2   :  { %2680 = vmatpush.msrb.mxu1 %v9679_v4  ;;  %2649 = vmatpush.msra.mxu0 %v9681_v16 }
 0x4a3   :  { %2720 = vmatpush.msrb.mxu3 %v9680_v62  ;;  %2689 = vmatpush.msrb.mxu2 %v9682_v10 }
 0x4a4   :  { %2650 = vmatpush.msra.mxu0 %v9683_v29 }
 0x4a5   :  { %2690 = vmatpush.msrb.mxu2 %v9684_v7  ;;  %v9706_v7 = vld [vmem:[#allocation33_spill] sm:$0xff] }
 0x4a6   :  { %2651 = vmatpush.msra.mxu0 %v9685_v48 }
 0x4a7   :  { %2691 = vmatpush.msrb.mxu2 %v9686_v60 }
 0x4a8   :  { %2652 = vmatpush.msra.mxu0 %v9687_v14  ;;  %v9707_v14 = vld [vmem:[#allocation122_spill] sm:$0xff] }
 0x4a9   :  { %2692 = vmatpush.msrb.mxu2 %v9688_v63  ;;  %v9708_v63 = vld [vmem:[#allocation100_spill] sm:$0xff] }
 0x4aa   :  { %2653 = vmatpush.msra.mxu0 %v9689_v38  ;;  %v202_v38 = vadd.f32 %v9708_v63, %v9707_v14 }
 0x4ab   :  { %2693 = vmatpush.msrb.mxu2 %v9690_v43 }
 0x4ac   :  { %2654 = vmatpush.msra.mxu0 %v9691_v32 }
 0x4ad   :  { %2694 = vmatpush.msrb.mxu2 %v9692_v3 }
 0x4ae   :  { %2655 = vmatpush.msra.mxu0 %v9693_v21 }
 0x4af   :  { %2695 = vmatpush.msrb.mxu2 %v9694_v2 }
 0x4b0   :  { %2656 = vmatpush.msra.mxu0 %v9695_v61 }
 0x4b1   :  { %2696 = vmatpush.msrb.mxu2 %v9696_v44 }
 0x4b2   :  { %2657 = vmatpush.msra.mxu0 %v9697_v12 }
 0x4b3   :  { %2697 = vmatpush.msrb.mxu2 %v9698_v24  ;;  %v9709_v24 = vld [vmem:[#allocation34_spill] sm:$0xff] }
 0x4b4   :  { %2658 = vmatpush.msra.mxu0 %v9699_v1 }
 0x4b5   :  { %2698 = vmatpush.msrb.mxu2 %v9700_v40 }
 0x4b6   :  { %2659 = vmatpush.msra.mxu0 %v9701_v9 }
 0x4b7   :  { %2699 = vmatpush.msrb.mxu2 %v9702_v19 }
 0x4b8   :  { %2660 = vmatpush.msra.mxu0 %v9703_v52 }
 0x4b9   :  { %2700 = vmatpush.msrb.mxu2 %v9704_v39 }
 0x4bc   :  { %v2225_v54 = vpop.f32.mrf.mxu1 }
 0x4c2   :  { %v2265_v4 = vpop.f32.mrf.mxu3 }
 0x4c4   :  { %v2305_v62 = vpop.f32.mrf.mxu1 }
 0x4ca   :  { %v2345_v3 = vpop.f32.mrf.mxu3 }
 0x4d4   :  { %v2205_v51 = vpop.f32.mrf.mxu0 }
 0x4d5   :  { %v2206_v34 = vadd.f32 %v2205_v51, %v9705_v6  ;;  %v9711_v51 = vld [vmem:[#allocation114_spill] sm:$0xff] }
 0x4d7   :  { %v2226_v16 = vadd.f32 %v2225_v54, %v2206_v34  ;;  %v9710_v54 = vld [vmem:[#allocation124_spill] sm:$0xff] }
 0x4d8   :  { %v284_v34 = vadd.f32 %v9711_v51, %v9710_v54 }
 0x4d9   :  { %v3667_v10 = vmul.f32 -1.442695, %v2226_v16 }
 0x4da   :  { %v2245_v29 = vpop.f32.mrf.mxu2 }
 0x4db   :  { %3848 = vpow2.f32 %v3667_v10  ;;  %v2246_v48 = vadd.f32 %v2245_v29, %v9706_v7  ;;  %v9712_v10 = vld [vmem:[#allocation35_spill] sm:$0xff] }
 0x4dd   :  { %v2266_v60 = vadd.f32 %v2265_v4, %v2246_v48  ;;  %v2285_v9 = vpop.f32.mrf.mxu0 }
 0x4de   :  { %v2455_v43 = vpop.f32.mrf.mxu1  ;;  %v2286_v29 = vadd.f32 %v2285_v9, %v9712_v10 }
 0x4df   :  { %v3668_v32 = vmul.f32 -1.442695, %v2266_v60  ;;  %v2499_v21 = vadd.f32 %v2455_v43, %v202_v38 }
 0x4e0   :  { %v2306_v43 = vadd.f32 %v2305_v62, %v2286_v29 }
 0x4e1   :  { %v3849_v2 = vpop.eup %3848  ;;  %3850 = vpow2.f32 %v3668_v32  ;;  %v3671_v12 = vmul.f32 -1.442695, %v2499_v21 }
 0x4e2   :  { %v2351_v61 = vadd.f32 1.0, %v3849_v2 }
 0x4e3   :  { %v2325_v44 = vpop.f32.mrf.mxu2 }
 0x4e4   :  { %3852 = vrcp.f32 %v2351_v61  ;;  %v2326_v1 = vadd.f32 %v2325_v44, %v9709_v24  ;;  %vm2357_vm14 = vweird.f32 %v2351_v61  ;;  %v2361_v9 = vand.u32 2147483647, %v2351_v61 }
 0x4e5   :  { %3854 = vpow2.f32 %v3671_v12  ;;  %v2495_v39 = vpop.f32.mrf.mxu3 }
 0x4e6   :  { %v2346_v19 = vadd.f32 %v2345_v3, %v2326_v1  ;;  %v2501_v60 = vadd.f32 %v2495_v39, %v284_v34  ;;  %v9713_v39 = vld [vmem:[#allocation102_spill] sm:$0xff]  ;;  %vm2362_vm2 = vcmp.eq.f32.partialorder %v2361_v9, 8.507059e+37 }
 0x4e7   :  { %v3851_v40 = vpop.eup %3850  ;;  %v9714_v34 = vld [vmem:[#allocation14_spill] sm:$0xff] }
 0x4e8   :  { %v2370_v52 = vadd.f32 1.0, %v3851_v40  ;;  %v3669_v4 = vmul.f32 -1.442695, %v2346_v19  ;;  %v3672_v21 = vmul.f32 -1.442695, %v2501_v60  ;;  %v2363_v40 = vand.u32 2147483648, %v2351_v61 }
 0x4ea   :  { %v3853_v16 = vpop.eup %3852  ;;  %3856 = vrcp.f32 %v2370_v52  ;;  %v2382_v62 = vand.u32 2147483648, %v2370_v52  ;;  %vm2376_vm1 = vweird.f32 %v2370_v52 }
 0x4eb   :  { %v2353_v48 = vmul.f32 %v3853_v16, %v2351_v61  ;;  %3858 = vpow2.f32 %v3669_v4  ;;  %v3855_v38 = vpop.eup %3854  ;;  %vm2358_vm13 = vweird.f32 %v3853_v16  ;;  %v161_v4 = vadd.f32 %v9714_v34, %v9713_v39 }
 0x4ec   :  { %v7552_v1 = vadd.f32 1.0, %v3855_v38  ;;  %3860 = vtanh.f32 %v2306_v43  ;;  %vm7556_vm15 = vmor %vm2357_vm14, %vm2358_vm13  ;;  %v2364_v61 = vor.u32 1.1754944e-38, %v2363_v40 }
 0x4ed   :  { %v2354_v63 = vsub.f32 1.0, %v2353_v48  ;;  %3862 = vpow2.f32 %v3672_v21  ;;  %v2380_v48 = vand.u32 2147483647, %v2370_v52 }
 0x4ee   :  { %vm2530_vm10 = vweird.f32 %v7552_v1 }
 0x4ef   :  { %v2355_v32 = vmul.f32 %v3853_v16, %v2354_v63  ;;  %vm2381_vm4 = vcmp.eq.f32.partialorder %v2380_v48, 8.507059e+37 }
 0x4f0   :  { %v3857_v3 = vpop.eup %3856 }
 0x4f1   :  { %v3859_v2 = vpop.eup %3858  ;;  %v2372_v44 = vmul.f32 %v3857_v3, %v2370_v52  ;;  %v2356_v12 = vadd.f32 %v3853_v16, %v2355_v32  ;;  %vm2377_vm0 = vweird.f32 %v3857_v3 }
 0x4f2   :  { %v2390_v19 = vadd.f32 1.0, %v3859_v2  ;;  %v3861_v21 = vpop.eup %3860  ;;  %vm2378_vm3 = vmor %vm2376_vm1, %vm2377_vm0  ;;  %v2383_v2 = vor.u32 1.1754944e-38, %v2382_v62 }
 0x4f3   :  { %v2373_v51 = vsub.f32 1.0, %v2372_v44  ;;  %v2360_v63 = vsel %vm7556_vm15, %v3853_v16, %v2356_v12  ;;  %v3863_v34 = vpop.eup %3862 }
 0x4f4   :  { %3864 = vrcp.f32 %v2390_v19  ;;  %v2365_v44 = vsel %vm2362_vm2, %v2364_v61, %v2360_v63  ;;  %v7570_v62 = vadd.f32 1.0, %v3863_v34  ;;  %v2402_v48 = vand.u32 2147483648, %v2390_v19 }
 0x4f5   :  { %v2374_v60 = vmul.f32 %v3857_v3, %v2373_v51  ;;  %3866 = vrcp.f32 %v7552_v1  ;;  %v2435_v38 = vpop.f32.mrf.mxu0  ;;  %v2407_v12 = vmul.f32 %v3861_v21, %v2365_v44  ;;  %vm2396_vm6 = vweird.f32 %v2390_v19 }
 0x4f6   :  { %v2498_v32 = vadd.f32 %v2435_v38, %v161_v4  ;;  %v2403_v61 = vor.u32 1.1754944e-38, %v2402_v48  ;;  %v7594_v48 = vld [vmem:[#allocation3 + $0x1d8] sm:$0xff]  ;;  %vm2550_vm2 = vweird.f32 %v7570_v62 }
 0x4f7   :  { %v2375_v43 = vadd.f32 %v3857_v3, %v2374_v60 }
 0x4f8   :  { %v3670_v51 = vmul.f32 -1.442695, %v2498_v32 }
 0x4f9   :  { %v2379_v39 = vsel %vm2378_vm3, %v3857_v3, %v2375_v43 }
 0x4fa   :  { %v3865_v10 = vpop.eup %3864  ;;  %v2384_v54 = vsel %vm2381_vm4, %v2383_v2, %v2379_v39  ;;  %3868 = vpow2.f32 %v3670_v51  ;;  %v2400_v39 = vand.u32 2147483647, %v2390_v19 }
 0x4fb   :  { %v7563_v29 = vpop.eup %3866  ;;  %v2406_v16 = vmul.f32 %v2384_v54, %v7242_v27  ;;  %v2392_v40 = vmul.f32 %v3865_v10, %v2390_v19  ;;  %vm2397_vm5 = vweird.f32 %v3865_v10  ;;  %v9717_v19 = vld [vmem:[#allocation113_spill] sm:$0xff] }
 0x4fc   :  { %v2526_v4 = vmul.f32 %v7563_v29, %v7552_v1  ;;  %vm2398_vm7 = vmor %vm2396_vm6, %vm2397_vm5  ;;  %vm2401_vm8 = vcmp.eq.f32.partialorder %v2400_v39, 8.507059e+37  ;;  %v2475_v44 = vpop.f32.mrf.mxu2  ;;  %v243_v34 = vadd.f32 %v9717_v19, %v5421_v47  ;;  %vm2531_vm9 = vweird.f32 %v7563_v29  ;;  %v7619_v19 = vld [vmem:[#allocation3 + $0x188] sm:$0xff] }
 0x4fd   :  { %v7566_v52 = vadd.f32 %v2407_v12, %v2406_v16  ;;  %v2393_v9 = vsub.f32 1.0, %v2392_v40  ;;  %v7582_v16 = vld [vmem:[#allocation3 + $0x1e8] sm:$0xff]  ;;  %v2536_v39 = vand.u32 2147483648, %v7552_v1  ;;  %vm7610_vm11 = vmor %vm2530_vm10, %vm2531_vm9 }
 0x4fe   :  { %v2527_v63 = vsub.f32 1.0, %v2526_v4  ;;  %v2500_v40 = vadd.f32 %v2475_v44, %v243_v34  ;;  %v7622_v34 = vld [vmem:[#allocation3 + $0x198] sm:$0xff] }
 0x4ff   :  { %3870 = vtanh.f32 %v7566_v52  ;;  %v2394_v3 = vmul.f32 %v3865_v10, %v2393_v9  ;;  %9721 = vst [vmem:[#allocation167_spill] sm:$0xff] %v7622_v34 }
 0x500   :  { %v3869_v60 = vpop.eup %3868  ;;  %3872 = vrcp.f32 %v7570_v62  ;;  %v2528_v2 = vmul.f32 %v7563_v29, %v2527_v63  ;;  %v2534_v63 = vand.u32 2147483647, %v7552_v1 }
 0x501   :  { %v2395_v27 = vadd.f32 %v3865_v10, %v2394_v3  ;;  %v7573_v54 = vadd.f32 1.0, %v3869_v60  ;;  %v7591_v3 = vld [vmem:[#allocation3 + $0x1c8] sm:$0xff] }
 0x502   :  { %v2529_v4 = vadd.f32 %v7563_v29, %v2528_v2  ;;  %vm2535_vm14 = vcmp.eq.f32.partialorder %v2534_v63, 8.507059e+37 }
 0x503   :  { %v2399_v38 = vsel %vm2398_vm7, %v3865_v10, %v2395_v27  ;;  %3874 = vrcp.f32 %v7573_v54  ;;  %v7585_v10 = vld [vmem:[#allocation3 + $0x1f8] sm:$0xff]  ;;  %v2515_v1 = vand.u32 2147483647, %v7573_v54  ;;  %vm2511_vm13 = vweird.f32 %v7573_v54 }
 0x504   :  { %v2404_v32 = vsel %vm2401_vm8, %v2403_v61, %v2399_v38  ;;  %v7602_v38 = vld [vmem:[#allocation3 + $0x1a8] sm:$0xff]  ;;  %v7605_v61 = vld [vmem:[#allocation3 + $0x1b8] sm:$0xff]  ;;  %3876 = vtanh.f32 %v2500_v40  ;;  %v2533_v44 = vsel %vm7610_vm11, %v7563_v29, %v2529_v4 }
 0x505   :  { %v3871_v43 = vpop.eup %3870  ;;  %9718 = vst [vmem:[#allocation166_spill] sm:$0xff] %v7605_v61  ;;  %v7629_v29 = vld [vmem:[#allocation3 + $0x178] sm:$0xff]  ;;  %vm2516_vm0 = vcmp.eq.f32.partialorder %v2515_v1, 8.507059e+37  ;;  %v7649_v1 = vld [vmem:[#allocation3 + $0x108] sm:$0xff] }
 0x506   :  { %v2410_v21 = vmul.f32 %v3871_v43, %v2404_v32  ;;  %v7580_v51 = vpop.eup %3872  ;;  %v2517_v32 = vand.u32 2147483648, %v7573_v54  ;;  %9723 = vst [vmem:[#allocation169_spill] sm:$0xff] %v7629_v29 }
 0x507   :  { %v2546_v60 = vmul.f32 %v7580_v51, %v7570_v62  ;;  %vm2551_vm1 = vweird.f32 %v7580_v51 }
 0x508   :  { %2601 = vmatmul.f32.vlgmr.msra.gmra.mxu1 %v2410_v21  ;;  %2641 = vmatmul.f32.vlgmr.msra.gmra.mxu3 %v2410_v21  ;;  %v2518_v4 = vor.u32 1.1754944e-38, %v2517_v32  ;;  %vm2552_vm3 = vmor %vm2550_vm2, %vm2551_vm1 }
 0x509   :  { %2815 = vmatpush.msra.mxu1 %v7582_v16  ;;  %2855 = vmatpush.msra.mxu3 %v7585_v10  ;;  %v3875_v12 = vpop.eup %3874 }
 0x50a   :  { %v2507_v9 = vmul.f32 %v3875_v12, %v7573_v54  ;;  %vm2512_vm12 = vweird.f32 %v3875_v12  ;;  %v7636_v54 = vld [vmem:[#allocation3 + $0x158] sm:$0xff] }
 0x50b   :  { %2816 = vmatpush.msra.mxu1 %v7591_v3  ;;  %2856 = vmatpush.msra.mxu3 %v7594_v48  ;;  %vm2513_vm15 = vmor %vm2511_vm13, %vm2512_vm12 }
 0x50c   :  { %v2508_v27 = vsub.f32 1.0, %v2507_v9  ;;  %v2537_v9 = vor.u32 1.1754944e-38, %v2536_v39 }
 0x50d   :  { %2817 = vmatpush.msra.mxu1 %v7602_v38  ;;  %2857 = vmatpush.msra.mxu3 %v7605_v61  ;;  %v2547_v61 = vsub.f32 1.0, %v2546_v60  ;;  %v7633_v60 = vld [vmem:[#allocation3 + $0x148] sm:$0xff] }
 0x50e   :  { %v2509_v2 = vmul.f32 %v3875_v12, %v2508_v27  ;;  %v7626_v27 = vld [vmem:[#allocation3 + $0x168] sm:$0xff]  ;;  %v2538_v43 = vsel %vm2535_vm14, %v2537_v9, %v2533_v44  ;;  %v7652_v44 = vld [vmem:[#allocation3 + $0x118] sm:$0xff] }
 0x50f   :  { %2818 = vmatpush.msra.mxu1 %v7619_v19  ;;  %2858 = vmatpush.msra.mxu3 %v7622_v34  ;;  %9722 = vst [vmem:[#allocation168_spill] sm:$0xff] %v7626_v27  ;;  %v2548_v63 = vmul.f32 %v7580_v51, %v2547_v61  ;;  %v7641_v34 = vld [vmem:[#allocation3 + $0x128] sm:$0xff]  ;;  %v2556_v61 = vand.u32 2147483648, %v7570_v62 }
 0x510   :  { %2681 = vmatmul.f32.vlgmr.msrb.gmra.mxu1 %v2410_v21  ;;  %2721 = vmatmul.f32.vlgmr.msrb.gmra.mxu3 %v2410_v21  ;;  %v2510_v40 = vadd.f32 %v3875_v12, %v2509_v2  ;;  %v3877_v21 = vpop.eup %3876  ;;  %v7659_v9 = vld [vmem:[#allocation3 + $0xe8] sm:$0xff] }
 0x511   :  { %2819 = vmatpush.msra.mxu1 %v7626_v27  ;;  %2859 = vmatpush.msra.mxu3 %v7629_v29  ;;  %v2560_v29 = vmul.f32 %v2538_v43, %v7285_v53  ;;  %v2549_v53 = vadd.f32 %v7580_v51, %v2548_v63  ;;  %v7677_v63 = vld [vmem:[#allocation3 + $0xb8] sm:$0xff] }
 0x512   :  { %v2514_v39 = vsel %vm2513_vm15, %v3875_v12, %v2510_v40  ;;  %v7644_v12 = vld [vmem:[#allocation3 + $0x138] sm:$0xff] }
 0x513   :  { %2820 = vmatpush.msra.mxu1 %v7633_v60  ;;  %2860 = vmatpush.msra.mxu3 %v7636_v54  ;;  %v2519_v2 = vsel %vm2516_vm0, %v2518_v4, %v2514_v39  ;;  %v7662_v40 = vld [vmem:[#allocation3 + $0xf8] sm:$0xff]  ;;  %v2553_v43 = vsel %vm2552_vm3, %v7580_v51, %v2549_v53  ;;  %v2557_v39 = vor.u32 1.1754944e-38, %v2556_v61  ;;  %v7688_v53 = vld [vmem:[#allocation3 + $0x68] sm:$0xff] }
 0x514   :  { %v2561_v27 = vmul.f32 %v3877_v21, %v2519_v2  ;;  %9724 = vst [vmem:[#allocation61_spill] sm:$0xff] %v7662_v40  ;;  %v7670_v4 = vld [vmem:[#allocation3 + $0xd8] sm:$0xff]  ;;  %v7674_v21 = vld [vmem:[#allocation3 + $0xa8] sm:$0xff] }
 0x515   :  { %2821 = vmatpush.msra.mxu1 %v7641_v34  ;;  %2861 = vmatpush.msra.mxu3 %v7644_v12  ;;  %v7691_v61 = vld [vmem:[#allocation3 + $0x78] sm:$0xff] }
 0x516   :  { %v7647_v32 = vadd.f32 %v2561_v27, %v2560_v29  ;;  %v2554_v27 = vand.u32 2147483647, %v7570_v62  ;;  %v7667_v29 = vld [vmem:[#allocation3 + $0xc8] sm:$0xff] }
 0x517   :  { %2822 = vmatpush.msra.mxu1 %v7649_v1  ;;  %2862 = vmatpush.msra.mxu3 %v7652_v44  ;;  %9725 = vst [vmem:[#allocation80_spill] sm:$0xff] %v7667_v29 }
 0x518   :  { %3878 = vtanh.f32 %v7647_v32  ;;  %vm2555_vm4 = vcmp.eq.f32.partialorder %v2554_v27, 8.507059e+37  ;;  %v7698_v27 = vld [vmem:[#allocation3 + $0x48] sm:$0xff] }
 0x519   :  { %2823 = vmatpush.msra.mxu1 %v7659_v9  ;;  %2863 = vmatpush.msra.mxu3 %v7662_v40  ;;  %v2558_v2 = vsel %vm2555_vm4, %v2557_v39, %v2553_v43  ;;  %v7680_v40 = vld [vmem:[#allocation3 + $0x88] sm:$0xff]  ;;  %v7701_v43 = vld [vmem:[#allocation3 + $0x58] sm:$0xff] }
 0x51a   :  { %v7706_v39 = vld [vmem:[#allocation3 + $0x28] sm:$0xff] }
 0x51b   :  { %2824 = vmatpush.msra.mxu1 %v7667_v29  ;;  %2864 = vmatpush.msra.mxu3 %v7670_v4  ;;  %v7683_v29 = vld [vmem:[#allocation3 + $0x98] sm:$0xff] }
 0x51d   :  { %2825 = vmatpush.msra.mxu1 %v7674_v21  ;;  %2865 = vmatpush.msra.mxu3 %v7677_v63 }
 0x51e   :  { %v3879_v62 = vpop.eup %3878 }
 0x51f   :  { %2826 = vmatpush.msra.mxu1 %v7680_v40  ;;  %2866 = vmatpush.msra.mxu3 %v7683_v29  ;;  %v7686_v51 = vmul.f32 %v3879_v62, %v2558_v2  ;;  %v7709_v62 = vld [vmem:[#allocation3 + $0x38] sm:$0xff]  ;;  %v7838_v2 = vld [vmem:[#allocation6 + $0x268] sm:$0xff] }
 0x520   :  { %9747 = vst [vmem:[#allocation66_spill] sm:$0xff] %v7838_v2 }
 0x521   :  { %2827 = vmatpush.msra.mxu1 %v7688_v53  ;;  %2867 = vmatpush.msra.mxu3 %v7691_v61 }
 0x522   :  { %2581 = vmatmul.f32.vlgmr.msrb.gmra.mxu0 %v7686_v51  ;;  %2621 = vmatmul.f32.vlgmr.msra.gmra.mxu2 %v7686_v51 }
 0x523   :  { %2795 = vmatpush.msrb.mxu0 %v7308_v30  ;;  %2835 = vmatpush.msra.mxu2 %v7311_v5  ;;  %v7714_v30 = vld [vmem:[#allocation3 + $0x8] sm:$0xff]  ;;  %v7717_v5 = vld [vmem:[#allocation3 + $0x18] sm:$0xff] }
 0x524   :  { %2828 = vmatpush.msra.mxu1 %v7698_v27  ;;  %2868 = vmatpush.msra.mxu3 %v7701_v43 }
 0x525   :  { %2796 = vmatpush.msrb.mxu0 %v7316_v26  ;;  %2836 = vmatpush.msra.mxu2 %v7319_v56  ;;  %v7729_v26 = vld [vmem:[#allocation6 + $0x3e0] sm:$0xff]  ;;  %v7733_v56 = vld [vmem:[#allocation6 + $0x3e8] sm:$0xff] }
 0x526   :  { %2829 = vmatpush.msra.mxu1 %v7706_v39  ;;  %2869 = vmatpush.msra.mxu3 %v7709_v62 }
 0x527   :  { %2797 = vmatpush.msrb.mxu0 %v7324_v41  ;;  %2837 = vmatpush.msra.mxu2 %v7327_v8  ;;  %v7737_v41 = vld [vmem:[#allocation6 + $0x3c0] sm:$0xff]  ;;  %v7741_v8 = vld [vmem:[#allocation6 + $0x3c8] sm:$0xff] }
 0x528   :  { %2830 = vmatpush.msra.mxu1 %v7714_v30  ;;  %2870 = vmatpush.msra.mxu3 %v7717_v5 }
 0x529   :  { %2798 = vmatpush.msrb.mxu0 %v7332_v31  ;;  %2838 = vmatpush.msra.mxu2 %v7335_v45  ;;  %v7745_v31 = vld [vmem:[#allocation6 + $0x3a0] sm:$0xff]  ;;  %v7749_v45 = vld [vmem:[#allocation6 + $0x3a8] sm:$0xff] }
 0x52a   :  { %2661 = vmatmul.f32.vlgmr.msra.gmra.mxu0 %v7686_v51  ;;  %2701 = vmatmul.f32.vlgmr.msrb.gmra.mxu2 %v7686_v51 }
 0x52b   :  { %2799 = vmatpush.msrb.mxu0 %v7342_v28  ;;  %2831 = vmatmul.f32.vlgmr.msra.gmra.mxu1 %v7686_v51  ;;  %v7753_v28 = vld [vmem:[#allocation6 + $0x380] sm:$0xff] }
 0x52c   :  { %2839 = vmatpush.msra.mxu2 %v7346_v33  ;;  %2871 = vmatmul.f32.vlgmr.msra.gmra.mxu3 %v7686_v51  ;;  %v7757_v33 = vld [vmem:[#allocation6 + $0x388] sm:$0xff] }
 0x52d   :  { %2800 = vmatpush.msrb.mxu0 %v7350_v15  ;;  %2962 = vmatpush.msrb.mxu1 %v7729_v26  ;;  %v7761_v15 = vld [vmem:[#allocation6 + $0x360] sm:$0xff] }
 0x52e   :  { %2840 = vmatpush.msra.mxu2 %v7354_v18  ;;  %3002 = vmatpush.msrb.mxu3 %v7733_v56  ;;  %9726 = vst [vmem:[#allocation51_spill] sm:$0xff] %v7761_v15  ;;  %v7765_v18 = vld [vmem:[#allocation6 + $0x368] sm:$0xff] }
 0x52f   :  { %2801 = vmatpush.msrb.mxu0 %v7358_v22  ;;  %2963 = vmatpush.msrb.mxu1 %v7737_v41  ;;  %9727 = vst [vmem:[#allocation76_spill] sm:$0xff] %v7765_v18  ;;  %v7769_v22 = vld [vmem:[#allocation6 + $0x340] sm:$0xff] }
 0x530   :  { %2841 = vmatpush.msra.mxu2 %v7362_v20  ;;  %3003 = vmatpush.msrb.mxu3 %v7741_v8  ;;  %9728 = vst [vmem:[#allocation81_spill] sm:$0xff] %v7769_v22  ;;  %v7773_v20 = vld [vmem:[#allocation6 + $0x348] sm:$0xff] }
 0x531   :  { %2802 = vmatpush.msrb.mxu0 %v7366_v59  ;;  %2964 = vmatpush.msrb.mxu1 %v7745_v31  ;;  %9729 = vst [vmem:[#allocation99_spill] sm:$0xff] %v7773_v20  ;;  %v7777_v59 = vld [vmem:[#allocation6 + $0x320] sm:$0xff] }
 0x532   :  { %2842 = vmatpush.msra.mxu2 %v7370_v58  ;;  %3004 = vmatpush.msrb.mxu3 %v7749_v45  ;;  %9730 = vst [vmem:[#allocation75_spill] sm:$0xff] %v7777_v59  ;;  %v7781_v58 = vld [vmem:[#allocation6 + $0x328] sm:$0xff] }
 0x533   :  { %2803 = vmatpush.msrb.mxu0 %v7374_v46  ;;  %2965 = vmatpush.msrb.mxu1 %v7753_v28  ;;  %9731 = vst [vmem:[#allocation95_spill] sm:$0xff] %v7781_v58  ;;  %v7785_v46 = vld [vmem:[#allocation6 + $0x300] sm:$0xff] }
 0x534   :  { %2843 = vmatpush.msra.mxu2 %v7378_v36  ;;  %3005 = vmatpush.msrb.mxu3 %v7757_v33  ;;  %9732 = vst [vmem:[#allocation41_spill] sm:$0xff] %v7785_v46  ;;  %v7789_v36 = vld [vmem:[#allocation6 + $0x308] sm:$0xff] }
 0x535   :  { %2804 = vmatpush.msrb.mxu0 %v7382_v57  ;;  %2966 = vmatpush.msrb.mxu1 %v7761_v15  ;;  %9733 = vst [vmem:[#allocation57_spill] sm:$0xff] %v7789_v36  ;;  %v7793_v57 = vld [vmem:[#allocation6 + $0x2e0] sm:$0xff] }
 0x536   :  { %2844 = vmatpush.msra.mxu2 %v7386_v55  ;;  %3006 = vmatpush.msrb.mxu3 %v7765_v18  ;;  %9734 = vst [vmem:[#allocation31_spill] sm:$0xff] %v7793_v57  ;;  %v7797_v55 = vld [vmem:[#allocation6 + $0x2e8] sm:$0xff] }
 0x537   :  { %2805 = vmatpush.msrb.mxu0 %v7390_v11  ;;  %2967 = vmatpush.msrb.mxu1 %v7769_v22  ;;  %9735 = vst [vmem:[#allocation56_spill] sm:$0xff] %v7797_v55  ;;  %v7801_v11 = vld [vmem:[#allocation6 + $0x2c0] sm:$0xff] }
 0x538   :  { %2845 = vmatpush.msra.mxu2 %v7394_v42  ;;  %3007 = vmatpush.msrb.mxu3 %v7773_v20  ;;  %9736 = vst [vmem:[#allocation40_spill] sm:$0xff] %v7801_v11  ;;  %v7805_v42 = vld [vmem:[#allocation6 + $0x2c8] sm:$0xff] }
 0x539   :  { %2806 = vmatpush.msrb.mxu0 %v7398_v23  ;;  %2968 = vmatpush.msrb.mxu1 %v7777_v59  ;;  %9737 = vst [vmem:[#allocation42_spill] sm:$0xff] %v7805_v42  ;;  %v7809_v23 = vld [vmem:[#allocation6 + $0x2a0] sm:$0xff] }
 0x53a   :  { %2846 = vmatpush.msra.mxu2 %v7402_v17  ;;  %3008 = vmatpush.msrb.mxu3 %v7781_v58  ;;  %9738 = vst [vmem:[#allocation45_spill] sm:$0xff] %v7809_v23  ;;  %v7812_v17 = vld [vmem:[#allocation3 + $0x10] sm:$0xff] }
 0x53b   :  { %2807 = vmatpush.msrb.mxu0 %v7406_v13  ;;  %2969 = vmatpush.msrb.mxu1 %v7785_v46  ;;  %9739 = vst [vmem:[#allocation46_spill] sm:$0xff] %v7812_v17  ;;  %v7817_v13 = vld [vmem:[#allocation6 + $0x2a8] sm:$0xff] }
 0x53c   :  { %2847 = vmatpush.msra.mxu2 %v7410_v37  ;;  %3009 = vmatpush.msrb.mxu3 %v7789_v36  ;;  %9740 = vst [vmem:[#allocation49_spill] sm:$0xff] %v7817_v13  ;;  %v7820_v37 = vld [vmem:[#allocation6 + $0x280] sm:$0xff] }
 0x53d   :  { %2808 = vmatpush.msrb.mxu0 %v7414_v50  ;;  %2970 = vmatpush.msrb.mxu1 %v7793_v57  ;;  %9741 = vst [vmem:[#allocation50_spill] sm:$0xff] %v7820_v37  ;;  %v7823_v50 = vld [vmem:[#allocation6 + $0x1e0] sm:$0xff] }
 0x53e   :  { %2848 = vmatpush.msra.mxu2 %v7418_v49  ;;  %3010 = vmatpush.msrb.mxu3 %v7797_v55  ;;  %9742 = vst [vmem:[#allocation54_spill] sm:$0xff] %v7823_v50  ;;  %v7826_v49 = vld [vmem:[#allocation6 + $0x288] sm:$0xff] }
 0x53f   :  { %2809 = vmatpush.msrb.mxu0 %v7422_v25  ;;  %2971 = vmatpush.msrb.mxu1 %v7801_v11  ;;  %9743 = vst [vmem:[#allocation55_spill] sm:$0xff] %v7826_v49  ;;  %v7829_v25 = vld [vmem:[#allocation6 + $0x1e8] sm:$0xff] }
 0x540   :  { %2849 = vmatpush.msra.mxu2 %v7426_v0  ;;  %3011 = vmatpush.msrb.mxu3 %v7805_v42  ;;  %9744 = vst [vmem:[#allocation60_spill] sm:$0xff] %v7829_v25  ;;  %v7832_v0 = vld [vmem:[#allocation6 + $0x260] sm:$0xff] }
 0x541   :  { %2810 = vmatpush.msrb.mxu0 %v7430_v35  ;;  %2972 = vmatpush.msrb.mxu1 %v7809_v23  ;;  %9745 = vst [vmem:[#allocation62_spill] sm:$0xff] %v7832_v0  ;;  %v7835_v35 = vld [vmem:[#allocation6 + $0x1c0] sm:$0xff] }
 0x542   :  { %2850 = vmatpush.msra.mxu2 %v7812_v17  ;;  %2811 = vmatmul.f32.vlgmr.msrb.gmra.mxu0 %v7686_v51  ;;  %9746 = vst [vmem:[#allocation65_spill] sm:$0xff] %v7835_v35 }
 0x543   :  { %2851 = vmatmul.f32.vlgmr.msra.gmra.mxu2 %v7686_v51  ;;  %3012 = vmatpush.msrb.mxu3 %v7817_v13  ;;  %v7841_v51 = vld [vmem:[#allocation6 + $0x1c8] sm:$0xff] }
 0x544   :  { %2973 = vmatpush.msrb.mxu1 %v7820_v37  ;;  %2942 = vmatpush.msra.mxu0 %v7823_v50  ;;  %9748 = vst [vmem:[#allocation69_spill] sm:$0xff] %v7841_v51 }
 0x545   :  { %3013 = vmatpush.msrb.mxu3 %v7826_v49  ;;  %2982 = vmatpush.msrb.mxu2 %v7829_v25  ;;  %v7844_v49 = vld [vmem:[#allocation6 + $0x240] sm:$0xff] }
 0x546   :  { %2974 = vmatpush.msrb.mxu1 %v7832_v0  ;;  %2943 = vmatpush.msra.mxu0 %v7835_v35  ;;  %9749 = vst [vmem:[#allocation70_spill] sm:$0xff] %v7844_v49  ;;  %v7847_v25 = vld [vmem:[#allocation6 + $0x1a0] sm:$0xff]  ;;  %v7850_v0 = vld [vmem:[#allocation6 + $0x248] sm:$0xff] }
 0x547   :  { %3014 = vmatpush.msrb.mxu3 %v7838_v2  ;;  %2983 = vmatpush.msrb.mxu2 %v7841_v51  ;;  %9750 = vst [vmem:[#allocation73_spill] sm:$0xff] %v7847_v25  ;;  %v7853_v35 = vld [vmem:[#allocation6 + $0x1a8] sm:$0xff]  ;;  %v7856_v2 = vld [vmem:[#allocation6 + $0x220] sm:$0xff] }
 0x548   :  { %2975 = vmatpush.msrb.mxu1 %v7844_v49  ;;  %2944 = vmatpush.msra.mxu0 %v7847_v25  ;;  %9751 = vst [vmem:[#allocation74_spill] sm:$0xff] %v7850_v0  ;;  %v7859_v51 = vld [vmem:[#allocation6 + $0x180] sm:$0xff]  ;;  %v7862_v49 = vld [vmem:[#allocation6 + $0x228] sm:$0xff] }
 0x549   :  { %3015 = vmatpush.msrb.mxu3 %v7850_v0  ;;  %9752 = vst [vmem:[#allocation79_spill] sm:$0xff] %v7853_v35  ;;  %2984 = vmatpush.msrb.mxu2 %v7853_v35  ;;  %v7865_v25 = vld [vmem:[#allocation6 + $0x188] sm:$0xff]  ;;  %v7868_v0 = vld [vmem:[#allocation6 + $0x200] sm:$0xff] }
 0x54a   :  { %9753 = vst [vmem:[#allocation82_spill] sm:$0xff] %v7856_v2  ;;  %2976 = vmatpush.msrb.mxu1 %v7856_v2  ;;  %2945 = vmatpush.msra.mxu0 %v7859_v51  ;;  %v7871_v35 = vld [vmem:[#allocation6 + $0x160] sm:$0xff]  ;;  %v7874_v2 = vld [vmem:[#allocation6 + $0x208] sm:$0xff] }
 0x54b   :  { %9754 = vst [vmem:[#allocation85_spill] sm:$0xff] %v7859_v51  ;;  %3016 = vmatpush.msrb.mxu3 %v7862_v49  ;;  %2985 = vmatpush.msrb.mxu2 %v7865_v25  ;;  %v7877_v51 = vld [vmem:[#allocation6 + $0x168] sm:$0xff] }
 0x54c   :  { %9755 = vst [vmem:[#allocation86_spill] sm:$0xff] %v7862_v49  ;;  %2977 = vmatpush.msrb.mxu1 %v7868_v0  ;;  %2946 = vmatpush.msra.mxu0 %v7871_v35  ;;  %v7880_v49 = vld [vmem:[#allocation6 + $0x3f0] sm:$0xff] }
 0x54d   :  { %9756 = vst [vmem:[#allocation89_spill] sm:$0xff] %v7865_v25  ;;  %3017 = vmatpush.msrb.mxu3 %v7874_v2  ;;  %2986 = vmatpush.msrb.mxu2 %v7877_v51  ;;  %v7883_v25 = vld [vmem:[#allocation6 + $0x3f8] sm:$0xff] }
 0x54e   :  { %9757 = vst [vmem:[#allocation13_spill] sm:$0xff] %v7868_v0  ;;  %3042 = vmatpush.msra.mxu1 %v7880_v49  ;;  %v7886_v0 = vld [vmem:[#allocation6 + $0x140] sm:$0xff] }
 0x54f   :  { %9758 = vst [vmem:[#allocation38_spill] sm:$0xff] %v7871_v35  ;;  %3082 = vmatpush.msra.mxu3 %v7883_v25  ;;  %2947 = vmatpush.msra.mxu0 %v7886_v0  ;;  %v7889_v35 = vld [vmem:[#allocation6 + $0x148] sm:$0xff] }
 0x550   :  { %9759 = vst [vmem:[#allocation39_spill] sm:$0xff] %v7874_v2  ;;  %2987 = vmatpush.msrb.mxu2 %v7889_v35  ;;  %v7892_v2 = vld [vmem:[#allocation6 + $0x3d0] sm:$0xff] }
 0x551   :  { %9760 = vst [vmem:[#allocation90_spill] sm:$0xff] %v7877_v51  ;;  %3043 = vmatpush.msra.mxu1 %v7892_v2  ;;  %v7895_v51 = vld [vmem:[#allocation6 + $0x3d8] sm:$0xff] }
 0x552   :  { %9761 = vst [vmem:[#allocation43_spill] sm:$0xff] %v7880_v49  ;;  %3083 = vmatpush.msra.mxu3 %v7895_v51  ;;  %v7898_v49 = vld [vmem:[#allocation6 + $0x120] sm:$0xff] }
 0x553   :  { %9762 = vst [vmem:[#allocation93_spill] sm:$0xff] %v7883_v25  ;;  %2948 = vmatpush.msra.mxu0 %v7898_v49  ;;  %v7901_v25 = vld [vmem:[#allocation6 + $0x128] sm:$0xff] }
 0x554   :  { %9763 = vst [vmem:[#allocation44_spill] sm:$0xff] %v7886_v0  ;;  %2988 = vmatpush.msrb.mxu2 %v7901_v25  ;;  %v7904_v0 = vld [vmem:[#allocation6 + $0x3b0] sm:$0xff] }
 0x555   :  { %9764 = vst [vmem:[#allocation94_spill] sm:$0xff] %v7889_v35  ;;  %3044 = vmatpush.msra.mxu1 %v7904_v0  ;;  %v7907_v35 = vld [vmem:[#allocation6 + $0x3b8] sm:$0xff] }
 0x556   :  { %9765 = vst [vmem:[#allocation47_spill] sm:$0xff] %v7892_v2  ;;  %3084 = vmatpush.msra.mxu3 %v7907_v35  ;;  %v7910_v2 = vld [vmem:[#allocation6 + $0x100] sm:$0xff] }
 0x557   :  { %9766 = vst [vmem:[#allocation98_spill] sm:$0xff] %v7895_v51  ;;  %2949 = vmatpush.msra.mxu0 %v7910_v2  ;;  %v7913_v51 = vld [vmem:[#allocation6 + $0x108] sm:$0xff] }
 0x558   :  { %9767 = vst [vmem:[#allocation48_spill] sm:$0xff] %v7898_v49  ;;  %2989 = vmatpush.msrb.mxu2 %v7913_v51  ;;  %v7916_v49 = vld [vmem:[#allocation6 + $0x390] sm:$0xff] }
 0x559   :  { %9768 = vst [vmem:[#allocation101_spill] sm:$0xff] %v7901_v25  ;;  %3045 = vmatpush.msra.mxu1 %v7916_v49  ;;  %v7919_v25 = vld [vmem:[#allocation6 + $0x398] sm:$0xff] }
 0x55a   :  { %9769 = vst [vmem:[#allocation52_spill] sm:$0xff] %v7904_v0  ;;  %3085 = vmatpush.msra.mxu3 %v7919_v25  ;;  %v7922_v0 = vld [vmem:[#allocation6 + $0xe0] sm:$0xff] }
 0x55b   :  { %9770 = vst [vmem:[#allocation105_spill] sm:$0xff] %v7907_v35  ;;  %2950 = vmatpush.msra.mxu0 %v7922_v0  ;;  %v7925_v35 = vld [vmem:[#allocation6 + $0xe8] sm:$0xff] }
 0x55c   :  { %9771 = vst [vmem:[#allocation53_spill] sm:$0xff] %v7910_v2  ;;  %2990 = vmatpush.msrb.mxu2 %v7925_v35  ;;  %v7928_v2 = vld [vmem:[#allocation6 + $0x370] sm:$0xff] }
 0x55d   :  { %9772 = vst [vmem:[#allocation106_spill] sm:$0xff] %v7913_v51  ;;  %3046 = vmatpush.msra.mxu1 %v7928_v2  ;;  %v7931_v51 = vld [vmem:[#allocation6 + $0x378] sm:$0xff] }
 0x55e   :  { %9773 = vst [vmem:[#allocation58_spill] sm:$0xff] %v7916_v49  ;;  %3086 = vmatpush.msra.mxu3 %v7931_v51  ;;  %v7934_v49 = vld [vmem:[#allocation6 + $0xc0] sm:$0xff] }
 0x55f   :  { %9774 = vst [vmem:[#allocation109_spill] sm:$0xff] %v7919_v25  ;;  %2951 = vmatpush.msra.mxu0 %v7934_v49  ;;  %v7937_v25 = vld [vmem:[#allocation6 + $0xc8] sm:$0xff] }
 0x560   :  { %9775 = vst [vmem:[#allocation59_spill] sm:$0xff] %v7922_v0  ;;  %2991 = vmatpush.msrb.mxu2 %v7937_v25  ;;  %v7940_v0 = vld [vmem:[#allocation6 + $0x350] sm:$0xff] }
 0x561   :  { %9776 = vst [vmem:[#allocation110_spill] sm:$0xff] %v7925_v35  ;;  %3047 = vmatpush.msra.mxu1 %v7940_v0  ;;  %v7943_v35 = vld [vmem:[#allocation6 + $0x358] sm:$0xff] }
 0x562   :  { %9777 = vst [vmem:[#allocation63_spill] sm:$0xff] %v7928_v2  ;;  %3087 = vmatpush.msra.mxu3 %v7943_v35  ;;  %v7946_v2 = vld [vmem:[#allocation6 + $0xa0] sm:$0xff] }
 0x563   :  { %9778 = vst [vmem:[#allocation64_spill] sm:$0xff] %v7931_v51  ;;  %2952 = vmatpush.msra.mxu0 %v7946_v2  ;;  %v7949_v51 = vld [vmem:[#allocation6 + $0xa8] sm:$0xff] }
 0x564   :  { %9779 = vst [vmem:[#allocation67_spill] sm:$0xff] %v7934_v49  ;;  %2992 = vmatpush.msrb.mxu2 %v7949_v51  ;;  %v7952_v49 = vld [vmem:[#allocation6 + $0x330] sm:$0xff] }
 0x565   :  { %9780 = vst [vmem:[#allocation68_spill] sm:$0xff] %v7937_v25  ;;  %3048 = vmatpush.msra.mxu1 %v7952_v49  ;;  %v7955_v25 = vld [vmem:[#allocation6 + $0x338] sm:$0xff] }
 0x566   :  { %9781 = vst [vmem:[#allocation71_spill] sm:$0xff] %v7940_v0  ;;  %3088 = vmatpush.msra.mxu3 %v7955_v25  ;;  %v7958_v0 = vld [vmem:[#allocation6 + $0x80] sm:$0xff] }
 0x567   :  { %9782 = vst [vmem:[#allocation72_spill] sm:$0xff] %v7943_v35  ;;  %2953 = vmatpush.msra.mxu0 %v7958_v0  ;;  %v7961_v35 = vld [vmem:[#allocation6 + $0x88] sm:$0xff] }
 0x568   :  { %9783 = vst [vmem:[#allocation77_spill] sm:$0xff] %v7946_v2  ;;  %2993 = vmatpush.msrb.mxu2 %v7961_v35  ;;  %v7964_v2 = vld [vmem:[#allocation6 + $0x310] sm:$0xff] }
 0x569   :  { %9784 = vst [vmem:[#allocation78_spill] sm:$0xff] %v7949_v51  ;;  %3049 = vmatpush.msra.mxu1 %v7964_v2  ;;  %v7967_v51 = vld [vmem:[#allocation6 + $0x318] sm:$0xff] }
 0x56a   :  { %9785 = vst [vmem:[#allocation83_spill] sm:$0xff] %v7952_v49  ;;  %3089 = vmatpush.msra.mxu3 %v7967_v51  ;;  %v7970_v49 = vld [vmem:[#allocation6 + $0x60] sm:$0xff] }
 0x56b   :  { %9786 = vst [vmem:[#allocation84_spill] sm:$0xff] %v7955_v25  ;;  %2954 = vmatpush.msra.mxu0 %v7970_v49  ;;  %v7973_v25 = vld [vmem:[#allocation6 + $0x68] sm:$0xff] }
 0x56c   :  { %9787 = vst [vmem:[#allocation87_spill] sm:$0xff] %v7958_v0  ;;  %2994 = vmatpush.msrb.mxu2 %v7973_v25  ;;  %v7976_v0 = vld [vmem:[#allocation6 + $0x2f0] sm:$0xff] }
 0x56d   :  { %9788 = vst [vmem:[#allocation88_spill] sm:$0xff] %v7961_v35  ;;  %3050 = vmatpush.msra.mxu1 %v7976_v0  ;;  %v7979_v35 = vld [vmem:[#allocation6 + $0x2f8] sm:$0xff] }
 0x56e   :  { %9789 = vst [vmem:[#allocation91_spill] sm:$0xff] %v7964_v2  ;;  %3090 = vmatpush.msra.mxu3 %v7979_v35  ;;  %v7982_v2 = vld [vmem:[#allocation6 + $0x40] sm:$0xff] }
 0x56f   :  { %9790 = vst [vmem:[#allocation92_spill] sm:$0xff] %v7967_v51  ;;  %2955 = vmatpush.msra.mxu0 %v7982_v2  ;;  %v7985_v51 = vld [vmem:[#allocation6 + $0x48] sm:$0xff] }
 0x570   :  { %9791 = vst [vmem:[#allocation96_spill] sm:$0xff] %v7970_v49  ;;  %2995 = vmatpush.msrb.mxu2 %v7985_v51  ;;  %v7988_v49 = vld [vmem:[#allocation6 + $0x2d0] sm:$0xff] }
 0x571   :  { %9792 = vst [vmem:[#allocation97_spill] sm:$0xff] %v7973_v25  ;;  %3051 = vmatpush.msra.mxu1 %v7988_v49  ;;  %v7991_v25 = vld [vmem:[#allocation6 + $0x2d8] sm:$0xff] }
 0x572   :  { %9793 = vst [vmem:[#allocation103_spill] sm:$0xff] %v7976_v0  ;;  %3091 = vmatpush.msra.mxu3 %v7991_v25  ;;  %v7994_v0 = vld [vmem:[#allocation6 + $0x20] sm:$0xff] }
 0x573   :  { %9794 = vst [vmem:[#allocation104_spill] sm:$0xff] %v7979_v35  ;;  %2956 = vmatpush.msra.mxu0 %v7994_v0  ;;  %v7997_v35 = vld [vmem:[#allocation6 + $0x28] sm:$0xff] }
 0x574   :  { %9795 = vst [vmem:[#allocation107_spill] sm:$0xff] %v7982_v2  ;;  %2996 = vmatpush.msrb.mxu2 %v7997_v35  ;;  %v8000_v2 = vld [vmem:[#allocation6 + $0x2b0] sm:$0xff] }
 0x575   :  { %9796 = vst [vmem:[#allocation108_spill] sm:$0xff] %v7985_v51  ;;  %3052 = vmatpush.msra.mxu1 %v8000_v2  ;;  %v8003_v51 = vld [vmem:[#allocation6 + $0x2b8] sm:$0xff] }
 0x576   :  { %9797 = vst [vmem:[#allocation111_spill] sm:$0xff] %v7988_v49  ;;  %3092 = vmatpush.msra.mxu3 %v8003_v51  ;;  %v8006_v49 = vld [vmem:[#allocation6] sm:$0xff] }
 0x577   :  { %9798 = vst [vmem:[#allocation112_spill] sm:$0xff] %v7991_v25  ;;  %2957 = vmatpush.msra.mxu0 %v8006_v49  ;;  %v8009_v25 = vld [vmem:[#allocation6 + $0x8] sm:$0xff] }
 0x578   :  { %9799 = vst [vmem:[#allocation118_spill] sm:$0xff] %v7994_v0  ;;  %2997 = vmatpush.msrb.mxu2 %v8009_v25  ;;  %v8012_v0 = vld [vmem:[#allocation6 + $0x290] sm:$0xff] }
 0x579   :  { %9800 = vst [vmem:[#allocation119_spill] sm:$0xff] %v7997_v35  ;;  %3053 = vmatpush.msra.mxu1 %v8012_v0  ;;  %v8015_v35 = vld [vmem:[#allocation6 + $0x298] sm:$0xff] }
 0x57a   :  { %9801 = vst [vmem:[#allocation121_spill] sm:$0xff] %v8000_v2  ;;  %3093 = vmatpush.msra.mxu3 %v8015_v35  ;;  %v8018_v2 = vld [vmem:[#allocation6 + $0x1f0] sm:$0xff] }
 0x57b   :  { %9802 = vst [vmem:[#allocation26_spill] sm:$0xff] %v8003_v51  ;;  %3022 = vmatpush.msrb.mxu0 %v8018_v2  ;;  %v8021_v51 = vld [vmem:[#allocation6 + $0x1f8] sm:$0xff] }
 0x57c   :  { %9803 = vst [vmem:[#allocation37_spill] sm:$0xff] %v8006_v49  ;;  %3062 = vmatpush.msra.mxu2 %v8021_v51  ;;  %v8024_v49 = vld [vmem:[#allocation6 + $0x270] sm:$0xff] }
 0x57d   :  { %9804 = vst [vmem:[#allocation19_spill] sm:$0xff] %v8009_v25  ;;  %3054 = vmatpush.msra.mxu1 %v8024_v49  ;;  %v8027_v25 = vld [vmem:[#allocation6 + $0x278] sm:$0xff] }
 0x57e   :  { %9805 = vst [vmem:[#allocation36_spill] sm:$0xff] %v8012_v0  ;;  %3094 = vmatpush.msra.mxu3 %v8027_v25  ;;  %v8030_v0 = vld [vmem:[#allocation6 + $0x1d0] sm:$0xff] }
 0x57f   :  { %9806 = vst [vmem:[#allocation17_spill] sm:$0xff] %v8015_v35  ;;  %3023 = vmatpush.msrb.mxu0 %v8030_v0  ;;  %v8033_v35 = vld [vmem:[#allocation6 + $0x1d8] sm:$0xff] }
 0x580   :  { %9807 = vst [vmem:[#allocation18_spill] sm:$0xff] %v8018_v2  ;;  %3063 = vmatpush.msra.mxu2 %v8033_v35  ;;  %v8036_v2 = vld [vmem:[#allocation6 + $0x250] sm:$0xff] }
 0x581   :  { %9808 = vst [vmem:[#allocation20_spill] sm:$0xff] %v8021_v51  ;;  %3055 = vmatpush.msra.mxu1 %v8036_v2  ;;  %v8039_v51 = vld [vmem:[#allocation6 + $0x258] sm:$0xff] }
 0x582   :  { %9809 = vst [vmem:[#allocation21_spill] sm:$0xff] %v8024_v49  ;;  %3095 = vmatpush.msra.mxu3 %v8039_v51  ;;  %v8042_v49 = vld [vmem:[#allocation6 + $0x1b0] sm:$0xff] }
 0x583   :  { %9810 = vst [vmem:[#allocation22_spill] sm:$0xff] %v8027_v25  ;;  %3024 = vmatpush.msrb.mxu0 %v8042_v49  ;;  %v8045_v25 = vld [vmem:[#allocation6 + $0x1b8] sm:$0xff] }
 0x584   :  { %9811 = vst [vmem:[#allocation23_spill] sm:$0xff] %v8030_v0  ;;  %3064 = vmatpush.msra.mxu2 %v8045_v25  ;;  %v8048_v0 = vld [vmem:[#allocation6 + $0x230] sm:$0xff] }
 0x585   :  { %9812 = vst [vmem:[#allocation24_spill] sm:$0xff] %v8033_v35  ;;  %3056 = vmatpush.msra.mxu1 %v8048_v0  ;;  %v8051_v35 = vld [vmem:[#allocation6 + $0x238] sm:$0xff] }
 0x586   :  { %9813 = vst [vmem:[#allocation25_spill] sm:$0xff] %v8036_v2  ;;  %3096 = vmatpush.msra.mxu3 %v8051_v35  ;;  %v8054_v2 = vld [vmem:[#allocation6 + $0x190] sm:$0xff] }
 0x587   :  { %9814 = vst [vmem:[#allocation27_spill] sm:$0xff] %v8039_v51  ;;  %3025 = vmatpush.msrb.mxu0 %v8054_v2  ;;  %v8057_v51 = vld [vmem:[#allocation6 + $0x198] sm:$0xff] }
 0x588   :  { %9815 = vst [vmem:[#allocation28_spill] sm:$0xff] %v8042_v49  ;;  %3065 = vmatpush.msra.mxu2 %v8057_v51  ;;  %v8060_v49 = vld [vmem:[#allocation6 + $0x210] sm:$0xff] }
 0x589   :  { %9816 = vst [vmem:[#allocation29_spill] sm:$0xff] %v8045_v25  ;;  %3057 = vmatpush.msra.mxu1 %v8060_v49  ;;  %v8063_v25 = vld [vmem:[#allocation6 + $0x218] sm:$0xff] }
 0x58a   :  { %9817 = vst [vmem:[#allocation30_spill] sm:$0xff] %v8048_v0  ;;  %3097 = vmatpush.msra.mxu3 %v8063_v25  ;;  %v8066_v0 = vld [vmem:[#allocation6 + $0x170] sm:$0xff] }
 0x58b   :  { %9818 = vst [vmem:[#allocation126_spill] sm:$0xff] %v8051_v35  ;;  %3026 = vmatpush.msrb.mxu0 %v8066_v0  ;;  %v8069_v35 = vld [vmem:[#allocation6 + $0x178] sm:$0xff]  ;;  %v2642_v13 = vpop.f32.mrf.mxu3 }
 0x58c   :  { %9819 = vst [vmem:[#allocation127_spill] sm:$0xff] %v8054_v2  ;;  %3066 = vmatpush.msra.mxu2 %v8069_v35  ;;  %v8072_v2 = vld [vmem:[#allocation6 + $0x150] sm:$0xff] }
 0x58d   :  { %9820 = vst [vmem:[#allocation128_spill] sm:$0xff] %v8057_v51  ;;  %3027 = vmatpush.msrb.mxu0 %v8072_v2  ;;  %v8075_v51 = vld [vmem:[#allocation6 + $0x158] sm:$0xff] }
 0x58e   :  { %9821 = vst [vmem:[#allocation129_spill] sm:$0xff] %v8060_v49  ;;  %3067 = vmatpush.msra.mxu2 %v8075_v51  ;;  %v8078_v49 = vld [vmem:[#allocation6 + $0x130] sm:$0xff] }
 0x58f   :  { %9822 = vst [vmem:[#allocation130_spill] sm:$0xff] %v8063_v25  ;;  %3028 = vmatpush.msrb.mxu0 %v8078_v49  ;;  %v8081_v25 = vld [vmem:[#allocation6 + $0x138] sm:$0xff] }
 0x590   :  { %9823 = vst [vmem:[#allocation131_spill] sm:$0xff] %v8066_v0  ;;  %3068 = vmatpush.msra.mxu2 %v8081_v25  ;;  %v8084_v0 = vld [vmem:[#allocation6 + $0x110] sm:$0xff] }
 0x591   :  { %9824 = vst [vmem:[#allocation132_spill] sm:$0xff] %v8069_v35  ;;  %3029 = vmatpush.msrb.mxu0 %v8084_v0  ;;  %v8087_v35 = vld [vmem:[#allocation6 + $0x118] sm:$0xff] }
 0x592   :  { %9825 = vst [vmem:[#allocation133_spill] sm:$0xff] %v8072_v2  ;;  %3069 = vmatpush.msra.mxu2 %v8087_v35  ;;  %v8090_v2 = vld [vmem:[#allocation6 + $0xf0] sm:$0xff] }
 0x593   :  { %9826 = vst [vmem:[#allocation134_spill] sm:$0xff] %v8075_v51  ;;  %3030 = vmatpush.msrb.mxu0 %v8090_v2  ;;  %v8093_v51 = vld [vmem:[#allocation6 + $0xf8] sm:$0xff]  ;;  %v2722_v46 = vpop.f32.mrf.mxu3 }
 0x594   :  { %9827 = vst [vmem:[#allocation135_spill] sm:$0xff] %v8078_v49  ;;  %3070 = vmatpush.msra.mxu2 %v8093_v51  ;;  %v8096_v49 = vld [vmem:[#allocation6 + $0xd0] sm:$0xff] }
 0x595   :  { %9828 = vst [vmem:[#allocation136_spill] sm:$0xff] %v8081_v25  ;;  %3031 = vmatpush.msrb.mxu0 %v8096_v49  ;;  %v8099_v25 = vld [vmem:[#allocation6 + $0xd8] sm:$0xff] }
 0x596   :  { %9829 = vst [vmem:[#allocation137_spill] sm:$0xff] %v8084_v0  ;;  %3071 = vmatpush.msra.mxu2 %v8099_v25  ;;  %v8102_v0 = vld [vmem:[#allocation6 + $0xb0] sm:$0xff] }
 0x597   :  { %9830 = vst [vmem:[#allocation138_spill] sm:$0xff] %v8087_v35  ;;  %3032 = vmatpush.msrb.mxu0 %v8102_v0  ;;  %v8105_v35 = vld [vmem:[#allocation6 + $0xb8] sm:$0xff] }
 0x598   :  { %9831 = vst [vmem:[#allocation139_spill] sm:$0xff] %v8090_v2  ;;  %3072 = vmatpush.msra.mxu2 %v8105_v35  ;;  %v8108_v2 = vld [vmem:[#allocation6 + $0x90] sm:$0xff] }
 0x599   :  { %9832 = vst [vmem:[#allocation140_spill] sm:$0xff] %v8093_v51  ;;  %3033 = vmatpush.msrb.mxu0 %v8108_v2  ;;  %v8111_v51 = vld [vmem:[#allocation6 + $0x98] sm:$0xff] }
 0x59a   :  { %9833 = vst [vmem:[#allocation141_spill] sm:$0xff] %v8096_v49  ;;  %3073 = vmatpush.msra.mxu2 %v8111_v51  ;;  %v8114_v49 = vld [vmem:[#allocation6 + $0x70] sm:$0xff] }
 0x59b   :  { %9834 = vst [vmem:[#allocation142_spill] sm:$0xff] %v8099_v25  ;;  %3034 = vmatpush.msrb.mxu0 %v8114_v49  ;;  %v8117_v25 = vld [vmem:[#allocation6 + $0x78] sm:$0xff] }
 0x59c   :  { %9835 = vst [vmem:[#allocation143_spill] sm:$0xff] %v8102_v0  ;;  %3074 = vmatpush.msra.mxu2 %v8117_v25  ;;  %v8120_v0 = vld [vmem:[#allocation6 + $0x50] sm:$0xff] }
 0x59d   :  { %9836 = vst [vmem:[#allocation144_spill] sm:$0xff] %v8105_v35  ;;  %3035 = vmatpush.msrb.mxu0 %v8120_v0  ;;  %v8123_v35 = vld [vmem:[#allocation6 + $0x58] sm:$0xff] }
 0x59e   :  { %9837 = vst [vmem:[#allocation145_spill] sm:$0xff] %v8108_v2  ;;  %3075 = vmatpush.msra.mxu2 %v8123_v35  ;;  %v8126_v2 = vld [vmem:[#allocation6 + $0x30] sm:$0xff] }
 0x59f   :  { %9838 = vst [vmem:[#allocation146_spill] sm:$0xff] %v8111_v51  ;;  %3036 = vmatpush.msrb.mxu0 %v8126_v2  ;;  %v8129_v51 = vld [vmem:[#allocation6 + $0x38] sm:$0xff]  ;;  %v2582_v50 = vpop.f32.mrf.mxu0 }
 0x5a0   :  { %9839 = vst [vmem:[#allocation147_spill] sm:$0xff] %v8114_v49  ;;  %3076 = vmatpush.msra.mxu2 %v8129_v51  ;;  %v8132_v49 = vld [vmem:[#allocation6 + $0x10] sm:$0xff] }
 0x5a1   :  { %9840 = vst [vmem:[#allocation148_spill] sm:$0xff] %v8117_v25  ;;  %3037 = vmatpush.msrb.mxu0 %v8132_v49  ;;  %v8135_v25 = vld [vmem:[#allocation6 + $0x18] sm:$0xff] }
 0x5a2   :  { %9841 = vst [vmem:[#allocation149_spill] sm:$0xff] %v8120_v0  ;;  %3077 = vmatpush.msra.mxu2 %v8135_v25  ;;  %v2602_v0 = vpop.f32.mrf.mxu1 }
 0x5a3   :  { %9842 = vst [vmem:[#allocation150_spill] sm:$0xff] %v8123_v35  ;;  %v2583_v35 = vadd.f32 %v2582_v50, %v9705_v6 }
 0x5a4   :  { %9843 = vst [vmem:[#allocation151_spill] sm:$0xff] %v8126_v2 }
 0x5a5   :  { %9844 = vst [vmem:[#allocation152_spill] sm:$0xff] %v8129_v51  ;;  %v2603_v17 = vadd.f32 %v2602_v0, %v2583_v35  ;;  %v2622_v23 = vpop.f32.mrf.mxu2 }
 0x5a6   :  { %9845 = vst [vmem:[#allocation153_spill] sm:$0xff] %v8132_v49  ;;  %v2623_v51 = vadd.f32 %v2622_v23, %v9706_v7  ;;  %v9847_v49 = vld [vmem:[#allocation115_spill] sm:$0xff] }
 0x5a7   :  { %9846 = vst [vmem:[#allocation154_spill] sm:$0xff] %v8135_v25  ;;  %v3673_v2 = vmul.f32 -1.442695, %v2603_v17  ;;  %v205_v55 = vadd.f32 %v9847_v49, %v9707_v14 }
 0x5a8   :  { %v2643_v42 = vadd.f32 %v2642_v13, %v2623_v51  ;;  %v2662_v13 = vpop.f32.mrf.mxu0 }
 0x5a9   :  { %3880 = vpow2.f32 %v3673_v2 }
 0x5aa   :  { %v2682_v37 = vpop.f32.mrf.mxu1  ;;  %v3674_v57 = vmul.f32 -1.442695, %v2643_v42  ;;  %v9848_v42 = vld [vmem:[#allocation124_spill] sm:$0xff] }
 0x5ac   :  { %3882 = vpow2.f32 %v3674_v57 }
 0x5ad   :  { %v2702_v59 = vpop.f32.mrf.mxu2 }
 0x5ae   :  { %v2703_v50 = vadd.f32 %v2702_v59, %v9709_v24 }
 0x5af   :  { %v3881_v25 = vpop.eup %3880  ;;  %v2872_v51 = vpop.f32.mrf.mxu3 }
 0x5b0   :  { %v2728_v58 = vadd.f32 1.0, %v3881_v25  ;;  %v2723_v0 = vadd.f32 %v2722_v46, %v2703_v50  ;;  %v9850_v25 = vld [vmem:[#allocation35_spill] sm:$0xff] }
 0x5b1   :  { %v2663_v14 = vadd.f32 %v2662_v13, %v9850_v25  ;;  %v9851_v13 = vld [vmem:[#allocation102_spill] sm:$0xff] }
 0x5b2   :  { %v2832_v11 = vpop.f32.mrf.mxu1  ;;  %3884 = vrcp.f32 %v2728_v58  ;;  %v3883_v35 = vpop.eup %3882  ;;  %v3675_v2 = vmul.f32 -1.442695, %v2723_v0  ;;  %v2740_v22 = vand.u32 2147483648, %v2728_v58  ;;  %vm2734_vm6 = vweird.f32 %v2728_v58 }
 0x5b3   :  { %v2876_v36 = vadd.f32 %v2832_v11, %v205_v55  ;;  %v2747_v23 = vadd.f32 1.0, %v3883_v35  ;;  %v9849_v55 = vld [vmem:[#allocation116_spill] sm:$0xff]  ;;  %v2683_v46 = vadd.f32 %v2682_v37, %v2663_v14 }
 0x5b4   :  { %v287_v11 = vadd.f32 %v9849_v55, %v9848_v42  ;;  %v2738_v42 = vand.u32 2147483647, %v2728_v58 }
 0x5b5   :  { %v3677_v17 = vmul.f32 -1.442695, %v2876_v36  ;;  %vm2753_vm9 = vweird.f32 %v2747_v23 }
 0x5b6   :  { %v2878_v7 = vadd.f32 %v2872_v51, %v287_v11  ;;  %v9852_v51 = vld [vmem:[#allocation15_spill] sm:$0xff]  ;;  %vm2739_vm10 = vcmp.eq.f32.partialorder %v2738_v42, 8.507059e+37 }
 0x5b7   :  { %3886 = vpow2.f32 %v3677_v17  ;;  %v164_v11 = vadd.f32 %v9852_v51, %v9851_v13 }
 0x5b8   :  { %3888 = vpow2.f32 %v3675_v2  ;;  %v3885_v49 = vpop.eup %3884  ;;  %v3678_v6 = vmul.f32 -1.442695, %v2878_v7  ;;  %v2757_v7 = vand.u32 2147483647, %v2747_v23 }
 0x5b9   :  { %3890 = vrcp.f32 %v2747_v23  ;;  %v2730_v57 = vmul.f32 %v3885_v49, %v2728_v58  ;;  %vm2735_vm5 = vweird.f32 %v3885_v49  ;;  %v2741_v58 = vor.u32 1.1754944e-38, %v2740_v22 }
 0x5ba   :  { %vm8150_vm7 = vmor %vm2734_vm6, %vm2735_vm5  ;;  %vm2758_vm12 = vcmp.eq.f32.partialorder %v2757_v7, 8.507059e+37 }
 0x5bb   :  { %v2731_v59 = vsub.f32 1.0, %v2730_v57  ;;  %v2759_v57 = vand.u32 2147483648, %v2747_v23 }
 0x5bd   :  { %v3887_v24 = vpop.eup %3886  ;;  %v2732_v50 = vmul.f32 %v3885_v49, %v2731_v59 }
 0x5be   :  { %v3889_v36 = vpop.eup %3888  ;;  %v8146_v20 = vadd.f32 1.0, %v3887_v24 }
 0x5bf   :  { %v3891_v0 = vpop.eup %3890  ;;  %v2767_v35 = vadd.f32 1.0, %v3889_v36  ;;  %v2733_v2 = vadd.f32 %v3885_v49, %v2732_v50  ;;  %v2812_v37 = vpop.f32.mrf.mxu0 }
 0x5c0   :  { %v2749_v17 = vmul.f32 %v3891_v0, %v2747_v23  ;;  %vm2754_vm8 = vweird.f32 %v3891_v0  ;;  %v2875_v36 = vadd.f32 %v2812_v37, %v164_v11  ;;  %vm2907_vm2 = vweird.f32 %v8146_v20 }
 0x5c1   :  { %3892 = vrcp.f32 %v2767_v35  ;;  %v2737_v24 = vsel %vm8150_vm7, %v3885_v49, %v2733_v2  ;;  %vm2755_vm11 = vmor %vm2753_vm9, %vm2754_vm8  ;;  %vm2773_vm14 = vweird.f32 %v2767_v35  ;;  %v2777_v37 = vand.u32 2147483647, %v2767_v35 }
 0x5c2   :  { %v2750_v55 = vsub.f32 1.0, %v2749_v17  ;;  %3894 = vtanh.f32 %v2683_v46  ;;  %v2760_v17 = vor.u32 1.1754944e-38, %v2759_v57  ;;  %v2742_v51 = vsel %vm2739_vm10, %v2741_v58, %v2737_v24 }
 0x5c3   :  { %3896 = vpow2.f32 %v3678_v6  ;;  %v3676_v13 = vmul.f32 -1.442695, %v2875_v36  ;;  %vm2778_vm0 = vcmp.eq.f32.partialorder %v2777_v37, 8.507059e+37 }
 0x5c4   :  { %v2751_v59 = vmul.f32 %v3891_v0, %v2750_v55  ;;  %3898 = vrcp.f32 %v8146_v20 }
 0x5c5   :  { %3900 = vpow2.f32 %v3676_v13 }
 0x5c6   :  { %v2752_v46 = vadd.f32 %v3891_v0, %v2751_v59  ;;  %v2852_v36 = vpop.f32.mrf.mxu2 }
 0x5c7   :  { %v3893_v50 = vpop.eup %3892 }
 0x5c8   :  { %v3895_v25 = vpop.eup %3894  ;;  %v2756_v6 = vsel %vm2755_vm11, %v3891_v0, %v2752_v46  ;;  %v2769_v55 = vmul.f32 %v3893_v50, %v2767_v35  ;;  %vm2774_vm13 = vweird.f32 %v3893_v50  ;;  %v2779_v0 = vand.u32 2147483648, %v2767_v35 }
 0x5c9   :  { %v3897_v18 = vpop.eup %3896  ;;  %v2761_v15 = vsel %vm2758_vm12, %v2760_v17, %v2756_v6  ;;  %v2784_v2 = vmul.f32 %v3895_v25, %v2742_v51  ;;  %vm2775_vm15 = vmor %vm2773_vm14, %vm2774_vm13  ;;  %v9855_v17 = vld [vmem:[#allocation120_spill] sm:$0xff] }
 0x5ca   :  { %v8157_v49 = vpop.eup %3898  ;;  %v2783_v22 = vmul.f32 %v2761_v15, %v7566_v52  ;;  %v2770_v23 = vsub.f32 1.0, %v2769_v55  ;;  %v8164_v14 = vadd.f32 1.0, %v3897_v18  ;;  %v2780_v25 = vor.u32 1.1754944e-38, %v2779_v0  ;;  %v9858_v0 = vld [vmem:[#allocation166_spill] sm:$0xff] }
 0x5cb   :  { %v2903_v57 = vmul.f32 %v8157_v49, %v8146_v20  ;;  %v3901_v13 = vpop.eup %3900  ;;  %v246_v51 = vadd.f32 %v9855_v17, %v5421_v47  ;;  %vm2908_vm1 = vweird.f32 %v8157_v49 }
 0x5cc   :  { %v8160_v42 = vadd.f32 %v2784_v2, %v2783_v22  ;;  %v2771_v11 = vmul.f32 %v3893_v50, %v2770_v23  ;;  %v2882_v59 = vadd.f32 1.0, %v3901_v13  ;;  %v2913_v2 = vand.u32 2147483648, %v8146_v20  ;;  %vm8184_vm3 = vmor %vm2907_vm2, %vm2908_vm1 }
 0x5cd   :  { %v2904_v52 = vsub.f32 1.0, %v2903_v57  ;;  %v2877_v55 = vadd.f32 %v2852_v36, %v246_v51  ;;  %vm2927_vm10 = vweird.f32 %v8164_v14 }
 0x5ce   :  { %3902 = vtanh.f32 %v8160_v42  ;;  %v2772_v7 = vadd.f32 %v3893_v50, %v2771_v11  ;;  %v2894_v57 = vand.u32 2147483648, %v2882_v59  ;;  %v2914_v13 = vor.u32 1.1754944e-38, %v2913_v2  ;;  %v9867_v2 = vld [vmem:[#allocation99_spill] sm:$0xff] }
 0x5cf   :  { %3904 = vrcp.f32 %v8164_v14  ;;  %v2905_v58 = vmul.f32 %v8157_v49, %v2904_v52  ;;  %vm2888_vm5 = vweird.f32 %v2882_v59 }
 0x5d0   :  { %v2776_v15 = vsel %vm2775_vm15, %v3893_v50, %v2772_v7  ;;  %3906 = vrcp.f32 %v2882_v59 }
 0x5d1   :  { %v2781_v18 = vsel %vm2778_vm0, %v2780_v25, %v2776_v15  ;;  %v2906_v22 = vadd.f32 %v8157_v49, %v2905_v58  ;;  %3908 = vtanh.f32 %v2877_v55  ;;  %v9860_v25 = vld [vmem:[#allocation168_spill] sm:$0xff]  ;;  %v9864_v55 = vld [vmem:[#allocation51_spill] sm:$0xff] }
 0x5d4   :  { %v3903_v24 = vpop.eup %3902 }
 0x5d5   :  { %v2787_v46 = vmul.f32 %v3903_v24, %v2781_v18  ;;  %v8171_v6 = vpop.eup %3904  ;;  %v9861_v24 = vld [vmem:[#allocation169_spill] sm:$0xff] }
 0x5d6   :  { %v3907_v35 = vpop.eup %3906  ;;  %v2923_v23 = vmul.f32 %v8171_v6, %v8164_v14  ;;  %vm2928_vm9 = vweird.f32 %v8171_v6 }
 0x5d7   :  { %2978 = vmatmul.f32.vlgmr.msrb.gmra.mxu1 %v2787_v46  ;;  %3018 = vmatmul.f32.vlgmr.msrb.gmra.mxu3 %v2787_v46  ;;  %v2884_v50 = vmul.f32 %v3907_v35, %v2882_v59  ;;  %vm2889_vm4 = vweird.f32 %v3907_v35  ;;  %vm2929_vm11 = vmor %vm2927_vm10, %vm2928_vm9 }
 0x5d8   :  { %3192 = vmatpush.msrb.mxu1 %v7582_v16  ;;  %3232 = vmatpush.msrb.mxu3 %v7585_v10  ;;  %v2911_v16 = vand.u32 2147483647, %v8146_v20  ;;  %v2924_v37 = vsub.f32 1.0, %v2923_v23  ;;  %v9859_v20 = vld [vmem:[#allocation167_spill] sm:$0xff]  ;;  %vm2890_vm7 = vmor %vm2888_vm5, %vm2889_vm4  ;;  %v9870_v10 = vld [vmem:[#allocation41_spill] sm:$0xff] }
 0x5d9   :  { %v2885_v11 = vsub.f32 1.0, %v2884_v50  ;;  %v9865_v50 = vld [vmem:[#allocation76_spill] sm:$0xff]  ;;  %v9868_v23 = vld [vmem:[#allocation75_spill] sm:$0xff] }
 0x5da   :  { %3193 = vmatpush.msrb.mxu1 %v7591_v3  ;;  %3233 = vmatpush.msrb.mxu3 %v7594_v48  ;;  %v2892_v3 = vand.u32 2147483647, %v2882_v59  ;;  %v2910_v48 = vsel %vm8184_vm3, %v8157_v49, %v2906_v22  ;;  %vm2912_vm6 = vcmp.eq.f32.partialorder %v2911_v16, 8.507059e+37  ;;  %v3909_v49 = vpop.eup %3908  ;;  %v2925_v58 = vmul.f32 %v8171_v6, %v2924_v37  ;;  %v9866_v22 = vld [vmem:[#allocation81_spill] sm:$0xff]  ;;  %v4560_v16 = vld [vmem:[#allocation3 + $0x60] sm:$0xff] }
 0x5db   :  { %v2886_v7 = vmul.f32 %v3907_v35, %v2885_v11  ;;  %v2915_v15 = vsel %vm2912_vm6, %v2914_v13, %v2910_v48  ;;  %v9869_v11 = vld [vmem:[#allocation95_spill] sm:$0xff]  ;;  %v4563_v48 = vld [vmem:[#allocation3 + $0x50] sm:$0xff]  ;;  %v9873_v13 = vld [vmem:[#allocation56_spill] sm:$0xff] }
 0x5dc   :  { %3194 = vmatpush.msrb.mxu1 %v7602_v38  ;;  %3234 = vmatpush.msrb.mxu3 %v9858_v0  ;;  %v2895_v38 = vor.u32 1.1754944e-38, %v2894_v57  ;;  %vm2893_vm8 = vcmp.eq.f32.partialorder %v2892_v3, 8.507059e+37  ;;  %v2937_v59 = vmul.f32 %v2915_v15, %v7647_v32  ;;  %v2926_v17 = vadd.f32 %v8171_v6, %v2925_v58  ;;  %v9863_v32 = vld [vmem:[#allocation80_spill] sm:$0xff]  ;;  %v4561_v57 = vld [vmem:[#allocation3 + $0x70] sm:$0xff]  ;;  %v9871_v0 = vld [vmem:[#allocation57_spill] sm:$0xff] }
 0x5dd   :  { %v2887_v52 = vadd.f32 %v3907_v35, %v2886_v7  ;;  %v4562_v7 = vld [vmem:[#allocation3 + $0x40] sm:$0xff]  ;;  %v9872_v3 = vld [vmem:[#allocation31_spill] sm:$0xff]  ;;  %v9880_v58 = vld [vmem:[#allocation54_spill] sm:$0xff] }
 0x5de   :  { %3195 = vmatpush.msrb.mxu1 %v7619_v19  ;;  %3235 = vmatpush.msrb.mxu3 %v9859_v20  ;;  %v4564_v37 = vld [vmem:[#allocation3 + $0x20] sm:$0xff] }
 0x5df   :  { %3058 = vmatmul.f32.vlgmr.msra.gmra.mxu1 %v2787_v46  ;;  %3098 = vmatmul.f32.vlgmr.msra.gmra.mxu3 %v2787_v46  ;;  %v2891_v18 = vsel %vm2890_vm7, %v3907_v35, %v2887_v52  ;;  %v4551_v35 = vld [vmem:[#allocation3 + $0x110] sm:$0xff]  ;;  %v9874_v20 = vld [vmem:[#allocation40_spill] sm:$0xff] }
 0x5e0   :  { %3196 = vmatpush.msrb.mxu1 %v9860_v25  ;;  %3236 = vmatpush.msrb.mxu3 %v9861_v24  ;;  %v2896_v19 = vsel %vm2893_vm8, %v2895_v38, %v2891_v18  ;;  %v4565_v52 = vld [vmem:[#allocation3 + $0x30] sm:$0xff]  ;;  %v4566_v15 = vld [vmem:[#allocation3] sm:$0xff]  ;;  %v9876_v25 = vld [vmem:[#allocation45_spill] sm:$0xff] }
 0x5e1   :  { %v2938_v36 = vmul.f32 %v3909_v49, %v2896_v19  ;;  %v9875_v38 = vld [vmem:[#allocation42_spill] sm:$0xff]  ;;  %v9878_v18 = vld [vmem:[#allocation49_spill] sm:$0xff]  ;;  %v9881_v19 = vld [vmem:[#allocation55_spill] sm:$0xff] }
 0x5e2   :  { %3197 = vmatpush.msrb.mxu1 %v7633_v60  ;;  %3237 = vmatpush.msrb.mxu3 %v7636_v54  ;;  %v2933_v60 = vand.u32 2147483648, %v8164_v14  ;;  %v9862_v54 = vld [vmem:[#allocation61_spill] sm:$0xff]  ;;  %v9877_v24 = vld [vmem:[#allocation46_spill] sm:$0xff] }
 0x5e3   :  { %v8203_v46 = vadd.f32 %v2938_v36, %v2937_v59  ;;  %v9879_v49 = vld [vmem:[#allocation50_spill] sm:$0xff]  ;;  %v9882_v59 = vld [vmem:[#allocation60_spill] sm:$0xff] }
 0x5e4   :  { %3198 = vmatpush.msrb.mxu1 %v7641_v34  ;;  %3238 = vmatpush.msrb.mxu3 %v7644_v12  ;;  %v2931_v34 = vand.u32 2147483647, %v8164_v14  ;;  %v2930_v12 = vsel %vm2929_vm11, %v8171_v6, %v2926_v17  ;;  %v4542_v6 = vld [vmem:[#allocation3 + $0x180] sm:$0xff]  ;;  %v9883_v36 = vld [vmem:[#allocation62_spill] sm:$0xff]  ;;  %v9884_v17 = vld [vmem:[#allocation65_spill] sm:$0xff] }
 0x5e5   :  { %3910 = vtanh.f32 %v8203_v46 }
 0x5e6   :  { %3199 = vmatpush.msrb.mxu1 %v7649_v1  ;;  %3239 = vmatpush.msrb.mxu3 %v7652_v44  ;;  %v2934_v1 = vor.u32 1.1754944e-38, %v2933_v60  ;;  %vm2932_vm12 = vcmp.eq.f32.partialorder %v2931_v34, 8.507059e+37  ;;  %v9885_v60 = vld [vmem:[#allocation66_spill] sm:$0xff]  ;;  %v9886_v34 = vld [vmem:[#allocation69_spill] sm:$0xff] }
 0x5e8   :  { %3200 = vmatpush.msrb.mxu1 %v7659_v9  ;;  %3240 = vmatpush.msrb.mxu3 %v9862_v54  ;;  %v2935_v51 = vsel %vm2932_vm12, %v2934_v1, %v2930_v12  ;;  %v4536_v9 = vld [vmem:[#allocation3 + $0x1e0] sm:$0xff]  ;;  %v9887_v54 = vld [vmem:[#allocation70_spill] sm:$0xff]  ;;  %v9888_v12 = vld [vmem:[#allocation73_spill] sm:$0xff] }
 0x5e9   :  { %v9890_v1 = vld [vmem:[#allocation79_spill] sm:$0xff] }
 0x5ea   :  { %3201 = vmatpush.msrb.mxu1 %v9863_v32  ;;  %3241 = vmatpush.msrb.mxu3 %v7670_v4  ;;  %v4537_v4 = vld [vmem:[#allocation3 + $0x1f0] sm:$0xff] }
 0x5eb   :  { %v3911_v44 = vpop.eup %3910  ;;  %v9889_v32 = vld [vmem:[#allocation74_spill] sm:$0xff] }
 0x5ec   :  { %3202 = vmatpush.msrb.mxu1 %v7674_v21  ;;  %3242 = vmatpush.msrb.mxu3 %v7677_v63  ;;  %v8220_v14 = vmul.f32 %v3911_v44, %v2935_v51  ;;  %v4538_v21 = vld [vmem:[#allocation3 + $0x1c0] sm:$0xff]  ;;  %v4539_v63 = vld [vmem:[#allocation3 + $0x1d0] sm:$0xff]  ;;  %v9892_v51 = vld [vmem:[#allocation85_spill] sm:$0xff] }
 0x5ed   :  { %v9891_v44 = vld [vmem:[#allocation82_spill] sm:$0xff] }
 0x5ee   :  { %3203 = vmatpush.msrb.mxu1 %v7680_v40  ;;  %3243 = vmatpush.msrb.mxu3 %v7683_v29  ;;  %v4540_v40 = vld [vmem:[#allocation3 + $0x1a0] sm:$0xff]  ;;  %v4541_v29 = vld [vmem:[#allocation3 + $0x1b0] sm:$0xff] }
 0x5ef   :  { %2958 = vmatmul.f32.vlgmr.msra.gmra.mxu0 %v8220_v14  ;;  %2998 = vmatmul.f32.vlgmr.msrb.gmra.mxu2 %v8220_v14 }
 0x5f0   :  { %3172 = vmatpush.msra.mxu0 %v4536_v9  ;;  %3212 = vmatpush.msrb.mxu2 %v4537_v4  ;;  %v9894_v9 = vld [vmem:[#allocation89_spill] sm:$0xff] }
 0x5f1   :  { %3204 = vmatpush.msrb.mxu1 %v7688_v53  ;;  %3244 = vmatpush.msrb.mxu3 %v7691_v61  ;;  %v4543_v53 = vld [vmem:[#allocation3 + $0x190] sm:$0xff]  ;;  %v4544_v61 = vld [vmem:[#allocation3 + $0x160] sm:$0xff]  ;;  %v9895_v4 = vld [vmem:[#allocation13_spill] sm:$0xff] }
 0x5f2   :  { %3173 = vmatpush.msra.mxu0 %v4538_v21  ;;  %3213 = vmatpush.msrb.mxu2 %v4539_v63  ;;  %v9896_v21 = vld [vmem:[#allocation38_spill] sm:$0xff]  ;;  %v9897_v63 = vld [vmem:[#allocation39_spill] sm:$0xff] }
 0x5f3   :  { %3205 = vmatpush.msrb.mxu1 %v7698_v27  ;;  %3245 = vmatpush.msrb.mxu3 %v7701_v43  ;;  %v4545_v27 = vld [vmem:[#allocation3 + $0x170] sm:$0xff]  ;;  %v4546_v43 = vld [vmem:[#allocation3 + $0x140] sm:$0xff] }
 0x5f4   :  { %3174 = vmatpush.msra.mxu0 %v4540_v40  ;;  %3214 = vmatpush.msrb.mxu2 %v4541_v29  ;;  %v9898_v40 = vld [vmem:[#allocation90_spill] sm:$0xff]  ;;  %v9899_v29 = vld [vmem:[#allocation43_spill] sm:$0xff] }
 0x5f5   :  { %3206 = vmatpush.msrb.mxu1 %v7706_v39  ;;  %3246 = vmatpush.msrb.mxu3 %v7709_v62  ;;  %v4547_v39 = vld [vmem:[#allocation3 + $0x150] sm:$0xff]  ;;  %v4548_v62 = vld [vmem:[#allocation3 + $0x120] sm:$0xff] }
 0x5f6   :  { %3175 = vmatpush.msra.mxu0 %v4542_v6  ;;  %3215 = vmatpush.msrb.mxu2 %v4543_v53  ;;  %v9900_v6 = vld [vmem:[#allocation93_spill] sm:$0xff]  ;;  %v9901_v53 = vld [vmem:[#allocation44_spill] sm:$0xff] }
 0x5f7   :  { %3207 = vmatpush.msrb.mxu1 %v7714_v30  ;;  %3247 = vmatpush.msrb.mxu3 %v7717_v5  ;;  %v4549_v30 = vld [vmem:[#allocation3 + $0x130] sm:$0xff]  ;;  %v4550_v5 = vld [vmem:[#allocation3 + $0x100] sm:$0xff] }
 0x5f8   :  { %3038 = vmatmul.f32.vlgmr.msrb.gmra.mxu0 %v8220_v14  ;;  %3078 = vmatmul.f32.vlgmr.msra.gmra.mxu2 %v8220_v14 }
 0x5f9   :  { %3176 = vmatpush.msra.mxu0 %v4544_v61  ;;  %3208 = vmatmul.f32.vlgmr.msrb.gmra.mxu1 %v8220_v14  ;;  %v9902_v61 = vld [vmem:[#allocation94_spill] sm:$0xff] }
 0x5fa   :  { %3216 = vmatpush.msrb.mxu2 %v4545_v27  ;;  %3248 = vmatmul.f32.vlgmr.msrb.gmra.mxu3 %v8220_v14  ;;  %v9903_v27 = vld [vmem:[#allocation47_spill] sm:$0xff] }
 0x5fb   :  { %3177 = vmatpush.msra.mxu0 %v4546_v43  ;;  %3339 = vmatpush.msra.mxu1 %v7729_v26  ;;  %v4552_v26 = vld [vmem:[#allocation3 + $0xe0] sm:$0xff]  ;;  %v9904_v43 = vld [vmem:[#allocation98_spill] sm:$0xff] }
 0x5fc   :  { %3217 = vmatpush.msrb.mxu2 %v4547_v39  ;;  %3379 = vmatpush.msra.mxu3 %v7733_v56  ;;  %v4553_v56 = vld [vmem:[#allocation3 + $0xf0] sm:$0xff]  ;;  %v9905_v39 = vld [vmem:[#allocation48_spill] sm:$0xff] }
 0x5fd   :  { %3178 = vmatpush.msra.mxu0 %v4548_v62  ;;  %3340 = vmatpush.msra.mxu1 %v7737_v41  ;;  %v4554_v41 = vld [vmem:[#allocation3 + $0xc0] sm:$0xff]  ;;  %v9906_v62 = vld [vmem:[#allocation101_spill] sm:$0xff] }
 0x5fe   :  { %3218 = vmatpush.msrb.mxu2 %v4549_v30  ;;  %3380 = vmatpush.msra.mxu3 %v7741_v8  ;;  %v4555_v8 = vld [vmem:[#allocation3 + $0xd0] sm:$0xff]  ;;  %v9907_v30 = vld [vmem:[#allocation52_spill] sm:$0xff] }
 0x5ff   :  { %3179 = vmatpush.msra.mxu0 %v4550_v5  ;;  %3341 = vmatpush.msra.mxu1 %v7745_v31  ;;  %v4556_v31 = vld [vmem:[#allocation3 + $0xa0] sm:$0xff]  ;;  %v9908_v5 = vld [vmem:[#allocation105_spill] sm:$0xff] }
 0x600   :  { %3219 = vmatpush.msrb.mxu2 %v4551_v35  ;;  %3381 = vmatpush.msra.mxu3 %v7749_v45  ;;  %v4557_v45 = vld [vmem:[#allocation3 + $0xb0] sm:$0xff]  ;;  %v9909_v35 = vld [vmem:[#allocation53_spill] sm:$0xff] }
 0x601   :  { %3180 = vmatpush.msra.mxu0 %v4552_v26  ;;  %3342 = vmatpush.msra.mxu1 %v7753_v28  ;;  %v4558_v28 = vld [vmem:[#allocation3 + $0x80] sm:$0xff]  ;;  %v9910_v26 = vld [vmem:[#allocation106_spill] sm:$0xff] }
 0x602   :  { %3220 = vmatpush.msrb.mxu2 %v4553_v56  ;;  %3382 = vmatpush.msra.mxu3 %v7757_v33  ;;  %v4559_v33 = vld [vmem:[#allocation3 + $0x90] sm:$0xff] }
 0x603   :  { %3181 = vmatpush.msra.mxu0 %v4554_v41  ;;  %3343 = vmatpush.msra.mxu1 %v9864_v55  ;;  %v9911_v56 = vld [vmem:[#allocation58_spill] sm:$0xff]  ;;  %v9912_v41 = vld [vmem:[#allocation109_spill] sm:$0xff]  ;;  %v9913_v55 = vld [vmem:[#allocation59_spill] sm:$0xff] }
 0x604   :  { %3221 = vmatpush.msrb.mxu2 %v4555_v8  ;;  %3383 = vmatpush.msra.mxu3 %v9865_v50  ;;  %v9914_v8 = vld [vmem:[#allocation110_spill] sm:$0xff]  ;;  %v9915_v50 = vld [vmem:[#allocation63_spill] sm:$0xff] }
 0x605   :  { %3182 = vmatpush.msra.mxu0 %v4556_v31  ;;  %3344 = vmatpush.msra.mxu1 %v9866_v22  ;;  %v9916_v31 = vld [vmem:[#allocation64_spill] sm:$0xff]  ;;  %v9917_v22 = vld [vmem:[#allocation67_spill] sm:$0xff] }
 0x606   :  { %3222 = vmatpush.msrb.mxu2 %v4557_v45  ;;  %3384 = vmatpush.msra.mxu3 %v9867_v2  ;;  %v9918_v45 = vld [vmem:[#allocation68_spill] sm:$0xff]  ;;  %v9919_v2 = vld [vmem:[#allocation71_spill] sm:$0xff] }
 0x607   :  { %3183 = vmatpush.msra.mxu0 %v4558_v28  ;;  %3345 = vmatpush.msra.mxu1 %v9868_v23  ;;  %v9920_v28 = vld [vmem:[#allocation72_spill] sm:$0xff]  ;;  %v9921_v23 = vld [vmem:[#allocation77_spill] sm:$0xff] }
 0x608   :  { %3223 = vmatpush.msrb.mxu2 %v4559_v33  ;;  %3385 = vmatpush.msra.mxu3 %v9869_v11  ;;  %v9922_v33 = vld [vmem:[#allocation78_spill] sm:$0xff]  ;;  %v9923_v11 = vld [vmem:[#allocation83_spill] sm:$0xff] }
 0x609   :  { %3184 = vmatpush.msra.mxu0 %v4560_v16  ;;  %3346 = vmatpush.msra.mxu1 %v9870_v10  ;;  %v9924_v16 = vld [vmem:[#allocation84_spill] sm:$0xff]  ;;  %v9925_v10 = vld [vmem:[#allocation87_spill] sm:$0xff] }
 0x60a   :  { %3224 = vmatpush.msrb.mxu2 %v4561_v57  ;;  %3386 = vmatpush.msra.mxu3 %v9871_v0  ;;  %v9926_v57 = vld [vmem:[#allocation88_spill] sm:$0xff]  ;;  %v9927_v0 = vld [vmem:[#allocation91_spill] sm:$0xff] }
 0x60b   :  { %3185 = vmatpush.msra.mxu0 %v4562_v7  ;;  %3347 = vmatpush.msra.mxu1 %v9872_v3  ;;  %v9928_v7 = vld [vmem:[#allocation92_spill] sm:$0xff] }
 0x60c   :  { %3225 = vmatpush.msrb.mxu2 %v4563_v48  ;;  %3387 = vmatpush.msra.mxu3 %v9873_v13  ;;  %v9929_v3 = vld [vmem:[#allocation96_spill] sm:$0xff]  ;;  %v9930_v48 = vld [vmem:[#allocation97_spill] sm:$0xff]  ;;  %v9931_v13 = vld [vmem:[#allocation103_spill] sm:$0xff] }
 0x60d   :  { %3186 = vmatpush.msra.mxu0 %v4564_v37  ;;  %3348 = vmatpush.msra.mxu1 %v9874_v20  ;;  %v9932_v37 = vld [vmem:[#allocation104_spill] sm:$0xff]  ;;  %v9933_v20 = vld [vmem:[#allocation107_spill] sm:$0xff] }
 0x60e   :  { %3226 = vmatpush.msrb.mxu2 %v4565_v52  ;;  %3388 = vmatpush.msra.mxu3 %v9875_v38  ;;  %v9934_v52 = vld [vmem:[#allocation108_spill] sm:$0xff]  ;;  %v9935_v38 = vld [vmem:[#allocation111_spill] sm:$0xff] }
 0x60f   :  { %3187 = vmatpush.msra.mxu0 %v4566_v15  ;;  %3349 = vmatpush.msra.mxu1 %v9876_v25  ;;  %v9936_v15 = vld [vmem:[#allocation112_spill] sm:$0xff]  ;;  %v9937_v25 = vld [vmem:[#allocation118_spill] sm:$0xff] }
 0x610   :  { %3227 = vmatpush.msrb.mxu2 %v9877_v24  ;;  %3188 = vmatmul.f32.vlgmr.msra.gmra.mxu0 %v8220_v14  ;;  %v9938_v24 = vld [vmem:[#allocation119_spill] sm:$0xff] }
 0x611   :  { %3228 = vmatmul.f32.vlgmr.msrb.gmra.mxu2 %v8220_v14  ;;  %3389 = vmatpush.msra.mxu3 %v9878_v18  ;;  %v9893_v14 = vld [vmem:[#allocation86_spill] sm:$0xff]  ;;  %v9939_v18 = vld [vmem:[#allocation121_spill] sm:$0xff] }
 0x612   :  { %3350 = vmatpush.msra.mxu1 %v9879_v49  ;;  %3319 = vmatpush.msrb.mxu0 %v9880_v58  ;;  %v9940_v49 = vld [vmem:[#allocation26_spill] sm:$0xff]  ;;  %v9941_v58 = vld [vmem:[#allocation37_spill] sm:$0xff] }
 0x613   :  { %3390 = vmatpush.msra.mxu3 %v9881_v19  ;;  %3359 = vmatpush.msra.mxu2 %v9882_v59  ;;  %v9942_v19 = vld [vmem:[#allocation19_spill] sm:$0xff]  ;;  %v9943_v59 = vld [vmem:[#allocation36_spill] sm:$0xff] }
 0x614   :  { %3351 = vmatpush.msra.mxu1 %v9883_v36  ;;  %3320 = vmatpush.msrb.mxu0 %v9884_v17  ;;  %v9944_v36 = vld [vmem:[#allocation17_spill] sm:$0xff]  ;;  %v9945_v17 = vld [vmem:[#allocation18_spill] sm:$0xff] }
 0x615   :  { %3391 = vmatpush.msra.mxu3 %v9885_v60  ;;  %3360 = vmatpush.msra.mxu2 %v9886_v34  ;;  %v9946_v60 = vld [vmem:[#allocation20_spill] sm:$0xff]  ;;  %v9947_v34 = vld [vmem:[#allocation21_spill] sm:$0xff] }
 0x616   :  { %3352 = vmatpush.msra.mxu1 %v9887_v54  ;;  %3321 = vmatpush.msrb.mxu0 %v9888_v12  ;;  %v9948_v54 = vld [vmem:[#allocation22_spill] sm:$0xff]  ;;  %v9949_v12 = vld [vmem:[#allocation23_spill] sm:$0xff] }
 0x617   :  { %3392 = vmatpush.msra.mxu3 %v9889_v32  ;;  %3361 = vmatpush.msra.mxu2 %v9890_v1  ;;  %v9950_v32 = vld [vmem:[#allocation24_spill] sm:$0xff]  ;;  %v9951_v1 = vld [vmem:[#allocation25_spill] sm:$0xff] }
 0x618   :  { %3353 = vmatpush.msra.mxu1 %v9891_v44  ;;  %3322 = vmatpush.msrb.mxu0 %v9892_v51  ;;  %v9952_v44 = vld [vmem:[#allocation27_spill] sm:$0xff]  ;;  %v9953_v51 = vld [vmem:[#allocation28_spill] sm:$0xff] }
 0x619   :  { %3393 = vmatpush.msra.mxu3 %v9893_v14  ;;  %3362 = vmatpush.msra.mxu2 %v9894_v9  ;;  %v9954_v14 = vld [vmem:[#allocation29_spill] sm:$0xff]  ;;  %v9955_v9 = vld [vmem:[#allocation30_spill] sm:$0xff] }
 0x61a   :  { %3354 = vmatpush.msra.mxu1 %v9895_v4  ;;  %3323 = vmatpush.msrb.mxu0 %v9896_v21  ;;  %v9956_v4 = vld [vmem:[#allocation126_spill] sm:$0xff]  ;;  %v9957_v21 = vld [vmem:[#allocation127_spill] sm:$0xff] }
 0x61b   :  { %3394 = vmatpush.msra.mxu3 %v9897_v63  ;;  %3363 = vmatpush.msra.mxu2 %v9898_v40  ;;  %v9958_v63 = vld [vmem:[#allocation128_spill] sm:$0xff]  ;;  %v9959_v40 = vld [vmem:[#allocation129_spill] sm:$0xff] }
 0x61c   :  { %3419 = vmatpush.msrb.mxu1 %v9899_v29  ;;  %3324 = vmatpush.msrb.mxu0 %v9901_v53  ;;  %v9960_v29 = vld [vmem:[#allocation130_spill] sm:$0xff]  ;;  %v9962_v53 = vld [vmem:[#allocation132_spill] sm:$0xff] }
 0x61d   :  { %3459 = vmatpush.msrb.mxu3 %v9900_v6  ;;  %3364 = vmatpush.msra.mxu2 %v9902_v61  ;;  %v9961_v6 = vld [vmem:[#allocation131_spill] sm:$0xff]  ;;  %v9963_v61 = vld [vmem:[#allocation133_spill] sm:$0xff] }
 0x61e   :  { %3420 = vmatpush.msrb.mxu1 %v9903_v27  ;;  %3325 = vmatpush.msrb.mxu0 %v9905_v39  ;;  %v9964_v27 = vld [vmem:[#allocation134_spill] sm:$0xff]  ;;  %v9966_v39 = vld [vmem:[#allocation136_spill] sm:$0xff] }
 0x61f   :  { %3460 = vmatpush.msrb.mxu3 %v9904_v43  ;;  %3365 = vmatpush.msra.mxu2 %v9906_v62  ;;  %v9965_v43 = vld [vmem:[#allocation135_spill] sm:$0xff]  ;;  %v9967_v62 = vld [vmem:[#allocation137_spill] sm:$0xff] }
 0x620   :  { %3421 = vmatpush.msrb.mxu1 %v9907_v30  ;;  %3326 = vmatpush.msrb.mxu0 %v9909_v35  ;;  %v9968_v30 = vld [vmem:[#allocation138_spill] sm:$0xff]  ;;  %v9970_v35 = vld [vmem:[#allocation140_spill] sm:$0xff] }
 0x621   :  { %3461 = vmatpush.msrb.mxu3 %v9908_v5  ;;  %3366 = vmatpush.msra.mxu2 %v9910_v26  ;;  %v9969_v5 = vld [vmem:[#allocation139_spill] sm:$0xff]  ;;  %v9971_v26 = vld [vmem:[#allocation141_spill] sm:$0xff] }
 0x622   :  { %3422 = vmatpush.msrb.mxu1 %v9911_v56  ;;  %3327 = vmatpush.msrb.mxu0 %v9913_v55  ;;  %v9972_v56 = vld [vmem:[#allocation142_spill] sm:$0xff]  ;;  %v9974_v55 = vld [vmem:[#allocation144_spill] sm:$0xff] }
 0x623   :  { %3462 = vmatpush.msrb.mxu3 %v9912_v41  ;;  %3367 = vmatpush.msra.mxu2 %v9914_v8  ;;  %v9973_v41 = vld [vmem:[#allocation143_spill] sm:$0xff]  ;;  %v9975_v8 = vld [vmem:[#allocation145_spill] sm:$0xff] }
 0x624   :  { %3423 = vmatpush.msrb.mxu1 %v9915_v50  ;;  %3328 = vmatpush.msrb.mxu0 %v9917_v22  ;;  %v9976_v50 = vld [vmem:[#allocation146_spill] sm:$0xff]  ;;  %v9978_v22 = vld [vmem:[#allocation148_spill] sm:$0xff] }
 0x625   :  { %3463 = vmatpush.msrb.mxu3 %v9916_v31  ;;  %3368 = vmatpush.msra.mxu2 %v9918_v45  ;;  %v9977_v31 = vld [vmem:[#allocation147_spill] sm:$0xff]  ;;  %v9979_v45 = vld [vmem:[#allocation149_spill] sm:$0xff] }
 0x626   :  { %3424 = vmatpush.msrb.mxu1 %v9919_v2  ;;  %3329 = vmatpush.msrb.mxu0 %v9921_v23  ;;  %v9980_v2 = vld [vmem:[#allocation150_spill] sm:$0xff]  ;;  %v9982_v23 = vld [vmem:[#allocation152_spill] sm:$0xff] }
 0x627   :  { %3464 = vmatpush.msrb.mxu3 %v9920_v28  ;;  %3369 = vmatpush.msra.mxu2 %v9922_v33  ;;  %v9981_v28 = vld [vmem:[#allocation151_spill] sm:$0xff]  ;;  %v9983_v33 = vld [vmem:[#allocation153_spill] sm:$0xff] }
 0x628   :  { %3425 = vmatpush.msrb.mxu1 %v9923_v11  ;;  %3330 = vmatpush.msrb.mxu0 %v9925_v10  ;;  %v9984_v11 = vld [vmem:[#allocation154_spill] sm:$0xff] }
 0x629   :  { %3465 = vmatpush.msrb.mxu3 %v9924_v16  ;;  %3370 = vmatpush.msra.mxu2 %v9926_v57  ;;  %v9985_v57 = vld [vmem:[#allocation32_spill] sm:$0xff] }
 0x62a   :  { %3426 = vmatpush.msrb.mxu1 %v9927_v0  ;;  %3331 = vmatpush.msrb.mxu0 %v9929_v3 }
 0x62b   :  { %3466 = vmatpush.msrb.mxu3 %v9928_v7  ;;  %3371 = vmatpush.msra.mxu2 %v9930_v48 }
 0x62c   :  { %3427 = vmatpush.msrb.mxu1 %v9931_v13  ;;  %3332 = vmatpush.msrb.mxu0 %v9933_v20  ;;  %v9986_v20 = vld [vmem:[#allocation33_spill] sm:$0xff] }
 0x62d   :  { %3467 = vmatpush.msrb.mxu3 %v9932_v37  ;;  %3372 = vmatpush.msra.mxu2 %v9934_v52 }
 0x62e   :  { %3428 = vmatpush.msrb.mxu1 %v9935_v38  ;;  %3333 = vmatpush.msrb.mxu0 %v9937_v25  ;;  %v9988_v25 = vld [vmem:[#allocation117_spill] sm:$0xff] }
 0x62f   :  { %3468 = vmatpush.msrb.mxu3 %v9936_v15  ;;  %3373 = vmatpush.msra.mxu2 %v9938_v24  ;;  %v9987_v15 = vld [vmem:[#allocation122_spill] sm:$0xff] }
 0x630   :  { %3429 = vmatpush.msrb.mxu1 %v9939_v18  ;;  %3334 = vmatpush.msrb.mxu0 %v9941_v58  ;;  %v208_v24 = vadd.f32 %v9988_v25, %v9987_v15 }
 0x631   :  { %3469 = vmatpush.msrb.mxu3 %v9940_v49  ;;  %3374 = vmatpush.msra.mxu2 %v9942_v19 }
 0x632   :  { %3430 = vmatpush.msrb.mxu1 %v9943_v59  ;;  %3399 = vmatpush.msra.mxu0 %v9945_v17 }
 0x633   :  { %3470 = vmatpush.msrb.mxu3 %v9944_v36  ;;  %3439 = vmatpush.msrb.mxu2 %v9946_v60 }
 0x634   :  { %3431 = vmatpush.msrb.mxu1 %v9947_v34  ;;  %3400 = vmatpush.msra.mxu0 %v9949_v12  ;;  %v9989_v34 = vld [vmem:[#allocation34_spill] sm:$0xff] }
 0x635   :  { %3471 = vmatpush.msrb.mxu3 %v9948_v54  ;;  %3440 = vmatpush.msrb.mxu2 %v9950_v32 }
 0x636   :  { %3432 = vmatpush.msrb.mxu1 %v9951_v1  ;;  %3401 = vmatpush.msra.mxu0 %v9953_v51 }
 0x637   :  { %3472 = vmatpush.msrb.mxu3 %v9952_v44  ;;  %3441 = vmatpush.msrb.mxu2 %v9954_v14  ;;  %v9990_v14 = vld [vmem:[#allocation124_spill] sm:$0xff] }
 0x638   :  { %3433 = vmatpush.msrb.mxu1 %v9955_v9  ;;  %3402 = vmatpush.msra.mxu0 %v9957_v21  ;;  %v9991_v9 = vld [vmem:[#allocation123_spill] sm:$0xff] }
 0x639   :  { %3473 = vmatpush.msrb.mxu3 %v9956_v4  ;;  %3442 = vmatpush.msrb.mxu2 %v9958_v63  ;;  %v290_v4 = vadd.f32 %v9991_v9, %v9990_v14 }
 0x63a   :  { %3434 = vmatpush.msrb.mxu1 %v9959_v40  ;;  %3403 = vmatpush.msra.mxu0 %v9961_v6  ;;  %v9992_v40 = vld [vmem:[#allocation35_spill] sm:$0xff] }
 0x63b   :  { %3474 = vmatpush.msrb.mxu3 %v9960_v29  ;;  %3443 = vmatpush.msrb.mxu2 %v9962_v53 }
 0x63c   :  { %3404 = vmatpush.msra.mxu0 %v9963_v61 }
 0x63d   :  { %3444 = vmatpush.msrb.mxu2 %v9964_v27 }
 0x63e   :  { %3405 = vmatpush.msra.mxu0 %v9965_v43 }
 0x63f   :  { %3445 = vmatpush.msrb.mxu2 %v9966_v39 }
 0x640   :  { %3406 = vmatpush.msra.mxu0 %v9967_v62 }
 0x641   :  { %3446 = vmatpush.msrb.mxu2 %v9968_v30 }
 0x642   :  { %3407 = vmatpush.msra.mxu0 %v9969_v5 }
 0x643   :  { %3447 = vmatpush.msrb.mxu2 %v9970_v35 }
 0x644   :  { %3408 = vmatpush.msra.mxu0 %v9971_v26 }
 0x645   :  { %3448 = vmatpush.msrb.mxu2 %v9972_v56 }
 0x646   :  { %3409 = vmatpush.msra.mxu0 %v9973_v41 }
 0x647   :  { %3449 = vmatpush.msrb.mxu2 %v9974_v55 }
 0x648   :  { %3410 = vmatpush.msra.mxu0 %v9975_v8 }
 0x649   :  { %3450 = vmatpush.msrb.mxu2 %v9976_v50 }
 0x64a   :  { %3411 = vmatpush.msra.mxu0 %v9977_v31  ;;  %v9993_v31 = vld [vmem:[#allocation102_spill] sm:$0xff] }
 0x64b   :  { %3451 = vmatpush.msrb.mxu2 %v9978_v22  ;;  %v9994_v22 = vld [vmem:[#allocation16_spill] sm:$0xff] }
 0x64c   :  { %3412 = vmatpush.msra.mxu0 %v9979_v45  ;;  %v167_v45 = vadd.f32 %v9994_v22, %v9993_v31 }
 0x64d   :  { %3452 = vmatpush.msrb.mxu2 %v9980_v2 }
 0x64e   :  { %3413 = vmatpush.msra.mxu0 %v9981_v28 }
 0x64f   :  { %3453 = vmatpush.msrb.mxu2 %v9982_v23 }
 0x650   :  { %3414 = vmatpush.msra.mxu0 %v9983_v33 }
 0x651   :  { %3454 = vmatpush.msrb.mxu2 %v9984_v11 }
 0x654   :  { %v2979_v16 = vpop.f32.mrf.mxu1 }
 0x65a   :  { %v3019_v7 = vpop.f32.mrf.mxu3 }
 0x65c   :  { %v3059_v3 = vpop.f32.mrf.mxu1 }
 0x662   :  { %v3099_v58 = vpop.f32.mrf.mxu3 }
 0x66c   :  { %v2959_v10 = vpop.f32.mrf.mxu0 }
 0x66d   :  { %v2960_v0 = vadd.f32 %v2959_v10, %v9985_v57 }
 0x66f   :  { %v2980_v48 = vadd.f32 %v2979_v16, %v2960_v0 }
 0x671   :  { %v3679_v13 = vmul.f32 -1.442695, %v2980_v48 }
 0x672   :  { %v2999_v37 = vpop.f32.mrf.mxu2 }
 0x673   :  { %3912 = vpow2.f32 %v3679_v13  ;;  %v3000_v52 = vadd.f32 %v2999_v37, %v9986_v20 }
 0x675   :  { %v3020_v38 = vadd.f32 %v3019_v7, %v3000_v52  ;;  %v3039_v32 = vpop.f32.mrf.mxu0 }
 0x676   :  { %v3209_v18 = vpop.f32.mrf.mxu1  ;;  %v3040_v29 = vadd.f32 %v3039_v32, %v9992_v40 }
 0x677   :  { %v3680_v49 = vmul.f32 -1.442695, %v3020_v38  ;;  %v3253_v19 = vadd.f32 %v3209_v18, %v208_v24 }
 0x678   :  { %v3060_v43 = vadd.f32 %v3059_v3, %v3040_v29 }
 0x679   :  { %v3913_v59 = vpop.eup %3912  ;;  %3914 = vpow2.f32 %v3680_v49  ;;  %v3683_v60 = vmul.f32 -1.442695, %v3253_v19 }
 0x67a   :  { %v3105_v36 = vadd.f32 1.0, %v3913_v59 }
 0x67b   :  { %v3079_v17 = vpop.f32.mrf.mxu2 }
 0x67c   :  { %3916 = vrcp.f32 %v3105_v36  ;;  %v3080_v54 = vadd.f32 %v3079_v17, %v9989_v34  ;;  %v3117_v41 = vand.u32 2147483648, %v3105_v36  ;;  %vm3111_vm14 = vweird.f32 %v3105_v36 }
 0x67d   :  { %3918 = vpow2.f32 %v3683_v60  ;;  %v3249_v51 = vpop.f32.mrf.mxu3  ;;  %v3115_v50 = vand.u32 2147483647, %v3105_v36 }
 0x67e   :  { %v3100_v1 = vadd.f32 %v3099_v58, %v3080_v54  ;;  %v3255_v53 = vadd.f32 %v3249_v51, %v290_v4  ;;  %v3118_v10 = vor.u32 1.1754944e-38, %v3117_v41 }
 0x67f   :  { %v3915_v12 = vpop.eup %3914  ;;  %vm3116_vm2 = vcmp.eq.f32.partialorder %v3115_v50, 8.507059e+37 }
 0x680   :  { %v3124_v44 = vadd.f32 1.0, %v3915_v12  ;;  %v3681_v21 = vmul.f32 -1.442695, %v3100_v1  ;;  %v3684_v62 = vmul.f32 -1.442695, %v3255_v53 }
 0x682   :  { %v3917_v63 = vpop.eup %3916  ;;  %3920 = vrcp.f32 %v3124_v44  ;;  %v3136_v2 = vand.u32 2147483648, %v3124_v44  ;;  %v3134_v23 = vand.u32 2147483647, %v3124_v44  ;;  %vm3130_vm1 = vweird.f32 %v3124_v44 }
 0x683   :  { %v3107_v6 = vmul.f32 %v3917_v63, %v3105_v36  ;;  %3922 = vpow2.f32 %v3681_v21  ;;  %v3919_v27 = vpop.eup %3918  ;;  %vm3112_vm13 = vweird.f32 %v3917_v63 }
 0x684   :  { %v8377_v56 = vadd.f32 1.0, %v3919_v27  ;;  %3924 = vtanh.f32 %v3060_v43  ;;  %vm8381_vm15 = vmor %vm3111_vm14, %vm3112_vm13  ;;  %v3137_v48 = vor.u32 1.1754944e-38, %v3136_v2  ;;  %vm3135_vm4 = vcmp.eq.f32.partialorder %v3134_v23, 8.507059e+37 }
 0x685   :  { %v3108_v61 = vsub.f32 1.0, %v3107_v6  ;;  %3926 = vpow2.f32 %v3684_v62  ;;  %v9997_v6 = vld [vmem:[#allocation125_spill] sm:$0xff] }
 0x686   :  { %v249_v53 = vadd.f32 %v9997_v6, %v5421_v47  ;;  %vm3284_vm10 = vweird.f32 %v8377_v56 }
 0x687   :  { %v3109_v39 = vmul.f32 %v3917_v63, %v3108_v61 }
 0x688   :  { %v3921_v30 = vpop.eup %3920 }
 0x689   :  { %v3923_v5 = vpop.eup %3922  ;;  %v3126_v35 = vmul.f32 %v3921_v30, %v3124_v44  ;;  %v3110_v26 = vadd.f32 %v3917_v63, %v3109_v39  ;;  %vm3131_vm0 = vweird.f32 %v3921_v30 }
 0x68a   :  { %v3144_v55 = vadd.f32 1.0, %v3923_v5  ;;  %v3925_v3 = vpop.eup %3924  ;;  %vm3132_vm3 = vmor %vm3130_vm1, %vm3131_vm0 }
 0x68b   :  { %v3127_v8 = vsub.f32 1.0, %v3126_v35  ;;  %v3114_v11 = vsel %vm8381_vm15, %v3917_v63, %v3110_v26  ;;  %v3927_v37 = vpop.eup %3926  ;;  %v3288_v26 = vand.u32 2147483647, %v8377_v56 }
 0x68c   :  { %3928 = vrcp.f32 %v3144_v55  ;;  %v3119_v13 = vsel %vm3116_vm2, %v3118_v10, %v3114_v11  ;;  %v8392_v17 = vadd.f32 1.0, %v3927_v37  ;;  %v3156_v54 = vand.u32 2147483648, %v3144_v55 }
 0x68d   :  { %v3128_v33 = vmul.f32 %v3921_v30, %v3127_v8  ;;  %3930 = vrcp.f32 %v8377_v56  ;;  %v3189_v16 = vpop.f32.mrf.mxu0  ;;  %v3161_v49 = vmul.f32 %v3925_v3, %v3119_v13  ;;  %v3154_v12 = vand.u32 2147483647, %v3144_v55 }
 0x68e   :  { %v3252_v7 = vadd.f32 %v3189_v16, %v167_v45  ;;  %vm3150_vm6 = vweird.f32 %v3144_v55  ;;  %v3157_v14 = vor.u32 1.1754944e-38, %v3156_v54  ;;  %vm3289_vm14 = vcmp.eq.f32.partialorder %v3288_v26, 8.507059e+37  ;;  %v3542_v26 = vld [vmem:[#allocation8] sm:$0xff] }
 0x68f   :  { %v3129_v0 = vadd.f32 %v3921_v30, %v3128_v33  ;;  %vm3155_vm8 = vcmp.eq.f32.partialorder %v3154_v12, 8.507059e+37  ;;  %v3310_v3 = vand.u32 2147483648, %v8392_v17  ;;  %vm3304_vm2 = vweird.f32 %v8392_v17  ;;  %v3551_v12 = vld [vmem:[#allocation8 + $0x48] sm:$0xff] }
 0x690   :  { %v3682_v38 = vmul.f32 -1.442695, %v3252_v7 }
 0x691   :  { %v3133_v52 = vsel %vm3132_vm3, %v3921_v30, %v3129_v0  ;;  %v3290_v30 = vand.u32 2147483648, %v8377_v56  ;;  %v3311_v37 = vor.u32 1.1754944e-38, %v3310_v3 }
 0x692   :  { %v3929_v15 = vpop.eup %3928  ;;  %v3138_v25 = vsel %vm3135_vm4, %v3137_v48, %v3133_v52  ;;  %3932 = vpow2.f32 %v3682_v38  ;;  %v3308_v48 = vand.u32 2147483647, %v8392_v17 }
 0x693   :  { %v3931_v24 = vpop.eup %3930  ;;  %v3160_v18 = vmul.f32 %v3138_v25, %v8160_v42  ;;  %v3146_v58 = vmul.f32 %v3929_v15, %v3144_v55  ;;  %vm3151_vm5 = vweird.f32 %v3929_v15  ;;  %v3291_v31 = vor.u32 1.1754944e-38, %v3290_v30  ;;  %v3556_v25 = vld [vmem:[#allocation8 + $0x70] sm:$0xff]  ;;  %v3543_v30 = vld [vmem:[#allocation8 + $0x8] sm:$0xff] }
 0x694   :  { %v3280_v36 = vmul.f32 %v3931_v24, %v8377_v56  ;;  %vm3152_vm7 = vmor %vm3150_vm6, %vm3151_vm5  ;;  %v3229_v29 = vpop.f32.mrf.mxu2  ;;  %vm3285_vm9 = vweird.f32 %v3931_v24  ;;  %vm3309_vm4 = vcmp.eq.f32.partialorder %v3308_v48, 8.507059e+37 }
 0x695   :  { %v8389_v19 = vadd.f32 %v3161_v49, %v3160_v18  ;;  %v3147_v59 = vsub.f32 1.0, %v3146_v58  ;;  %v3254_v43 = vadd.f32 %v3229_v29, %v249_v53  ;;  %vm8402_vm11 = vmor %vm3284_vm10, %vm3285_vm9  ;;  %v3554_v18 = vld [vmem:[#allocation8 + $0x60] sm:$0xff] }
 0x696   :  { %v3281_v44 = vsub.f32 1.0, %v3280_v36 }
 0x697   :  { %3934 = vtanh.f32 %v8389_v19  ;;  %v3148_v60 = vmul.f32 %v3929_v15, %v3147_v59  ;;  %v3553_v59 = vld [vmem:[#allocation8 + $0x58] sm:$0xff] }
 0x698   :  { %v3933_v32 = vpop.eup %3932  ;;  %3936 = vrcp.f32 %v8392_v17  ;;  %v3282_v63 = vmul.f32 %v3931_v24, %v3281_v44  ;;  %v3550_v44 = vld [vmem:[#allocation8 + $0x40] sm:$0xff] }
 0x699   :  { %v3149_v1 = vadd.f32 %v3929_v15, %v3148_v60  ;;  %v3259_v42 = vadd.f32 1.0, %v3933_v32  ;;  %v3552_v60 = vld [vmem:[#allocation8 + $0x50] sm:$0xff] }
 0x69a   :  { %v3283_v62 = vadd.f32 %v3931_v24, %v3282_v63  ;;  %v3546_v63 = vld [vmem:[#allocation8 + $0x20] sm:$0xff] }
 0x69b   :  { %v3153_v51 = vsel %vm3152_vm7, %v3929_v15, %v3149_v1  ;;  %3938 = vrcp.f32 %v3259_v42  ;;  %v3271_v47 = vand.u32 2147483648, %v3259_v42  ;;  %v3269_v8 = vand.u32 2147483647, %v3259_v42 }
 0x69c   :  { %v3158_v4 = vsel %vm3155_vm8, %v3157_v14, %v3153_v51  ;;  %3940 = vtanh.f32 %v3254_v43  ;;  %v3287_v50 = vsel %vm8402_vm11, %v3931_v24, %v3283_v62  ;;  %vm3265_vm13 = vweird.f32 %v3259_v42  ;;  %v3555_v24 = vld [vmem:[#allocation8 + $0x68] sm:$0xff]  ;;  %v3549_v14 = vld [vmem:[#allocation8 + $0x38] sm:$0xff]  ;;  %v3544_v43 = vld [vmem:[#allocation8 + $0x10] sm:$0xff] }
 0x69d   :  { %v3935_v9 = vpop.eup %3934  ;;  %v3272_v56 = vor.u32 1.1754944e-38, %v3271_v47  ;;  %v3292_v2 = vsel %vm3289_vm14, %v3291_v31, %v3287_v50  ;;  %vm3270_vm0 = vcmp.eq.f32.partialorder %v3269_v8, 8.507059e+37 }
 0x69e   :  { %v3164_v21 = vmul.f32 %v3935_v9, %v3158_v4  ;;  %v3937_v61 = vpop.eup %3936  ;;  %v3314_v16 = vmul.f32 %v3292_v2, %v8203_v46  ;;  %v3557_v46 = vld [vmem:[#allocation8 + $0x78] sm:$0xff]  ;;  %v3548_v9 = vld [vmem:[#allocation8 + $0x30] sm:$0xff]  ;;  %v3547_v4 = vld [vmem:[#allocation8 + $0x28] sm:$0xff] }
 0x69f   :  { %v3300_v5 = vmul.f32 %v3937_v61, %v8392_v17  ;;  %vm3305_vm1 = vweird.f32 %v3937_v61 }
 0x6a0   :  { %3355 = vmatmul.f32.vlgmr.msra.gmra.mxu1 %v3164_v21  ;;  %3395 = vmatmul.f32.vlgmr.msra.gmra.mxu3 %v3164_v21  ;;  %vm3306_vm3 = vmor %vm3304_vm2, %vm3305_vm1 }
 0x6a1   :  { %v3939_v27 = vpop.eup %3938  ;;  %v3301_v22 = vsub.f32 1.0, %v3300_v5 }
 0x6a2   :  { %v3261_v39 = vmul.f32 %v3939_v27, %v3259_v42  ;;  %vm3266_vm12 = vweird.f32 %v3939_v27  ;;  %v3941_v23 = vpop.eup %3940 }
 0x6a3   :  { %vm3267_vm15 = vmor %vm3265_vm13, %vm3266_vm12  ;;  %v3302_v33 = vmul.f32 %v3937_v61, %v3301_v22 }
 0x6a4   :  { %v3262_v35 = vsub.f32 1.0, %v3261_v39 }
 0x6a5   :  { %v3303_v7 = vadd.f32 %v3937_v61, %v3302_v33 }
 0x6a6   :  { %v3263_v55 = vmul.f32 %v3939_v27, %v3262_v35 }
 0x6a7   :  { %v3307_v13 = vsel %vm3306_vm3, %v3937_v61, %v3303_v7  ;;  %v3545_v61 = vld [vmem:[#allocation8 + $0x18] sm:$0xff] }
 0x6a8   :  { %3435 = vmatmul.f32.vlgmr.msrb.gmra.mxu1 %v3164_v21  ;;  %3475 = vmatmul.f32.vlgmr.msrb.gmra.mxu3 %v3164_v21  ;;  %v3264_v45 = vadd.f32 %v3939_v27, %v3263_v55  ;;  %v3312_v38 = vsel %vm3309_vm4, %v3311_v37, %v3307_v13 }
 0x6aa   :  { %v3268_v28 = vsel %vm3267_vm15, %v3939_v27, %v3264_v45 }
 0x6ab   :  { %v3273_v11 = vsel %vm3270_vm0, %v3272_v56, %v3268_v28 }
 0x6ac   :  { %v3315_v10 = vmul.f32 %v3941_v23, %v3273_v11 }
 0x6ae   :  { %v3316_v0 = vadd.f32 %v3315_v10, %v3314_v16 }
 0x6b0   :  { %3942 = vtanh.f32 %v3316_v0 }
 0x6b6   :  { %v3943_v52 = vpop.eup %3942 }
 0x6b7   :  { %v3318_v15 = vmul.f32 %v3943_v52, %v3312_v38 }
 0x6b9   :  { %3335 = vmatmul.f32.vlgmr.msrb.gmra.mxu0 %v3318_v15  ;;  %3375 = vmatmul.f32.vlgmr.msra.gmra.mxu2 %v3318_v15 }
 0x6ba   :  { %3562 = vmatpush.msrb.mxu0 %v3557_v46 }
 0x6bc   :  { %3563 = vmatpush.msrb.mxu0 %v3556_v25 }
 0x6be   :  { %3564 = vmatpush.msrb.mxu0 %v3555_v24 }
 0x6c0   :  { %3565 = vmatpush.msrb.mxu0 %v3554_v18 }
 0x6c1   :  { %3415 = vmatmul.f32.vlgmr.msra.gmra.mxu0 %v3318_v15  ;;  %3455 = vmatmul.f32.vlgmr.msrb.gmra.mxu2 %v3318_v15 }
 0x6c2   :  { %3566 = vmatpush.msrb.mxu0 %v3553_v59 }
 0x6c4   :  { %3567 = vmatpush.msrb.mxu0 %v3552_v60 }
 0x6c6   :  { %3568 = vmatpush.msrb.mxu0 %v3551_v12 }
 0x6c8   :  { %3569 = vmatpush.msrb.mxu0 %v3550_v44 }
 0x6ca   :  { %3570 = vmatpush.msrb.mxu0 %v3549_v14 }
 0x6cc   :  { %3571 = vmatpush.msrb.mxu0 %v3548_v9 }
 0x6ce   :  { %3572 = vmatpush.msrb.mxu0 %v3547_v4 }
 0x6d0   :  { %3573 = vmatpush.msrb.mxu0 %v3546_v63 }
 0x6d2   :  { %3574 = vmatpush.msrb.mxu0 %v3545_v61 }
 0x6d4   :  { %3575 = vmatpush.msrb.mxu0 %v3544_v43 }
 0x6d6   :  { %3576 = vmatpush.msrb.mxu0 %v3543_v30 }
 0x6d8   :  { %3577 = vmatpush.msrb.mxu0 %v3542_v26 }
 0x71d   :  { %v3356_v36 = vpop.f32.mrf.mxu1 }
 0x723   :  { %v3396_v32 = vpop.f32.mrf.mxu3 }
 0x725   :  { %v3436_v50 = vpop.f32.mrf.mxu1 }
 0x72b   :  { %v3476_v27 = vpop.f32.mrf.mxu3 }
 0x736   :  { %v3336_v49 = vpop.f32.mrf.mxu0 }
 0x737   :  { %v3337_v58 = vadd.f32 %v3336_v49, %v9985_v57 }
 0x739   :  { %v3357_v17 = vadd.f32 %v3356_v36, %v3337_v58 }
 0x73b   :  { %v3685_v54 = vmul.f32 -1.442695, %v3357_v17 }
 0x73c   :  { %v3376_v1 = vpop.f32.mrf.mxu2 }
 0x73d   :  { %3944 = vpow2.f32 %v3685_v54  ;;  %v3377_v42 = vadd.f32 %v3376_v1, %v9986_v20 }
 0x73e   :  { %v3416_v35 = vpop.f32.mrf.mxu0 }
 0x73f   :  { %v3397_v51 = vadd.f32 %v3396_v32, %v3377_v42 }
 0x741   :  { %v3686_v57 = vmul.f32 -1.442695, %v3397_v51 }
 0x743   :  { %v3945_v21 = vpop.eup %3944  ;;  %3946 = vpow2.f32 %v3686_v57 }
 0x744   :  { %v3482_v29 = vadd.f32 1.0, %v3945_v21  ;;  %v3456_v6 = vpop.f32.mrf.mxu2 }
 0x745   :  { %v3457_v53 = vadd.f32 %v3456_v6, %v9989_v34  ;;  %v3417_v34 = vadd.f32 %v3416_v35, %v9992_v40 }
 0x746   :  { %3948 = vrcp.f32 %v3482_v29  ;;  %v3494_v23 = vand.u32 2147483648, %v3482_v29  ;;  %vm3488_vm6 = vweird.f32 %v3482_v29  ;;  %v3492_v11 = vand.u32 2147483647, %v3482_v29 }
 0x747   :  { %v3477_v20 = vadd.f32 %v3476_v27, %v3457_v53  ;;  %v3437_v45 = vadd.f32 %v3436_v50, %v3417_v34 }
 0x748   :  { %v3495_v7 = vor.u32 1.1754944e-38, %v3494_v23  ;;  %vm3493_vm10 = vcmp.eq.f32.partialorder %v3492_v11, 8.507059e+37 }
 0x749   :  { %v3947_v39 = vpop.eup %3946  ;;  %v3687_v62 = vmul.f32 -1.442695, %v3477_v20 }
 0x74a   :  { %v3501_v5 = vadd.f32 1.0, %v3947_v39 }
 0x74b   :  { %3950 = vpow2.f32 %v3687_v62 }
 0x74c   :  { %v3949_v41 = vpop.eup %3948  ;;  %3952 = vrcp.f32 %v3501_v5  ;;  %v3513_v16 = vand.u32 2147483648, %v3501_v5  ;;  %v3511_v0 = vand.u32 2147483647, %v3501_v5  ;;  %vm3507_vm9 = vweird.f32 %v3501_v5 }
 0x74d   :  { %v3484_v47 = vmul.f32 %v3949_v41, %v3482_v29  ;;  %vm3489_vm5 = vweird.f32 %v3949_v41 }
 0x74e   :  { %vm3490_vm7 = vmor %vm3488_vm6, %vm3489_vm5  ;;  %v3514_v13 = vor.u32 1.1754944e-38, %v3513_v16  ;;  %vm3512_vm12 = vcmp.eq.f32.partialorder %v3511_v0, 8.507059e+37 }
 0x74f   :  { %v3485_v55 = vsub.f32 1.0, %v3484_v47 }
 0x751   :  { %v3951_v8 = vpop.eup %3950  ;;  %v3486_v31 = vmul.f32 %v3949_v41, %v3485_v55 }
 0x752   :  { %v3953_v22 = vpop.eup %3952  ;;  %v3521_v56 = vadd.f32 1.0, %v3951_v8 }
 0x753   :  { %v3503_v2 = vmul.f32 %v3953_v22, %v3501_v5  ;;  %v3487_v28 = vadd.f32 %v3949_v41, %v3486_v31  ;;  %vm3508_vm8 = vweird.f32 %v3953_v22 }
 0x754   :  { %3954 = vrcp.f32 %v3521_v56  ;;  %vm3509_vm11 = vmor %vm3507_vm9, %vm3508_vm8  ;;  %v3533_v59 = vand.u32 2147483648, %v3521_v56  ;;  %vm3527_vm14 = vweird.f32 %v3521_v56  ;;  %v3531_v17 = vand.u32 2147483647, %v3521_v56 }
 0x755   :  { %v3504_v33 = vsub.f32 1.0, %v3503_v2  ;;  %3956 = vtanh.f32 %v3437_v45  ;;  %v3491_v10 = vsel %vm3490_vm7, %v3949_v41, %v3487_v28 }
 0x756   :  { %v3496_v37 = vsel %vm3493_vm10, %v3495_v7, %v3491_v10  ;;  %v3534_v54 = vor.u32 1.1754944e-38, %v3533_v59  ;;  %vm3532_vm0 = vcmp.eq.f32.partialorder %v3531_v17, 8.507059e+37 }
 0x757   :  { %v3505_v40 = vmul.f32 %v3953_v22, %v3504_v33 }
 0x759   :  { %v3506_v3 = vadd.f32 %v3953_v22, %v3505_v40 }
 0x75a   :  { %v3955_v48 = vpop.eup %3954 }
 0x75b   :  { %v3510_v52 = vsel %vm3509_vm11, %v3953_v22, %v3506_v3  ;;  %v3523_v38 = vmul.f32 %v3955_v48, %v3521_v56  ;;  %v3957_v15 = vpop.eup %3956  ;;  %vm3528_vm13 = vweird.f32 %v3955_v48 }
 0x75c   :  { %v3515_v46 = vsel %vm3512_vm12, %v3514_v13, %v3510_v52  ;;  %v3538_v24 = vmul.f32 %v3957_v15, %v3496_v37  ;;  %vm3529_vm15 = vmor %vm3527_vm14, %vm3528_vm13 }
 0x75d   :  { %v3537_v25 = vmul.f32 %v3515_v46, %v8389_v19  ;;  %v3524_v18 = vsub.f32 1.0, %v3523_v38  ;;  %v3703_v19 = vld [vmem:[%s8430_s7] ss:$0 sm:$0xff] }
 0x75f   :  { %v3539_v49 = vadd.f32 %v3538_v24, %v3537_v25  ;;  %v3525_v58 = vmul.f32 %v3955_v48, %v3524_v18 }
 0x761   :  { %3958 = vtanh.f32 %v3539_v49  ;;  %v3526_v36 = vadd.f32 %v3955_v48, %v3525_v58 }
 0x763   :  { %v3530_v60 = vsel %vm3529_vm15, %v3955_v48, %v3526_v36 }
 0x764   :  { %v3535_v32 = vsel %vm3532_vm0, %v3534_v54, %v3530_v60 }
 0x767   :  { %v3959_v12 = vpop.eup %3958 }
 0x768   :  { %v3541_v1 = vmul.f32 %v3959_v12, %v3535_v32 }
 0x76a   :  { %3578 = vmatmul.f32.vlgmr.msrb.gmra.mxu0 %v3541_v1 }
 0x7e7   :  { %v3579_v42 = vpop.f32.mrf.mxu0 }
 0x7e8   :  { %v3580_v44 = vadd.f32 %v3703_v19, %v3579_v42 }
 0x7ea   :  { %3582 = vst [vmem:[#allocation9] sm:$0xff] %v3580_v44 }
 0x7eb   :  { %3593 = dma.vmem_to_hbm [thread:$0]  %s3589_s9, 128, %s3591_s12, [#allocation5]  }
 0x7ec   :  { %4667 = dma.done.wait [#allocation5], 128  }
 0x7ed   :  { %4668 = vsyncadd [#allocation5], 4294967168 }
 0x7ee   :  { %3598 = vsyncpa [#allocation4], 1 }
 0x7ef   :  { %3599 = vsyncpa [#allocation7], 1 }
 0x7f0   :  { %3600 = vsyncpa [#allocation5], 1 }

</bundles_post_ra>
